<compile_context>
chip_gen: v6e
topology: v6e:2x2x1
jax: 0.10.0
libtpu: 0.0.40
codegen_flags: <defaults>
</compile_context>

<pallas_src>
import jax
import jax.numpy as jnp
from jax.experimental import pallas as pl
from jax.experimental.pallas import tpu as pltpu

T_IN    = 48      # padded text length (true length comes from x_lengths)
HIDDEN  = 64
FFN     = 256
BERT_D  = 1024
JBERT_D = 768
GIN     = 32
FILT    = 64
HALF    = HIDDEN // 2
FLOWH   = 64
T_OUT   = 256
UPS     = 4
DEC0, DEC1, DEC2 = 64, 32, 16
N_VOCAB, N_TONES, N_LANGS, N_SPK = 112, 16, 8, 4

F32 = jnp.float32
VMEM = pl.BlockSpec(memory_space=pltpu.MemorySpace.VMEM)
SMEM = pl.BlockSpec(memory_space=pltpu.MemorySpace.SMEM)

NT = (((1,), (1,)), ((), ()))       # a @ b.T  (rhs-transposed contraction)

WEIGHT_ORDER = (
    'bert_w', 'bert_b', 'jbert_w', 'jbert_b', 'wqkv', 'bqkv', 'wo', 'bo',
    'ln1_g', 'ln1_b', 'ffn_w1', 'ffn_b1', 'ffn_w2', 'ffn_b2', 'ln2_g', 'ln2_b', 'wml', 'bml',
    'dp_cond', 'dp_w1', 'dp_b1', 'dp_ln1_g', 'dp_ln1_b', 'dp_w2', 'dp_b2', 'dp_ln2_g', 'dp_ln2_b',
    'sdp_cond', 'sdp_pre_w', 'sdp_pre_b', 'sdp_w1', 'sdp_b1', 'dur_proj_wt', 'dur_proj_b',
    'flow_P', 'f1_pre_w', 'f1_pre_b', 'f1_cond_w', 'f1_out_w', 'f1_out_b',
    'f2_pre_w', 'f2_pre_b', 'f2_cond_w', 'f2_out_w', 'f2_out_b',
    'dec_pre_w', 'dec_pre_b', 'dec_cond_w', 'up1_w', 'up1_b', 'res1_w', 'res1_b',
    'up2_w', 'up2_b', 'res2_w', 'res2_b', 'post_wt', 'post_b',
)
N_DATA = 8   # scal, xlen, emb_sum, bert_t, jbert_t, g, noise_w_row, noise


def _ln(x, g, b, eps=1e-5):
    mu = jnp.mean(x, axis=-1, keepdims=True)
    var = jnp.mean((x - mu) ** 2, axis=-1, keepdims=True)
    return (x - mu) * jax.lax.rsqrt(var + eps) * g + b


def _mm(a, b):
    return jnp.dot(a, b, preferred_element_type=F32)


def _mm_nt(a, b):
    return jax.lax.dot_general(a, b, NT, preferred_element_type=F32)


def _maskf(cond):
    return jnp.where(cond, F32(1.0), F32(0.0))


# ------------------------- single fused TTS kernel --------------------------
def synthesizer_fused_kernel(*refs):
    (scal_ref, xlen_ref, emb_ref, bert_ref, jbert_ref, g_ref,
     nw_ref, nz_ref) = refs[:N_DATA]
    W = dict(zip(WEIGHT_ORDER, refs[N_DATA:N_DATA + len(WEIGHT_ORDER)]))
    wav_ref, attn_ref, ymask_ref = refs[N_DATA + len(WEIGHT_ORDER):]

    noise_scale   = scal_ref[0]
    noise_scale_w = scal_ref[1]
    length_scale  = scal_ref[2]
    sdp_ratio     = scal_ref[3]
    xlen = xlen_ref[0]

    xm  = _maskf(jax.lax.broadcasted_iota(jnp.int32, (T_IN, 1), 0) < xlen)   # [T,1]
    xmr = _maskf(jax.lax.broadcasted_iota(jnp.int32, (1, T_IN), 1) < xlen)   # [1,T]
    g = g_ref[...]                                                           # [1,GIN]

    # ---------------- 1) text encoder ----------------
    h = (emb_ref[...]
         + _mm(bert_ref[...], W['bert_w'][...]) + W['bert_b'][...]
         + _mm(jbert_ref[...], W['jbert_w'][...]) + W['jbert_b'][...]
         ) * jnp.sqrt(F32(HIDDEN))
    h = h * xm

    # merged q|k|v projection (N=192 keeps the MXU lanes fuller than 3x N=64)
    qkv = _mm(h, W['wqkv'][...]) + W['bqkv'][...]
    q = qkv[:, :HIDDEN]
    k = qkv[:, HIDDEN:2 * HIDDEN]
    v = qkv[:, 2 * HIDDEN:]
    scores = _mm_nt(q, k) * (1.0 / jnp.sqrt(F32(HIDDEN)))
    amask = xm * xmr
    scores = jnp.where(amask > 0.5, scores, F32(-1e9))
    scores = scores - jnp.max(scores, axis=-1, keepdims=True)
    e = jnp.exp(scores)
    p_att = e * pl.reciprocal(jnp.sum(e, axis=-1, keepdims=True), approx=True)
    att = _mm(_mm(p_att, v), W['wo'][...]) + W['bo'][...]
    h = _ln(h + att, W['ln1_g'][...], W['ln1_b'][...])
    ff = jnp.maximum(_mm(h * xm, W['ffn_w1'][...]) + W['ffn_b1'][...], 0.0)
    ff = _mm(ff, W['ffn_w2'][...]) + W['ffn_b2'][...]
    h = _ln(h + ff, W['ln2_g'][...], W['ln2_b'][...])
    h = h * xm
    # merged m|logs stats projection (N=128, lane-full)
    stats = (_mm(h, W['wml'][...]) + W['bml'][...]) * xm                     # [T, 2H]

    # ---------------- 2) duration predictors ----------------
    hc = h + _mm(g, W['dp_cond'][...])
    t1 = jnp.maximum(_mm(hc * xm, W['dp_w1'][...]) + W['dp_b1'][...], 0.0)
    t1 = _ln(t1, W['dp_ln1_g'][...], W['dp_ln1_b'][...])
    t1 = jnp.maximum(_mm(t1 * xm, W['dp_w2'][...]) + W['dp_b2'][...], 0.0)
    t1 = _ln(t1, W['dp_ln2_g'][...], W['dp_ln2_b'][...])

    hs = h + _mm(g, W['sdp_cond'][...])
    s1 = jnp.maximum(_mm(hs * xm, W['sdp_pre_w'][...]) + W['sdp_pre_b'][...], 0.0)
    s1 = jnp.maximum(_mm(s1 * xm, W['sdp_w1'][...]) + W['sdp_b1'][...], 0.0)

    # merged (block-diagonal) dp/sdp output projection, transposed so durations
    # land on the lane axis -> [2, T]
    ts = jnp.concatenate([t1, s1], axis=-1) * xm                             # [T, 2*FILT]
    pr = _mm_nt(W['dur_proj_wt'][...], ts) + W['dur_proj_b'][...]            # [2, T]
    logw_dp  = pr[0:1, :] * xmr
    logw_sdp = (nw_ref[...] * noise_scale_w + pr[1:2, :]) * xmr
    logw = logw_sdp * sdp_ratio + logw_dp * (1.0 - sdp_ratio)
    w_ceil = jnp.ceil(jnp.exp(logw) * xmr * length_scale)                    # [1, T]

    # ---------------- 3) length regulation (generate_path) ----------------
    rj = jax.lax.broadcasted_iota(jnp.int32, (T_IN, T_IN), 0)
    ci = jax.lax.broadcasted_iota(jnp.int32, (T_IN, T_IN), 1)
    cum  = jnp.minimum(_mm(w_ceil, _maskf(rj <= ci)), F32(T_OUT))            # inclusive cumsum
    cump = jnp.minimum(_mm(w_ceil, _maskf(rj < ci)), F32(T_OUT))             # exclusive cumsum
    y_len = jnp.maximum(jnp.max(cum, axis=-1, keepdims=True), F32(1.0))      # [1,1]
    ty = jax.lax.broadcasted_iota(jnp.int32, (T_OUT, 1), 0).astype(F32)      # [T_OUT,1]
    ym = _maskf(ty < y_len)                                                  # [T_OUT,1]
    attn = (_maskf(ty < cum) - _maskf(ty < cump)) * ym * xmr                 # [T_OUT, T]

    # ---------------- 4) expand stats, sample z_p, reverse flow ----------------
    ex = _mm(attn, stats)                                                    # [T_OUT, 2H]
    mp_y = ex[:, :HIDDEN]
    lp_y = ex[:, HIDDEN:]
    z = (mp_y + nz_ref[...] * jnp.exp(lp_y) * noise_scale) * ym              # z_p
    P = W['flow_P'][...]

    def coupling_rev(zc, wpre, bpre, wcond, wout, bout):
        z0 = zc[:, :HALF]
        z1 = zc[:, HALF:]
        hh = jnp.maximum(_mm(z0 * ym, wpre) + bpre + _mm(g, wcond), 0.0)
        mshift = _mm(hh * ym, wout) + bout
        return jnp.concatenate([z0, (z1 - mshift) * ym], axis=-1)

    # reverse of flows = [coupling1, flip, coupling2, flip]
    z = _mm(z, P)
    z = coupling_rev(z, W['f2_pre_w'][...], W['f2_pre_b'][...], W['f2_cond_w'][...],
                     W['f2_out_w'][...], W['f2_out_b'][...])
    z = _mm(z, P)
    z = coupling_rev(z, W['f1_pre_w'][...], W['f1_pre_b'][...], W['f1_cond_w'][...],
                     W['f1_out_w'][...], W['f1_out_b'][...])
    z = z * ym

    # ---------------- 5) decoder (pointwise; x4 nearest upsample deferred) ----------------
    x0 = _mm(z, W['dec_pre_w'][...]) + W['dec_pre_b'][...] + _mm(g, W['dec_cond_w'][...])
    a1 = jax.nn.leaky_relu(x0, 0.1)
    h1 = _mm(a1, W['up1_w'][...]) + W['up1_b'][...]
    x1 = h1 + _mm(jax.nn.leaky_relu(h1, 0.1), W['res1_w'][...]) + W['res1_b'][...]
    a2 = jax.nn.leaky_relu(x1, 0.1)
    h2 = _mm(a2, W['up2_w'][...]) + W['up2_b'][...]
    x2 = h2 + _mm(jax.nn.leaky_relu(h2, 0.1), W['res2_w'][...]) + W['res2_b'][...]
    xp = jax.nn.leaky_relu(x2, 0.1)                                          # [T_OUT, DEC2]
    # post projection stored transposed -> lane-dense waveform [1, T_OUT]
    wav = jnp.tanh(_mm_nt(W['post_wt'][...], xp) + W['post_b'][...])

    wav_ref[...] = wav
    attn_ref[...] = attn
    ymask_ref[...] = ym


# ------------------------------ parameters ----------------------------------
def make_params(seed=0):
    key = jax.random.PRNGKey(seed)

    def nxt():
        nonlocal key
        key, sub = jax.random.split(key)
        return sub

    def w(shape, scale=0.02):
        return (scale * jax.random.normal(nxt(), shape)).astype(F32)

    z = lambda s: jnp.zeros(s, F32)
    o = lambda s: jnp.ones(s, F32)

    # block-diagonal merged dp/sdp output projection, stored transposed [2, 2*FILT]
    dp_proj = w((1, FILT))
    sdp_proj = w((1, FILT))
    zrow = jnp.zeros((1, FILT), F32)
    dur_proj_wt = jnp.concatenate(
        [jnp.concatenate([dp_proj, zrow], axis=1),
         jnp.concatenate([zrow, sdp_proj], axis=1)], axis=0)

    p = {
        # embeddings
        'emb': w((N_VOCAB, HIDDEN)), 'tone_emb': w((N_TONES, HIDDEN)),
        'lang_emb': w((N_LANGS, HIDDEN)), 'emb_g': w((N_SPK, GIN)),
        # bert projections
        'bert_w': w((BERT_D, HIDDEN)), 'bert_b': z((1, HIDDEN)),
        'jbert_w': w((JBERT_D, HIDDEN)), 'jbert_b': z((1, HIDDEN)),
        # encoder block (q|k|v merged, m|logs merged)
        'wqkv': w((HIDDEN, 3 * HIDDEN)), 'bqkv': z((1, 3 * HIDDEN)),
        'wo': w((HIDDEN, HIDDEN)), 'bo': z((1, HIDDEN)),
        'ln1_g': o((1, HIDDEN)), 'ln1_b': z((1, HIDDEN)),
        'ffn_w1': w((HIDDEN, FFN)), 'ffn_b1': z((1, FFN)),
        'ffn_w2': w((FFN, HIDDEN)), 'ffn_b2': z((1, HIDDEN)),
        'ln2_g': o((1, HIDDEN)), 'ln2_b': z((1, HIDDEN)),
        'wml': w((HIDDEN, 2 * HIDDEN)), 'bml': z((1, 2 * HIDDEN)),
        # deterministic duration predictor
        'dp_cond': w((GIN, HIDDEN)),
        'dp_w1': w((HIDDEN, FILT)), 'dp_b1': z((1, FILT)),
        'dp_ln1_g': o((1, FILT)), 'dp_ln1_b': z((1, FILT)),
        'dp_w2': w((FILT, FILT)), 'dp_b2': z((1, FILT)),
        'dp_ln2_g': o((1, FILT)), 'dp_ln2_b': z((1, FILT)),
        # stochastic duration predictor (reduced)
        'sdp_cond': w((GIN, HIDDEN)),
        'sdp_pre_w': w((HIDDEN, FILT)), 'sdp_pre_b': z((1, FILT)),
        'sdp_w1': w((FILT, FILT)), 'sdp_b1': z((1, FILT)),
        'dur_proj_wt': dur_proj_wt, 'dur_proj_b': z((2, 1)),
        # flow (2 mean-only coupling layers + flips)
        'flow_P': jnp.flip(jnp.eye(HIDDEN, dtype=F32), axis=0),
        'f1_pre_w': w((HALF, FLOWH)), 'f1_pre_b': z((1, FLOWH)),
        'f1_cond_w': w((GIN, FLOWH)),
        'f1_out_w': w((FLOWH, HALF)), 'f1_out_b': z((1, HALF)),
        'f2_pre_w': w((HALF, FLOWH)), 'f2_pre_b': z((1, FLOWH)),
        'f2_cond_w': w((GIN, FLOWH)),
        'f2_out_w': w((FLOWH, HALF)), 'f2_out_b': z((1, HALF)),
        # decoder
        'dec_pre_w': w((HIDDEN, DEC0)), 'dec_pre_b': z((1, DEC0)),
        'dec_cond_w': w((GIN, DEC0)),
        'up1_w': w((DEC0, DEC1)), 'up1_b': z((1, DEC1)),
        'res1_w': w((DEC1, DEC1)), 'res1_b': z((1, DEC1)),
        'up2_w': w((DEC1, DEC2)), 'up2_b': z((1, DEC2)),
        'res2_w': w((DEC2, DEC2)), 'res2_b': z((1, DEC2)),
        'post_wt': w((1, DEC2)), 'post_b': z((1, 1)),
    }
    return p


# ------------------------------ inference wrapper ----------------------------
def synthesizer_infer(p, x, x_lengths, sid, tone, language, bert, ja_bert,
                      noise_scale, length_scale, noise_scale_w, sdp_ratio):
    x = x[0].astype(jnp.int32)
    tone = tone[0].astype(jnp.int32)
    language = language[0].astype(jnp.int32)
    T = x.shape[0]

    # embedding gathers stay in XLA (fused into the same jitted executable)
    emb_sum = p['emb'][x] + p['tone_emb'][tone] + p['lang_emb'][language]    # [T, H]
    g = p['emb_g'][sid.astype(jnp.int32)]                                    # [1, GIN]
    # NOTE: bert transposes kept in the jitted wrapper (fused by XLA) rather than
    # relying on transposed-LHS MXU contractions inside the kernel.
    bert_t = jnp.transpose(bert[0]).astype(F32)                              # [T, 1024]
    jbert_t = jnp.transpose(ja_bert[0]).astype(F32)                          # [T, 768]

    noise_w = jax.random.normal(jax.random.PRNGKey(7), (1, T), F32)
    noise = jax.random.normal(jax.random.PRNGKey(11), (T_OUT, HIDDEN), F32)

    scal = jnp.stack([jnp.asarray(noise_scale, F32), jnp.asarray(noise_scale_w, F32),
                      jnp.asarray(length_scale, F32), jnp.asarray(sdp_ratio, F32)])
    xlen = x_lengths.astype(jnp.int32).reshape((1,))

    data_in = (scal, xlen, emb_sum, bert_t, jbert_t, g, noise_w, noise)
    weights = tuple(p[name] for name in WEIGHT_ORDER)
    in_specs = [SMEM, SMEM] + [VMEM] * (len(data_in) - 2 + len(weights))

    wav_row, attn, y_mask = pl.pallas_call(
        synthesizer_fused_kernel,
        out_shape=(jax.ShapeDtypeStruct((1, T_OUT), F32),
                   jax.ShapeDtypeStruct((T_OUT, T), F32),
                   jax.ShapeDtypeStruct((T_OUT, 1), F32)),
        in_specs=in_specs,
        out_specs=(VMEM, VMEM, VMEM),
    )(*data_in, *weights)

    # nearest x2-x2 upsample commutes with the pointwise decoder; apply once here.
    o = jnp.repeat(wav_row, UPS, axis=1).reshape(1, 1, T_OUT * UPS)          # [B, 1, T_wav]
    return o, attn, y_mask


if __name__ == "__main__":
    params = make_params(seed=0)

    toks = [0, 0, 0, 100, 0, 13, 0, 101, 0, 26, 0, 21, 0, 41, 0, 7, 0, 33, 0, 57,
            0, 33, 0, 77, 0, 12, 0, 62, 0, 101, 0, 67, 0, 106, 0, 0, 0]
    tns = [0, 0, 0, 4, 0, 4, 0, 4, 0, 4, 0, 4, 0, 4, 0, 7, 0, 8, 0, 7,
           0, 9, 0, 7, 0, 8, 0, 7, 0, 1, 0, 1, 0, 0, 0, 0, 0]
    lng = [0, 3, 0, 3, 0, 3, 0, 3, 0, 3, 0, 3, 0, 3, 0, 3, 0, 3, 0, 3,
           0, 3, 0, 3, 0, 3, 0, 3, 0, 3, 0, 3, 0, 3, 0, 3, 0]
    n = len(toks)
    pad = T_IN - n

    x = jnp.array([toks + [0] * pad], dtype=jnp.int32)
    x_lengths = jnp.array([n], dtype=jnp.int32)
    sid = jnp.array([1], dtype=jnp.int32)
    tone = jnp.array([tns + [0] * pad], dtype=jnp.int32)
    language = jnp.array([lng + [0] * pad], dtype=jnp.int32)
    bert = jnp.zeros((1, BERT_D, T_IN), dtype=F32)
    ja_bert = jax.random.normal(jax.random.PRNGKey(0), (1, JBERT_D, T_IN), F32)

    noise_scale, length_scale, noise_scale_w, sdp_ratio = 0.6, 1.0, 0.8, 0.2

    infer = jax.jit(synthesizer_infer)
    o, attn, y_mask = infer(params, x, x_lengths, sid, tone, language, bert, ja_bert,
                            noise_scale, length_scale, noise_scale_w, sdp_ratio)
    jax.block_until_ready(o)
    assert o.shape == (1, 1, T_OUT * UPS) and bool(jnp.all(jnp.isfinite(o)))
    print("KERNEL_OK")
</pallas_src>

<mosaic_0001>
module attributes {stable_mosaic.version = 11 : i64} {
  func.func @synthesizer_fused_kernel(%arg0: memref<4xf32, #tpu.memory_space<smem>>, %arg1: memref<1xi32, #tpu.memory_space<smem>>, %arg2: memref<48x64xf32, #tpu.memory_space<vmem>>, %arg3: memref<48x1024xf32, #tpu.memory_space<vmem>>, %arg4: memref<48x768xf32, #tpu.memory_space<vmem>>, %arg5: memref<1x32xf32, #tpu.memory_space<vmem>>, %arg6: memref<1x48xf32, #tpu.memory_space<vmem>>, %arg7: memref<256x64xf32, #tpu.memory_space<vmem>>, %arg8: memref<1024x64xf32, #tpu.memory_space<vmem>>, %arg9: memref<1x64xf32, #tpu.memory_space<vmem>>, %arg10: memref<768x64xf32, #tpu.memory_space<vmem>>, %arg11: memref<1x64xf32, #tpu.memory_space<vmem>>, %arg12: memref<64x192xf32, #tpu.memory_space<vmem>>, %arg13: memref<1x192xf32, #tpu.memory_space<vmem>>, %arg14: memref<64x64xf32, #tpu.memory_space<vmem>>, %arg15: memref<1x64xf32, #tpu.memory_space<vmem>>, %arg16: memref<1x64xf32, #tpu.memory_space<vmem>>, %arg17: memref<1x64xf32, #tpu.memory_space<vmem>>, %arg18: memref<64x256xf32, #tpu.memory_space<vmem>>, %arg19: memref<1x256xf32, #tpu.memory_space<vmem>>, %arg20: memref<256x64xf32, #tpu.memory_space<vmem>>, %arg21: memref<1x64xf32, #tpu.memory_space<vmem>>, %arg22: memref<1x64xf32, #tpu.memory_space<vmem>>, %arg23: memref<1x64xf32, #tpu.memory_space<vmem>>, %arg24: memref<64x128xf32, #tpu.memory_space<vmem>>, %arg25: memref<1x128xf32, #tpu.memory_space<vmem>>, %arg26: memref<32x64xf32, #tpu.memory_space<vmem>>, %arg27: memref<64x64xf32, #tpu.memory_space<vmem>>, %arg28: memref<1x64xf32, #tpu.memory_space<vmem>>, %arg29: memref<1x64xf32, #tpu.memory_space<vmem>>, %arg30: memref<1x64xf32, #tpu.memory_space<vmem>>, %arg31: memref<64x64xf32, #tpu.memory_space<vmem>>, %arg32: memref<1x64xf32, #tpu.memory_space<vmem>>, %arg33: memref<1x64xf32, #tpu.memory_space<vmem>>, %arg34: memref<1x64xf32, #tpu.memory_space<vmem>>, %arg35: memref<32x64xf32, #tpu.memory_space<vmem>>, %arg36: memref<64x64xf32, #tpu.memory_space<vmem>>, %arg37: memref<1x64xf32, #tpu.memory_space<vmem>>, %arg38: memref<64x64xf32, #tpu.memory_space<vmem>>, %arg39: memref<1x64xf32, #tpu.memory_space<vmem>>, %arg40: memref<2x128xf32, #tpu.memory_space<vmem>>, %arg41: memref<2x1xf32, #tpu.memory_space<vmem>>, %arg42: memref<64x64xf32, #tpu.memory_space<vmem>>, %arg43: memref<32x64xf32, #tpu.memory_space<vmem>>, %arg44: memref<1x64xf32, #tpu.memory_space<vmem>>, %arg45: memref<32x64xf32, #tpu.memory_space<vmem>>, %arg46: memref<64x32xf32, #tpu.memory_space<vmem>>, %arg47: memref<1x32xf32, #tpu.memory_space<vmem>>, %arg48: memref<32x64xf32, #tpu.memory_space<vmem>>, %arg49: memref<1x64xf32, #tpu.memory_space<vmem>>, %arg50: memref<32x64xf32, #tpu.memory_space<vmem>>, %arg51: memref<64x32xf32, #tpu.memory_space<vmem>>, %arg52: memref<1x32xf32, #tpu.memory_space<vmem>>, %arg53: memref<64x64xf32, #tpu.memory_space<vmem>>, %arg54: memref<1x64xf32, #tpu.memory_space<vmem>>, %arg55: memref<32x64xf32, #tpu.memory_space<vmem>>, %arg56: memref<64x32xf32, #tpu.memory_space<vmem>>, %arg57: memref<1x32xf32, #tpu.memory_space<vmem>>, %arg58: memref<32x32xf32, #tpu.memory_space<vmem>>, %arg59: memref<1x32xf32, #tpu.memory_space<vmem>>, %arg60: memref<32x16xf32, #tpu.memory_space<vmem>>, %arg61: memref<1x16xf32, #tpu.memory_space<vmem>>, %arg62: memref<16x16xf32, #tpu.memory_space<vmem>>, %arg63: memref<1x16xf32, #tpu.memory_space<vmem>>, %arg64: memref<1x16xf32, #tpu.memory_space<vmem>>, %arg65: memref<1x1xf32, #tpu.memory_space<vmem>>, %arg66: memref<1x256xf32, #tpu.memory_space<vmem>>, %arg67: memref<256x48xf32, #tpu.memory_space<vmem>>, %arg68: memref<256x1xf32, #tpu.memory_space<vmem>>) attributes {dimension_semantics = [], scalar_prefetch = 0 : i64, scratch_operands = 0 : i64, tpu.core_type = #tpu.core_type<tc>} {
    %c0 = arith.constant 0 : index
    %0 = memref.load %arg0[%c0] : memref<4xf32, #tpu.memory_space<smem>>
    %c1 = arith.constant 1 : index
    %1 = memref.load %arg0[%c1] : memref<4xf32, #tpu.memory_space<smem>>
    %c2 = arith.constant 2 : index
    %2 = memref.load %arg0[%c2] : memref<4xf32, #tpu.memory_space<smem>>
    %c3 = arith.constant 3 : index
    %3 = memref.load %arg0[%c3] : memref<4xf32, #tpu.memory_space<smem>>
    %c0_0 = arith.constant 0 : index
    %4 = memref.load %arg1[%c0_0] : memref<1xi32, #tpu.memory_space<smem>>
    %5 = tpu.iota {dimensions = array<i32: 0>} : vector<48x1xi32>
    %6 = vector.broadcast %4 : i32 to vector<48x1xi32>
    %7 = arith.cmpi slt, %5, %6 : vector<48x1xi32>
    %cst = arith.constant 1.000000e+00 : f32
    %cst_1 = arith.constant 0.000000e+00 : f32
    %8 = vector.broadcast %cst : f32 to vector<48x1xf32>
    %9 = vector.broadcast %cst_1 : f32 to vector<48x1xf32>
    %10 = arith.select %7, %8, %9 : vector<48x1xi1>, vector<48x1xf32>
    %11 = tpu.iota {dimensions = array<i32: 1>} : vector<1x48xi32>
    %12 = vector.broadcast %4 : i32 to vector<1x48xi32>
    %13 = arith.cmpi slt, %11, %12 : vector<1x48xi32>
    %cst_2 = arith.constant 1.000000e+00 : f32
    %cst_3 = arith.constant 0.000000e+00 : f32
    %14 = vector.broadcast %cst_2 : f32 to vector<1x48xf32>
    %15 = vector.broadcast %cst_3 : f32 to vector<1x48xf32>
    %16 = arith.select %13, %14, %15 : vector<1x48xi1>, vector<1x48xf32>
    %c0_4 = arith.constant 0 : index
    %c0_5 = arith.constant 0 : index
    %17 = vector.load %arg5[%c0_4, %c0_5] : memref<1x32xf32, #tpu.memory_space<vmem>>, vector<1x32xf32>
    %c0_6 = arith.constant 0 : index
    %c0_7 = arith.constant 0 : index
    %18 = vector.load %arg2[%c0_6, %c0_7] : memref<48x64xf32, #tpu.memory_space<vmem>>, vector<48x64xf32>
    %c0_8 = arith.constant 0 : index
    %c0_9 = arith.constant 0 : index
    %19 = vector.load %arg3[%c0_8, %c0_9] : memref<48x1024xf32, #tpu.memory_space<vmem>>, vector<48x1024xf32>
    %c0_10 = arith.constant 0 : index
    %c0_11 = arith.constant 0 : index
    %20 = vector.load %arg8[%c0_10, %c0_11] : memref<1024x64xf32, #tpu.memory_space<vmem>>, vector<1024x64xf32>
    %cst_12 = arith.constant dense<0.000000e+00> : vector<48x64xf32>
    %21 = tpu.matmul %19, %20, %cst_12 {dimension_numbers = #tpu.dot_dimension_numbers<[1], [0], [0], [1], [0, 0, 1, 1], [], []>} : vector<48x1024xf32>, vector<1024x64xf32>, vector<48x64xf32> -> vector<48x64xf32>
    %22 = arith.addf %18, %21 : vector<48x64xf32>
    %c0_13 = arith.constant 0 : index
    %c0_14 = arith.constant 0 : index
    %23 = vector.load %arg9[%c0_13, %c0_14] : memref<1x64xf32, #tpu.memory_space<vmem>>, vector<1x64xf32>
    %24 = vector.broadcast %23 : vector<1x64xf32> to vector<48x64xf32>
    %25 = arith.addf %22, %24 : vector<48x64xf32>
    %c0_15 = arith.constant 0 : index
    %c0_16 = arith.constant 0 : index
    %26 = vector.load %arg4[%c0_15, %c0_16] : memref<48x768xf32, #tpu.memory_space<vmem>>, vector<48x768xf32>
    %c0_17 = arith.constant 0 : index
    %c0_18 = arith.constant 0 : index
    %27 = vector.load %arg10[%c0_17, %c0_18] : memref<768x64xf32, #tpu.memory_space<vmem>>, vector<768x64xf32>
    %cst_19 = arith.constant dense<0.000000e+00> : vector<48x64xf32>
    %28 = tpu.matmul %26, %27, %cst_19 {dimension_numbers = #tpu.dot_dimension_numbers<[1], [0], [0], [1], [0, 0, 1, 1], [], []>} : vector<48x768xf32>, vector<768x64xf32>, vector<48x64xf32> -> vector<48x64xf32>
    %29 = arith.addf %25, %28 : vector<48x64xf32>
    %c0_20 = arith.constant 0 : index
    %c0_21 = arith.constant 0 : index
    %30 = vector.load %arg11[%c0_20, %c0_21] : memref<1x64xf32, #tpu.memory_space<vmem>>, vector<1x64xf32>
    %31 = vector.broadcast %30 : vector<1x64xf32> to vector<48x64xf32>
    %32 = arith.addf %29, %31 : vector<48x64xf32>
    %cst_22 = arith.constant 6.400000e+01 : f32
    %33 = math.sqrt %cst_22 : f32
    %34 = vector.broadcast %33 : f32 to vector<48x64xf32>
    %35 = arith.mulf %32, %34 : vector<48x64xf32>
    %36 = vector.broadcast %10 : vector<48x1xf32> to vector<48x64xf32>
    %37 = arith.mulf %35, %36 : vector<48x64xf32>
    %c0_23 = arith.constant 0 : index
    %c0_24 = arith.constant 0 : index
    %38 = vector.load %arg12[%c0_23, %c0_24] : memref<64x192xf32, #tpu.memory_space<vmem>>, vector<64x192xf32>
    %cst_25 = arith.constant dense<0.000000e+00> : vector<48x192xf32>
    %39 = tpu.matmul %37, %38, %cst_25 {dimension_numbers = #tpu.dot_dimension_numbers<[1], [0], [0], [1], [0, 0, 1, 1], [], []>} : vector<48x64xf32>, vector<64x192xf32>, vector<48x192xf32> -> vector<48x192xf32>
    %c0_26 = arith.constant 0 : index
    %c0_27 = arith.constant 0 : index
    %40 = vector.load %arg13[%c0_26, %c0_27] : memref<1x192xf32, #tpu.memory_space<vmem>>, vector<1x192xf32>
    %41 = vector.broadcast %40 : vector<1x192xf32> to vector<48x192xf32>
    %42 = arith.addf %39, %41 : vector<48x192xf32>
    %43 = vector.extract_strided_slice %42 {offsets = [0, 0], sizes = [48, 64], strides = [1, 1]} : vector<48x192xf32> to vector<48x64xf32>
    %44 = vector.extract_strided_slice %42 {offsets = [0, 64], sizes = [48, 64], strides = [1, 1]} : vector<48x192xf32> to vector<48x64xf32>
    %45 = vector.extract_strided_slice %42 {offsets = [0, 128], sizes = [48, 64], strides = [1, 1]} : vector<48x192xf32> to vector<48x64xf32>
    %cst_28 = arith.constant dense<0.000000e+00> : vector<48x48xf32>
    %46 = tpu.matmul %43, %44, %cst_28 {dimension_numbers = #tpu.dot_dimension_numbers<[1], [1], [0], [0], [0, 0, 1, 0], [], []>} : vector<48x64xf32>, vector<48x64xf32>, vector<48x48xf32> -> vector<48x48xf32>
    %cst_29 = arith.constant 6.400000e+01 : f32
    %47 = math.sqrt %cst_29 : f32
    %cst_30 = arith.constant 1.000000e+00 : f32
    %48 = arith.divf %cst_30, %47 : f32
    %49 = vector.broadcast %48 : f32 to vector<48x48xf32>
    %50 = arith.mulf %46, %49 : vector<48x48xf32>
    %51 = vector.broadcast %10 : vector<48x1xf32> to vector<48x48xf32>
    %52 = vector.broadcast %16 : vector<1x48xf32> to vector<48x48xf32>
    %53 = arith.mulf %51, %52 : vector<48x48xf32>
    %cst_31 = arith.constant 5.000000e-01 : f32
    %54 = vector.broadcast %cst_31 : f32 to vector<48x48xf32>
    %55 = arith.cmpf ogt, %53, %54 : vector<48x48xf32>
    %cst_32 = arith.constant -1.000000e+09 : f32
    %56 = vector.broadcast %cst_32 : f32 to vector<48x48xf32>
    %57 = arith.select %55, %50, %56 : vector<48x48xi1>, vector<48x48xf32>
    %cst_33 = arith.constant dense<0xFF800000> : vector<48xf32>
    %58 = vector.multi_reduction <maximumf>, %57, %cst_33 [1] : vector<48x48xf32> to vector<48xf32>
    %59 = vector.shape_cast %58 : vector<48xf32> to vector<48x1xf32>
    %60 = vector.broadcast %59 : vector<48x1xf32> to vector<48x48xf32>
    %61 = arith.subf %57, %60 : vector<48x48xf32>
    %62 = math.exp %61 : vector<48x48xf32>
    %cst_34 = arith.constant dense<0.000000e+00> : vector<48xf32>
    %63 = vector.multi_reduction <add>, %62, %cst_34 [1] : vector<48x48xf32> to vector<48xf32>
    %64 = vector.shape_cast %63 : vector<48xf32> to vector<48x1xf32>
    %65 = tpu.reciprocal %64 {approx = true} : vector<48x1xf32> -> vector<48x1xf32>
    %66 = vector.broadcast %65 : vector<48x1xf32> to vector<48x48xf32>
    %67 = arith.mulf %62, %66 : vector<48x48xf32>
    %cst_35 = arith.constant dense<0.000000e+00> : vector<48x64xf32>
    %68 = tpu.matmul %67, %45, %cst_35 {dimension_numbers = #tpu.dot_dimension_numbers<[1], [0], [0], [1], [0, 0, 1, 1], [], []>} : vector<48x48xf32>, vector<48x64xf32>, vector<48x64xf32> -> vector<48x64xf32>
    %c0_36 = arith.constant 0 : index
    %c0_37 = arith.constant 0 : index
    %69 = vector.load %arg14[%c0_36, %c0_37] : memref<64x64xf32, #tpu.memory_space<vmem>>, vector<64x64xf32>
    %cst_38 = arith.constant dense<0.000000e+00> : vector<48x64xf32>
    %70 = tpu.matmul %68, %69, %cst_38 {dimension_numbers = #tpu.dot_dimension_numbers<[1], [0], [0], [1], [0, 0, 1, 1], [], []>} : vector<48x64xf32>, vector<64x64xf32>, vector<48x64xf32> -> vector<48x64xf32>
    %c0_39 = arith.constant 0 : index
    %c0_40 = arith.constant 0 : index
    %71 = vector.load %arg15[%c0_39, %c0_40] : memref<1x64xf32, #tpu.memory_space<vmem>>, vector<1x64xf32>
    %72 = vector.broadcast %71 : vector<1x64xf32> to vector<48x64xf32>
    %73 = arith.addf %70, %72 : vector<48x64xf32>
    %74 = arith.addf %37, %73 : vector<48x64xf32>
    %c0_41 = arith.constant 0 : index
    %c0_42 = arith.constant 0 : index
    %75 = vector.load %arg16[%c0_41, %c0_42] : memref<1x64xf32, #tpu.memory_space<vmem>>, vector<1x64xf32>
    %c0_43 = arith.constant 0 : index
    %c0_44 = arith.constant 0 : index
    %76 = vector.load %arg17[%c0_43, %c0_44] : memref<1x64xf32, #tpu.memory_space<vmem>>, vector<1x64xf32>
    %cst_45 = arith.constant dense<0.000000e+00> : vector<48xf32>
    %77 = vector.multi_reduction <add>, %74, %cst_45 [1] : vector<48x64xf32> to vector<48xf32>
    %78 = vector.shape_cast %77 : vector<48xf32> to vector<48x1xf32>
    %cst_46 = arith.constant 6.400000e+01 : f32
    %79 = vector.broadcast %cst_46 : f32 to vector<48x1xf32>
    %80 = arith.divf %78, %79 : vector<48x1xf32>
    %81 = vector.broadcast %80 : vector<48x1xf32> to vector<48x64xf32>
    %82 = arith.subf %74, %81 : vector<48x64xf32>
    %83 = arith.mulf %82, %82 : vector<48x64xf32>
    %cst_47 = arith.constant dense<0.000000e+00> : vector<48xf32>
    %84 = vector.multi_reduction <add>, %83, %cst_47 [1] : vector<48x64xf32> to vector<48xf32>
    %85 = vector.shape_cast %84 : vector<48xf32> to vector<48x1xf32>
    %cst_48 = arith.constant 6.400000e+01 : f32
    %86 = vector.broadcast %cst_48 : f32 to vector<48x1xf32>
    %87 = arith.divf %85, %86 : vector<48x1xf32>
    %88 = vector.broadcast %80 : vector<48x1xf32> to vector<48x64xf32>
    %89 = arith.subf %74, %88 : vector<48x64xf32>
    %cst_49 = arith.constant 9.99999974E-6 : f32
    %90 = vector.broadcast %cst_49 : f32 to vector<48x1xf32>
    %91 = arith.addf %87, %90 : vector<48x1xf32>
    %92 = math.rsqrt %91 : vector<48x1xf32>
    %93 = vector.broadcast %92 : vector<48x1xf32> to vector<48x64xf32>
    %94 = arith.mulf %89, %93 : vector<48x64xf32>
    %95 = vector.broadcast %75 : vector<1x64xf32> to vector<48x64xf32>
    %96 = arith.mulf %94, %95 : vector<48x64xf32>
    %97 = vector.broadcast %76 : vector<1x64xf32> to vector<48x64xf32>
    %98 = arith.addf %96, %97 : vector<48x64xf32>
    %99 = vector.broadcast %10 : vector<48x1xf32> to vector<48x64xf32>
    %100 = arith.mulf %98, %99 : vector<48x64xf32>
    %c0_50 = arith.constant 0 : index
    %c0_51 = arith.constant 0 : index
    %101 = vector.load %arg18[%c0_50, %c0_51] : memref<64x256xf32, #tpu.memory_space<vmem>>, vector<64x256xf32>
    %cst_52 = arith.constant dense<0.000000e+00> : vector<48x256xf32>
    %102 = tpu.matmul %100, %101, %cst_52 {dimension_numbers = #tpu.dot_dimension_numbers<[1], [0], [0], [1], [0, 0, 1, 1], [], []>} : vector<48x64xf32>, vector<64x256xf32>, vector<48x256xf32> -> vector<48x256xf32>
    %c0_53 = arith.constant 0 : index
    %c0_54 = arith.constant 0 : index
    %103 = vector.load %arg19[%c0_53, %c0_54] : memref<1x256xf32, #tpu.memory_space<vmem>>, vector<1x256xf32>
    %104 = vector.broadcast %103 : vector<1x256xf32> to vector<48x256xf32>
    %105 = arith.addf %102, %104 : vector<48x256xf32>
    %cst_55 = arith.constant 0.000000e+00 : f32
    %106 = vector.broadcast %cst_55 : f32 to vector<48x256xf32>
    %107 = arith.maximumf %105, %106 : vector<48x256xf32>
    %c0_56 = arith.constant 0 : index
    %c0_57 = arith.constant 0 : index
    %108 = vector.load %arg20[%c0_56, %c0_57] : memref<256x64xf32, #tpu.memory_space<vmem>>, vector<256x64xf32>
    %cst_58 = arith.constant dense<0.000000e+00> : vector<48x64xf32>
    %109 = tpu.matmul %107, %108, %cst_58 {dimension_numbers = #tpu.dot_dimension_numbers<[1], [0], [0], [1], [0, 0, 1, 1], [], []>} : vector<48x256xf32>, vector<256x64xf32>, vector<48x64xf32> -> vector<48x64xf32>
    %c0_59 = arith.constant 0 : index
    %c0_60 = arith.constant 0 : index
    %110 = vector.load %arg21[%c0_59, %c0_60] : memref<1x64xf32, #tpu.memory_space<vmem>>, vector<1x64xf32>
    %111 = vector.broadcast %110 : vector<1x64xf32> to vector<48x64xf32>
    %112 = arith.addf %109, %111 : vector<48x64xf32>
    %113 = arith.addf %98, %112 : vector<48x64xf32>
    %c0_61 = arith.constant 0 : index
    %c0_62 = arith.constant 0 : index
    %114 = vector.load %arg22[%c0_61, %c0_62] : memref<1x64xf32, #tpu.memory_space<vmem>>, vector<1x64xf32>
    %c0_63 = arith.constant 0 : index
    %c0_64 = arith.constant 0 : index
    %115 = vector.load %arg23[%c0_63, %c0_64] : memref<1x64xf32, #tpu.memory_space<vmem>>, vector<1x64xf32>
    %cst_65 = arith.constant dense<0.000000e+00> : vector<48xf32>
    %116 = vector.multi_reduction <add>, %113, %cst_65 [1] : vector<48x64xf32> to vector<48xf32>
    %117 = vector.shape_cast %116 : vector<48xf32> to vector<48x1xf32>
    %cst_66 = arith.constant 6.400000e+01 : f32
    %118 = vector.broadcast %cst_66 : f32 to vector<48x1xf32>
    %119 = arith.divf %117, %118 : vector<48x1xf32>
    %120 = vector.broadcast %119 : vector<48x1xf32> to vector<48x64xf32>
    %121 = arith.subf %113, %120 : vector<48x64xf32>
    %122 = arith.mulf %121, %121 : vector<48x64xf32>
    %cst_67 = arith.constant dense<0.000000e+00> : vector<48xf32>
    %123 = vector.multi_reduction <add>, %122, %cst_67 [1] : vector<48x64xf32> to vector<48xf32>
    %124 = vector.shape_cast %123 : vector<48xf32> to vector<48x1xf32>
    %cst_68 = arith.constant 6.400000e+01 : f32
    %125 = vector.broadcast %cst_68 : f32 to vector<48x1xf32>
    %126 = arith.divf %124, %125 : vector<48x1xf32>
    %127 = vector.broadcast %119 : vector<48x1xf32> to vector<48x64xf32>
    %128 = arith.subf %113, %127 : vector<48x64xf32>
    %cst_69 = arith.constant 9.99999974E-6 : f32
    %129 = vector.broadcast %cst_69 : f32 to vector<48x1xf32>
    %130 = arith.addf %126, %129 : vector<48x1xf32>
    %131 = math.rsqrt %130 : vector<48x1xf32>
    %132 = vector.broadcast %131 : vector<48x1xf32> to vector<48x64xf32>
    %133 = arith.mulf %128, %132 : vector<48x64xf32>
    %134 = vector.broadcast %114 : vector<1x64xf32> to vector<48x64xf32>
    %135 = arith.mulf %133, %134 : vector<48x64xf32>
    %136 = vector.broadcast %115 : vector<1x64xf32> to vector<48x64xf32>
    %137 = arith.addf %135, %136 : vector<48x64xf32>
    %138 = vector.broadcast %10 : vector<48x1xf32> to vector<48x64xf32>
    %139 = arith.mulf %137, %138 : vector<48x64xf32>
    %c0_70 = arith.constant 0 : index
    %c0_71 = arith.constant 0 : index
    %140 = vector.load %arg24[%c0_70, %c0_71] : memref<64x128xf32, #tpu.memory_space<vmem>>, vector<64x128xf32>
    %cst_72 = arith.constant dense<0.000000e+00> : vector<48x128xf32>
    %141 = tpu.matmul %139, %140, %cst_72 {dimension_numbers = #tpu.dot_dimension_numbers<[1], [0], [0], [1], [0, 0, 1, 1], [], []>} : vector<48x64xf32>, vector<64x128xf32>, vector<48x128xf32> -> vector<48x128xf32>
    %c0_73 = arith.constant 0 : index
    %c0_74 = arith.constant 0 : index
    %142 = vector.load %arg25[%c0_73, %c0_74] : memref<1x128xf32, #tpu.memory_space<vmem>>, vector<1x128xf32>
    %143 = vector.broadcast %142 : vector<1x128xf32> to vector<48x128xf32>
    %144 = arith.addf %141, %143 : vector<48x128xf32>
    %145 = vector.broadcast %10 : vector<48x1xf32> to vector<48x128xf32>
    %146 = arith.mulf %144, %145 : vector<48x128xf32>
    %c0_75 = arith.constant 0 : index
    %c0_76 = arith.constant 0 : index
    %147 = vector.load %arg26[%c0_75, %c0_76] : memref<32x64xf32, #tpu.memory_space<vmem>>, vector<32x64xf32>
    %cst_77 = arith.constant dense<0.000000e+00> : vector<1x64xf32>
    %148 = tpu.matmul %17, %147, %cst_77 {dimension_numbers = #tpu.dot_dimension_numbers<[1], [0], [0], [1], [0, 0, 1, 1], [], []>} : vector<1x32xf32>, vector<32x64xf32>, vector<1x64xf32> -> vector<1x64xf32>
    %149 = vector.broadcast %148 : vector<1x64xf32> to vector<48x64xf32>
    %150 = arith.addf %139, %149 : vector<48x64xf32>
    %151 = vector.broadcast %10 : vector<48x1xf32> to vector<48x64xf32>
    %152 = arith.mulf %150, %151 : vector<48x64xf32>
    %c0_78 = arith.constant 0 : index
    %c0_79 = arith.constant 0 : index
    %153 = vector.load %arg27[%c0_78, %c0_79] : memref<64x64xf32, #tpu.memory_space<vmem>>, vector<64x64xf32>
    %cst_80 = arith.constant dense<0.000000e+00> : vector<48x64xf32>
    %154 = tpu.matmul %152, %153, %cst_80 {dimension_numbers = #tpu.dot_dimension_numbers<[1], [0], [0], [1], [0, 0, 1, 1], [], []>} : vector<48x64xf32>, vector<64x64xf32>, vector<48x64xf32> -> vector<48x64xf32>
    %c0_81 = arith.constant 0 : index
    %c0_82 = arith.constant 0 : index
    %155 = vector.load %arg28[%c0_81, %c0_82] : memref<1x64xf32, #tpu.memory_space<vmem>>, vector<1x64xf32>
    %156 = vector.broadcast %155 : vector<1x64xf32> to vector<48x64xf32>
    %157 = arith.addf %154, %156 : vector<48x64xf32>
    %cst_83 = arith.constant 0.000000e+00 : f32
    %158 = vector.broadcast %cst_83 : f32 to vector<48x64xf32>
    %159 = arith.maximumf %157, %158 : vector<48x64xf32>
    %c0_84 = arith.constant 0 : index
    %c0_85 = arith.constant 0 : index
    %160 = vector.load %arg29[%c0_84, %c0_85] : memref<1x64xf32, #tpu.memory_space<vmem>>, vector<1x64xf32>
    %c0_86 = arith.constant 0 : index
    %c0_87 = arith.constant 0 : index
    %161 = vector.load %arg30[%c0_86, %c0_87] : memref<1x64xf32, #tpu.memory_space<vmem>>, vector<1x64xf32>
    %cst_88 = arith.constant dense<0.000000e+00> : vector<48xf32>
    %162 = vector.multi_reduction <add>, %159, %cst_88 [1] : vector<48x64xf32> to vector<48xf32>
    %163 = vector.shape_cast %162 : vector<48xf32> to vector<48x1xf32>
    %cst_89 = arith.constant 6.400000e+01 : f32
    %164 = vector.broadcast %cst_89 : f32 to vector<48x1xf32>
    %165 = arith.divf %163, %164 : vector<48x1xf32>
    %166 = vector.broadcast %165 : vector<48x1xf32> to vector<48x64xf32>
    %167 = arith.subf %159, %166 : vector<48x64xf32>
    %168 = arith.mulf %167, %167 : vector<48x64xf32>
    %cst_90 = arith.constant dense<0.000000e+00> : vector<48xf32>
    %169 = vector.multi_reduction <add>, %168, %cst_90 [1] : vector<48x64xf32> to vector<48xf32>
    %170 = vector.shape_cast %169 : vector<48xf32> to vector<48x1xf32>
    %cst_91 = arith.constant 6.400000e+01 : f32
    %171 = vector.broadcast %cst_91 : f32 to vector<48x1xf32>
    %172 = arith.divf %170, %171 : vector<48x1xf32>
    %173 = vector.broadcast %165 : vector<48x1xf32> to vector<48x64xf32>
    %174 = arith.subf %159, %173 : vector<48x64xf32>
    %cst_92 = arith.constant 9.99999974E-6 : f32
    %175 = vector.broadcast %cst_92 : f32 to vector<48x1xf32>
    %176 = arith.addf %172, %175 : vector<48x1xf32>
    %177 = math.rsqrt %176 : vector<48x1xf32>
    %178 = vector.broadcast %177 : vector<48x1xf32> to vector<48x64xf32>
    %179 = arith.mulf %174, %178 : vector<48x64xf32>
    %180 = vector.broadcast %160 : vector<1x64xf32> to vector<48x64xf32>
    %181 = arith.mulf %179, %180 : vector<48x64xf32>
    %182 = vector.broadcast %161 : vector<1x64xf32> to vector<48x64xf32>
    %183 = arith.addf %181, %182 : vector<48x64xf32>
    %184 = vector.broadcast %10 : vector<48x1xf32> to vector<48x64xf32>
    %185 = arith.mulf %183, %184 : vector<48x64xf32>
    %c0_93 = arith.constant 0 : index
    %c0_94 = arith.constant 0 : index
    %186 = vector.load %arg31[%c0_93, %c0_94] : memref<64x64xf32, #tpu.memory_space<vmem>>, vector<64x64xf32>
    %cst_95 = arith.constant dense<0.000000e+00> : vector<48x64xf32>
    %187 = tpu.matmul %185, %186, %cst_95 {dimension_numbers = #tpu.dot_dimension_numbers<[1], [0], [0], [1], [0, 0, 1, 1], [], []>} : vector<48x64xf32>, vector<64x64xf32>, vector<48x64xf32> -> vector<48x64xf32>
    %c0_96 = arith.constant 0 : index
    %c0_97 = arith.constant 0 : index
    %188 = vector.load %arg32[%c0_96, %c0_97] : memref<1x64xf32, #tpu.memory_space<vmem>>, vector<1x64xf32>
    %189 = vector.broadcast %188 : vector<1x64xf32> to vector<48x64xf32>
    %190 = arith.addf %187, %189 : vector<48x64xf32>
    %cst_98 = arith.constant 0.000000e+00 : f32
    %191 = vector.broadcast %cst_98 : f32 to vector<48x64xf32>
    %192 = arith.maximumf %190, %191 : vector<48x64xf32>
    %c0_99 = arith.constant 0 : index
    %c0_100 = arith.constant 0 : index
    %193 = vector.load %arg33[%c0_99, %c0_100] : memref<1x64xf32, #tpu.memory_space<vmem>>, vector<1x64xf32>
    %c0_101 = arith.constant 0 : index
    %c0_102 = arith.constant 0 : index
    %194 = vector.load %arg34[%c0_101, %c0_102] : memref<1x64xf32, #tpu.memory_space<vmem>>, vector<1x64xf32>
    %cst_103 = arith.constant dense<0.000000e+00> : vector<48xf32>
    %195 = vector.multi_reduction <add>, %192, %cst_103 [1] : vector<48x64xf32> to vector<48xf32>
    %196 = vector.shape_cast %195 : vector<48xf32> to vector<48x1xf32>
    %cst_104 = arith.constant 6.400000e+01 : f32
    %197 = vector.broadcast %cst_104 : f32 to vector<48x1xf32>
    %198 = arith.divf %196, %197 : vector<48x1xf32>
    %199 = vector.broadcast %198 : vector<48x1xf32> to vector<48x64xf32>
    %200 = arith.subf %192, %199 : vector<48x64xf32>
    %201 = arith.mulf %200, %200 : vector<48x64xf32>
    %cst_105 = arith.constant dense<0.000000e+00> : vector<48xf32>
    %202 = vector.multi_reduction <add>, %201, %cst_105 [1] : vector<48x64xf32> to vector<48xf32>
    %203 = vector.shape_cast %202 : vector<48xf32> to vector<48x1xf32>
    %cst_106 = arith.constant 6.400000e+01 : f32
    %204 = vector.broadcast %cst_106 : f32 to vector<48x1xf32>
    %205 = arith.divf %203, %204 : vector<48x1xf32>
    %206 = vector.broadcast %198 : vector<48x1xf32> to vector<48x64xf32>
    %207 = arith.subf %192, %206 : vector<48x64xf32>
    %cst_107 = arith.constant 9.99999974E-6 : f32
    %208 = vector.broadcast %cst_107 : f32 to vector<48x1xf32>
    %209 = arith.addf %205, %208 : vector<48x1xf32>
    %210 = math.rsqrt %209 : vector<48x1xf32>
    %211 = vector.broadcast %210 : vector<48x1xf32> to vector<48x64xf32>
    %212 = arith.mulf %207, %211 : vector<48x64xf32>
    %213 = vector.broadcast %193 : vector<1x64xf32> to vector<48x64xf32>
    %214 = arith.mulf %212, %213 : vector<48x64xf32>
    %215 = vector.broadcast %194 : vector<1x64xf32> to vector<48x64xf32>
    %216 = arith.addf %214, %215 : vector<48x64xf32>
    %c0_108 = arith.constant 0 : index
    %c0_109 = arith.constant 0 : index
    %217 = vector.load %arg35[%c0_108, %c0_109] : memref<32x64xf32, #tpu.memory_space<vmem>>, vector<32x64xf32>
    %cst_110 = arith.constant dense<0.000000e+00> : vector<1x64xf32>
    %218 = tpu.matmul %17, %217, %cst_110 {dimension_numbers = #tpu.dot_dimension_numbers<[1], [0], [0], [1], [0, 0, 1, 1], [], []>} : vector<1x32xf32>, vector<32x64xf32>, vector<1x64xf32> -> vector<1x64xf32>
    %219 = vector.broadcast %218 : vector<1x64xf32> to vector<48x64xf32>
    %220 = arith.addf %139, %219 : vector<48x64xf32>
    %221 = vector.broadcast %10 : vector<48x1xf32> to vector<48x64xf32>
    %222 = arith.mulf %220, %221 : vector<48x64xf32>
    %c0_111 = arith.constant 0 : index
    %c0_112 = arith.constant 0 : index
    %223 = vector.load %arg36[%c0_111, %c0_112] : memref<64x64xf32, #tpu.memory_space<vmem>>, vector<64x64xf32>
    %cst_113 = arith.constant dense<0.000000e+00> : vector<48x64xf32>
    %224 = tpu.matmul %222, %223, %cst_113 {dimension_numbers = #tpu.dot_dimension_numbers<[1], [0], [0], [1], [0, 0, 1, 1], [], []>} : vector<48x64xf32>, vector<64x64xf32>, vector<48x64xf32> -> vector<48x64xf32>
    %c0_114 = arith.constant 0 : index
    %c0_115 = arith.constant 0 : index
    %225 = vector.load %arg37[%c0_114, %c0_115] : memref<1x64xf32, #tpu.memory_space<vmem>>, vector<1x64xf32>
    %226 = vector.broadcast %225 : vector<1x64xf32> to vector<48x64xf32>
    %227 = arith.addf %224, %226 : vector<48x64xf32>
    %cst_116 = arith.constant 0.000000e+00 : f32
    %228 = vector.broadcast %cst_116 : f32 to vector<48x64xf32>
    %229 = arith.maximumf %227, %228 : vector<48x64xf32>
    %230 = vector.broadcast %10 : vector<48x1xf32> to vector<48x64xf32>
    %231 = arith.mulf %229, %230 : vector<48x64xf32>
    %c0_117 = arith.constant 0 : index
    %c0_118 = arith.constant 0 : index
    %232 = vector.load %arg38[%c0_117, %c0_118] : memref<64x64xf32, #tpu.memory_space<vmem>>, vector<64x64xf32>
    %cst_119 = arith.constant dense<0.000000e+00> : vector<48x64xf32>
    %233 = tpu.matmul %231, %232, %cst_119 {dimension_numbers = #tpu.dot_dimension_numbers<[1], [0], [0], [1], [0, 0, 1, 1], [], []>} : vector<48x64xf32>, vector<64x64xf32>, vector<48x64xf32> -> vector<48x64xf32>
    %c0_120 = arith.constant 0 : index
    %c0_121 = arith.constant 0 : index
    %234 = vector.load %arg39[%c0_120, %c0_121] : memref<1x64xf32, #tpu.memory_space<vmem>>, vector<1x64xf32>
    %235 = vector.broadcast %234 : vector<1x64xf32> to vector<48x64xf32>
    %236 = arith.addf %233, %235 : vector<48x64xf32>
    %cst_122 = arith.constant 0.000000e+00 : f32
    %237 = vector.broadcast %cst_122 : f32 to vector<48x64xf32>
    %238 = arith.maximumf %236, %237 : vector<48x64xf32>
    %239 = tpu.concatenate %216, %238 in 1 : vector<48x64xf32>, vector<48x64xf32> -> vector<48x128xf32>
    %240 = vector.broadcast %10 : vector<48x1xf32> to vector<48x128xf32>
    %241 = arith.mulf %239, %240 : vector<48x128xf32>
    %c0_123 = arith.constant 0 : index
    %c0_124 = arith.constant 0 : index
    %242 = vector.load %arg40[%c0_123, %c0_124] : memref<2x128xf32, #tpu.memory_space<vmem>>, vector<2x128xf32>
    %cst_125 = arith.constant dense<0.000000e+00> : vector<2x48xf32>
    %243 = tpu.matmul %242, %241, %cst_125 {dimension_numbers = #tpu.dot_dimension_numbers<[1], [1], [0], [0], [0, 0, 1, 0], [], []>} : vector<2x128xf32>, vector<48x128xf32>, vector<2x48xf32> -> vector<2x48xf32>
    %c0_126 = arith.constant 0 : index
    %c0_127 = arith.constant 0 : index
    %244 = vector.load %arg41[%c0_126, %c0_127] : memref<2x1xf32, #tpu.memory_space<vmem>>, vector<2x1xf32>
    %245 = vector.broadcast %244 : vector<2x1xf32> to vector<2x48xf32>
    %246 = arith.addf %243, %245 : vector<2x48xf32>
    %247 = vector.extract_strided_slice %246 {offsets = [0, 0], sizes = [1, 48], strides = [1, 1]} : vector<2x48xf32> to vector<1x48xf32>
    %248 = arith.mulf %247, %16 : vector<1x48xf32>
    %c0_128 = arith.constant 0 : index
    %c0_129 = arith.constant 0 : index
    %249 = vector.load %arg6[%c0_128, %c0_129] : memref<1x48xf32, #tpu.memory_space<vmem>>, vector<1x48xf32>
    %250 = vector.broadcast %1 : f32 to vector<1x48xf32>
    %251 = arith.mulf %249, %250 : vector<1x48xf32>
    %252 = vector.extract_strided_slice %246 {offsets = [1, 0], sizes = [1, 48], strides = [1, 1]} : vector<2x48xf32> to vector<1x48xf32>
    %253 = arith.addf %251, %252 : vector<1x48xf32>
    %254 = arith.mulf %253, %16 : vector<1x48xf32>
    %255 = vector.broadcast %3 : f32 to vector<1x48xf32>
    %256 = arith.mulf %254, %255 : vector<1x48xf32>
    %cst_130 = arith.constant 1.000000e+00 : f32
    %257 = arith.subf %cst_130, %3 : f32
    %258 = vector.broadcast %257 : f32 to vector<1x48xf32>
    %259 = arith.mulf %248, %258 : vector<1x48xf32>
    %260 = arith.addf %256, %259 : vector<1x48xf32>
    %261 = math.exp %260 : vector<1x48xf32>
    %262 = arith.mulf %261, %16 : vector<1x48xf32>
    %263 = vector.broadcast %2 : f32 to vector<1x48xf32>
    %264 = arith.mulf %262, %263 : vector<1x48xf32>
    %265 = math.ceil %264 : vector<1x48xf32>
    %266 = tpu.iota {dimensions = array<i32: 0>} : vector<48x48xi32>
    %267 = tpu.iota {dimensions = array<i32: 1>} : vector<48x48xi32>
    %268 = arith.cmpi sle, %266, %267 : vector<48x48xi32>
    %cst_131 = arith.constant 1.000000e+00 : f32
    %cst_132 = arith.constant 0.000000e+00 : f32
    %269 = vector.broadcast %cst_131 : f32 to vector<48x48xf32>
    %270 = vector.broadcast %cst_132 : f32 to vector<48x48xf32>
    %271 = arith.select %268, %269, %270 : vector<48x48xi1>, vector<48x48xf32>
    %cst_133 = arith.constant dense<0.000000e+00> : vector<1x48xf32>
    %272 = tpu.matmul %265, %271, %cst_133 {dimension_numbers = #tpu.dot_dimension_numbers<[1], [0], [0], [1], [0, 0, 1, 1], [], []>} : vector<1x48xf32>, vector<48x48xf32>, vector<1x48xf32> -> vector<1x48xf32>
    %cst_134 = arith.constant 2.560000e+02 : f32
    %273 = vector.broadcast %cst_134 : f32 to vector<1x48xf32>
    %274 = arith.minimumf %272, %273 : vector<1x48xf32>
    %275 = arith.cmpi slt, %266, %267 : vector<48x48xi32>
    %cst_135 = arith.constant 1.000000e+00 : f32
    %cst_136 = arith.constant 0.000000e+00 : f32
    %276 = vector.broadcast %cst_135 : f32 to vector<48x48xf32>
    %277 = vector.broadcast %cst_136 : f32 to vector<48x48xf32>
    %278 = arith.select %275, %276, %277 : vector<48x48xi1>, vector<48x48xf32>
    %cst_137 = arith.constant dense<0.000000e+00> : vector<1x48xf32>
    %279 = tpu.matmul %265, %278, %cst_137 {dimension_numbers = #tpu.dot_dimension_numbers<[1], [0], [0], [1], [0, 0, 1, 1], [], []>} : vector<1x48xf32>, vector<48x48xf32>, vector<1x48xf32> -> vector<1x48xf32>
    %cst_138 = arith.constant 2.560000e+02 : f32
    %280 = vector.broadcast %cst_138 : f32 to vector<1x48xf32>
    %281 = arith.minimumf %279, %280 : vector<1x48xf32>
    %cst_139 = arith.constant dense<0xFF800000> : vector<1xf32>
    %282 = vector.multi_reduction <maximumf>, %274, %cst_139 [1] : vector<1x48xf32> to vector<1xf32>
    %283 = vector.shape_cast %282 : vector<1xf32> to vector<1x1xf32>
    %cst_140 = arith.constant 1.000000e+00 : f32
    %284 = vector.broadcast %cst_140 : f32 to vector<1x1xf32>
    %285 = arith.maximumf %283, %284 : vector<1x1xf32>
    %286 = tpu.iota {dimensions = array<i32: 0>} : vector<256x1xi32>
    %287 = arith.sitofp %286 : vector<256x1xi32> to vector<256x1xf32>
    %288 = vector.broadcast %285 : vector<1x1xf32> to vector<256x1xf32>
    %289 = arith.cmpf olt, %287, %288 : vector<256x1xf32>
    %cst_141 = arith.constant 1.000000e+00 : f32
    %cst_142 = arith.constant 0.000000e+00 : f32
    %290 = vector.broadcast %cst_141 : f32 to vector<256x1xf32>
    %291 = vector.broadcast %cst_142 : f32 to vector<256x1xf32>
    %292 = arith.select %289, %290, %291 : vector<256x1xi1>, vector<256x1xf32>
    %293 = vector.broadcast %287 : vector<256x1xf32> to vector<256x48xf32>
    %294 = vector.broadcast %274 : vector<1x48xf32> to vector<256x48xf32>
    %295 = arith.cmpf olt, %293, %294 : vector<256x48xf32>
    %cst_143 = arith.constant 1.000000e+00 : f32
    %cst_144 = arith.constant 0.000000e+00 : f32
    %296 = vector.broadcast %cst_143 : f32 to vector<256x48xf32>
    %297 = vector.broadcast %cst_144 : f32 to vector<256x48xf32>
    %298 = arith.select %295, %296, %297 : vector<256x48xi1>, vector<256x48xf32>
    %299 = vector.broadcast %287 : vector<256x1xf32> to vector<256x48xf32>
    %300 = vector.broadcast %281 : vector<1x48xf32> to vector<256x48xf32>
    %301 = arith.cmpf olt, %299, %300 : vector<256x48xf32>
    %cst_145 = arith.constant 1.000000e+00 : f32
    %cst_146 = arith.constant 0.000000e+00 : f32
    %302 = vector.broadcast %cst_145 : f32 to vector<256x48xf32>
    %303 = vector.broadcast %cst_146 : f32 to vector<256x48xf32>
    %304 = arith.select %301, %302, %303 : vector<256x48xi1>, vector<256x48xf32>
    %305 = arith.subf %298, %304 : vector<256x48xf32>
    %306 = vector.broadcast %292 : vector<256x1xf32> to vector<256x48xf32>
    %307 = arith.mulf %305, %306 : vector<256x48xf32>
    %308 = vector.broadcast %16 : vector<1x48xf32> to vector<256x48xf32>
    %309 = arith.mulf %307, %308 : vector<256x48xf32>
    %cst_147 = arith.constant dense<0.000000e+00> : vector<256x128xf32>
    %310 = tpu.matmul %309, %146, %cst_147 {dimension_numbers = #tpu.dot_dimension_numbers<[1], [0], [0], [1], [0, 0, 1, 1], [], []>} : vector<256x48xf32>, vector<48x128xf32>, vector<256x128xf32> -> vector<256x128xf32>
    %311 = vector.extract_strided_slice %310 {offsets = [0, 0], sizes = [256, 64], strides = [1, 1]} : vector<256x128xf32> to vector<256x64xf32>
    %312 = vector.extract_strided_slice %310 {offsets = [0, 64], sizes = [256, 64], strides = [1, 1]} : vector<256x128xf32> to vector<256x64xf32>
    %c0_148 = arith.constant 0 : index
    %c0_149 = arith.constant 0 : index
    %313 = vector.load %arg7[%c0_148, %c0_149] : memref<256x64xf32, #tpu.memory_space<vmem>>, vector<256x64xf32>
    %314 = math.exp %312 : vector<256x64xf32>
    %315 = arith.mulf %313, %314 : vector<256x64xf32>
    %316 = vector.broadcast %0 : f32 to vector<256x64xf32>
    %317 = arith.mulf %315, %316 : vector<256x64xf32>
    %318 = arith.addf %311, %317 : vector<256x64xf32>
    %319 = vector.broadcast %292 : vector<256x1xf32> to vector<256x64xf32>
    %320 = arith.mulf %318, %319 : vector<256x64xf32>
    %c0_150 = arith.constant 0 : index
    %c0_151 = arith.constant 0 : index
    %321 = vector.load %arg42[%c0_150, %c0_151] : memref<64x64xf32, #tpu.memory_space<vmem>>, vector<64x64xf32>
    %cst_152 = arith.constant dense<0.000000e+00> : vector<256x64xf32>
    %322 = tpu.matmul %320, %321, %cst_152 {dimension_numbers = #tpu.dot_dimension_numbers<[1], [0], [0], [1], [0, 0, 1, 1], [], []>} : vector<256x64xf32>, vector<64x64xf32>, vector<256x64xf32> -> vector<256x64xf32>
    %c0_153 = arith.constant 0 : index
    %c0_154 = arith.constant 0 : index
    %323 = vector.load %arg48[%c0_153, %c0_154] : memref<32x64xf32, #tpu.memory_space<vmem>>, vector<32x64xf32>
    %c0_155 = arith.constant 0 : index
    %c0_156 = arith.constant 0 : index
    %324 = vector.load %arg49[%c0_155, %c0_156] : memref<1x64xf32, #tpu.memory_space<vmem>>, vector<1x64xf32>
    %c0_157 = arith.constant 0 : index
    %c0_158 = arith.constant 0 : index
    %325 = vector.load %arg50[%c0_157, %c0_158] : memref<32x64xf32, #tpu.memory_space<vmem>>, vector<32x64xf32>
    %c0_159 = arith.constant 0 : index
    %c0_160 = arith.constant 0 : index
    %326 = vector.load %arg51[%c0_159, %c0_160] : memref<64x32xf32, #tpu.memory_space<vmem>>, vector<64x32xf32>
    %c0_161 = arith.constant 0 : index
    %c0_162 = arith.constant 0 : index
    %327 = vector.load %arg52[%c0_161, %c0_162] : memref<1x32xf32, #tpu.memory_space<vmem>>, vector<1x32xf32>
    %328 = vector.extract_strided_slice %322 {offsets = [0, 0], sizes = [256, 32], strides = [1, 1]} : vector<256x64xf32> to vector<256x32xf32>
    %329 = vector.extract_strided_slice %322 {offsets = [0, 32], sizes = [256, 32], strides = [1, 1]} : vector<256x64xf32> to vector<256x32xf32>
    %330 = vector.broadcast %292 : vector<256x1xf32> to vector<256x32xf32>
    %331 = arith.mulf %328, %330 : vector<256x32xf32>
    %cst_163 = arith.constant dense<0.000000e+00> : vector<256x64xf32>
    %332 = tpu.matmul %331, %323, %cst_163 {dimension_numbers = #tpu.dot_dimension_numbers<[1], [0], [0], [1], [0, 0, 1, 1], [], []>} : vector<256x32xf32>, vector<32x64xf32>, vector<256x64xf32> -> vector<256x64xf32>
    %333 = vector.broadcast %324 : vector<1x64xf32> to vector<256x64xf32>
    %334 = arith.addf %332, %333 : vector<256x64xf32>
    %cst_164 = arith.constant dense<0.000000e+00> : vector<1x64xf32>
    %335 = tpu.matmul %17, %325, %cst_164 {dimension_numbers = #tpu.dot_dimension_numbers<[1], [0], [0], [1], [0, 0, 1, 1], [], []>} : vector<1x32xf32>, vector<32x64xf32>, vector<1x64xf32> -> vector<1x64xf32>
    %336 = vector.broadcast %335 : vector<1x64xf32> to vector<256x64xf32>
    %337 = arith.addf %334, %336 : vector<256x64xf32>
    %cst_165 = arith.constant 0.000000e+00 : f32
    %338 = vector.broadcast %cst_165 : f32 to vector<256x64xf32>
    %339 = arith.maximumf %337, %338 : vector<256x64xf32>
    %340 = vector.broadcast %292 : vector<256x1xf32> to vector<256x64xf32>
    %341 = arith.mulf %339, %340 : vector<256x64xf32>
    %cst_166 = arith.constant dense<0.000000e+00> : vector<256x32xf32>
    %342 = tpu.matmul %341, %326, %cst_166 {dimension_numbers = #tpu.dot_dimension_numbers<[1], [0], [0], [1], [0, 0, 1, 1], [], []>} : vector<256x64xf32>, vector<64x32xf32>, vector<256x32xf32> -> vector<256x32xf32>
    %343 = vector.broadcast %327 : vector<1x32xf32> to vector<256x32xf32>
    %344 = arith.addf %342, %343 : vector<256x32xf32>
    %345 = arith.subf %329, %344 : vector<256x32xf32>
    %346 = vector.broadcast %292 : vector<256x1xf32> to vector<256x32xf32>
    %347 = arith.mulf %345, %346 : vector<256x32xf32>
    %348 = tpu.concatenate %328, %347 in 1 : vector<256x32xf32>, vector<256x32xf32> -> vector<256x64xf32>
    %cst_167 = arith.constant dense<0.000000e+00> : vector<256x64xf32>
    %349 = tpu.matmul %348, %321, %cst_167 {dimension_numbers = #tpu.dot_dimension_numbers<[1], [0], [0], [1], [0, 0, 1, 1], [], []>} : vector<256x64xf32>, vector<64x64xf32>, vector<256x64xf32> -> vector<256x64xf32>
    %c0_168 = arith.constant 0 : index
    %c0_169 = arith.constant 0 : index
    %350 = vector.load %arg43[%c0_168, %c0_169] : memref<32x64xf32, #tpu.memory_space<vmem>>, vector<32x64xf32>
    %c0_170 = arith.constant 0 : index
    %c0_171 = arith.constant 0 : index
    %351 = vector.load %arg44[%c0_170, %c0_171] : memref<1x64xf32, #tpu.memory_space<vmem>>, vector<1x64xf32>
    %c0_172 = arith.constant 0 : index
    %c0_173 = arith.constant 0 : index
    %352 = vector.load %arg45[%c0_172, %c0_173] : memref<32x64xf32, #tpu.memory_space<vmem>>, vector<32x64xf32>
    %c0_174 = arith.constant 0 : index
    %c0_175 = arith.constant 0 : index
    %353 = vector.load %arg46[%c0_174, %c0_175] : memref<64x32xf32, #tpu.memory_space<vmem>>, vector<64x32xf32>
    %c0_176 = arith.constant 0 : index
    %c0_177 = arith.constant 0 : index
    %354 = vector.load %arg47[%c0_176, %c0_177] : memref<1x32xf32, #tpu.memory_space<vmem>>, vector<1x32xf32>
    %355 = vector.extract_strided_slice %349 {offsets = [0, 0], sizes = [256, 32], strides = [1, 1]} : vector<256x64xf32> to vector<256x32xf32>
    %356 = vector.extract_strided_slice %349 {offsets = [0, 32], sizes = [256, 32], strides = [1, 1]} : vector<256x64xf32> to vector<256x32xf32>
    %357 = vector.broadcast %292 : vector<256x1xf32> to vector<256x32xf32>
    %358 = arith.mulf %355, %357 : vector<256x32xf32>
    %cst_178 = arith.constant dense<0.000000e+00> : vector<256x64xf32>
    %359 = tpu.matmul %358, %350, %cst_178 {dimension_numbers = #tpu.dot_dimension_numbers<[1], [0], [0], [1], [0, 0, 1, 1], [], []>} : vector<256x32xf32>, vector<32x64xf32>, vector<256x64xf32> -> vector<256x64xf32>
    %360 = vector.broadcast %351 : vector<1x64xf32> to vector<256x64xf32>
    %361 = arith.addf %359, %360 : vector<256x64xf32>
    %cst_179 = arith.constant dense<0.000000e+00> : vector<1x64xf32>
    %362 = tpu.matmul %17, %352, %cst_179 {dimension_numbers = #tpu.dot_dimension_numbers<[1], [0], [0], [1], [0, 0, 1, 1], [], []>} : vector<1x32xf32>, vector<32x64xf32>, vector<1x64xf32> -> vector<1x64xf32>
    %363 = vector.broadcast %362 : vector<1x64xf32> to vector<256x64xf32>
    %364 = arith.addf %361, %363 : vector<256x64xf32>
    %cst_180 = arith.constant 0.000000e+00 : f32
    %365 = vector.broadcast %cst_180 : f32 to vector<256x64xf32>
    %366 = arith.maximumf %364, %365 : vector<256x64xf32>
    %367 = vector.broadcast %292 : vector<256x1xf32> to vector<256x64xf32>
    %368 = arith.mulf %366, %367 : vector<256x64xf32>
    %cst_181 = arith.constant dense<0.000000e+00> : vector<256x32xf32>
    %369 = tpu.matmul %368, %353, %cst_181 {dimension_numbers = #tpu.dot_dimension_numbers<[1], [0], [0], [1], [0, 0, 1, 1], [], []>} : vector<256x64xf32>, vector<64x32xf32>, vector<256x32xf32> -> vector<256x32xf32>
    %370 = vector.broadcast %354 : vector<1x32xf32> to vector<256x32xf32>
    %371 = arith.addf %369, %370 : vector<256x32xf32>
    %372 = arith.subf %356, %371 : vector<256x32xf32>
    %373 = vector.broadcast %292 : vector<256x1xf32> to vector<256x32xf32>
    %374 = arith.mulf %372, %373 : vector<256x32xf32>
    %375 = tpu.concatenate %355, %374 in 1 : vector<256x32xf32>, vector<256x32xf32> -> vector<256x64xf32>
    %376 = vector.broadcast %292 : vector<256x1xf32> to vector<256x64xf32>
    %377 = arith.mulf %375, %376 : vector<256x64xf32>
    %c0_182 = arith.constant 0 : index
    %c0_183 = arith.constant 0 : index
    %378 = vector.load %arg53[%c0_182, %c0_183] : memref<64x64xf32, #tpu.memory_space<vmem>>, vector<64x64xf32>
    %cst_184 = arith.constant dense<0.000000e+00> : vector<256x64xf32>
    %379 = tpu.matmul %377, %378, %cst_184 {dimension_numbers = #tpu.dot_dimension_numbers<[1], [0], [0], [1], [0, 0, 1, 1], [], []>} : vector<256x64xf32>, vector<64x64xf32>, vector<256x64xf32> -> vector<256x64xf32>
    %c0_185 = arith.constant 0 : index
    %c0_186 = arith.constant 0 : index
    %380 = vector.load %arg54[%c0_185, %c0_186] : memref<1x64xf32, #tpu.memory_space<vmem>>, vector<1x64xf32>
    %381 = vector.broadcast %380 : vector<1x64xf32> to vector<256x64xf32>
    %382 = arith.addf %379, %381 : vector<256x64xf32>
    %c0_187 = arith.constant 0 : index
    %c0_188 = arith.constant 0 : index
    %383 = vector.load %arg55[%c0_187, %c0_188] : memref<32x64xf32, #tpu.memory_space<vmem>>, vector<32x64xf32>
    %cst_189 = arith.constant dense<0.000000e+00> : vector<1x64xf32>
    %384 = tpu.matmul %17, %383, %cst_189 {dimension_numbers = #tpu.dot_dimension_numbers<[1], [0], [0], [1], [0, 0, 1, 1], [], []>} : vector<1x32xf32>, vector<32x64xf32>, vector<1x64xf32> -> vector<1x64xf32>
    %385 = vector.broadcast %384 : vector<1x64xf32> to vector<256x64xf32>
    %386 = arith.addf %382, %385 : vector<256x64xf32>
    %cst_190 = arith.constant 1.000000e-01 : f32
    %cst_191 = arith.constant 0.000000e+00 : f32
    %387 = vector.broadcast %cst_191 : f32 to vector<256x64xf32>
    %388 = arith.cmpf oge, %386, %387 : vector<256x64xf32>
    %389 = vector.broadcast %cst_190 : f32 to vector<256x64xf32>
    %390 = arith.mulf %389, %386 : vector<256x64xf32>
    %391 = arith.select %388, %386, %390 : vector<256x64xi1>, vector<256x64xf32>
    %c0_192 = arith.constant 0 : index
    %c0_193 = arith.constant 0 : index
    %392 = vector.load %arg56[%c0_192, %c0_193] : memref<64x32xf32, #tpu.memory_space<vmem>>, vector<64x32xf32>
    %cst_194 = arith.constant dense<0.000000e+00> : vector<256x32xf32>
    %393 = tpu.matmul %391, %392, %cst_194 {dimension_numbers = #tpu.dot_dimension_numbers<[1], [0], [0], [1], [0, 0, 1, 1], [], []>} : vector<256x64xf32>, vector<64x32xf32>, vector<256x32xf32> -> vector<256x32xf32>
    %c0_195 = arith.constant 0 : index
    %c0_196 = arith.constant 0 : index
    %394 = vector.load %arg57[%c0_195, %c0_196] : memref<1x32xf32, #tpu.memory_space<vmem>>, vector<1x32xf32>
    %395 = vector.broadcast %394 : vector<1x32xf32> to vector<256x32xf32>
    %396 = arith.addf %393, %395 : vector<256x32xf32>
    %cst_197 = arith.constant 1.000000e-01 : f32
    %cst_198 = arith.constant 0.000000e+00 : f32
    %397 = vector.broadcast %cst_198 : f32 to vector<256x32xf32>
    %398 = arith.cmpf oge, %396, %397 : vector<256x32xf32>
    %399 = vector.broadcast %cst_197 : f32 to vector<256x32xf32>
    %400 = arith.mulf %399, %396 : vector<256x32xf32>
    %401 = arith.select %398, %396, %400 : vector<256x32xi1>, vector<256x32xf32>
    %c0_199 = arith.constant 0 : index
    %c0_200 = arith.constant 0 : index
    %402 = vector.load %arg58[%c0_199, %c0_200] : memref<32x32xf32, #tpu.memory_space<vmem>>, vector<32x32xf32>
    %cst_201 = arith.constant dense<0.000000e+00> : vector<256x32xf32>
    %403 = tpu.matmul %401, %402, %cst_201 {dimension_numbers = #tpu.dot_dimension_numbers<[1], [0], [0], [1], [0, 0, 1, 1], [], []>} : vector<256x32xf32>, vector<32x32xf32>, vector<256x32xf32> -> vector<256x32xf32>
    %404 = arith.addf %396, %403 : vector<256x32xf32>
    %c0_202 = arith.constant 0 : index
    %c0_203 = arith.constant 0 : index
    %405 = vector.load %arg59[%c0_202, %c0_203] : memref<1x32xf32, #tpu.memory_space<vmem>>, vector<1x32xf32>
    %406 = vector.broadcast %405 : vector<1x32xf32> to vector<256x32xf32>
    %407 = arith.addf %404, %406 : vector<256x32xf32>
    %cst_204 = arith.constant 1.000000e-01 : f32
    %cst_205 = arith.constant 0.000000e+00 : f32
    %408 = vector.broadcast %cst_205 : f32 to vector<256x32xf32>
    %409 = arith.cmpf oge, %407, %408 : vector<256x32xf32>
    %410 = vector.broadcast %cst_204 : f32 to vector<256x32xf32>
    %411 = arith.mulf %410, %407 : vector<256x32xf32>
    %412 = arith.select %409, %407, %411 : vector<256x32xi1>, vector<256x32xf32>
    %c0_206 = arith.constant 0 : index
    %c0_207 = arith.constant 0 : index
    %413 = vector.load %arg60[%c0_206, %c0_207] : memref<32x16xf32, #tpu.memory_space<vmem>>, vector<32x16xf32>
    %cst_208 = arith.constant dense<0.000000e+00> : vector<256x16xf32>
    %414 = tpu.matmul %412, %413, %cst_208 {dimension_numbers = #tpu.dot_dimension_numbers<[1], [0], [0], [1], [0, 0, 1, 1], [], []>} : vector<256x32xf32>, vector<32x16xf32>, vector<256x16xf32> -> vector<256x16xf32>
    %c0_209 = arith.constant 0 : index
    %c0_210 = arith.constant 0 : index
    %415 = vector.load %arg61[%c0_209, %c0_210] : memref<1x16xf32, #tpu.memory_space<vmem>>, vector<1x16xf32>
    %416 = vector.broadcast %415 : vector<1x16xf32> to vector<256x16xf32>
    %417 = arith.addf %414, %416 : vector<256x16xf32>
    %cst_211 = arith.constant 1.000000e-01 : f32
    %cst_212 = arith.constant 0.000000e+00 : f32
    %418 = vector.broadcast %cst_212 : f32 to vector<256x16xf32>
    %419 = arith.cmpf oge, %417, %418 : vector<256x16xf32>
    %420 = vector.broadcast %cst_211 : f32 to vector<256x16xf32>
    %421 = arith.mulf %420, %417 : vector<256x16xf32>
    %422 = arith.select %419, %417, %421 : vector<256x16xi1>, vector<256x16xf32>
    %c0_213 = arith.constant 0 : index
    %c0_214 = arith.constant 0 : index
    %423 = vector.load %arg62[%c0_213, %c0_214] : memref<16x16xf32, #tpu.memory_space<vmem>>, vector<16x16xf32>
    %cst_215 = arith.constant dense<0.000000e+00> : vector<256x16xf32>
    %424 = tpu.matmul %422, %423, %cst_215 {dimension_numbers = #tpu.dot_dimension_numbers<[1], [0], [0], [1], [0, 0, 1, 1], [], []>} : vector<256x16xf32>, vector<16x16xf32>, vector<256x16xf32> -> vector<256x16xf32>
    %425 = arith.addf %417, %424 : vector<256x16xf32>
    %c0_216 = arith.constant 0 : index
    %c0_217 = arith.constant 0 : index
    %426 = vector.load %arg63[%c0_216, %c0_217] : memref<1x16xf32, #tpu.memory_space<vmem>>, vector<1x16xf32>
    %427 = vector.broadcast %426 : vector<1x16xf32> to vector<256x16xf32>
    %428 = arith.addf %425, %427 : vector<256x16xf32>
    %cst_218 = arith.constant 1.000000e-01 : f32
    %cst_219 = arith.constant 0.000000e+00 : f32
    %429 = vector.broadcast %cst_219 : f32 to vector<256x16xf32>
    %430 = arith.cmpf oge, %428, %429 : vector<256x16xf32>
    %431 = vector.broadcast %cst_218 : f32 to vector<256x16xf32>
    %432 = arith.mulf %431, %428 : vector<256x16xf32>
    %433 = arith.select %430, %428, %432 : vector<256x16xi1>, vector<256x16xf32>
    %c0_220 = arith.constant 0 : index
    %c0_221 = arith.constant 0 : index
    %434 = vector.load %arg64[%c0_220, %c0_221] : memref<1x16xf32, #tpu.memory_space<vmem>>, vector<1x16xf32>
    %cst_222 = arith.constant dense<0.000000e+00> : vector<1x256xf32>
    %435 = tpu.matmul %434, %433, %cst_222 {dimension_numbers = #tpu.dot_dimension_numbers<[1], [1], [0], [0], [0, 0, 1, 0], [], []>} : vector<1x16xf32>, vector<256x16xf32>, vector<1x256xf32> -> vector<1x256xf32>
    %c0_223 = arith.constant 0 : index
    %c0_224 = arith.constant 0 : index
    %436 = vector.load %arg65[%c0_223, %c0_224] : memref<1x1xf32, #tpu.memory_space<vmem>>, vector<1x1xf32>
    %437 = vector.broadcast %436 : vector<1x1xf32> to vector<1x256xf32>
    %438 = arith.addf %435, %437 : vector<1x256xf32>
    %439 = math.tanh %438 : vector<1x256xf32>
    %c0_225 = arith.constant 0 : index
    %c0_226 = arith.constant 0 : index
    %440 = vector.load %arg66[%c0_225, %c0_226] : memref<1x256xf32, #tpu.memory_space<vmem>>, vector<1x256xf32>
    tpu.vector_store %arg66[%c0_225, %c0_226], %439 {strides = array<i32>} : memref<1x256xf32, #tpu.memory_space<vmem>>, vector<1x256xf32>,
    %c0_227 = arith.constant 0 : index
    %c0_228 = arith.constant 0 : index
    %441 = vector.load %arg67[%c0_227, %c0_228] : memref<256x48xf32, #tpu.memory_space<vmem>>, vector<256x48xf32>
    tpu.vector_store %arg67[%c0_227, %c0_228], %309 {strides = array<i32>} : memref<256x48xf32, #tpu.memory_space<vmem>>, vector<256x48xf32>,
    %c0_229 = arith.constant 0 : index
    %c0_230 = arith.constant 0 : index
    %442 = vector.load %arg68[%c0_229, %c0_230] : memref<256x1xf32, #tpu.memory_space<vmem>>, vector<256x1xf32>
    tpu.vector_store %arg68[%c0_229, %c0_230], %292 {strides = array<i32>} : memref<256x1xf32, #tpu.memory_space<vmem>>, vector<256x1xf32>,
    return
  }
}

</mosaic_0001>

<bundles_post_ra>
// kernel: synthesizer_infer.1
= control target key start
LH: loop header
LB: loop body
LE: loop exit
PB: predicated region body
PF: predicated region fallthrough
CT: control target
= control target key end

     0   :  { %s13838_s6 = smov 1   ;;  %s13839_s10 = smov 2   ;;  %s18884_s0 = inlined_call_operand.smem [shape: u32[69], index: -1, kind: input, shape index: {}] }
   0x1   :  { %s13936_s5 = sld [smem:[%s18884_s0]]   ;;  %s13840_s14 = smov 3  }
   0x2   :  { %s13941_s9 = sld [smem:[%s18884_s0 + %s13838_s6]]   ;;  %s13841_s18 = smov 4  }
   0x3   :  { %s13946_s13 = sld [smem:[%s18884_s0 + %s13839_s10]]   ;;  %s13842_s22 = smov 5  }
   0x4   :  { %s13951_s17 = sld [smem:[%s18884_s0 + %s13840_s14]]   ;;  %s13843_s26 = smov 6  }
   0x5   :  { %s13956_s21 = sld [smem:[%s18884_s0 + %s13841_s18]]   ;;  %s13844_s30 = smov 7  }
   0x6   :  { %s13961_s25 = sld [smem:[%s18884_s0 + %s13842_s22]]   ;;  %s13845_s4 = smov 8  }
   0x7   :  { %s13966_s29 = sld [smem:[%s18884_s0 + %s13843_s26]]   ;;  %s13846_s10 = smov 9  }
   0x8   :  { %19096 = sst [smem:[#allocation37_spill]] %s13941_s9  ;;  %s13847_s15 = smov 10  }
   0x9   :  { %19097 = sst [smem:[#allocation38_spill]] %s13946_s13  ;;  %s13848_s20 = smov 11  }
   0xa   :  { %19098 = sst [smem:[#allocation39_spill]] %s13951_s17  ;;  %s13849_s26 = smov 12  }
   0xb   :  { %19099 = sst [smem:[#allocation40_spill]] %s13956_s21  ;;  %s13850_s1 = smov 13  }
   0xc   :  { %19100 = sst [smem:[#allocation41_spill]] %s13961_s25  ;;  %s13851_s7 = smov 14  }
   0xd   :  { %19101 = sst [smem:[#allocation42_spill]] %s13966_s29  ;;  %s13853_s22 = smov 16  }
   0xe   :  { %s13971_s3 = sld [smem:[%s18884_s0 + %s13844_s30]]   ;;  %s13854_s28 = smov 17  }
   0xf   :  { %s13976_s8 = sld [smem:[%s18884_s0 + %s13845_s4]]   ;;  %s13904_s16 = smov 67  }
  0x10   :  { %s13981_s14 = sld [smem:[%s18884_s0 + %s13846_s10]]   ;;  %s13903_s10 = smov 66  }
  0x11   :  { %s13986_s19 = sld [smem:[%s18884_s0 + %s13847_s15]]   ;;  %s13852_s15 = smov 15  }
  0x12   :  { %s13991_s24 = sld [smem:[%s18884_s0 + %s13848_s20]]   ;;  %s13905_s23 = smov 68  }
  0x13   :  { %s13996_s30 = sld [smem:[%s18884_s0 + %s13849_s26]]  }
  0x14   :  { %19102 = sst [smem:[#allocation43_spill]] %s13971_s3 }
  0x15   :  { %19103 = sst [smem:[#allocation44_spill]] %s13976_s8 }
  0x16   :  { %19104 = sst [smem:[#allocation45_spill]] %s13981_s14 }
  0x17   :  { %19105 = sst [smem:[#allocation46_spill]] %s13986_s19 }
  0x18   :  { %19106 = sst [smem:[#allocation47_spill]] %s13991_s24 }
  0x19   :  { %19107 = sst [smem:[#allocation48_spill]] %s13996_s30 }
  0x1a   :  { %s14001_s6 = sld [smem:[%s18884_s0 + %s13850_s1]]  }
  0x1b   :  { %s14006_s12 = sld [smem:[%s18884_s0 + %s13851_s7]]   ;;  %s13855_s7 = smov 18  }
  0x1c   :  { %s14011_s20 = sld [smem:[%s18884_s0 + %s13852_s15]]   ;;  %s13856_s15 = smov 19  }
  0x1d   :  { %s14016_s27 = sld [smem:[%s18884_s0 + %s13853_s22]]   ;;  %s13857_s22 = smov 20  }
  0x1e   :  { %s14021_s4 = sld [smem:[%s18884_s0 + %s13854_s28]]   ;;  %s13858_s28 = smov 21  }
  0x1f   :  { %s14026_s3 = sld [smem:[%s18884_s0 + %s13855_s7]]   ;;  %s13859_s7 = smov 22  }
  0x20   :  { %19108 = sst [smem:[#allocation49_spill]] %s14001_s6 }
  0x21   :  { %19109 = sst [smem:[#allocation50_spill]] %s14006_s12 }
  0x22   :  { %19110 = sst [smem:[#allocation51_spill]] %s14011_s20 }
  0x23   :  { %19111 = sst [smem:[#allocation52_spill]] %s14016_s27 }
  0x24   :  { %19112 = sst [smem:[#allocation53_spill]] %s14021_s4 }
  0x25   :  { %19113 = sst [smem:[#allocation54_spill]] %s14026_s3 }
  0x26   :  { %s14031_s29 = sld [smem:[%s18884_s0 + %s13856_s15]]   ;;  %s13860_s15 = smov 23  }
  0x27   :  { %s14036_s25 = sld [smem:[%s18884_s0 + %s13857_s22]]   ;;  %s13861_s22 = smov 24  }
  0x28   :  { %s14041_s4 = sld [smem:[%s18884_s0 + %s13858_s28]]   ;;  %s13862_s28 = smov 25  }
  0x29   :  { %s14046_s27 = sld [smem:[%s18884_s0 + %s13859_s7]]   ;;  %s13863_s7 = smov 26  }
  0x2a   :  { %s14269_s8 = sld [smem:[%s18884_s0 + %s13904_s16]]  }
  0x2c   :  { %19114 = sst [smem:[#allocation55_spill]] %s14031_s29 }
  0x2d   :  { %19115 = sst [smem:[#allocation56_spill]] %s14036_s25 }
  0x2e   :  { %19116 = sst [smem:[#allocation57_spill]] %s14041_s4 }
  0x2f   :  { %19117 = sst [smem:[#allocation58_spill]] %s14046_s27 }
  0x30   :  { %s14051_s29 = sld [smem:[%s18884_s0 + %s13860_s15]]   ;;  %s13864_s15 = smov 27  }
  0x31   :  { %s14056_s25 = sld [smem:[%s18884_s0 + %s13861_s22]]   ;;  %s13865_s22 = smov 28  }
  0x32   :  { %s14061_s4 = sld [smem:[%s18884_s0 + %s13862_s28]]   ;;  %s13866_s28 = smov 29  }
  0x33   :  { %s14066_s27 = sld [smem:[%s18884_s0 + %s13863_s7]]   ;;  %s13867_s7 = smov 30  }
  0x36   :  { %19118 = sst [smem:[#allocation59_spill]] %s14051_s29 }
  0x37   :  { %19119 = sst [smem:[#allocation60_spill]] %s14056_s25 }
  0x38   :  { %19120 = sst [smem:[#allocation61_spill]] %s14061_s4 }
  0x39   :  { %19121 = sst [smem:[#allocation62_spill]] %s14066_s27 }
  0x3a   :  { %s14071_s29 = sld [smem:[%s18884_s0 + %s13864_s15]]   ;;  %s13868_s15 = smov 31  }
  0x3b   :  { %s14076_s25 = sld [smem:[%s18884_s0 + %s13865_s22]]   ;;  %s13869_s22 = smov 32  }
  0x3c   :  { %s14081_s4 = sld [smem:[%s18884_s0 + %s13866_s28]]   ;;  %s13870_s28 = smov 33  }
  0x3d   :  { %s14086_s27 = sld [smem:[%s18884_s0 + %s13867_s7]]   ;;  %s13871_s7 = smov 34  }
  0x40   :  { %19122 = sst [smem:[#allocation63_spill]] %s14071_s29 }
  0x41   :  { %19123 = sst [smem:[#allocation64_spill]] %s14076_s25 }
  0x42   :  { %19124 = sst [smem:[#allocation65_spill]] %s14081_s4 }
  0x43   :  { %19125 = sst [smem:[#allocation66_spill]] %s14086_s27 }
  0x44   :  { %s14091_s29 = sld [smem:[%s18884_s0 + %s13868_s15]]   ;;  %s13872_s15 = smov 35  }
  0x45   :  { %s14096_s25 = sld [smem:[%s18884_s0 + %s13869_s22]]   ;;  %s13873_s22 = smov 36  }
  0x46   :  { %s14101_s4 = sld [smem:[%s18884_s0 + %s13870_s28]]   ;;  %s13874_s28 = smov 37  }
  0x47   :  { %s14106_s27 = sld [smem:[%s18884_s0 + %s13871_s7]]   ;;  %s13875_s7 = smov 38  }
  0x48   :  { %s14121_s3 = sld [smem:[%s18884_s0 + %s13874_s28]]   ;;  %s13878_s28 = smov 41  }
  0x49   :  { %s14126_s20 = sld [smem:[%s18884_s0 + %s13875_s7]]   ;;  %s13879_s7 = smov 42  }
  0x4a   :  { %19126 = sst [smem:[#allocation67_spill]] %s14091_s29 }
  0x4b   :  { %19127 = sst [smem:[#allocation68_spill]] %s14096_s25 }
  0x4c   :  { %s14111_s29 = sld [smem:[%s18884_s0 + %s13872_s15]]   ;;  %s13876_s15 = smov 39  }
  0x4d   :  { %s14116_s25 = sld [smem:[%s18884_s0 + %s13873_s22]]   ;;  %s13877_s22 = smov 40  }
  0x4e   :  { %s14141_s12 = sld [smem:[%s18884_s0 + %s13878_s28]]   ;;  %s13882_s28 = smov 45  }
  0x4f   :  { %19130 = sst [smem:[#allocation71_spill]] %s14126_s20 }
  0x50   :  { %s14146_s20 = sld [smem:[%s18884_s0 + %s13879_s7]]   ;;  %s13883_s7 = smov 46  }
  0x52   :  { %19128 = sst [smem:[#allocation69_spill]] %s14111_s29 }
  0x53   :  { %19129 = sst [smem:[#allocation70_spill]] %s14116_s25 }
  0x54   :  { %s14131_s29 = sld [smem:[%s18884_s0 + %s13876_s15]]   ;;  %s13880_s15 = smov 43  }
  0x55   :  { %s14136_s25 = sld [smem:[%s18884_s0 + %s13877_s22]]   ;;  %s13881_s22 = smov 44  }
  0x56   :  { %19132 = sst [smem:[#allocation73_spill]] %s14141_s12 }
  0x57   :  { %19133 = sst [smem:[#allocation74_spill]] %s14146_s20 }
  0x58   :  { %s14151_s6 = sld [smem:[%s18884_s0 + %s13880_s15]]   ;;  %s13884_s15 = smov 47  }
  0x59   :  { %s14161_s12 = sld [smem:[%s18884_s0 + %s13882_s28]]   ;;  %s13886_s28 = smov 49  }
  0x5a   :  { %s14166_s20 = sld [smem:[%s18884_s0 + %s13883_s7]]   ;;  %s13887_s7 = smov 50  }
  0x5b   :  { %19131 = sst [smem:[#allocation72_spill]] %s14136_s25 }
  0x5c   :  { %s14156_s25 = sld [smem:[%s18884_s0 + %s13881_s22]]   ;;  %s13885_s22 = smov 48  }
  0x5d   :  { %s14176_s24 = sld [smem:[%s18884_s0 + %s13885_s22]]   ;;  %s13889_s22 = smov 52  }
  0x5e   :  { %19134 = sst [smem:[#allocation75_spill]] %s14151_s6 }
  0x5f   :  { %19135 = sst [smem:[#allocation76_spill]] %s14161_s12 }
  0x60   :  { %19136 = sst [smem:[#allocation77_spill]] %s14166_s20 }
  0x61   :  { %s14171_s6 = sld [smem:[%s18884_s0 + %s13884_s15]]   ;;  %s13888_s15 = smov 51  }
  0x62   :  { %s14181_s12 = sld [smem:[%s18884_s0 + %s13886_s28]]   ;;  %s13890_s28 = smov 53  }
  0x63   :  { %19137 = sst [smem:[#allocation78_spill]] %s14176_s24 }
  0x64   :  { %s14186_s20 = sld [smem:[%s18884_s0 + %s13887_s7]]   ;;  %s13891_s7 = smov 54  }
  0x65   :  { %s14191_s14 = sld [smem:[%s18884_s0 + %s13888_s15]]   ;;  %s13892_s15 = smov 55  }
  0x66   :  { %s14196_s24 = sld [smem:[%s18884_s0 + %s13889_s22]]   ;;  %s13893_s22 = smov 56  }
  0x67   :  { %s14201_s13 = sld [smem:[%s18884_s0 + %s13890_s28]]   ;;  %s13894_s28 = smov 57  }
  0x68   :  { %s14216_s9 = sld [smem:[%s18884_s0 + %s13893_s22]]   ;;  %s13897_s22 = smov 60  }
  0x6a   :  { %19138 = sst [smem:[#allocation79_spill]] %s14186_s20 }
  0x6b   :  { %19139 = sst [smem:[#allocation80_spill]] %s14191_s14 }
  0x6c   :  { %s14206_s20 = sld [smem:[%s18884_s0 + %s13891_s7]]   ;;  %s13895_s7 = smov 58  }
  0x6d   :  { %19140 = sst [smem:[#allocation81_spill]] %s14201_s13 }
  0x6e   :  { %s14211_s14 = sld [smem:[%s18884_s0 + %s13892_s15]]   ;;  %s13896_s15 = smov 59  }
  0x6f   :  { %19142 = sst [smem:[#allocation83_spill]] %s14216_s9 }
  0x70   :  { %s14221_s13 = sld [smem:[%s18884_s0 + %s13894_s28]]   ;;  %s13898_s28 = smov 61  }
  0x71   :  { %s14226_s30 = sld [smem:[%s18884_s0 + %s13895_s7]]   ;;  %s13899_s7 = smov 62  }
  0x72   :  { %s14236_s9 = sld [smem:[%s18884_s0 + %s13897_s22]]   ;;  %s13901_s22 = smov 64  }
  0x73   :  { %s14241_s21 = sld [smem:[%s18884_s0 + %s13898_s28]]   ;;  %s13902_s28 = smov 65  }
  0x74   :  { %19141 = sst [smem:[#allocation82_spill]] %s14211_s14 }
  0x75   :  { %s14231_s14 = sld [smem:[%s18884_s0 + %s13896_s15]]   ;;  %s13900_s15 = smov 63  }
  0x76   :  { %s14251_s19 = sld [smem:[%s18884_s0 + %s13900_s15]]  }
  0x77   :  { %19143 = sst [smem:[#allocation84_spill]] %s14226_s30 }
  0x78   :  { %19144 = sst [smem:[#allocation85_spill]] %s14236_s9 }
  0x79   :  { %s14246_s30 = sld [smem:[%s18884_s0 + %s13899_s7]]  }
  0x7a   :  { %s14256_s9 = sld [smem:[%s18884_s0 + %s13901_s22]]  }
  0x7b   :  { %s10702_s17 = sld [smem:[%s18884_s0 + %s13902_s28]]  }
  0x7f   :  { %19145 = sst [smem:[#allocation86_spill]] %s14246_s30 }
  0x80   :  { %19146 = sst [smem:[#allocation87_spill]] %s14256_s9 }
  0x81   :  { %s14264_s30 = sld [smem:[%s18884_s0 + %s13903_s10]]   ;;  %v144_v0 = vstv %s10702_s17 }
  0x82   :  { %s14274_s9 = sld [smem:[%s18884_s0 + %s13905_s23]]   ;;  %145 = vst [vmem:[#allocation3] sm:$0x1] %v144_v0 }
  0x83   :  { %146 = vsyncpa [#allocation6], 0 }
  0x84   :  { %147 = vsyncpa [#allocation5], 0 }
  0x85   :  { %148 = vsyncpa [#allocation9], 0 }
  0x86   :  { %149 = vsyncpa [#allocation12], 0 }
  0x87   :  { %150 = vsyncpa [#allocation15], 0 }
  0x88   :  { %151 = vsyncpa [#allocation18], 0 }
  0x89   :  { %152 = vsyncpa [#allocation21], 0 }
  0x8a   :  { %153 = vsyncpa [#allocation24], 0 }
  0x8b   :  { %154 = vsyncpa [#allocation27], 0  ;;  %s13906_s28 = smov [#allocation8]   ;;  %s13907_s2 = smov [#allocation11]  }
  0x8c   :  { %s245_s1 = sshll.u32 %s13906_s28, 4  ;;  %s271_s10 = sshll.u32 %s13907_s2, 4  ;;  %s246_s1 = int_to_ptr.vmem [resolvable:$true] %s245_s1  ;;  %s272_s10 = int_to_ptr.vmem [resolvable:$true] %s271_s10 }
  0x8d   :  { %s13536_s7 = scalar_lea.vmem %s246_s1, 16  ;;  %s13540_s0 = scalar_lea.vmem %s246_s1, 32 }
  0x8e   :  { %p13537_p0 = scmp.ne.s32.totalorder %s246_s1, %s13536_s7  ;;  %p13541_p1 = scmp.lt.s32.totalorder %s246_s1, %s246_s1 }
  0x8f   :  { %p13542_p2 = scmp.lt.s32.totalorder %s13540_s0, %s13536_s7 }
  0x91   :  { %p13543_p3 = por %p13542_p2, %p13541_p1 }
  0x93   :  { %p13544_p4 = pnand %p13543_p3, %p13537_p0 }
  0x95   :  { %13547 = shalt.err (!%p13544_p4)
}
  0x96   :  { %248 = dma.hbm_to_vmem [thread:$0]  %s14106_s27, 16, %s246_s1, [#allocation9]  }
  0x97   :  { %s13556_s17 = scalar_lea.vmem %s272_s10, 16  ;;  %s13560_s11 = scalar_lea.vmem %s272_s10, 32 }
  0x98   :  { %p13557_p5 = scmp.ne.s32.totalorder %s272_s10, %s13556_s17  ;;  %p13561_p6 = scmp.lt.s32.totalorder %s272_s10, %s272_s10 }
  0x99   :  { %p13562_p7 = scmp.lt.s32.totalorder %s13560_s11, %s13556_s17 }
  0x9b   :  { %p13563_p8 = por %p13562_p7, %p13561_p6 }
  0x9d   :  { %p13564_p9 = pnand %p13563_p8, %p13557_p5 }
  0x9f   :  { %13567 = shalt.err (!%p13564_p9)
}
  0xa0   :  { %274 = dma.hbm_to_vmem [thread:$0]  %s14131_s29, 16, %s272_s10, [#allocation12]  }
  0xa1   :  { %s13908_s16 = smov [#allocation14]   ;;  %s13909_s18 = smov [#allocation17]  }
  0xa2   :  { %s303_s15 = sshll.u32 %s13908_s16, 4  ;;  %s329_s23 = sshll.u32 %s13909_s18, 4  ;;  %s304_s15 = int_to_ptr.vmem [resolvable:$true] %s303_s15  ;;  %s330_s23 = int_to_ptr.vmem [resolvable:$true] %s329_s23 }
  0xa3   :  { %s13576_s22 = scalar_lea.vmem %s304_s15, 16  ;;  %s13580_s26 = scalar_lea.vmem %s304_s15, 32 }
  0xa4   :  { %p13577_p10 = scmp.ne.s32.totalorder %s304_s15, %s13576_s22  ;;  %p13581_p11 = scmp.lt.s32.totalorder %s304_s15, %s304_s15 }
  0xa5   :  { %p13582_p12 = scmp.lt.s32.totalorder %s13580_s26, %s13576_s22 }
  0xa7   :  { %p13583_p13 = por %p13582_p12, %p13581_p11 }
  0xa9   :  { %p13584_p0 = pnand %p13583_p13, %p13577_p10 }
  0xab   :  { %13587 = shalt.err (!%p13584_p0)
}
  0xac   :  { %306 = dma.hbm_to_vmem [thread:$0]  %s14171_s6, 16, %s304_s15, [#allocation15]  }
  0xad   :  { %s13596_s27 = scalar_lea.vmem %s330_s23, 16  ;;  %s13600_s28 = scalar_lea.vmem %s330_s23, 32 }
  0xae   :  { %p13597_p1 = scmp.ne.s32.totalorder %s330_s23, %s13596_s27  ;;  %p13601_p2 = scmp.lt.s32.totalorder %s330_s23, %s330_s23 }
  0xaf   :  { %p13602_p3 = scmp.lt.s32.totalorder %s13600_s28, %s13596_s27 }
  0xb1   :  { %p13603_p4 = por %p13602_p3, %p13601_p2 }
  0xb3   :  { %p13604_p5 = pnand %p13603_p4, %p13597_p1 }
  0xb5   :  { %13607 = shalt.err (!%p13604_p5)
}
  0xb6   :  { %332 = dma.hbm_to_vmem [thread:$0]  %s14196_s24, 16, %s330_s23, [#allocation18]  }
  0xb7   :  { %s13910_s29 = smov [#allocation20]   ;;  %s13911_s2 = smov [#allocation23]  }
  0xb8   :  { %s355_s1 = sshll.u32 %s13910_s29, 4  ;;  %s379_s10 = sshll.u32 %s13911_s2, 4  ;;  %s356_s1 = int_to_ptr.vmem [resolvable:$true] %s355_s1  ;;  %s380_s10 = int_to_ptr.vmem [resolvable:$true] %s379_s10 }
  0xb9   :  { %s13616_s7 = scalar_lea.vmem %s356_s1, 16  ;;  %s13620_s0 = scalar_lea.vmem %s356_s1, 32 }
  0xba   :  { %p13617_p6 = scmp.ne.s32.totalorder %s356_s1, %s13616_s7  ;;  %p13621_p7 = scmp.lt.s32.totalorder %s356_s1, %s356_s1 }
  0xbb   :  { %p13622_p8 = scmp.lt.s32.totalorder %s13620_s0, %s13616_s7 }
  0xbd   :  { %p13623_p9 = por %p13622_p8, %p13621_p7 }
  0xbf   :  { %p13624_p10 = pnand %p13623_p9, %p13617_p6 }
  0xc1   :  { %13627 = shalt.err (!%p13624_p10)
}
  0xc2   :  { %358 = dma.hbm_to_vmem [thread:$0]  %s14221_s13, 16, %s356_s1, [#allocation21]  }
  0xc3   :  { %s13636_s6 = scalar_lea.vmem %s380_s10, 16  ;;  %s13640_s17 = scalar_lea.vmem %s380_s10, 32 }
  0xc4   :  { %p13637_p11 = scmp.ne.s32.totalorder %s380_s10, %s13636_s6  ;;  %p13641_p12 = scmp.lt.s32.totalorder %s380_s10, %s380_s10 }
  0xc5   :  { %p13642_p13 = scmp.lt.s32.totalorder %s13640_s17, %s13636_s6 }
  0xc7   :  { %p13643_p0 = por %p13642_p13, %p13641_p12 }
  0xc9   :  { %p13644_p1 = pnand %p13643_p0, %p13637_p11 }
  0xcb   :  { %13647 = shalt.err (!%p13644_p1)
}
  0xcc   :  { %382 = dma.hbm_to_vmem [thread:$0]  %s14241_s21, 16, %s380_s10, [#allocation24]  }
  0xcd   :  { %s161_s24 = sshll.u32 %s13936_s5, 4  ;;  %s162_s24 = int_to_ptr.vmem [resolvable:$true] %s161_s24 }
  0xce   :  { %s13648_s11 = scalar_lea.vmem %s162_s24, 16  ;;  %p13653_p3 = scmp.lt.s32.totalorder %s162_s24, %s162_s24 }
  0xcf   :  { %p13649_p2 = scmp.ne.s32.totalorder %s162_s24, %s13648_s11  ;;  %p13654_p4 = scmp.lt.s32.totalorder %s13648_s11, %s13648_s11 }
  0xd1   :  { %p13655_p5 = por %p13654_p4, %p13653_p3 }
  0xd3   :  { %p13656_p6 = pnand %p13655_p5, %p13649_p2 }
  0xd5   :  { %13659 = shalt.err (!%p13656_p6)
}
  0xd6   :  { %s13912_s13 = smov [#allocation4]   ;;  %s13913_s16 = smov [#allocation7]  }
  0xd7   :  { %164 = dma.vmem_to_smem %s162_s24, 16, %s13912_s13, [#allocation6]  }
  0xd8   :  { %s235_s15 = sshll.u32 %s13913_s16, 4  ;;  %s13914_s18 = smov [#allocation10]   ;;  %s236_s15 = int_to_ptr.vmem [resolvable:$true] %s235_s15 }
  0xd9   :  { %s259_s23 = sshll.u32 %s13914_s18, 4  ;;  %s13668_s22 = scalar_lea.vmem %s236_s15, 16  ;;  %s260_s23 = int_to_ptr.vmem [resolvable:$true] %s259_s23 }
  0xda   :  { %p13669_p7 = scmp.ne.s32.totalorder %s236_s15, %s13668_s22  ;;  %s13672_s26 = scalar_lea.vmem %s236_s15, 32 }
  0xdb   :  { %p13673_p8 = scmp.lt.s32.totalorder %s236_s15, %s236_s15  ;;  %p13674_p9 = scmp.lt.s32.totalorder %s13672_s26, %s13668_s22 }
  0xdd   :  { %p13675_p10 = por %p13674_p9, %p13673_p8 }
  0xdf   :  { %p13676_p11 = pnand %p13675_p10, %p13669_p7 }
  0xe1   :  { %13679 = shalt.err (!%p13676_p11)
}
  0xe2   :  { %238 = dma.hbm_to_vmem [thread:$0]  %s14101_s4, 16, %s236_s15, [#allocation5]  }
  0xe3   :  { %s13688_s5 = scalar_lea.vmem %s260_s23, 16  ;;  %s13692_s21 = scalar_lea.vmem %s260_s23, 32 }
  0xe4   :  { %p13689_p12 = scmp.ne.s32.totalorder %s260_s23, %s13688_s5  ;;  %p13693_p13 = scmp.lt.s32.totalorder %s260_s23, %s260_s23 }
  0xe5   :  { %p13694_p0 = scmp.lt.s32.totalorder %s13692_s21, %s13688_s5 }
  0xe7   :  { %p13695_p1 = por %p13694_p0, %p13693_p13 }
  0xe9   :  { %p13696_p2 = pnand %p13695_p1, %p13689_p12 }
  0xeb   :  { %13699 = shalt.err (!%p13696_p2)
}
  0xec   :  { %262 = dma.hbm_to_vmem [thread:$0]  %s14121_s3, 16, %s260_s23, [#allocation9]  }
  0xed   :  { %s13915_s27 = smov [#allocation13]   ;;  %s13916_s29 = smov [#allocation16]  }
  0xee   :  { %s289_s28 = sshll.u32 %s13915_s27, 4  ;;  %s315_s1 = sshll.u32 %s13916_s29, 4  ;;  %s290_s28 = int_to_ptr.vmem [resolvable:$true] %s289_s28  ;;  %s316_s1 = int_to_ptr.vmem [resolvable:$true] %s315_s1 }
  0xef   :  { %s13708_s2 = scalar_lea.vmem %s290_s28, 16  ;;  %s13712_s10 = scalar_lea.vmem %s290_s28, 32 }
  0xf0   :  { %p13709_p3 = scmp.ne.s32.totalorder %s290_s28, %s13708_s2  ;;  %p13713_p4 = scmp.lt.s32.totalorder %s290_s28, %s290_s28 }
  0xf1   :  { %p13714_p5 = scmp.lt.s32.totalorder %s13712_s10, %s13708_s2 }
  0xf3   :  { %p13715_p6 = por %p13714_p5, %p13713_p4 }
  0xf5   :  { %p13716_p7 = pnand %p13715_p6, %p13709_p3 }
  0xf7   :  { %13719 = shalt.err (!%p13716_p7)
}
  0xf8   :  { %292 = dma.hbm_to_vmem [thread:$0]  %s14156_s25, 16, %s290_s28, [#allocation12]  }
  0xf9   :  { %s13728_s4 = scalar_lea.vmem %s316_s1, 16  ;;  %s13732_s7 = scalar_lea.vmem %s316_s1, 32 }
  0xfa   :  { %p13729_p8 = scmp.ne.s32.totalorder %s316_s1, %s13728_s4  ;;  %p13733_p9 = scmp.lt.s32.totalorder %s316_s1, %s316_s1 }
  0xfb   :  { %p13734_p10 = scmp.lt.s32.totalorder %s13732_s7, %s13728_s4 }
  0xfd   :  { %p13735_p11 = por %p13734_p10, %p13733_p9 }
  0xff   :  { %p13736_p12 = pnand %p13735_p11, %p13729_p8 }
 0x101   :  { %13739 = shalt.err (!%p13736_p12)
}
 0x102   :  { %318 = dma.hbm_to_vmem [thread:$0]  %s14181_s12, 16, %s316_s1, [#allocation15]  }
 0x103   :  { %s13917_s3 = smov [#allocation19]   ;;  %s13918_s6 = smov [#allocation22]  }
 0x104   :  { %s341_s0 = sshll.u32 %s13917_s3, 4  ;;  %s367_s17 = sshll.u32 %s13918_s6, 4  ;;  %s342_s0 = int_to_ptr.vmem [resolvable:$true] %s341_s0  ;;  %s368_s17 = int_to_ptr.vmem [resolvable:$true] %s367_s17 }
 0x105   :  { %s13748_s24 = scalar_lea.vmem %s342_s0, 16  ;;  %s13752_s11 = scalar_lea.vmem %s342_s0, 32 }
 0x106   :  { %p13749_p13 = scmp.ne.s32.totalorder %s342_s0, %s13748_s24  ;;  %p13753_p0 = scmp.lt.s32.totalorder %s342_s0, %s342_s0 }
 0x107   :  { %p13754_p1 = scmp.lt.s32.totalorder %s13752_s11, %s13748_s24 }
 0x109   :  { %p13755_p2 = por %p13754_p1, %p13753_p0 }
 0x10b   :  { %p13756_p3 = pnand %p13755_p2, %p13749_p13 }
 0x10d   :  { %13759 = shalt.err (!%p13756_p3)
}
 0x10e   :  { %344 = dma.hbm_to_vmem [thread:$0]  %s14206_s20, 16, %s342_s0, [#allocation18]  }
 0x10f   :  { %s13768_s25 = scalar_lea.vmem %s368_s17, 16  ;;  %s13772_s13 = scalar_lea.vmem %s368_s17, 32 }
 0x110   :  { %p13769_p4 = scmp.ne.s32.totalorder %s368_s17, %s13768_s25  ;;  %p13773_p5 = scmp.lt.s32.totalorder %s368_s17, %s368_s17 }
 0x111   :  { %p13774_p6 = scmp.lt.s32.totalorder %s13772_s13, %s13768_s25 }
 0x113   :  { %p13775_p7 = por %p13774_p6, %p13773_p5 }
 0x115   :  { %p13776_p8 = pnand %p13775_p7, %p13769_p4 }
 0x117   :  { %13779 = shalt.err (!%p13776_p8)
}
 0x118   :  { %370 = dma.hbm_to_vmem [thread:$0]  %s14231_s14, 16, %s368_s17, [#allocation21]  }
 0x119   :  { %s13919_s12 = smov [#allocation25]   ;;  %s13920_s15 = smov [#allocation26]  }
 0x11a   :  { %s391_s16 = sshll.u32 %s13919_s12, 4  ;;  %s401_s18 = sshll.u32 %s13920_s15, 4  ;;  %s392_s16 = int_to_ptr.vmem [resolvable:$true] %s391_s16  ;;  %s402_s18 = int_to_ptr.vmem [resolvable:$true] %s401_s18 }
 0x11b   :  { %s13788_s23 = scalar_lea.vmem %s392_s16, 16  ;;  %s13792_s22 = scalar_lea.vmem %s392_s16, 32 }
 0x11c   :  { %p13789_p9 = scmp.ne.s32.totalorder %s392_s16, %s13788_s23  ;;  %p13793_p10 = scmp.lt.s32.totalorder %s392_s16, %s392_s16 }
 0x11d   :  { %p13794_p11 = scmp.lt.s32.totalorder %s13792_s22, %s13788_s23 }
 0x11f   :  { %p13795_p12 = por %p13794_p11, %p13793_p10 }
 0x121   :  { %p13796_p13 = pnand %p13795_p12, %p13789_p9 }
 0x123   :  { %13799 = shalt.err (!%p13796_p13)
}
 0x124   :  { %394 = dma.hbm_to_vmem [thread:$0]  %s14251_s19, 16, %s392_s16, [#allocation24]  }
 0x125   :  { %s13808_s20 = scalar_lea.vmem %s402_s18, 16  ;;  %s13812_s26 = scalar_lea.vmem %s402_s18, 32 }
 0x126   :  { %p13809_p0 = scmp.ne.s32.totalorder %s402_s18, %s13808_s20  ;;  %p13813_p1 = scmp.lt.s32.totalorder %s402_s18, %s402_s18 }
 0x127   :  { %p13814_p2 = scmp.lt.s32.totalorder %s13812_s26, %s13808_s20 }
 0x129   :  { %p13815_p3 = por %p13814_p2, %p13813_p1 }
 0x12b   :  { %p13816_p4 = pnand %p13815_p3, %p13809_p0 }
 0x12d   :  { %13819 = shalt.err (!%p13816_p4)
}
 0x12e   :  { %s19147_s14 = sld [smem:[#allocation87_spill]] }
 0x134   :  { %404 = dma.hbm_to_vmem [thread:$0]  %s19147_s14, 16, %s402_s18, [#allocation27]  }
 0x135   :  { %13820 = dma.done.wait [#allocation6], 16  }
 0x136   :  { %13821 = vsyncadd [#allocation6], 4294967280 }
 0x137   :  { %13822 = dma.done.wait [#allocation5], 16  }
 0x138   :  { %13823 = vsyncadd [#allocation5], 4294967280 }
 0x139   :  { %13824 = dma.done.wait [#allocation9], 32  }
 0x13a   :  { %13825 = vsyncadd [#allocation9], 4294967264 }
 0x13b   :  { %13826 = dma.done.wait [#allocation12], 32  }
 0x13c   :  { %13827 = vsyncadd [#allocation12], 4294967264 }
 0x13d   :  { %13828 = dma.done.wait [#allocation15], 32  }
 0x13e   :  { %13829 = vsyncadd [#allocation15], 4294967264 }
 0x13f   :  { %13830 = dma.done.wait [#allocation18], 32  }
 0x140   :  { %13831 = vsyncadd [#allocation18], 4294967264 }
 0x141   :  { %13832 = dma.done.wait [#allocation21], 32  }
 0x142   :  { %13833 = vsyncadd [#allocation21], 4294967264 }
 0x143   :  { %13834 = dma.done.wait [#allocation24], 32  }
 0x144   :  { %13835 = vsyncadd [#allocation24], 4294967264 }
 0x145   :  { %13836 = dma.done.wait [#allocation27], 16  }
 0x146   :  { %13837 = vsyncadd [#allocation27], 4294967280 }
 0x147   :  { %452 = sfence }
 0x148   :  { %s19148_s19 = sld [smem:[#allocation44_spill]]  ;;  %vm1540_vm1 = vcmask 523264   ;;  %s13922_s7 = smov 64   ;;  %vm1821_vm9 = vcmask 392192   ;;  %vm13923_vm15 = vmmov 0  }
 0x149   :  { %s19149_s5 = sld [smem:[#allocation39_spill]] }
 0x14a   :  { %s19150_s21 = sld [smem:[#allocation46_spill]] }
 0x14b   :  { %s19151_s27 = sld [smem:[#allocation40_spill]] }
 0x14c   :  { %s19152_s28 = sld [smem:[#allocation48_spill]] }
 0x14d   :  { %s19162_s29 = sld [smem:[#allocation37_spill]] }
 0x14e   :  { %v568_v1 = vld [vmem:[%s19148_s19 + $0xf8] sm:$0xff]  ;;  %v567_v5 = vld [vmem:[%s19148_s19 + $0xf0] sm:$0xff]  ;;  %v566_v9 = vld [vmem:[%s19148_s19 + $0xe8] sm:$0xff]  ;;  %s19163_s1 = sld [smem:[#allocation38_spill]] }
 0x14f   :  { %v600_v2 = vld [vmem:[%s19148_s19 + $0x1f8] sm:$0xff]  ;;  %11237 = vmatprep.subr.mxu0 %v568_v1  ;;  %v599_v6 = vld [vmem:[%s19148_s19 + $0x1f0] sm:$0xff]  ;;  %v598_v10 = vld [vmem:[%s19148_s19 + $0x1e8] sm:$0xff]  ;;  %s19164_s2 = sld [smem:[#allocation45_spill]] }
 0x150   :  { %v552_v3 = vld [vmem:[%s19148_s19 + $0x78] sm:$0xff]  ;;  %11287 = vmatprep.subr.mxu1 %v600_v2  ;;  %v551_v7 = vld [vmem:[%s19148_s19 + $0x70] sm:$0xff]  ;;  %v550_v11 = vld [vmem:[%s19148_s19 + $0x68] sm:$0xff]  ;;  %s19166_s10 = sld [smem:[#allocation47_spill]] }
 0x151   :  { %v584_v4 = vld [vmem:[%s19148_s19 + $0x178] sm:$0xff]  ;;  %11238 = vmatpush3.msra.mxu0 %v552_v3  ;;  %v583_v8 = vld [vmem:[%s19148_s19 + $0x170] sm:$0xff]  ;;  %v582_v12 = vld [vmem:[%s19148_s19 + $0x168] sm:$0xff]  ;;  %s19176_s4 = sld [smem:[#allocation49_spill]] }
 0x152   :  { %11288 = vmatpush3.msra.mxu1 %v584_v4  ;;  %11239 = vmatprep.subr.mxu0 %v567_v5  ;;  %v565_v13 = vld [vmem:[%s19148_s19 + $0xe0] sm:$0xff]  ;;  %v564_v17 = vld [vmem:[%s19148_s19 + $0xd8] sm:$0xff]  ;;  %v563_v21 = vld [vmem:[%s19148_s19 + $0xd0] sm:$0xff]  ;;  %s19179_s3 = sld [smem:[#allocation50_spill]] }
 0x153   :  { %11289 = vmatprep.subr.mxu1 %v599_v6  ;;  %11240 = vmatpush3.msra.mxu0 %v551_v7  ;;  %v597_v14 = vld [vmem:[%s19148_s19 + $0x1e0] sm:$0xff]  ;;  %v596_v18 = vld [vmem:[%s19148_s19 + $0x1d8] sm:$0xff]  ;;  %v595_v22 = vld [vmem:[%s19148_s19 + $0x1d0] sm:$0xff]  ;;  %s19180_s0 = sld [smem:[#allocation51_spill]] }
 0x154   :  { %11290 = vmatpush3.msra.mxu1 %v583_v8  ;;  %11241 = vmatprep.subr.mxu0 %v566_v9  ;;  %v549_v15 = vld [vmem:[%s19148_s19 + $0x60] sm:$0xff]  ;;  %v548_v19 = vld [vmem:[%s19148_s19 + $0x58] sm:$0xff]  ;;  %v547_v23 = vld [vmem:[%s19148_s19 + $0x50] sm:$0xff]  ;;  %s19181_s6 = sld [smem:[#allocation54_spill]] }
 0x155   :  { %11291 = vmatprep.subr.mxu1 %v598_v10  ;;  %v581_v16 = vld [vmem:[%s19148_s19 + $0x160] sm:$0xff]  ;;  %11242 = vmatpush3.msra.mxu0 %v550_v11  ;;  %v580_v20 = vld [vmem:[%s19148_s19 + $0x158] sm:$0xff]  ;;  %v579_v24 = vld [vmem:[%s19148_s19 + $0x150] sm:$0xff]  ;;  %s19182_s17 = sld [smem:[#allocation56_spill]] }
 0x156   :  { %11292 = vmatpush3.msra.mxu1 %v582_v12  ;;  %11243 = vmatprep.subr.mxu0 %v565_v13  ;;  %v562_v25 = vld [vmem:[%s19148_s19 + $0xc8] sm:$0xff]  ;;  %v561_v29 = vld [vmem:[%s19148_s19 + $0xc0] sm:$0xff]  ;;  %v560_v33 = vld [vmem:[%s19148_s19 + $0xb8] sm:$0xff]  ;;  %s19183_s24 = sld [smem:[#allocation52_spill]] }
 0x157   :  { %11293 = vmatprep.subr.mxu1 %v597_v14  ;;  %11244 = vmatpush3.msra.mxu0 %v549_v15  ;;  %v594_v26 = vld [vmem:[%s19148_s19 + $0x1c8] sm:$0xff]  ;;  %v593_v30 = vld [vmem:[%s19148_s19 + $0x1c0] sm:$0xff]  ;;  %v592_v34 = vld [vmem:[%s19148_s19 + $0x1b8] sm:$0xff]  ;;  %s19184_s11 = sld [smem:[#allocation53_spill]] }
 0x158   :  { %11294 = vmatpush3.msra.mxu1 %v581_v16  ;;  %11245 = vmatprep.subr.mxu0 %v564_v17  ;;  %v546_v27 = vld [vmem:[%s19148_s19 + $0x48] sm:$0xff]  ;;  %v545_v31 = vld [vmem:[%s19148_s19 + $0x40] sm:$0xff]  ;;  %v544_v35 = vld [vmem:[%s19148_s19 + $0x38] sm:$0xff]  ;;  %s19185_s25 = sld [smem:[#allocation55_spill]] }
 0x159   :  { %11295 = vmatprep.subr.mxu1 %v596_v18  ;;  %11246 = vmatpush3.msra.mxu0 %v548_v19  ;;  %v578_v28 = vld [vmem:[%s19148_s19 + $0x148] sm:$0xff]  ;;  %v577_v32 = vld [vmem:[%s19148_s19 + $0x140] sm:$0xff]  ;;  %v576_v36 = vld [vmem:[%s19148_s19 + $0x138] sm:$0xff]  ;;  %s19186_s13 = sld [smem:[#allocation57_spill]] }
 0x15a   :  { %11296 = vmatpush3.msra.mxu1 %v580_v20  ;;  %11247 = vmatprep.subr.mxu0 %v563_v21  ;;  %v559_v37 = vld [vmem:[%s19148_s19 + $0xb0] sm:$0xff]  ;;  %v558_v41 = vld [vmem:[%s19148_s19 + $0xa8] sm:$0xff]  ;;  %v557_v45 = vld [vmem:[%s19148_s19 + $0xa0] sm:$0xff]  ;;  %s19187_s12 = sld [smem:[#allocation60_spill]] }
 0x15b   :  { %11297 = vmatprep.subr.mxu1 %v595_v22  ;;  %11248 = vmatpush3.msra.mxu0 %v547_v23  ;;  %v591_v38 = vld [vmem:[%s19148_s19 + $0x1b0] sm:$0xff]  ;;  %v590_v42 = vld [vmem:[%s19148_s19 + $0x1a8] sm:$0xff]  ;;  %v589_v46 = vld [vmem:[%s19148_s19 + $0x1a0] sm:$0xff]  ;;  %s19188_s16 = sld [smem:[#allocation58_spill]] }
 0x15c   :  { %11298 = vmatpush3.msra.mxu1 %v579_v24  ;;  %11249 = vmatprep.subr.mxu0 %v562_v25  ;;  %v543_v39 = vld [vmem:[%s19148_s19 + $0x30] sm:$0xff]  ;;  %v542_v43 = vld [vmem:[%s19148_s19 + $0x28] sm:$0xff]  ;;  %v541_v47 = vld [vmem:[%s19148_s19 + $0x20] sm:$0xff]  ;;  %s19189_s15 = sld [smem:[#allocation59_spill]] }
 0x15d   :  { %11299 = vmatprep.subr.mxu1 %v594_v26  ;;  %11250 = vmatpush3.msra.mxu0 %v546_v27  ;;  %v575_v40 = vld [vmem:[%s19148_s19 + $0x130] sm:$0xff]  ;;  %v574_v44 = vld [vmem:[%s19148_s19 + $0x128] sm:$0xff]  ;;  %v573_v48 = vld [vmem:[%s19148_s19 + $0x120] sm:$0xff]  ;;  %s19190_s18 = sld [smem:[#allocation62_spill]] }
 0x15e   :  { %11300 = vmatpush3.msra.mxu1 %v578_v28  ;;  %11251 = vmatprep.subr.mxu0 %v561_v29  ;;  %v556_v49 = vld [vmem:[%s19148_s19 + $0x98] sm:$0xff]  ;;  %v555_v53 = vld [vmem:[%s19148_s19 + $0x90] sm:$0xff]  ;;  %v554_v57 = vld [vmem:[%s19148_s19 + $0x88] sm:$0xff]  ;;  %s19191_s23 = sld [smem:[#allocation41_spill]] }
 0x15f   :  { %11301 = vmatprep.subr.mxu1 %v593_v30  ;;  %11252 = vmatpush3.msra.mxu0 %v545_v31  ;;  %v588_v50 = vld [vmem:[%s19148_s19 + $0x198] sm:$0xff]  ;;  %v587_v54 = vld [vmem:[%s19148_s19 + $0x190] sm:$0xff]  ;;  %v586_v58 = vld [vmem:[%s19148_s19 + $0x188] sm:$0xff]  ;;  %s19192_s22 = sld [smem:[#allocation63_spill]] }
 0x160   :  { %11302 = vmatpush3.msra.mxu1 %v577_v32  ;;  %11253 = vmatprep.subr.mxu0 %v560_v33  ;;  %v540_v51 = vld [vmem:[%s19148_s19 + $0x18] sm:$0xff]  ;;  %v539_v55 = vld [vmem:[%s19148_s19 + $0x10] sm:$0xff]  ;;  %v538_v59 = vld [vmem:[%s19148_s19 + $0x8] sm:$0xff]  ;;  %s19193_s20 = sld [smem:[#allocation69_spill]] }
 0x161   :  { %11303 = vmatprep.subr.mxu1 %v592_v34  ;;  %11254 = vmatpush3.msra.mxu0 %v544_v35  ;;  %v572_v52 = vld [vmem:[%s19148_s19 + $0x118] sm:$0xff]  ;;  %v571_v56 = vld [vmem:[%s19148_s19 + $0x110] sm:$0xff]  ;;  %v570_v60 = vld [vmem:[%s19148_s19 + $0x108] sm:$0xff]  ;;  %s19194_s26 = sld [smem:[#allocation64_spill]] }
 0x162   :  { %11304 = vmatpush3.msra.mxu1 %v576_v36  ;;  %11255 = vmatprep.subr.mxu0 %v559_v37  ;;  %v553_v61 = vld [vmem:[%s19148_s19 + $0x80] sm:$0xff]  ;;  %v490_v0 = vld [vmem:[%s19149_s5 + $0x8] sm:$0xff]  ;;  %v492_v2 = vld [vmem:[%s19149_s5 + $0x18] sm:$0xff]  ;;  %s19195_s14 = sld [smem:[#allocation67_spill]] }
 0x163   :  { %11305 = vmatprep.subr.mxu1 %v591_v38  ;;  %11256 = vmatpush3.msra.mxu0 %v543_v39  ;;  %v585_v62 = vld [vmem:[%s19148_s19 + $0x180] sm:$0xff]  ;;  %v491_v4 = vld [vmem:[%s19149_s5 + $0x10] sm:$0xff]  ;;  %v632_v5 = vld [vmem:[%s19148_s19 + $0x2f8] sm:$0xff] }
 0x164   :  { %11306 = vmatpush3.msra.mxu1 %v575_v40  ;;  %11257 = vmatprep.subr.mxu0 %v558_v41  ;;  %v537_v63 = vld [vmem:[%s19148_s19] sm:$0xff]  ;;  %v664_v6 = vld [vmem:[%s19148_s19 + $0x3f8] sm:$0xff]  ;;  %v631_v9 = vld [vmem:[%s19148_s19 + $0x2f0] sm:$0xff] }
 0x165   :  { %11307 = vmatprep.subr.mxu1 %v590_v42  ;;  %11258 = vmatpush3.msra.mxu0 %v542_v43  ;;  %v569_v1 = vld [vmem:[%s19148_s19 + $0x100] sm:$0xff]  ;;  %v616_v7 = vld [vmem:[%s19148_s19 + $0x278] sm:$0xff]  ;;  %v663_v10 = vld [vmem:[%s19148_s19 + $0x3f0] sm:$0xff] }
 0x166   :  { %11308 = vmatpush3.msra.mxu1 %v574_v44  ;;  %11259 = vmatprep.subr.mxu0 %v557_v45  ;;  %v489_v3 = vld [vmem:[%s19149_s5] sm:$0xff]  ;;  %v648_v8 = vld [vmem:[%s19148_s19 + $0x378] sm:$0xff]  ;;  %v615_v11 = vld [vmem:[%s19148_s19 + $0x270] sm:$0xff] }
 0x167   :  { %11309 = vmatprep.subr.mxu1 %v589_v46  ;;  %11260 = vmatpush3.msra.mxu0 %v541_v47  ;;  %v647_v12 = vld [vmem:[%s19148_s19 + $0x370] sm:$0xff]  ;;  %v630_v13 = vld [vmem:[%s19148_s19 + $0x2e8] sm:$0xff]  ;;  %v629_v17 = vld [vmem:[%s19148_s19 + $0x2e0] sm:$0xff] }
 0x168   :  { %11310 = vmatpush3.msra.mxu1 %v573_v48  ;;  %11261 = vmatprep.subr.mxu0 %v556_v49  ;;  %v662_v14 = vld [vmem:[%s19148_s19 + $0x3e8] sm:$0xff]  ;;  %v661_v18 = vld [vmem:[%s19148_s19 + $0x3e0] sm:$0xff]  ;;  %v628_v21 = vld [vmem:[%s19148_s19 + $0x2d8] sm:$0xff] }
 0x169   :  { %11311 = vmatprep.subr.mxu1 %v588_v50  ;;  %11262 = vmatpush3.msra.mxu0 %v540_v51  ;;  %v614_v15 = vld [vmem:[%s19148_s19 + $0x268] sm:$0xff]  ;;  %v613_v19 = vld [vmem:[%s19148_s19 + $0x260] sm:$0xff]  ;;  %v660_v22 = vld [vmem:[%s19148_s19 + $0x3d8] sm:$0xff] }
 0x16a   :  { %11312 = vmatpush3.msra.mxu1 %v572_v52  ;;  %11263 = vmatprep.subr.mxu0 %v555_v53  ;;  %v646_v16 = vld [vmem:[%s19148_s19 + $0x368] sm:$0xff]  ;;  %v645_v20 = vld [vmem:[%s19148_s19 + $0x360] sm:$0xff]  ;;  %v612_v23 = vld [vmem:[%s19148_s19 + $0x258] sm:$0xff] }
 0x16b   :  { %11313 = vmatprep.subr.mxu1 %v587_v54  ;;  %11264 = vmatpush3.msra.mxu0 %v539_v55  ;;  %v644_v24 = vld [vmem:[%s19148_s19 + $0x358] sm:$0xff]  ;;  %v498_v25 = vld [vmem:[%s19149_s5 + $0x48] sm:$0xff]  ;;  %v627_v27 = vld [vmem:[%s19148_s19 + $0x2d0] sm:$0xff] }
 0x16c   :  { %11314 = vmatpush3.msra.mxu1 %v571_v56  ;;  %11265 = vmatprep.subr.mxu0 %v554_v57  ;;  %v500_v26 = vld [vmem:[%s19149_s5 + $0x58] sm:$0xff]  ;;  %v659_v28 = vld [vmem:[%s19148_s19 + $0x3d0] sm:$0xff]  ;;  %v497_v29 = vld [vmem:[%s19149_s5 + $0x40] sm:$0xff] }
 0x16d   :  { %11315 = vmatprep.subr.mxu1 %v586_v58  ;;  %11266 = vmatpush3.msra.mxu0 %v538_v59  ;;  %v499_v30 = vld [vmem:[%s19149_s5 + $0x50] sm:$0xff]  ;;  %v626_v33 = vld [vmem:[%s19148_s19 + $0x2c8] sm:$0xff]  ;;  %v508_v38 = vld [vmem:[%s19149_s5 + $0x98] sm:$0xff] }
 0x16e   :  { %11316 = vmatpush3.msra.mxu1 %v570_v60  ;;  %11267 = vmatprep.subr.mxu0 %v553_v61  ;;  %v611_v31 = vld [vmem:[%s19148_s19 + $0x250] sm:$0xff]  ;;  %v658_v34 = vld [vmem:[%s19148_s19 + $0x3c8] sm:$0xff]  ;;  %v625_v39 = vld [vmem:[%s19148_s19 + $0x2c0] sm:$0xff] }
 0x16f   :  { %11317 = vmatprep.subr.mxu1 %v585_v62  ;;  %11268 = vmatpush3.msra.mxu0 %v537_v63  ;;  %v643_v32 = vld [vmem:[%s19148_s19 + $0x350] sm:$0xff]  ;;  %v610_v35 = vld [vmem:[%s19148_s19 + $0x248] sm:$0xff]  ;;  %v657_v40 = vld [vmem:[%s19148_s19 + $0x3c0] sm:$0xff] }
 0x170   :  { %729 = vmatprep.mubr.f32.mxu0 %v490_v0  ;;  %11318 = vmatpush3.msra.mxu1 %v569_v1  ;;  %v642_v36 = vld [vmem:[%s19148_s19 + $0x348] sm:$0xff]  ;;  %v505_v41 = vld [vmem:[%s19149_s5 + $0x80] sm:$0xff]  ;;  %v507_v42 = vld [vmem:[%s19149_s5 + $0x90] sm:$0xff] }
 0x171   :  { %824 = vmatprep.mubr.f32.mxu1 %v492_v2  ;;  %730 = vmatmul.mubr.f32.vlgmr.msra.gmra.mxu0 %v489_v3  ;;  %v506_v37 = vld [vmem:[%s19149_s5 + $0x88] sm:$0xff]  ;;  %v609_v43 = vld [vmem:[%s19148_s19 + $0x240] sm:$0xff]  ;;  %v624_v45 = vld [vmem:[%s19148_s19 + $0x2b8] sm:$0xff] }
 0x172   :  { %825 = vmatmul.mubr.f32.vlgmr.msra.gmra.mxu1 %v491_v4  ;;  %11337 = vmatprep.subr.mxu0 %v632_v5  ;;  %v641_v44 = vld [vmem:[%s19148_s19 + $0x340] sm:$0xff]  ;;  %v656_v46 = vld [vmem:[%s19148_s19 + $0x3b8] sm:$0xff]  ;;  %v514_v49 = vld [vmem:[%s19149_s5 + $0xc8] sm:$0xff] }
 0x173   :  { %11387 = vmatprep.subr.mxu1 %v664_v6  ;;  %11338 = vmatpush3.msra.mxu0 %v616_v7  ;;  %v608_v47 = vld [vmem:[%s19148_s19 + $0x238] sm:$0xff]  ;;  %v623_v51 = vld [vmem:[%s19148_s19 + $0x2b0] sm:$0xff]  ;;  %v513_v53 = vld [vmem:[%s19149_s5 + $0xc0] sm:$0xff] }
 0x174   :  { %11388 = vmatpush3.msra.mxu1 %v648_v8  ;;  %11339 = vmatprep.subr.mxu0 %v631_v9  ;;  %v640_v48 = vld [vmem:[%s19148_s19 + $0x338] sm:$0xff]  ;;  %v655_v52 = vld [vmem:[%s19148_s19 + $0x3b0] sm:$0xff]  ;;  %v622_v57 = vld [vmem:[%s19148_s19 + $0x2a8] sm:$0xff] }
 0x175   :  { %11389 = vmatprep.subr.mxu1 %v663_v10  ;;  %11340 = vmatpush3.msra.mxu0 %v615_v11  ;;  %v516_v50 = vld [vmem:[%s19149_s5 + $0xd8] sm:$0xff]  ;;  %v515_v54 = vld [vmem:[%s19149_s5 + $0xd0] sm:$0xff]  ;;  %v654_v58 = vld [vmem:[%s19148_s19 + $0x3a8] sm:$0xff] }
 0x176   :  { %11390 = vmatpush3.msra.mxu1 %v647_v12  ;;  %11341 = vmatprep.subr.mxu0 %v630_v13  ;;  %v607_v55 = vld [vmem:[%s19148_s19 + $0x230] sm:$0xff]  ;;  %v606_v59 = vld [vmem:[%s19148_s19 + $0x228] sm:$0xff]  ;;  %v524_v62 = vld [vmem:[%s19149_s5 + $0x118] sm:$0xff] }
 0x177   :  { %11391 = vmatprep.subr.mxu1 %v662_v14  ;;  %11342 = vmatpush3.msra.mxu0 %v614_v15  ;;  %v639_v56 = vld [vmem:[%s19148_s19 + $0x330] sm:$0xff]  ;;  %v638_v60 = vld [vmem:[%s19148_s19 + $0x328] sm:$0xff]  ;;  %v621_v63 = vld [vmem:[%s19148_s19 + $0x2a0] sm:$0xff] }
 0x178   :  { %11392 = vmatpush3.msra.mxu1 %v646_v16  ;;  %11343 = vmatprep.subr.mxu0 %v629_v17  ;;  %v522_v61 = vld [vmem:[%s19149_s5 + $0x108] sm:$0xff]  ;;  %v653_v0 = vld [vmem:[%s19148_s19 + $0x3a0] sm:$0xff]  ;;  %v523_v2 = vld [vmem:[%s19149_s5 + $0x110] sm:$0xff] }
 0x179   :  { %11393 = vmatprep.subr.mxu1 %v661_v18  ;;  %11344 = vmatpush3.msra.mxu0 %v613_v19  ;;  %v521_v1 = vld [vmem:[%s19149_s5 + $0x100] sm:$0xff]  ;;  %v620_v5 = vld [vmem:[%s19148_s19 + $0x298] sm:$0xff]  ;;  %v530_v9 = vld [vmem:[%s19149_s5 + $0x148] sm:$0xff] }
 0x17a   :  { %11394 = vmatpush3.msra.mxu1 %v645_v20  ;;  %11345 = vmatprep.subr.mxu0 %v628_v21  ;;  %v605_v3 = vld [vmem:[%s19148_s19 + $0x220] sm:$0xff]  ;;  %v652_v6 = vld [vmem:[%s19148_s19 + $0x398] sm:$0xff]  ;;  %v619_v11 = vld [vmem:[%s19148_s19 + $0x290] sm:$0xff] }
 0x17b   :  { %11395 = vmatprep.subr.mxu1 %v660_v22  ;;  %11346 = vmatpush3.msra.mxu0 %v612_v23  ;;  %v637_v4 = vld [vmem:[%s19148_s19 + $0x320] sm:$0xff]  ;;  %v604_v7 = vld [vmem:[%s19148_s19 + $0x218] sm:$0xff]  ;;  %v651_v12 = vld [vmem:[%s19148_s19 + $0x390] sm:$0xff] }
 0x17c   :  { %11396 = vmatpush3.msra.mxu1 %v644_v24  ;;  %734 = vmatprep.mubr.f32.mxu0 %v498_v25  ;;  %v636_v8 = vld [vmem:[%s19148_s19 + $0x318] sm:$0xff]  ;;  %v529_v13 = vld [vmem:[%s19149_s5 + $0x140] sm:$0xff]  ;;  %v531_v14 = vld [vmem:[%s19149_s5 + $0x150] sm:$0xff] }
 0x17d   :  { %829 = vmatprep.mubr.f32.mxu1 %v500_v26  ;;  %11347 = vmatprep.subr.mxu0 %v627_v27  ;;  %v532_v10 = vld [vmem:[%s19149_s5 + $0x158] sm:$0xff]  ;;  %v603_v15 = vld [vmem:[%s19148_s19 + $0x210] sm:$0xff]  ;;  %v618_v17 = vld [vmem:[%s19148_s19 + $0x288] sm:$0xff] }
 0x17e   :  { %11397 = vmatprep.subr.mxu1 %v659_v28  ;;  %735 = vmatmul.mubr.f32.gmra.mxu0 %v497_v29  ;;  %v635_v16 = vld [vmem:[%s19148_s19 + $0x310] sm:$0xff]  ;;  %v650_v18 = vld [vmem:[%s19148_s19 + $0x388] sm:$0xff]  ;;  %v617_v21 = vld [vmem:[%s19148_s19 + $0x280] sm:$0xff] }
 0x17f   :  { %830 = vmatmul.mubr.f32.gmra.mxu1 %v499_v30  ;;  %11348 = vmatpush3.msra.mxu0 %v611_v31  ;;  %v602_v19 = vld [vmem:[%s19148_s19 + $0x208] sm:$0xff]  ;;  %v649_v22 = vld [vmem:[%s19148_s19 + $0x380] sm:$0xff]  ;;  %v496_v27 = vld [vmem:[%s19149_s5 + $0x38] sm:$0xff] }
 0x180   :  { %11398 = vmatpush3.msra.mxu1 %v643_v32  ;;  %11349 = vmatprep.subr.mxu0 %v626_v33  ;;  %v634_v20 = vld [vmem:[%s19148_s19 + $0x308] sm:$0xff]  ;;  %v601_v23 = vld [vmem:[%s19148_s19 + $0x200] sm:$0xff]  ;;  %v1131_v28 = vld [vmem:[%s19150_s21 + $0xf8] sm:$0xff] }
 0x181   :  { %11399 = vmatprep.subr.mxu1 %v658_v34  ;;  %11350 = vmatpush3.msra.mxu0 %v610_v35  ;;  %v494_v24 = vld [vmem:[%s19149_s5 + $0x28] sm:$0xff]  ;;  %v633_v25 = vld [vmem:[%s19148_s19 + $0x300] sm:$0xff]  ;;  %v1163_v29 = vld [vmem:[%s19150_s21 + $0x1f8] sm:$0xff]  ;;  %s19196_s19 = sld [smem:[#allocation70_spill]] }
 0x182   :  { %11400 = vmatpush3.msra.mxu1 %v642_v36  ;;  %739 = vmatprep.mubr.f32.mxu0 %v506_v37  ;;  %v493_v26 = vld [vmem:[%s19149_s5 + $0x20] sm:$0xff]  ;;  %v495_v30 = vld [vmem:[%s19149_s5 + $0x30] sm:$0xff]  ;;  %v1115_v31 = vld [vmem:[%s19150_s21 + $0x78] sm:$0xff] }
 0x183   :  { %834 = vmatprep.mubr.f32.mxu1 %v508_v38  ;;  %11351 = vmatprep.subr.mxu0 %v625_v39  ;;  %v1147_v32 = vld [vmem:[%s19150_s21 + $0x178] sm:$0xff]  ;;  %v1130_v33 = vld [vmem:[%s19150_s21 + $0xf0] sm:$0xff]  ;;  %v502_v35 = vld [vmem:[%s19149_s5 + $0x68] sm:$0xff] }
 0x184   :  { %11401 = vmatprep.subr.mxu1 %v657_v40  ;;  %740 = vmatmul.mubr.f32.gmra.mxu0 %v505_v41  ;;  %v1162_v34 = vld [vmem:[%s19150_s21 + $0x1f0] sm:$0xff]  ;;  %v501_v38 = vld [vmem:[%s19149_s5 + $0x60] sm:$0xff]  ;;  %v1129_v39 = vld [vmem:[%s19150_s21 + $0xe8] sm:$0xff] }
 0x185   :  { %835 = vmatmul.mubr.f32.gmra.mxu1 %v507_v42  ;;  %11352 = vmatpush3.msra.mxu0 %v609_v43  ;;  %v1114_v36 = vld [vmem:[%s19150_s21 + $0x70] sm:$0xff]  ;;  %v1161_v40 = vld [vmem:[%s19150_s21 + $0x1e8] sm:$0xff]  ;;  %v504_v41 = vld [vmem:[%s19149_s5 + $0x78] sm:$0xff] }
 0x186   :  { %11402 = vmatpush3.msra.mxu1 %v641_v44  ;;  %11353 = vmatprep.subr.mxu0 %v624_v45  ;;  %v1146_v37 = vld [vmem:[%s19150_s21 + $0x170] sm:$0xff]  ;;  %v1113_v42 = vld [vmem:[%s19150_s21 + $0x68] sm:$0xff]  ;;  %v1128_v44 = vld [vmem:[%s19150_s21 + $0xe0] sm:$0xff] }
 0x187   :  { %11403 = vmatprep.subr.mxu1 %v656_v46  ;;  %11354 = vmatpush3.msra.mxu0 %v608_v47  ;;  %v1145_v43 = vld [vmem:[%s19150_s21 + $0x168] sm:$0xff]  ;;  %v503_v45 = vld [vmem:[%s19149_s5 + $0x70] sm:$0xff]  ;;  %v1160_v46 = vld [vmem:[%s19150_s21 + $0x1e0] sm:$0xff] }
 0x188   :  { %11404 = vmatpush3.msra.mxu1 %v640_v48  ;;  %744 = vmatprep.mubr.f32.mxu0 %v514_v49  ;;  %v510_v47 = vld [vmem:[%s19149_s5 + $0xa8] sm:$0xff]  ;;  %v1112_v48 = vld [vmem:[%s19150_s21 + $0x60] sm:$0xff] }
 0x189   :  { %839 = vmatprep.mubr.f32.mxu1 %v516_v50  ;;  %11355 = vmatprep.subr.mxu0 %v623_v51  ;;  %v1144_v49 = vld [vmem:[%s19150_s21 + $0x160] sm:$0xff]  ;;  %v1127_v51 = vld [vmem:[%s19150_s21 + $0xd8] sm:$0xff] }
 0x18a   :  { %11405 = vmatprep.subr.mxu1 %v655_v52  ;;  %745 = vmatmul.mubr.f32.gmra.mxu0 %v513_v53  ;;  %v509_v50 = vld [vmem:[%s19149_s5 + $0xa0] sm:$0xff]  ;;  %v1159_v52 = vld [vmem:[%s19150_s21 + $0x1d8] sm:$0xff] }
 0x18b   :  { %840 = vmatmul.mubr.f32.gmra.mxu1 %v515_v54  ;;  %11356 = vmatpush3.msra.mxu0 %v607_v55  ;;  %v512_v53 = vld [vmem:[%s19149_s5 + $0xb8] sm:$0xff] }
 0x18c   :  { %11406 = vmatpush3.msra.mxu1 %v639_v56  ;;  %11357 = vmatprep.subr.mxu0 %v622_v57  ;;  %v1111_v54 = vld [vmem:[%s19150_s21 + $0x58] sm:$0xff]  ;;  %v1126_v56 = vld [vmem:[%s19150_s21 + $0xd0] sm:$0xff] }
 0x18d   :  { %11407 = vmatprep.subr.mxu1 %v654_v58  ;;  %11358 = vmatpush3.msra.mxu0 %v606_v59  ;;  %v1143_v55 = vld [vmem:[%s19150_s21 + $0x158] sm:$0xff]  ;;  %v511_v57 = vld [vmem:[%s19149_s5 + $0xb0] sm:$0xff]  ;;  %v518_v59 = vld [vmem:[%s19149_s5 + $0xe8] sm:$0xff] }
 0x18e   :  { %11408 = vmatpush3.msra.mxu1 %v638_v60  ;;  %749 = vmatprep.mubr.f32.mxu0 %v522_v61  ;;  %v1158_v58 = vld [vmem:[%s19150_s21 + $0x1d0] sm:$0xff] }
 0x18f   :  { %844 = vmatprep.mubr.f32.mxu1 %v524_v62  ;;  %11359 = vmatprep.subr.mxu0 %v621_v63  ;;  %v1110_v60 = vld [vmem:[%s19150_s21 + $0x50] sm:$0xff]  ;;  %v517_v62 = vld [vmem:[%s19149_s5 + $0xe0] sm:$0xff]  ;;  %v1125_v63 = vld [vmem:[%s19150_s21 + $0xc8] sm:$0xff] }
 0x190   :  { %11409 = vmatprep.subr.mxu1 %v653_v0  ;;  %750 = vmatmul.mubr.f32.gmra.mxu0 %v521_v1  ;;  %v1142_v61 = vld [vmem:[%s19150_s21 + $0x150] sm:$0xff]  ;;  %v1157_v0 = vld [vmem:[%s19150_s21 + $0x1c8] sm:$0xff]  ;;  %v520_v1 = vld [vmem:[%s19149_s5 + $0xf8] sm:$0xff] }
 0x191   :  { %845 = vmatmul.mubr.f32.gmra.mxu1 %v523_v2  ;;  %11360 = vmatpush3.msra.mxu0 %v605_v3  ;;  %v1109_v2 = vld [vmem:[%s19150_s21 + $0x48] sm:$0xff] }
 0x192   :  { %11410 = vmatpush3.msra.mxu1 %v637_v4  ;;  %11361 = vmatprep.subr.mxu0 %v620_v5  ;;  %v1141_v3 = vld [vmem:[%s19150_s21 + $0x148] sm:$0xff]  ;;  %v1124_v4 = vld [vmem:[%s19150_s21 + $0xc0] sm:$0xff]  ;;  %v519_v5 = vld [vmem:[%s19149_s5 + $0xf0] sm:$0xff] }
 0x193   :  { %11411 = vmatprep.subr.mxu1 %v652_v6  ;;  %11362 = vmatpush3.msra.mxu0 %v604_v7  ;;  %v1156_v6 = vld [vmem:[%s19150_s21 + $0x1c0] sm:$0xff]  ;;  %v526_v7 = vld [vmem:[%s19149_s5 + $0x128] sm:$0xff] }
 0x194   :  { %11412 = vmatpush3.msra.mxu1 %v636_v8  ;;  %754 = vmatprep.mubr.f32.mxu0 %v530_v9  ;;  %v1108_v8 = vld [vmem:[%s19150_s21 + $0x40] sm:$0xff] }
 0x195   :  { %849 = vmatprep.mubr.f32.mxu1 %v532_v10  ;;  %11363 = vmatprep.subr.mxu0 %v619_v11  ;;  %v1140_v9 = vld [vmem:[%s19150_s21 + $0x140] sm:$0xff]  ;;  %v1123_v11 = vld [vmem:[%s19150_s21 + $0xb8] sm:$0xff] }
 0x196   :  { %11413 = vmatprep.subr.mxu1 %v651_v12  ;;  %755 = vmatmul.mubr.f32.gmra.mxu0 %v529_v13  ;;  %v525_v10 = vld [vmem:[%s19149_s5 + $0x120] sm:$0xff]  ;;  %v1155_v12 = vld [vmem:[%s19150_s21 + $0x1b8] sm:$0xff] }
 0x197   :  { %850 = vmatmul.mubr.f32.gmra.mxu1 %v531_v14  ;;  %11364 = vmatpush3.msra.mxu0 %v603_v15  ;;  %v528_v13 = vld [vmem:[%s19149_s5 + $0x138] sm:$0xff] }
 0x198   :  { %11414 = vmatpush3.msra.mxu1 %v635_v16  ;;  %11365 = vmatprep.subr.mxu0 %v618_v17  ;;  %v1107_v14 = vld [vmem:[%s19150_s21 + $0x38] sm:$0xff]  ;;  %v1122_v16 = vld [vmem:[%s19150_s21 + $0xb0] sm:$0xff] }
 0x199   :  { %11415 = vmatprep.subr.mxu1 %v650_v18  ;;  %11366 = vmatpush3.msra.mxu0 %v602_v19  ;;  %v1139_v15 = vld [vmem:[%s19150_s21 + $0x138] sm:$0xff]  ;;  %v527_v17 = vld [vmem:[%s19149_s5 + $0x130] sm:$0xff]  ;;  %v534_v19 = vld [vmem:[%s19149_s5 + $0x168] sm:$0xff] }
 0x19a   :  { %11416 = vmatpush3.msra.mxu1 %v634_v20  ;;  %11367 = vmatprep.subr.mxu0 %v617_v21  ;;  %v1154_v18 = vld [vmem:[%s19150_s21 + $0x1b0] sm:$0xff] }
 0x19b   :  { %11417 = vmatprep.subr.mxu1 %v649_v22  ;;  %11368 = vmatpush3.msra.mxu0 %v601_v23  ;;  %v1106_v20 = vld [vmem:[%s19150_s21 + $0x30] sm:$0xff]  ;;  %v533_v22 = vld [vmem:[%s19149_s5 + $0x160] sm:$0xff]  ;;  %v1121_v23 = vld [vmem:[%s19150_s21 + $0xa8] sm:$0xff] }
 0x19c   :  { %919 = vmatprep.mubr.f32.mxu0 %v494_v24  ;;  %11418 = vmatpush3.msra.mxu1 %v633_v25  ;;  %v1138_v21 = vld [vmem:[%s19150_s21 + $0x130] sm:$0xff]  ;;  %v1153_v24 = vld [vmem:[%s19150_s21 + $0x1a8] sm:$0xff]  ;;  %v536_v25 = vld [vmem:[%s19149_s5 + $0x178] sm:$0xff] }
 0x19d   :  { %920 = vmatmul.mubr.f32.vlgmr.msra.gmra.mxu0 %v493_v26  ;;  %1014 = vmatprep.mubr.f32.mxu1 %v496_v27  ;;  %v1105_v26 = vld [vmem:[%s19150_s21 + $0x28] sm:$0xff] }
 0x19e   :  { %11437 = vmatprep.subr.mxu0 %v1131_v28  ;;  %11487 = vmatprep.subr.mxu1 %v1163_v29  ;;  %v1137_v27 = vld [vmem:[%s19150_s21 + $0x128] sm:$0xff]  ;;  %v1120_v28 = vld [vmem:[%s19150_s21 + $0xa0] sm:$0xff]  ;;  %v535_v29 = vld [vmem:[%s19149_s5 + $0x170] sm:$0xff]  ;;  %s19197_s5 = sld [smem:[#allocation65_spill]] }
 0x19f   :  { %1015 = vmatmul.mubr.f32.vlgmr.msra.gmra.mxu1 %v495_v30  ;;  %11438 = vmatpush3.msra.mxu0 %v1115_v31  ;;  %v1152_v30 = vld [vmem:[%s19150_s21 + $0x1a0] sm:$0xff] }
 0x1a0   :  { %11488 = vmatpush3.msra.mxu1 %v1147_v32  ;;  %11439 = vmatprep.subr.mxu0 %v1130_v33  ;;  %v1104_v31 = vld [vmem:[%s19150_s21 + $0x20] sm:$0xff]  ;;  %v1119_v33 = vld [vmem:[%s19150_s21 + $0x98] sm:$0xff] }
 0x1a1   :  { %11489 = vmatprep.subr.mxu1 %v1162_v34  ;;  %924 = vmatprep.mubr.f32.mxu0 %v502_v35  ;;  %v1136_v32 = vld [vmem:[%s19150_s21 + $0x120] sm:$0xff]  ;;  %v1151_v34 = vld [vmem:[%s19150_s21 + $0x198] sm:$0xff] }
 0x1a2   :  { %11440 = vmatpush3.msra.mxu0 %v1114_v36  ;;  %11490 = vmatpush3.msra.mxu1 %v1146_v37  ;;  %v1103_v35 = vld [vmem:[%s19150_s21 + $0x18] sm:$0xff]  ;;  %v1118_v37 = vld [vmem:[%s19150_s21 + $0x90] sm:$0xff] }
 0x1a3   :  { %925 = vmatmul.mubr.f32.gmra.mxu0 %v501_v38  ;;  %11441 = vmatprep.subr.mxu0 %v1129_v39  ;;  %v1135_v36 = vld [vmem:[%s19150_s21 + $0x118] sm:$0xff]  ;;  %v1150_v38 = vld [vmem:[%s19150_s21 + $0x190] sm:$0xff] }
 0x1a4   :  { %11491 = vmatprep.subr.mxu1 %v1161_v40  ;;  %1019 = vmatprep.mubr.f32.mxu1 %v504_v41  ;;  %v1102_v39 = vld [vmem:[%s19150_s21 + $0x10] sm:$0xff]  ;;  %v1117_v41 = vld [vmem:[%s19150_s21 + $0x88] sm:$0xff] }
 0x1a5   :  { %11442 = vmatpush3.msra.mxu0 %v1113_v42  ;;  %11492 = vmatpush3.msra.mxu1 %v1145_v43  ;;  %v1134_v40 = vld [vmem:[%s19150_s21 + $0x110] sm:$0xff]  ;;  %v1149_v42 = vld [vmem:[%s19150_s21 + $0x188] sm:$0xff] }
 0x1a6   :  { %11443 = vmatprep.subr.mxu0 %v1128_v44  ;;  %1020 = vmatmul.mubr.f32.gmra.mxu1 %v503_v45  ;;  %v1101_v43 = vld [vmem:[%s19150_s21 + $0x8] sm:$0xff]  ;;  %v1116_v45 = vld [vmem:[%s19150_s21 + $0x80] sm:$0xff] }
 0x1a7   :  { %11493 = vmatprep.subr.mxu1 %v1160_v46  ;;  %929 = vmatprep.mubr.f32.mxu0 %v510_v47  ;;  %v1133_v44 = vld [vmem:[%s19150_s21 + $0x108] sm:$0xff]  ;;  %v1148_v46 = vld [vmem:[%s19150_s21 + $0x180] sm:$0xff] }
 0x1a8   :  { %11444 = vmatpush3.msra.mxu0 %v1112_v48  ;;  %11494 = vmatpush3.msra.mxu1 %v1144_v49  ;;  %v1100_v47 = vld [vmem:[%s19150_s21] sm:$0xff]  ;;  %v1065_v48 = vld [vmem:[%s19151_s27 + $0x8] sm:$0xff] }
 0x1a9   :  { %930 = vmatmul.mubr.f32.gmra.mxu0 %v509_v50  ;;  %11445 = vmatprep.subr.mxu0 %v1127_v51  ;;  %v1132_v49 = vld [vmem:[%s19150_s21 + $0x100] sm:$0xff]  ;;  %v1067_v50 = vld [vmem:[%s19151_s27 + $0x18] sm:$0xff] }
 0x1aa   :  { %11495 = vmatprep.subr.mxu1 %v1159_v52  ;;  %1024 = vmatprep.mubr.f32.mxu1 %v512_v53  ;;  %v1064_v51 = vld [vmem:[%s19151_s27] sm:$0xff]  ;;  %v1066_v52 = vld [vmem:[%s19151_s27 + $0x10] sm:$0xff]  ;;  %v1195_v53 = vld [vmem:[%s19150_s21 + $0x2f8] sm:$0xff] }
 0x1ab   :  { %11446 = vmatpush3.msra.mxu0 %v1111_v54  ;;  %11496 = vmatpush3.msra.mxu1 %v1143_v55  ;;  %v1071_v54 = vld [vmem:[%s19151_s27 + $0x38] sm:$0xff] }
 0x1ac   :  { %11447 = vmatprep.subr.mxu0 %v1126_v56  ;;  %1025 = vmatmul.mubr.f32.gmra.mxu1 %v511_v57  ;;  %v1179_v55 = vld [vmem:[%s19150_s21 + $0x278] sm:$0xff]  ;;  %v1073_v56 = vld [vmem:[%s19151_s27 + $0x48] sm:$0xff]  ;;  %v1194_v57 = vld [vmem:[%s19150_s21 + $0x2f0] sm:$0xff] }
 0x1ad   :  { %11497 = vmatprep.subr.mxu1 %v1158_v58  ;;  %934 = vmatprep.mubr.f32.mxu0 %v518_v59  ;;  %v1178_v58 = vld [vmem:[%s19150_s21 + $0x270] sm:$0xff]  ;;  %v1072_v59 = vld [vmem:[%s19151_s27 + $0x40] sm:$0xff] }
 0x1ae   :  { %11448 = vmatpush3.msra.mxu0 %v1110_v60  ;;  %11498 = vmatpush3.msra.mxu1 %v1142_v61  ;;  %v1193_v60 = vld [vmem:[%s19150_s21 + $0x2e8] sm:$0xff]  ;;  %v1070_v61 = vld [vmem:[%s19151_s27 + $0x30] sm:$0xff] }
 0x1af   :  { %935 = vmatmul.mubr.f32.gmra.mxu0 %v517_v62  ;;  %11449 = vmatprep.subr.mxu0 %v1125_v63  ;;  %v1177_v62 = vld [vmem:[%s19150_s21 + $0x268] sm:$0xff] }
 0x1b0   :  { %11499 = vmatprep.subr.mxu1 %v1157_v0  ;;  %1029 = vmatprep.mubr.f32.mxu1 %v520_v1  ;;  %v1077_v63 = vld [vmem:[%s19151_s27 + $0x68] sm:$0xff]  ;;  %v1192_v0 = vld [vmem:[%s19150_s21 + $0x2e0] sm:$0xff]  ;;  %v1079_v1 = vld [vmem:[%s19151_s27 + $0x78] sm:$0xff] }
 0x1b1   :  { %11450 = vmatpush3.msra.mxu0 %v1109_v2  ;;  %11500 = vmatpush3.msra.mxu1 %v1141_v3  ;;  %v1176_v2 = vld [vmem:[%s19150_s21 + $0x260] sm:$0xff]  ;;  %v1078_v3 = vld [vmem:[%s19151_s27 + $0x70] sm:$0xff] }
 0x1b2   :  { %11451 = vmatprep.subr.mxu0 %v1124_v4  ;;  %1030 = vmatmul.mubr.f32.gmra.mxu1 %v519_v5  ;;  %v1191_v4 = vld [vmem:[%s19150_s21 + $0x2d8] sm:$0xff]  ;;  %v1076_v5 = vld [vmem:[%s19151_s27 + $0x60] sm:$0xff] }
 0x1b3   :  { %11501 = vmatprep.subr.mxu1 %v1156_v6  ;;  %939 = vmatprep.mubr.f32.mxu0 %v526_v7  ;;  %v1175_v6 = vld [vmem:[%s19150_s21 + $0x258] sm:$0xff] }
 0x1b4   :  { %11452 = vmatpush3.msra.mxu0 %v1108_v8  ;;  %11502 = vmatpush3.msra.mxu1 %v1140_v9  ;;  %v1083_v7 = vld [vmem:[%s19151_s27 + $0x98] sm:$0xff]  ;;  %v1190_v8 = vld [vmem:[%s19150_s21 + $0x2d0] sm:$0xff]  ;;  %v1085_v9 = vld [vmem:[%s19151_s27 + $0xa8] sm:$0xff] }
 0x1b5   :  { %940 = vmatmul.mubr.f32.gmra.mxu0 %v525_v10  ;;  %11453 = vmatprep.subr.mxu0 %v1123_v11  ;;  %v1174_v10 = vld [vmem:[%s19150_s21 + $0x250] sm:$0xff]  ;;  %v1084_v11 = vld [vmem:[%s19151_s27 + $0xa0] sm:$0xff] }
 0x1b6   :  { %11503 = vmatprep.subr.mxu1 %v1155_v12  ;;  %1034 = vmatprep.mubr.f32.mxu1 %v528_v13  ;;  %v1189_v12 = vld [vmem:[%s19150_s21 + $0x2c8] sm:$0xff]  ;;  %v1082_v13 = vld [vmem:[%s19151_s27 + $0x90] sm:$0xff] }
 0x1b7   :  { %11454 = vmatpush3.msra.mxu0 %v1107_v14  ;;  %11504 = vmatpush3.msra.mxu1 %v1139_v15  ;;  %v1173_v14 = vld [vmem:[%s19150_s21 + $0x248] sm:$0xff] }
 0x1b8   :  { %11455 = vmatprep.subr.mxu0 %v1122_v16  ;;  %1035 = vmatmul.mubr.f32.gmra.mxu1 %v527_v17  ;;  %v1089_v15 = vld [vmem:[%s19151_s27 + $0xc8] sm:$0xff]  ;;  %v1188_v16 = vld [vmem:[%s19150_s21 + $0x2c0] sm:$0xff]  ;;  %v1091_v17 = vld [vmem:[%s19151_s27 + $0xd8] sm:$0xff] }
 0x1b9   :  { %11505 = vmatprep.subr.mxu1 %v1154_v18  ;;  %944 = vmatprep.mubr.f32.mxu0 %v534_v19  ;;  %v1172_v18 = vld [vmem:[%s19150_s21 + $0x240] sm:$0xff]  ;;  %v1090_v19 = vld [vmem:[%s19151_s27 + $0xd0] sm:$0xff] }
 0x1ba   :  { %11456 = vmatpush3.msra.mxu0 %v1106_v20  ;;  %11506 = vmatpush3.msra.mxu1 %v1138_v21  ;;  %v1187_v20 = vld [vmem:[%s19150_s21 + $0x2b8] sm:$0xff]  ;;  %v1088_v21 = vld [vmem:[%s19151_s27 + $0xc0] sm:$0xff] }
 0x1bb   :  { %945 = vmatmul.mubr.f32.gmra.mxu0 %v533_v22  ;;  %11457 = vmatprep.subr.mxu0 %v1121_v23  ;;  %v1171_v22 = vld [vmem:[%s19150_s21 + $0x238] sm:$0xff] }
 0x1bc   :  { %11507 = vmatprep.subr.mxu1 %v1153_v24  ;;  %1039 = vmatprep.mubr.f32.mxu1 %v536_v25  ;;  %v1095_v23 = vld [vmem:[%s19151_s27 + $0xf8] sm:$0xff]  ;;  %v1186_v24 = vld [vmem:[%s19150_s21 + $0x2b0] sm:$0xff]  ;;  %v1097_v25 = vld [vmem:[%s19151_s27 + $0x108] sm:$0xff] }
 0x1bd   :  { %11458 = vmatpush3.msra.mxu0 %v1105_v26  ;;  %11508 = vmatpush3.msra.mxu1 %v1137_v27  ;;  %v1170_v26 = vld [vmem:[%s19150_s21 + $0x230] sm:$0xff]  ;;  %v1096_v27 = vld [vmem:[%s19151_s27 + $0x100] sm:$0xff] }
 0x1be   :  { %11459 = vmatprep.subr.mxu0 %v1120_v28  ;;  %1040 = vmatmul.mubr.f32.gmra.mxu1 %v535_v29  ;;  %v1185_v28 = vld [vmem:[%s19150_s21 + $0x2a8] sm:$0xff]  ;;  %v1094_v29 = vld [vmem:[%s19151_s27 + $0xf0] sm:$0xff] }
 0x1bf   :  { %11509 = vmatprep.subr.mxu1 %v1152_v30  ;;  %11460 = vmatpush3.msra.mxu0 %v1104_v31  ;;  %v1169_v30 = vld [vmem:[%s19150_s21 + $0x228] sm:$0xff] }
 0x1c0   :  { %11510 = vmatpush3.msra.mxu1 %v1136_v32  ;;  %11461 = vmatprep.subr.mxu0 %v1119_v33  ;;  %v1069_v31 = vld [vmem:[%s19151_s27 + $0x28] sm:$0xff]  ;;  %v1184_v32 = vld [vmem:[%s19150_s21 + $0x2a0] sm:$0xff] }
 0x1c1   :  { %11511 = vmatprep.subr.mxu1 %v1151_v34  ;;  %11462 = vmatpush3.msra.mxu0 %v1103_v35  ;;  %v1168_v33 = vld [vmem:[%s19150_s21 + $0x220] sm:$0xff]  ;;  %v1183_v34 = vld [vmem:[%s19150_s21 + $0x298] sm:$0xff] }
 0x1c2   :  { %11512 = vmatpush3.msra.mxu1 %v1135_v36  ;;  %11463 = vmatprep.subr.mxu0 %v1118_v37  ;;  %v1167_v35 = vld [vmem:[%s19150_s21 + $0x218] sm:$0xff]  ;;  %v1182_v36 = vld [vmem:[%s19150_s21 + $0x290] sm:$0xff] }
 0x1c3   :  { %11513 = vmatprep.subr.mxu1 %v1150_v38  ;;  %11464 = vmatpush3.msra.mxu0 %v1102_v39  ;;  %v1166_v37 = vld [vmem:[%s19150_s21 + $0x210] sm:$0xff]  ;;  %v1181_v38 = vld [vmem:[%s19150_s21 + $0x288] sm:$0xff] }
 0x1c4   :  { %11514 = vmatpush3.msra.mxu1 %v1134_v40  ;;  %11465 = vmatprep.subr.mxu0 %v1117_v41  ;;  %v1165_v39 = vld [vmem:[%s19150_s21 + $0x208] sm:$0xff]  ;;  %v1180_v40 = vld [vmem:[%s19150_s21 + $0x280] sm:$0xff] }
 0x1c5   :  { %11515 = vmatprep.subr.mxu1 %v1149_v42  ;;  %11466 = vmatpush3.msra.mxu0 %v1101_v43  ;;  %v1164_v41 = vld [vmem:[%s19150_s21 + $0x200] sm:$0xff]  ;;  %v1075_v43 = vld [vmem:[%s19151_s27 + $0x58] sm:$0xff]  ;;  %s19198_s21 = sld [smem:[#allocation66_spill]] }
 0x1c6   :  { %11516 = vmatpush3.msra.mxu1 %v1133_v44  ;;  %11467 = vmatprep.subr.mxu0 %v1116_v45  ;;  %v1068_v42 = vld [vmem:[%s19151_s27 + $0x20] sm:$0xff]  ;;  %v1074_v44 = vld [vmem:[%s19151_s27 + $0x50] sm:$0xff]  ;;  %v1081_v45 = vld [vmem:[%s19151_s27 + $0x88] sm:$0xff] }
 0x1c7   :  { %11517 = vmatprep.subr.mxu1 %v1148_v46  ;;  %11468 = vmatpush3.msra.mxu0 %v1100_v47  ;;  %v1080_v46 = vld [vmem:[%s19151_s27 + $0x80] sm:$0xff]  ;;  %v1087_v47 = vld [vmem:[%s19151_s27 + $0xb8] sm:$0xff] }
 0x1c8   :  { %1260 = vmatprep.mubr.f32.mxu0 %v1065_v48  ;;  %11518 = vmatpush3.msra.mxu1 %v1132_v49  ;;  %v1086_v48 = vld [vmem:[%s19151_s27 + $0xb0] sm:$0xff]  ;;  %v1093_v49 = vld [vmem:[%s19151_s27 + $0xe8] sm:$0xff] }
 0x1c9   :  { %1355 = vmatprep.mubr.f32.mxu1 %v1067_v50  ;;  %1261 = vmatmul.mubr.f32.vlgmr.msra.gmra.mxu0 %v1064_v51  ;;  %v1092_v50 = vld [vmem:[%s19151_s27 + $0xe0] sm:$0xff]  ;;  %v1099_v51 = vld [vmem:[%s19151_s27 + $0x118] sm:$0xff] }
 0x1ca   :  { %1356 = vmatmul.mubr.f32.vlgmr.msra.gmra.mxu1 %v1066_v52  ;;  %11537 = vmatprep.subr.mxu0 %v1195_v53  ;;  %v1098_v52 = vld [vmem:[%s19151_s27 + $0x110] sm:$0xff]  ;;  %v1527_v53 = vld [vmem:[%s19152_s28 + $0x78] sm:$0xff]  ;;  %s19199_s27 = sld [smem:[#allocation71_spill]] }
 0x1cb   :  { %1265 = vmatprep.mubr.f32.mxu0 %v1071_v54  ;;  %11538 = vmatpush3.msra.mxu0 %v1179_v55  ;;  %v1526_v54 = vld [vmem:[%s19152_s28 + $0x70] sm:$0xff]  ;;  %v1525_v55 = vld [vmem:[%s19152_s28 + $0x68] sm:$0xff] }
 0x1cc   :  { %1360 = vmatprep.mubr.f32.mxu1 %v1073_v56  ;;  %11539 = vmatprep.subr.mxu0 %v1194_v57  ;;  %v1524_v56 = vld [vmem:[%s19152_s28 + $0x60] sm:$0xff]  ;;  %v1523_v57 = vld [vmem:[%s19152_s28 + $0x58] sm:$0xff] }
 0x1cd   :  { %11540 = vmatpush3.msra.mxu0 %v1178_v58  ;;  %1575 = vmatprep.subr.mxu1 %v1527_v53  ;;  %v1522_v58 = vld [vmem:[%s19152_s28 + $0x50] sm:$0xff] }
 0x1ce   :  { %1361 = vmatmul.mubr.f32.gmra.mxu1 %v1072_v59  ;;  %11541 = vmatprep.subr.mxu0 %v1193_v60  ;;  %v1521_v59 = vld [vmem:[%s19152_s28 + $0x48] sm:$0xff]  ;;  %v1520_v60 = vld [vmem:[%s19152_s28 + $0x40] sm:$0xff] }
 0x1cf   :  { %1266 = vmatmul.mubr.f32.gmra.mxu0 %v1070_v61  ;;  %1365 = vmatprep.mubr.f32.mxu1 %v1079_v1  ;;  %v18916_v61 = vmov 0.0   ;;  %v1516_v1 = vld [vmem:[%s19152_s28 + $0x20] sm:$0xff] }
 0x1d0   :  { %11542 = vmatpush3.msra.mxu0 %v1177_v62  ;;  %1270 = vmatprep.mubr.f32.mxu0 %v1077_v63  ;;  %v1519_v62 = vld [vmem:[%s19152_s28 + $0x38] sm:$0xff]  ;;  %v1518_v63 = vld [vmem:[%s19152_s28 + $0x30] sm:$0xff] }
 0x1d1   :  { %11543 = vmatprep.subr.mxu0 %v1192_v0  ;;  %1576 = vmatpush1.msra.mxu1 %v1526_v54  ;;  %v1517_v0 = vld [vmem:[%s19152_s28 + $0x28] sm:$0xff] }
 0x1d2   :  { %11544 = vmatpush3.msra.mxu0 %v1176_v2  ;;  %1366 = vmatmul.mubr.f32.gmra.mxu1 %v1078_v3  ;;  %v1515_v2 = vld [vmem:[%s19152_s28 + $0x18] sm:$0xff]  ;;  %v1514_v3 = vld [vmem:[%s19152_s28 + $0x10] sm:$0xff] }
 0x1d3   :  { %11545 = vmatprep.subr.mxu0 %v1191_v4  ;;  %1271 = vmatmul.mubr.f32.gmra.mxu0 %v1076_v5  ;;  %v1513_v4 = vld [vmem:[%s19152_s28 + $0x8] sm:$0xff]  ;;  %v1512_v5 = vld [vmem:[%s19152_s28] sm:$0xff]  ;;  %s19200_s28 = sld [smem:[#allocation68_spill]] }
 0x1d4   :  { %11546 = vmatpush3.msra.mxu0 %v1175_v6  ;;  %1275 = vmatprep.mubr.f32.mxu0 %v1083_v7 }
 0x1d5   :  { %11547 = vmatprep.subr.mxu0 %v1190_v8  ;;  %1370 = vmatprep.mubr.f32.mxu1 %v1085_v9 }
 0x1d6   :  { %11548 = vmatpush3.msra.mxu0 %v1174_v10  ;;  %1371 = vmatmul.mubr.f32.gmra.mxu1 %v1084_v11 }
 0x1d7   :  { %11549 = vmatprep.subr.mxu0 %v1189_v12  ;;  %1276 = vmatmul.mubr.f32.gmra.mxu0 %v1082_v13 }
 0x1d8   :  { %11550 = vmatpush3.msra.mxu0 %v1173_v14  ;;  %1280 = vmatprep.mubr.f32.mxu0 %v1089_v15 }
 0x1d9   :  { %11551 = vmatprep.subr.mxu0 %v1188_v16  ;;  %1375 = vmatprep.mubr.f32.mxu1 %v1091_v17 }
 0x1da   :  { %11552 = vmatpush3.msra.mxu0 %v1172_v18  ;;  %1376 = vmatmul.mubr.f32.gmra.mxu1 %v1090_v19 }
 0x1db   :  { %11553 = vmatprep.subr.mxu0 %v1187_v20  ;;  %1281 = vmatmul.mubr.f32.gmra.mxu0 %v1088_v21 }
 0x1dc   :  { %11554 = vmatpush3.msra.mxu0 %v1171_v22  ;;  %1285 = vmatprep.mubr.f32.mxu0 %v1095_v23 }
 0x1dd   :  { %11555 = vmatprep.subr.mxu0 %v1186_v24  ;;  %1380 = vmatprep.mubr.f32.mxu1 %v1097_v25 }
 0x1de   :  { %11556 = vmatpush3.msra.mxu0 %v1170_v26  ;;  %1381 = vmatmul.mubr.f32.gmra.mxu1 %v1096_v27 }
 0x1df   :  { %11557 = vmatprep.subr.mxu0 %v1185_v28  ;;  %1286 = vmatmul.mubr.f32.gmra.mxu0 %v1094_v29 }
 0x1e0   :  { %11558 = vmatpush3.msra.mxu0 %v1169_v30  ;;  %1450 = vmatprep.mubr.f32.mxu0 %v1069_v31 }
 0x1e1   :  { %11559 = vmatprep.subr.mxu0 %v1184_v32  ;;  %1577 = vmatprep.subr.mxu1 %v1525_v55 }
 0x1e2   :  { %11560 = vmatpush3.msra.mxu0 %v1168_v33  ;;  %1578 = vmatpush1.msra.mxu1 %v1524_v56 }
 0x1e3   :  { %11561 = vmatprep.subr.mxu0 %v1183_v34  ;;  %1579 = vmatprep.subr.mxu1 %v1523_v57 }
 0x1e4   :  { %11562 = vmatpush3.msra.mxu0 %v1167_v35  ;;  %1580 = vmatpush1.msra.mxu1 %v1522_v58 }
 0x1e5   :  { %11563 = vmatprep.subr.mxu0 %v1182_v36  ;;  %1581 = vmatprep.subr.mxu1 %v1521_v59 }
 0x1e6   :  { %11564 = vmatpush3.msra.mxu0 %v1166_v37  ;;  %1623 = vmatprep.mubr.f32.mxu1 %v18916_v61 }
 0x1e7   :  { %11565 = vmatprep.subr.mxu0 %v1181_v38  ;;  %1582 = vmatpush1.msra.mxu1 %v1520_v60 }
 0x1e8   :  { %11566 = vmatpush3.msra.mxu0 %v1165_v39  ;;  %1583 = vmatprep.subr.mxu1 %v1519_v62 }
 0x1e9   :  { %11567 = vmatprep.subr.mxu0 %v1180_v40  ;;  %1584 = vmatpush1.msra.mxu1 %v1518_v63 }
 0x1ea   :  { %11568 = vmatpush3.msra.mxu0 %v1164_v41  ;;  %1585 = vmatprep.subr.mxu1 %v1517_v0 }
 0x1eb   :  { %1451 = vmatmul.mubr.f32.vlgmr.msra.gmra.mxu0 %v1068_v42  ;;  %1586 = vmatpush1.msra.mxu1 %v1516_v1 }
 0x1ec   :  { %1455 = vmatprep.mubr.f32.mxu0 %v1075_v43  ;;  %1587 = vmatprep.subr.mxu1 %v1515_v2 }
 0x1ed   :  { %1588 = vmatpush1.msra.mxu1 %v1514_v3 }
 0x1ee   :  { %1589 = vmatprep.subr.mxu1 %v1513_v4 }
 0x1ef   :  { %1456 = vmatmul.mubr.f32.gmra.mxu0 %v1074_v44  ;;  %1590 = vmatpush1.msra.mxu1 %v1512_v5 }
 0x1f0   :  { %1460 = vmatprep.mubr.f32.mxu0 %v1081_v45 }
 0x1f3   :  { %1461 = vmatmul.mubr.f32.gmra.mxu0 %v1080_v46 }
 0x1f4   :  { %1465 = vmatprep.mubr.f32.mxu0 %v1087_v47 }
 0x1f7   :  { %1466 = vmatmul.mubr.f32.gmra.mxu0 %v1086_v48 }
 0x1f8   :  { %1470 = vmatprep.mubr.f32.mxu0 %v1093_v49 }
 0x1fb   :  { %1471 = vmatmul.mubr.f32.gmra.mxu0 %v1092_v50 }
 0x1fc   :  { %1475 = vmatprep.mubr.f32.mxu0 %v1099_v51 }
 0x1ff   :  { %1476 = vmatmul.mubr.f32.gmra.mxu0 %v1098_v52 }
 0x231   :  { %v11269_v6 = vpop.f32.mrf.mxu0 }
 0x232   :  { %v11319_v7 = vpop.f32.mrf.mxu1 }
 0x233   :  { %v11270_v8 = vpop.f32.mrf.mxu0 }
 0x234   :  { %v11320_v9 = vpop.f32.mrf.mxu1  ;;  %v11271_v4 = vadd.f32 %v11270_v8, %v11269_v6 }
 0x235   :  { %v11321_v5 = vadd.f32 %v11320_v9, %v11319_v7 }
 0x23e   :  { %v14616_v10 = vpop.f32.mrf.mxu0 }
 0x23f   :  { %v14618_v11 = vpop.f32.mrf.mxu1 }
 0x240   :  { %v11273_v12 = vpop.f32.mrf.mxu0 }
 0x241   :  { %v11323_v13 = vpop.f32.mrf.mxu1 }
 0x244   :  { %v14620_v14 = vpop.f32.mrf.mxu0 }
 0x245   :  { %v14622_v15 = vpop.f32.mrf.mxu1 }
 0x246   :  { %v11276_v16 = vpop.f32.mrf.mxu0 }
 0x247   :  { %v11326_v17 = vpop.f32.mrf.mxu1 }
 0x24a   :  { %v14624_v18 = vpop.f32.mrf.mxu0 }
 0x24b   :  { %v14626_v19 = vpop.f32.mrf.mxu1 }
 0x24c   :  { %v14628_v20 = vpop.f32.mrf.mxu0 }
 0x24d   :  { %v14630_v21 = vpop.f32.mrf.mxu1 }
 0x250   :  { %v14632_v22 = vpop.f32.mrf.mxu0 }
 0x251   :  { %v14636_v24 = vpop.f32.mrf.mxu1 }
 0x252   :  { %v14634_v23 = vpop.f32.mrf.mxu0 }
 0x253   :  { %v14640_v26 = vpop.f32.mrf.mxu1 }
 0x256   :  { %v14638_v25 = vpop.f32.mrf.mxu0 }
 0x257   :  { %v14644_v28 = vpop.f32.mrf.mxu1 }
 0x258   :  { %v14642_v27 = vpop.f32.mrf.mxu0 }
 0x259   :  { %v14646_v30 = vpop.f32.mrf.mxu1 }
 0x25d   :  { %v11369_v29 = vpop.f32.mrf.mxu0 }
 0x25f   :  { %v11370_v31 = vpop.f32.mrf.mxu0  ;;  %v11419_v32 = vpop.f32.mrf.mxu1 }
 0x261   :  { %v11420_v34 = vpop.f32.mrf.mxu1 }
 0x262   :  { %v11421_v7 = vadd.f32 %v11420_v34, %v11419_v32  ;;  %v483_v32 = vld [vmem:[%s19163_s1] sm:$0xff] }
 0x263   :  { %v11372_v33 = vpop.f32.mrf.mxu0 }
 0x265   :  { %v11373_v35 = vpop.f32.mrf.mxu0 }
 0x266   :  { %v11422_v36 = vpop.f32.mrf.mxu1  ;;  %v11374_v8 = vadd.f32 %v11373_v35, %v11372_v33 }
 0x268   :  { %v11423_v38 = vpop.f32.mrf.mxu1 }
 0x269   :  { %v11375_v37 = vpop.f32.mrf.mxu0 }
 0x26b   :  { %v11376_v39 = vpop.f32.mrf.mxu0 }
 0x26c   :  { %v11425_v40 = vpop.f32.mrf.mxu1  ;;  %v11377_v9 = vadd.f32 %v11376_v39, %v11375_v37 }
 0x26e   :  { %v11426_v42 = vpop.f32.mrf.mxu1 }
 0x26f   :  { %v11378_v41 = vpop.f32.mrf.mxu0  ;;  %v11427_v34 = vadd.f32 %v11426_v42, %v11425_v40  ;;  %v484_v42 = vld [vmem:[%s19163_s1 + $0x8] sm:$0xff] }
 0x271   :  { %v11379_v43 = vpop.f32.mrf.mxu0 }
 0x272   :  { %v14648_v44 = vpop.f32.mrf.mxu1 }
 0x274   :  { %v14652_v46 = vpop.f32.mrf.mxu1 }
 0x275   :  { %v14650_v45 = vpop.f32.mrf.mxu0 }
 0x277   :  { %v14654_v47 = vpop.f32.mrf.mxu0 }
 0x278   :  { %v14656_v48 = vpop.f32.mrf.mxu1 }
 0x279   :  { %19153 = vst [vmem:[#allocation88_spill] sm:$0xff] %v14656_v48 }
 0x27a   :  { %v14660_v50 = vpop.f32.mrf.mxu1 }
 0x27b   :  { %v14658_v49 = vpop.f32.mrf.mxu0  ;;  %19155 = vst [vmem:[#allocation90_spill] sm:$0xff] %v14660_v50  ;;  %v11324_v50 = vadd.f32 %v11323_v13, %v14618_v11 }
 0x27c   :  { %19154 = vst [vmem:[#allocation89_spill] sm:$0xff] %v14658_v49  ;;  %v11274_v49 = vadd.f32 %v11273_v12, %v14616_v10  ;;  %v14694_v12 = vstv %s19162_s29  ;;  %s19201_s29 = sld [smem:[#allocation73_spill]] }
 0x27d   :  { %v14662_v51 = vpop.f32.mrf.mxu0 }
 0x27e   :  { %19156 = vst [vmem:[#allocation91_spill] sm:$0xff] %v14662_v51  ;;  %v14664_v52 = vpop.f32.mrf.mxu1  ;;  %v827_v51 = vadd.f32 %v11321_v5, %v11271_v4 }
 0x27f   :  { %19157 = vst [vmem:[#allocation92_spill] sm:$0xff] %v14664_v52 }
 0x280   :  { %v14666_v55 = vpop.f32.mrf.mxu1 }
 0x281   :  { %19158 = vst [vmem:[#allocation93_spill] sm:$0xff] %v14666_v55  ;;  %v11371_v55 = vadd.f32 %v11370_v31, %v11369_v29  ;;  %v832_v31 = vadd.f32 %v11324_v50, %v11274_v49 }
 0x283   :  { %v922_v6 = vadd.f32 %v11371_v55, %v827_v51  ;;  %v19165_v51 = vmov 0.0  }
 0x285   :  { %v1017_v13 = vadd.f32 %v11421_v7, %v922_v6 }
 0x289   :  { %v11469_v53 = vpop.f32.mrf.mxu0 }
 0x28a   :  { %v11519_v57 = vpop.f32.mrf.mxu1 }
 0x28b   :  { %v11470_v54 = vpop.f32.mrf.mxu0 }
 0x28c   :  { %v11520_v60 = vpop.f32.mrf.mxu1  ;;  %v11471_v37 = vadd.f32 %v11470_v54, %v11469_v53  ;;  %v14714_v54 = vld [vmem:[%s19164_s2] ss:$0 sm:$0xff]  ;;  %s19203_s2 = sld [smem:[#allocation72_spill]] }
 0x28d   :  { %v11521_v39 = vadd.f32 %v11520_v60, %v11519_v57 }
 0x28e   :  { %v11522_v63 = vpop.f32.mrf.mxu1 }
 0x28f   :  { %v11472_v56 = vpop.f32.mrf.mxu0 }
 0x290   :  { %v11523_v2 = vpop.f32.mrf.mxu1 }
 0x291   :  { %v11473_v58 = vpop.f32.mrf.mxu0 }
 0x292   :  { %v14678_v61 = vpop.f32.mrf.mxu1 }
 0x293   :  { %v14668_v59 = vpop.f32.mrf.mxu0 }
 0x294   :  { %v11526_v48 = vpop.f32.mrf.mxu1 }
 0x295   :  { %v14670_v62 = vpop.f32.mrf.mxu0 }
 0x296   :  { %19159 = vst [vmem:[#allocation94_spill] sm:$0xff] %v14670_v62  ;;  %v11327_v62 = vadd.f32 %v11326_v17, %v14622_v15  ;;  %v14688_v4 = vpop.f32.mrf.mxu1  ;;  %v11280_v15 = vadd.f32 %v14628_v20, %v14624_v18  ;;  %v11330_v17 = vadd.f32 %v14630_v21, %v14626_v19  ;;  %v11283_v18 = vadd.f32 %v14634_v23, %v14632_v22 }
 0x297   :  { %v14672_v0 = vpop.f32.mrf.mxu0  ;;  %v11333_v19 = vadd.f32 %v14640_v26, %v14636_v24  ;;  %v1045_v20 = vadd.f32 %v1017_v13, %v483_v32  ;;  %v11474_v22 = vadd.f32 %v11473_v58, %v11472_v56  ;;  %v11524_v23 = vadd.f32 %v11523_v2, %v11522_v63  ;;  %v485_v24 = vld [vmem:[%s19163_s1 + $0x10] sm:$0xff]  ;;  %v14736_v2 = vld [vmem:[%s19166_s10] ss:$0 sm:$0xff]  ;;  %s19204_s10 = sld [smem:[#allocation42_spill]] }
 0x298   :  { %19160 = vst [vmem:[#allocation95_spill] sm:$0xff] %v14672_v0  ;;  %v18918_v0 = vlaneseq  ;;  %v11529_v49 = vpop.f32.mrf.mxu1  ;;  %v842_v40 = vadd.f32 %v11330_v17, %v11280_v15  ;;  %v11286_v63 = vadd.f32 %v14642_v27, %v14638_v25  ;;  %v19168_v25 = vld [vmem:[#allocation88_spill] sm:$0xff]  ;;  %v19169_v27 = vld [vmem:[#allocation90_spill] sm:$0xff] }
 0x299   :  { %v14674_v1 = vpop.f32.mrf.mxu0  ;;  %v847_v7 = vadd.f32 %v11333_v19, %v11283_v18  ;;  %v1058_v56 = vadd.f32 %v14714_v54, %v1045_v20  ;;  %v11433_v32 = vadd.f32 %v19169_v27, %v19168_v25 }
 0x29a   :  { %19161 = vst [vmem:[#allocation96_spill] sm:$0xff] %v14674_v1  ;;  %v11277_v1 = vadd.f32 %v11276_v16, %v14620_v14  ;;  %v14691_v10 = vshrl.u32 %v18918_v0, 7  ;;  %v927_v14 = vadd.f32 %v11374_v8, %v832_v31  ;;  %v11424_v16 = vadd.f32 %v11423_v38, %v11422_v36  ;;  %v11531_v57 = vpop.f32.mrf.mxu1 }
 0x29b   :  { %v14676_v3 = vpop.f32.mrf.mxu0  ;;  %v11380_v36 = vadd.f32 %v11379_v43, %v11378_v41  ;;  %v1358_v43 = vadd.f32 %v11521_v39, %v11471_v37 }
 0x29c   :  { %v837_v11 = vadd.f32 %v11327_v62, %v11277_v1  ;;  %vm466_vm0 = vcmp.lt.s32.totalorder %v14691_v10, %v14694_v12  ;;  %v1022_v21 = vadd.f32 %v11424_v16, %v927_v14  ;;  %v14717_v41 = vadd.s32 8, %v14691_v10  ;;  %v11532_v13 = vpop.f32.mrf.mxu1 }
 0x29d   :  { %v14680_v52 = vpop.f32.mrf.mxu0  ;;  %v14711_v53 = vsel %vm466_vm0, 1.0, %v19165_v51  ;;  %v937_v26 = vadd.f32 %v11380_v36, %v842_v40  ;;  %v11430_v62 = vadd.f32 %v14652_v46, %v14648_v44  ;;  %v11383_v1 = vadd.f32 %v14654_v47, %v14650_v45  ;;  %v19167_v46 = vld [vmem:[#allocation94_spill] sm:$0xff] }
 0x29e   :  { %v932_v33 = vadd.f32 %v11377_v9, %v837_v11  ;;  %v14725_v6 = vadd.s32 16, %v14691_v10  ;;  %v1046_v8 = vadd.f32 %v1022_v21, %v484_v42  ;;  %v11336_v44 = vadd.f32 %v14646_v30, %v14644_v28  ;;  %v19171_v28 = vld [vmem:[#allocation91_spill] sm:$0xff]  ;;  %v11534_v40 = vpop.f32.mrf.mxu1 }
 0x29f   :  { %v14686_v29 = vpop.f32.mrf.mxu0  ;;  %v11477_v45 = vadd.f32 %v19167_v46, %v14668_v59  ;;  %v11527_v47 = vadd.f32 %v11526_v48, %v14678_v61  ;;  %v1363_v11 = vadd.f32 %v11524_v23, %v11474_v22  ;;  %v1032_v15 = vadd.f32 %v11430_v62, %v937_v26  ;;  %v486_v59 = vld [vmem:[%s19163_s1 + $0x18] sm:$0xff]  ;;  %v487_v26 = vld [vmem:[%s19163_s1 + $0x20] sm:$0xff] }
 0x2a0   :  { %v1027_v50 = vadd.f32 %v11427_v34, %v932_v33  ;;  %v942_v17 = vadd.f32 %v11383_v1, %v847_v7  ;;  %v19170_v33 = vld [vmem:[#allocation89_spill] sm:$0xff]  ;;  %v1059_v48 = vadd.f32 %v14714_v54, %v1046_v8  ;;  %vm467_vm2 = vcmp.lt.s32.totalorder %v14717_v41, %v14694_v12  ;;  %v19172_v19 = vld [vmem:[#allocation95_spill] sm:$0xff]  ;;  %v19174_v62 = vld [vmem:[#allocation92_spill] sm:$0xff] }
 0x2a1   :  { %v14701_v35 = vpop.f32.mrf.mxu0  ;;  %v11386_v30 = vadd.f32 %v19171_v28, %v19170_v33  ;;  %v852_v39 = vadd.f32 %v11336_v44, %v11286_v63  ;;  %v1368_v36 = vadd.f32 %v11527_v47, %v11477_v45  ;;  %vm468_vm3 = vcmp.lt.s32.totalorder %v14725_v6, %v14694_v12  ;;  %v19173_v20 = vld [vmem:[#allocation96_spill] sm:$0xff]  ;;  %v11535_v45 = vpop.f32.mrf.mxu1 }
 0x2a2   :  { %v1047_v31 = vadd.f32 %v1027_v50, %v485_v24  ;;  %v11480_v21 = vadd.f32 %v19173_v20, %v19172_v19  ;;  %v1037_v22 = vadd.f32 %v11433_v32, %v942_v17  ;;  %v11483_v8 = vadd.f32 %v14680_v52, %v14676_v3  ;;  %v488_v17 = vld [vmem:[%s19163_s1 + $0x28] sm:$0xff]  ;;  %s19202_s1 = sld [smem:[#allocation61_spill]] }
 0x2a3   :  { %v947_v23 = vadd.f32 %v11386_v30, %v852_v39  ;;  %v14766_v63 = vsel %vm467_vm2, 1.0, %v19165_v51  ;;  %v14769_v44 = vadd.s32 24, %v14691_v10  ;;  %v11536_v27 = vadd.f32 %v11535_v45, %v11534_v40 }
 0x2a4   :  { %v1049_v52 = vadd.f32 %v1037_v22, %v487_v26  ;;  %v14789_v33 = vadd.s32 32, %v14691_v10  ;;  %v11486_v28 = vadd.f32 %v14701_v35, %v14686_v29  ;;  %v14807_v35 = vadd.s32 40, %v14691_v10 }
 0x2a5   :  { %vm469_vm4 = vcmp.lt.s32.totalorder %v14769_v44, %v14694_v12  ;;  %vm2793_vm0 = vcmask 261120  }
 0x2a6   :  { %v14802_v29 = vsel %vm469_vm4, 1.0, %v19165_v51  ;;  %vm470_vm5 = vcmp.lt.s32.totalorder %v14789_v33, %v14694_v12  ;;  %v1383_v19 = vadd.f32 %v11536_v27, %v11486_v28  ;;  %vm471_vm6 = vcmp.lt.s32.totalorder %v14807_v35, %v14694_v12 }
 0x2a7   :  { %v14818_v22 = vsel %vm470_vm5, 1.0, %v19165_v51  ;;  %v14830_v26 = vsel %vm471_vm6, 1.0, %v19165_v51 }
 0x2ab   :  { %v11569_v38 = vpop.f32.mrf.mxu0 }
 0x2ad   :  { %v11570_v55 = vpop.f32.mrf.mxu0 }
 0x2ae   :  { %v11571_v60 = vadd.f32 %v11570_v55, %v11569_v38  ;;  %v11530_v38 = vadd.f32 %v11529_v49, %v14688_v4  ;;  %v19175_v4 = vld [vmem:[#allocation93_spill] sm:$0xff] }
 0x2af   :  { %v11572_v5 = vpop.f32.mrf.mxu0  ;;  %v11436_v49 = vadd.f32 %v19175_v4, %v19174_v62 }
 0x2b0   :  { %v1453_v58 = vadd.f32 %v11571_v60, %v1358_v43  ;;  %v1048_v43 = vadd.f32 %v1032_v15, %v486_v59  ;;  %v1060_v60 = vadd.f32 %v14714_v54, %v1047_v31  ;;  %v1373_v46 = vadd.f32 %v11530_v38, %v11480_v21 }
 0x2b1   :  { %v11573_v9 = vpop.f32.mrf.mxu0 }
 0x2b2   :  { %v1481_v14 = vadd.f32 %v1453_v58, %v1058_v56  ;;  %v11574_v16 = vadd.f32 %v11573_v9, %v11572_v5  ;;  %v11533_v56 = vadd.f32 %v11532_v13, %v11531_v57  ;;  %v1061_v3 = vadd.f32 %v14714_v54, %v1048_v43 }
 0x2b3   :  { %v11575_v34 = vpop.f32.mrf.mxu0  ;;  %v1042_v13 = vadd.f32 %v11436_v49, %v947_v23  ;;  %v1528_v49 = vld [vmem:[%s19176_s4] sm:$0x3]  ;;  %s10706_s4 = sld [smem:[#allocation4 + $0x1]] }
 0x2b4   :  { %v1494_v61 = vadd.f32 %v14736_v2, %v1481_v14  ;;  %v1458_v37 = vadd.f32 %v11574_v16, %v1363_v11  ;;  %v14779_v11 = vsel %vm468_vm3, 1.0, %v19165_v51  ;;  %v1378_v25 = vadd.f32 %v11533_v56, %v11483_v8 }
 0x2b5   :  { %v11576_v18 = vpop.f32.mrf.mxu0 }
 0x2b6   :  { %v1500_v42 = vmul.f32 8.0, %v1494_v61  ;;  %v1482_v50 = vadd.f32 %v1458_v37, %v1059_v48  ;;  %v11577_v55 = vadd.f32 %v11576_v18, %v11575_v34  ;;  %v1062_v61 = vadd.f32 %v14714_v54, %v1049_v52 }
 0x2b7   :  { %v11578_v24 = vpop.f32.mrf.mxu0  ;;  %v1050_v37 = vadd.f32 %v1042_v13, %v488_v17 }
 0x2b8   :  { %v14757_v1 = vmul.f32 %v1500_v42, %v14711_v53  ;;  %v1495_v5 = vadd.f32 %v14736_v2, %v1482_v50  ;;  %v1463_v7 = vadd.f32 %v11577_v55, %v1368_v36 }
 0x2b9   :  { %v11579_v58 = vpop.f32.mrf.mxu0  ;;  %v1063_v50 = vadd.f32 %v14714_v54, %v1050_v37 }
 0x2ba   :  { %v1501_v47 = vmul.f32 8.0, %v1495_v5  ;;  %v1483_v9 = vadd.f32 %v1463_v7, %v1060_v60  ;;  %v11580_v31 = vadd.f32 %v11579_v58, %v11578_v24  ;;  %10711 = vmatmul.mubr.msk.f32.vlgmr.msra.gmra.mxu1 %vm1540_vm1, %v14757_v1 }
 0x2bb   :  { %v11581_v57 = vpop.f32.mrf.mxu0  ;;  %1629 = vmatprep.mubr.f32.mxu1 %v19165_v51 }
 0x2bc   :  { %v1496_v14 = vadd.f32 %v14736_v2, %v1483_v9  ;;  %v1468_v16 = vadd.f32 %v11580_v31, %v1373_v46  ;;  %v14783_v15 = vmul.f32 %v1501_v47, %v14766_v63 }
 0x2bd   :  { %v11582_v32 = vpop.f32.mrf.mxu0 }
 0x2be   :  { %v1502_v30 = vmul.f32 8.0, %v1496_v14  ;;  %v1484_v34 = vadd.f32 %v1468_v16, %v1061_v3  ;;  %v11583_v59 = vadd.f32 %v11582_v32, %v11581_v57  ;;  %10712 = vmatmul.mubr.msk.f32.gmra.mxu1 %vm1540_vm1, %v14783_v15  ;;  %v1536_v57 = vsub.s32 1, %v14691_v10 }
 0x2bf   :  { %v11584_v48 = vpop.f32.mrf.mxu0  ;;  %1635 = vmatprep.mubr.f32.mxu1 %v19165_v51 }
 0x2c0   :  { %v1497_v39 = vadd.f32 %v14736_v2, %v1484_v34  ;;  %v1473_v36 = vadd.f32 %v11583_v59, %v1378_v25  ;;  %v14799_v38 = vmul.f32 %v1502_v30, %v14779_v11  ;;  %v1537_v17 = vrot.slane %v1528_v49, %v1536_v57 }
 0x2c1   :  { %v11585_v18 = vpop.f32.mrf.mxu0 }
 0x2c2   :  { %v1503_v20 = vmul.f32 8.0, %v1497_v39  ;;  %v1485_v21 = vadd.f32 %v1473_v36, %v1062_v61  ;;  %v11586_v40 = vadd.f32 %v11585_v18, %v11584_v48  ;;  %10713 = vmatmul.mubr.msk.f32.gmra.mxu1 %vm1540_vm1, %v14799_v38 }
 0x2c3   :  { %1641 = vmatprep.mubr.f32.mxu1 %v19165_v51 }
 0x2c4   :  { %v1498_v42 = vadd.f32 %v14736_v2, %v1485_v21  ;;  %v1478_v55 = vadd.f32 %v11586_v40, %v1383_v19  ;;  %v14815_v43 = vmul.f32 %v1503_v20, %v14802_v29  ;;  %v14873_v40 = vand.u32 127, %v18918_v0 }
 0x2c6   :  { %v1504_v23 = vmul.f32 8.0, %v1498_v42  ;;  %v1486_v60 = vadd.f32 %v1478_v55, %v1063_v50  ;;  %10714 = vmatmul.mubr.msk.f32.gmra.mxu1 %vm1540_vm1, %v14815_v43  ;;  %vm480_vm7 = vcmp.lt.s32.totalorder %v14873_v40, %v14694_v12  ;;  %vm3882_vm2 = vcmp.le.s32.totalorder %v14807_v35, %v14873_v40 }
 0x2c7   :  { %1647 = vmatprep.mubr.f32.mxu1 %v19165_v51  ;;  %v14878_v42 = vsel %vm480_vm7, 1.0, %v19165_v51  ;;  %vm3881_vm3 = vcmp.le.s32.totalorder %v14789_v33, %v14873_v40  ;;  %vm3880_vm4 = vcmp.le.s32.totalorder %v14769_v44, %v14873_v40  ;;  %vm3879_vm5 = vcmp.le.s32.totalorder %v14725_v6, %v14873_v40 }
 0x2c8   :  { %v1499_v54 = vadd.f32 %v14736_v2, %v1486_v60  ;;  %v14827_v24 = vmul.f32 %v1504_v23, %v14818_v22  ;;  %v14841_v2 = vsub.s32 0, %v14691_v10  ;;  %19178 = vst [vmem:[#allocation88_spill] sm:$0xff] %v14878_v42  ;;  %v1804_v50 = vmul.f32 %v14878_v42, %v14766_v63 }
 0x2c9   :  { %v1803_v55 = vmul.f32 %v14878_v42, %v14711_v53  ;;  %vm3878_vm6 = vcmp.le.s32.totalorder %v14717_v41, %v14873_v40  ;;  %vm3877_vm7 = vcmp.le.s32.totalorder %v14691_v10, %v14873_v40 }
 0x2ca   :  { %v1505_v62 = vmul.f32 8.0, %v1499_v54  ;;  %10715 = vmatmul.mubr.msk.f32.gmra.mxu1 %vm1540_vm1, %v14827_v24  ;;  %19177 = vst [vmem:[#allocation94_spill] sm:$0xff] %v14841_v2  ;;  %v1533_v5 = vrot.slane %v1528_v49, %v14841_v2  ;;  %vm1810_vm8 = vcmp.gt.f32.partialorder %v1804_v50, 0.5 }
 0x2cb   :  { %1653 = vmatprep.mubr.f32.mxu1 %v19165_v51  ;;  %vm1809_vm10 = vcmp.gt.f32.partialorder %v1803_v55, 0.5 }
 0x2cc   :  { %v14836_v4 = vmul.f32 %v1505_v62, %v14830_v26  ;;  %v1805_v62 = vmul.f32 %v14878_v42, %v14779_v11 }
 0x2ce   :  { %10716 = vmatmul.mubr.msk.f32.gmra.mxu1 %vm1540_vm1, %v14836_v4  ;;  %vm1811_vm11 = vcmp.gt.f32.partialorder %v1805_v62, 0.5 }
 0x37a   :  { %v1625_v7 = vpop.f32.mrf.mxu1 }
 0x37b   :  { %v1626_v8 = vadd.f32 %v1625_v7, %v1533_v5 }
 0x37c   :  { %v1627_v56 = vpop.f32.mrf.mxu1 }
 0x37d   :  { %12293 = vmatprep.mubr.msk.f32.mxu1 %vm1540_vm1, %v1626_v8  ;;  %v1628_v37 = vadd.f32 %v1627_v56, %v1537_v17 }
 0x37e   :  { %v1631_v58 = vpop.f32.mrf.mxu1 }
 0x37f   :  { %v1632_v59 = vadd.f32 %v1631_v58, %v1533_v5 }
 0x380   :  { %v1633_v46 = vpop.f32.mrf.mxu1 }
 0x381   :  { %v1634_v48 = vadd.f32 %v1633_v46, %v1537_v17 }
 0x382   :  { %v1637_v45 = vpop.f32.mrf.mxu1 }
 0x383   :  { %v1638_v13 = vadd.f32 %v1637_v45, %v1533_v5  ;;  %v1807_v45 = vmul.f32 %v14878_v42, %v14818_v22 }
 0x384   :  { %v1639_v47 = vpop.f32.mrf.mxu1 }
 0x385   :  { %v1640_v61 = vadd.f32 %v1639_v47, %v1537_v17  ;;  %vm1813_vm13 = vcmp.gt.f32.partialorder %v1807_v45, 0.5 }
 0x386   :  { %v1643_v9 = vpop.f32.mrf.mxu1 }
 0x387   :  { %v1644_v31 = vadd.f32 %v1643_v9, %v1533_v5 }
 0x388   :  { %v1645_v52 = vpop.f32.mrf.mxu1 }
 0x389   :  { %1672 = vrot.lane.b32.xlu1 %v1644_v31, %s13922_s7  ;;  %v1646_v34 = vadd.f32 %v1645_v52, %v1537_v17  ;;  %v1808_v52 = vmul.f32 %v14878_v42, %v14830_v26 }
 0x38a   :  { %v1649_v3 = vpop.f32.mrf.mxu1 }
 0x38b   :  { %v1650_v28 = vadd.f32 %v1649_v3, %v1533_v5  ;;  %vm1814_vm14 = vcmp.gt.f32.partialorder %v1808_v52, 0.5 }
 0x38c   :  { %v1651_v14 = vpop.f32.mrf.mxu1 }
 0x38d   :  { %1670 = vrot.lane.b32.xlu1 %v1638_v13, %s13922_s7  ;;  %v1652_v30 = vadd.f32 %v1651_v14, %v1537_v17 }
 0x38e   :  { %v1655_v16 = vpop.f32.mrf.mxu1 }
 0x38f   :  { %v1656_v25 = vadd.f32 %v1655_v16, %v1533_v5 }
 0x390   :  { %v1657_v27 = vpop.f32.mrf.mxu1 }
 0x391   :  { %v1658_v32 = vadd.f32 %v1657_v27, %v1537_v17  ;;  %1676 = vrot.lane.b32.xlu0 %v1656_v25, %s13922_s7  ;;  %1666 = vrot.lane.b32.xlu1 %v1626_v8, %s13922_s7  ;;  %v1806_v8 = vmul.f32 %v14878_v42, %v14802_v29 }
 0x393   :  { %12302 = vmatprep.subr.mxu0 %v1658_v32  ;;  %vm1812_vm12 = vcmp.gt.f32.partialorder %v1806_v8, 0.5 }
 0x394   :  { %12303 = vmatpush3.msra.mxu0 %v1658_v32 }
 0x395   :  { %12304 = vmatprep.subr.mxu0 %v1652_v30  ;;  %1674 = vrot.lane.b32.xlu0 %v1650_v28, %s13922_s7 }
 0x396   :  { %12305 = vmatpush3.msra.mxu0 %v1652_v30 }
 0x397   :  { %12306 = vmatprep.subr.mxu0 %v1646_v34 }
 0x398   :  { %12307 = vmatpush3.msra.mxu0 %v1646_v34 }
 0x399   :  { %12308 = vmatprep.subr.mxu0 %v1640_v61  ;;  %1668 = vrot.lane.b32.xlu0 %v1632_v59, %s13922_s7 }
 0x39a   :  { %12309 = vmatpush3.msra.mxu0 %v1640_v61 }
 0x39b   :  { %12310 = vmatprep.subr.mxu0 %v1634_v48 }
 0x39c   :  { %12311 = vmatpush3.msra.mxu0 %v1634_v48 }
 0x39d   :  { %12312 = vmatprep.subr.mxu0 %v1628_v37 }
 0x39e   :  { %12313 = vmatpush3.msra.mxu0 %v1628_v37 }
 0x3fb   :  { %v1673_v36 = vpop.permute.xlu1 %1672 }
 0x3ff   :  { %v1671_v19 = vpop.permute.xlu1 %1670 }
 0x403   :  { %v1677_v39 = vpop.permute.xlu0 %1676  ;;  %v1667_v21 = vpop.permute.xlu1 %1666 }
 0x404   :  { %12281 = vmatprep.subr.msk.mxu1 %vm1540_vm1, %v1677_v39 }
 0x405   :  { %12282 = vmatpush3.xpose.msk.msra.mxu1 %vm1540_vm1, %v1677_v39 }
 0x407   :  { %v1675_v18 = vpop.permute.xlu0 %1674 }
 0x408   :  { %12283 = vmatprep.subr.msk.mxu1 %vm1540_vm1, %v1675_v18 }
 0x409   :  { %12284 = vmatpush3.xpose.msk.msra.mxu1 %vm1540_vm1, %v1675_v18 }
 0x40a   :  { %12285 = vmatprep.subr.msk.mxu1 %vm1540_vm1, %v1673_v36 }
 0x40b   :  { %v1669_v20 = vpop.permute.xlu0 %1668 }
 0x40d   :  { %12286 = vmatpush3.xpose.msk.msra.mxu1 %vm1540_vm1, %v1673_v36 }
 0x40e   :  { %12287 = vmatprep.subr.msk.mxu1 %vm1540_vm1, %v1671_v19 }
 0x411   :  { %12288 = vmatpush3.xpose.msk.msra.mxu1 %vm1540_vm1, %v1671_v19 }
 0x412   :  { %12289 = vmatprep.subr.msk.mxu1 %vm1540_vm1, %v1669_v20 }
 0x415   :  { %12290 = vmatpush3.xpose.msk.msra.mxu1 %vm1540_vm1, %v1669_v20 }
 0x416   :  { %12291 = vmatprep.subr.msk.mxu1 %vm1540_vm1, %v1667_v21 }
 0x419   :  { %12292 = vmatpush3.xpose.msk.msra.mxu1 %vm1540_vm1, %v1667_v21 }
 0x41c   :  { %12294 = vmatmul.mubr.msk.f32.vlgmr.msra.gmra.mxu1 %vm1540_vm1, %v1632_v59 }
 0x41d   :  { %12296 = vmatprep.mubr.msk.f32.mxu1 %vm1540_vm1, %v1638_v13 }
 0x420   :  { %12297 = vmatmul.mubr.msk.f32.gmra.mxu1 %vm1540_vm1, %v1644_v31 }
 0x421   :  { %12299 = vmatprep.mubr.msk.f32.mxu1 %vm1540_vm1, %v1650_v28 }
 0x424   :  { %12300 = vmatmul.mubr.msk.f32.gmra.mxu1 %vm1540_vm1, %v1656_v25 }
 0x4dc   :  { %v12295_v23 = vpop.f32.mrf.mxu1 }
 0x4dd   :  { %v1798_v60 = vmul.f32 0.125, %v12295_v23 }
 0x4de   :  { %v1768_v54 = vpop.f32.mrf.mxu1 }
 0x4df   :  { %v1797_v49 = vmul.f32 0.125, %v1768_v54  ;;  %v1816_v12 = vsel %vm1810_vm8, %v1798_v60, -1e+09  ;;  %vm3968_vm8 = vcmp.lt.s32.totalorder %v14807_v35, %v14873_v40 }
 0x4e0   :  { %v12298_v5 = vpop.f32.mrf.mxu1  ;;  %v1825_v7 = vsel %vm1821_vm9, %v1816_v12, -inf }
 0x4e1   :  { %1826 = vmax.xlane.f32.xlu1 %v1825_v7  ;;  %v1815_v56 = vsel %vm1809_vm10, %v1797_v49, -1e+09  ;;  %v1800_v47 = vmul.f32 0.125, %v12298_v5  ;;  %vm3967_vm10 = vcmp.lt.s32.totalorder %v14789_v33, %v14873_v40 }
 0x4e2   :  { %v1778_v58 = vpop.f32.mrf.mxu1  ;;  %v1822_v46 = vsel %vm1821_vm9, %v1815_v56, -inf }
 0x4e3   :  { %v1799_v9 = vmul.f32 0.125, %v1778_v58  ;;  %1823 = vmax.xlane.f32.xlu0 %v1822_v46  ;;  %v1818_v25 = vsel %vm1812_vm12, %v1800_v47, -1e+09  ;;  %vm3965_vm12 = vcmp.lt.s32.totalorder %v14725_v6, %v14873_v40 }
 0x4e4   :  { %v12301_v31 = vpop.f32.mrf.mxu1  ;;  %v1831_v32 = vsel %vm1821_vm9, %v1818_v25, -inf }
 0x4e5   :  { %v1817_v3 = vsel %vm1811_vm11, %v1799_v9, -1e+09  ;;  %v1802_v16 = vmul.f32 0.125, %v12301_v31  ;;  %vm3966_vm11 = vcmp.lt.s32.totalorder %v14769_v44, %v14873_v40 }
 0x4e6   :  { %v1788_v13 = vpop.f32.mrf.mxu1  ;;  %v1828_v14 = vsel %vm1821_vm9, %v1817_v3, -inf }
 0x4e7   :  { %v1801_v17 = vmul.f32 0.125, %v1788_v13  ;;  %1829 = vmax.xlane.f32.xlu0 %v1828_v14  ;;  %v1820_v30 = vsel %vm1814_vm14, %v1802_v16, -1e+09  ;;  %v2008_v13 = vld [vmem:[%s19179_s3 + $0x38] sm:$0xff]  ;;  %v2007_v14 = vld [vmem:[%s19179_s3 + $0x30] sm:$0xff]  ;;  %v2006_v16 = vld [vmem:[%s19179_s3 + $0x28] sm:$0xff]  ;;  %vm3963_vm14 = vcmp.lt.s32.totalorder %v14691_v10, %v14873_v40 }
 0x4e8   :  { %v1837_v34 = vsel %vm1821_vm9, %v1820_v30, -inf  ;;  %12323 = vmatprep.subr.mxu1 %v2008_v13 }
 0x4e9   :  { %v1819_v27 = vsel %vm1813_vm13, %v1801_v17, -1e+09  ;;  %12324 = vmatpush3.msra.mxu1 %v2008_v13  ;;  %v2005_v17 = vld [vmem:[%s19179_s3 + $0x20] sm:$0xff]  ;;  %vm3964_vm13 = vcmp.lt.s32.totalorder %v14717_v41, %v14873_v40  ;;  %v4052_v40 = vadd.s32 56, %v14691_v10 }
 0x4ea   :  { %v1834_v28 = vsel %vm1821_vm9, %v1819_v27, -inf  ;;  %12325 = vmatprep.subr.mxu1 %v2007_v14 }
 0x4eb   :  { %1832 = vmax.xlane.f32.xlu0 %v1831_v32  ;;  %1835 = vmax.xlane.f32.xlu1 %v1834_v28 }
 0x4ec   :  { %12326 = vmatpush3.msra.mxu1 %v2007_v14 }
 0x4ed   :  { %12327 = vmatprep.subr.mxu1 %v2006_v16 }
 0x4ee   :  { %12328 = vmatpush3.msra.mxu1 %v2006_v16 }
 0x4ef   :  { %1838 = vmax.xlane.f32.xlu0 %v1837_v34  ;;  %12329 = vmatprep.subr.mxu1 %v2005_v17 }
 0x4f0   :  { %12330 = vmatpush3.msra.mxu1 %v2005_v17 }
 0x56a   :  { %v1827_v59 = vpop.xlane.xlu1 %1826 }
 0x56b   :  { %v1841_v61 = vsub.f32 %v1816_v12, %v1827_v59 }
 0x56c   :  { %v1824_v48 = vpop.xlane.xlu0 %1823 }
 0x56d   :  { %v1848_v37 = vmul.f32 1.442695, %v1841_v61  ;;  %v1840_v39 = vsub.f32 %v1815_v56, %v1824_v48 }
 0x56f   :  { %13384 = vpow2.f32 %v1848_v37  ;;  %v1846_v36 = vmul.f32 1.442695, %v1840_v39 }
 0x570   :  { %v1830_v18 = vpop.xlane.xlu0 %1829 }
 0x571   :  { %13386 = vpow2.f32 %v1846_v36  ;;  %v1842_v19 = vsub.f32 %v1817_v3, %v1830_v18 }
 0x573   :  { %v1850_v20 = vmul.f32 1.442695, %v1842_v19 }
 0x574   :  { %v1833_v21 = vpop.xlane.xlu0 %1832  ;;  %v1836_v50 = vpop.xlane.xlu1 %1835 }
 0x575   :  { %13388 = vpow2.f32 %v1850_v20  ;;  %v1843_v55 = vsub.f32 %v1818_v25, %v1833_v21  ;;  %v1844_v23 = vsub.f32 %v1819_v27, %v1836_v50  ;;  %v2004_v25 = vld [vmem:[%s19179_s3 + $0x18] sm:$0xff]  ;;  %v2003_v27 = vld [vmem:[%s19179_s3 + $0x10] sm:$0xff] }
 0x576   :  { %12331 = vmatprep.subr.mxu1 %v2004_v25 }
 0x577   :  { %v1852_v60 = vmul.f32 1.442695, %v1843_v55  ;;  %v1854_v54 = vmul.f32 1.442695, %v1844_v23  ;;  %12332 = vmatpush3.msra.mxu1 %v2004_v25 }
 0x578   :  { %v1839_v62 = vpop.xlane.xlu0 %1838  ;;  %12333 = vmatprep.subr.mxu1 %v2003_v27 }
 0x579   :  { %13390 = vpow2.f32 %v1852_v60  ;;  %v1845_v49 = vsub.f32 %v1820_v30, %v1839_v62  ;;  %12334 = vmatpush3.msra.mxu1 %v2003_v27  ;;  %v2001_v62 = vld [vmem:[%s19179_s3] sm:$0xff] }
 0x57a   :  { %13392 = vpow2.f32 %v1854_v54  ;;  %v2002_v54 = vld [vmem:[%s19179_s3 + $0x8] sm:$0xff]  ;;  %s10708_s3 = sld [smem:[#allocation4 + $0x3]] }
 0x57b   :  { %v1856_v12 = vmul.f32 1.442695, %v1845_v49  ;;  %12335 = vmatprep.subr.mxu1 %v2002_v54 }
 0x57c   :  { %v13385_v5 = vpop.eup %13384  ;;  %12336 = vmatpush3.msra.mxu1 %v2002_v54 }
 0x57d   :  { %13394 = vpow2.f32 %v1856_v12  ;;  %v1861_v7 = vsel %vm1821_vm9, %v13385_v5, 0.0  ;;  %12337 = vmatprep.subr.mxu1 %v2001_v62 }
 0x57e   :  { %v13387_v8 = vpop.eup %13386  ;;  %1862 = vadd.xlane.f32.xlu0 %v1861_v7  ;;  %12338 = vmatpush3.msra.mxu1 %v2001_v62 }
 0x57f   :  { %v1858_v56 = vsel %vm1821_vm9, %v13387_v8, 0.0 }
 0x580   :  { %1859 = vadd.xlane.f32.xlu1 %v1858_v56 }
 0x582   :  { %v13389_v58 = vpop.eup %13388 }
 0x583   :  { %v1864_v46 = vsel %vm1821_vm9, %v13389_v58, 0.0 }
 0x584   :  { %1865 = vadd.xlane.f32.xlu1 %v1864_v46 }
 0x586   :  { %v13391_v45 = vpop.eup %13390 }
 0x587   :  { %v13393_v47 = vpop.eup %13392  ;;  %v1867_v9 = vsel %vm1821_vm9, %v13391_v45, 0.0 }
 0x588   :  { %1868 = vadd.xlane.f32.xlu0 %v1867_v9  ;;  %v1870_v31 = vsel %vm1821_vm9, %v13393_v47, 0.0 }
 0x589   :  { %1871 = vadd.xlane.f32.xlu1 %v1870_v31 }
 0x58a   :  { %v13395_v52 = vpop.eup %13394 }
 0x58b   :  { %v1873_v3 = vsel %vm1821_vm9, %v13395_v52, 0.0 }
 0x58c   :  { %1874 = vadd.xlane.f32.xlu0 %v1873_v3 }
 0x607   :  { %v1863_v32 = vpop.xlane.xlu0 %1862 }
 0x608   :  { %13396 = vrcp.f32 %v1863_v32 }
 0x609   :  { %v1860_v28 = vpop.xlane.xlu1 %1859 }
 0x60a   :  { %13398 = vrcp.f32 %v1860_v28 }
 0x60d   :  { %v1866_v30 = vpop.xlane.xlu1 %1865 }
 0x60e   :  { %13400 = vrcp.f32 %v1866_v30 }
 0x611   :  { %v1869_v34 = vpop.xlane.xlu0 %1868 }
 0x612   :  { %13402 = vrcp.f32 %v1869_v34  ;;  %v1872_v59 = vpop.xlane.xlu1 %1871 }
 0x613   :  { %13404 = vrcp.f32 %v1872_v59 }
 0x615   :  { %v1875_v61 = vpop.xlane.xlu0 %1874  ;;  %v13397_v48 = vpop.eup %13396 }
 0x616   :  { %13406 = vrcp.f32 %v1875_v61  ;;  %v1883_v36 = vmul.f32 %v13397_v48, %v13385_v5 }
 0x617   :  { %v13399_v37 = vpop.eup %13398 }
 0x618   :  { %v1882_v39 = vmul.f32 %v13399_v37, %v13387_v8 }
 0x61a   :  { %12314 = vmatprep.mubr.msk.f32.mxu0 %vm1821_vm9, %v1882_v39 }
 0x61b   :  { %v13401_v18 = vpop.eup %13400  ;;  %12315 = vmatmul.mubr.msk.f32.vlgmr.msra.gmra.mxu0 %vm1821_vm9, %v1883_v36 }
 0x61c   :  { %v1884_v19 = vmul.f32 %v13401_v18, %v13389_v58  ;;  %v10735_v58 = vld [vmem:[%s19180_s0] ss:$0 sm:$0xff]  ;;  %s3867_s0 = ssub.f32 1.0, %s10708_s3 }
 0x61e   :  { %12317 = vmatprep.mubr.msk.f32.mxu0 %vm1821_vm9, %v1884_v19 }
 0x61f   :  { %v13403_v20 = vpop.eup %13402 }
 0x620   :  { %v13405_v21 = vpop.eup %13404  ;;  %v1885_v50 = vmul.f32 %v13403_v20, %v13391_v45 }
 0x621   :  { %v1886_v55 = vmul.f32 %v13405_v21, %v13393_v47 }
 0x622   :  { %12318 = vmatmul.mubr.msk.f32.gmra.mxu0 %vm1821_vm9, %v1885_v50 }
 0x623   :  { %v13407_v23 = vpop.eup %13406  ;;  %12320 = vmatprep.mubr.msk.f32.mxu0 %vm1821_vm9, %v1886_v55 }
 0x624   :  { %v1887_v60 = vmul.f32 %v13407_v23, %v13395_v52 }
 0x626   :  { %12321 = vmatmul.mubr.msk.f32.gmra.mxu0 %vm1821_vm9, %v1887_v60 }
 0x627   :  { %2356 = vmatprep.mubr.f32.mxu0 %v19165_v51 }
 0x6db   :  { %v12316_v49 = vpop.f32.mrf.mxu0 }
 0x6dd   :  { %v1972_v12 = vpop.f32.mrf.mxu0 }
 0x6de   :  { %12339 = vmatprep.mubr.msk.f32.mxu1 %vm1540_vm1, %v1972_v12 }
 0x6df   :  { %12340 = vmatmul.mubr.msk.f32.vlgmr.msra.gmra.mxu1 %vm1540_vm1, %v12316_v49 }
 0x6e2   :  { %v12319_v5 = vpop.f32.mrf.mxu0 }
 0x6e4   :  { %v1982_v7 = vpop.f32.mrf.mxu0 }
 0x6e5   :  { %12342 = vmatprep.mubr.msk.f32.mxu1 %vm1540_vm1, %v1982_v7 }
 0x6e6   :  { %v12322_v8 = vpop.f32.mrf.mxu0  ;;  %12343 = vmatmul.mubr.msk.f32.gmra.mxu1 %vm1540_vm1, %v12319_v5 }
 0x6e8   :  { %v1992_v56 = vpop.f32.mrf.mxu0 }
 0x6e9   :  { %12345 = vmatprep.mubr.msk.f32.mxu1 %vm1540_vm1, %v1992_v56 }
 0x6ea   :  { %12346 = vmatmul.mubr.msk.f32.gmra.mxu1 %vm1540_vm1, %v12322_v8 }
 0x79f   :  { %v12341_v46 = vpop.f32.mrf.mxu1 }
 0x7a0   :  { %v2106_v45 = vadd.f32 %v12341_v46, %v10735_v58 }
 0x7a1   :  { %v2100_v47 = vpop.f32.mrf.mxu1 }
 0x7a2   :  { %v2101_v9 = vadd.f32 %v10735_v58, %v2100_v47  ;;  %v2130_v31 = vadd.f32 %v2106_v45, %v14783_v15 }
 0x7a4   :  { %v2140_v52 = vsel %vm1540_vm1, %v2130_v31, 0.0  ;;  %v2129_v3 = vadd.f32 %v2101_v9, %v14757_v1 }
 0x7a5   :  { %2141 = vadd.xlane.f32.xlu0 %v2140_v52 }
 0x7a6   :  { %v12344_v13 = vpop.f32.mrf.mxu1  ;;  %v2137_v14 = vsel %vm1540_vm1, %v2129_v3, 0.0 }
 0x7a7   :  { %v2116_v16 = vadd.f32 %v12344_v13, %v10735_v58  ;;  %2138 = vadd.xlane.f32.xlu1 %v2137_v14  ;;  %v2261_v14 = vld [vmem:[%s19181_s6 + $0x78] sm:$0xff] }
 0x7a8   :  { %v2110_v17 = vpop.f32.mrf.mxu1  ;;  %2308 = vmatprep.subr.mxu0 %v2261_v14 }
 0x7a9   :  { %v2111_v25 = vadd.f32 %v10735_v58, %v2110_v17  ;;  %v2132_v27 = vadd.f32 %v2116_v16, %v14815_v43  ;;  %v2260_v16 = vld [vmem:[%s19181_s6 + $0x70] sm:$0xff]  ;;  %v2259_v17 = vld [vmem:[%s19181_s6 + $0x68] sm:$0xff] }
 0x7aa   :  { %v12347_v32 = vpop.f32.mrf.mxu1  ;;  %2309 = vmatpush1.msra.mxu0 %v2260_v16 }
 0x7ab   :  { %v2126_v28 = vadd.f32 %v12347_v32, %v10735_v58  ;;  %v2146_v30 = vsel %vm1540_vm1, %v2132_v27, 0.0  ;;  %v2131_v15 = vadd.f32 %v2111_v25, %v14799_v38  ;;  %2310 = vmatprep.subr.mxu0 %v2259_v17  ;;  %v2258_v25 = vld [vmem:[%s19181_s6 + $0x60] sm:$0xff]  ;;  %v2256_v32 = vld [vmem:[%s19181_s6 + $0x50] sm:$0xff] }
 0x7ac   :  { %2147 = vadd.xlane.f32.xlu0 %v2146_v30  ;;  %v2120_v34 = vpop.f32.mrf.mxu1  ;;  %2311 = vmatpush1.msra.mxu0 %v2258_v25  ;;  %v2254_v30 = vld [vmem:[%s19181_s6 + $0x40] sm:$0xff] }
 0x7ad   :  { %v2121_v59 = vadd.f32 %v10735_v58, %v2120_v34  ;;  %v2143_v1 = vsel %vm1540_vm1, %v2131_v15, 0.0  ;;  %v2134_v61 = vadd.f32 %v2126_v28, %v14836_v4  ;;  %v2255_v28 = vld [vmem:[%s19181_s6 + $0x48] sm:$0xff]  ;;  %v2252_v34 = vld [vmem:[%s19181_s6 + $0x30] sm:$0xff] }
 0x7ae   :  { %2144 = vadd.xlane.f32.xlu1 %v2143_v1  ;;  %v2250_v1 = vld [vmem:[%s19181_s6 + $0x20] sm:$0xff] }
 0x7af   :  { %v2152_v48 = vsel %vm1540_vm1, %v2134_v61, 0.0  ;;  %v2133_v37 = vadd.f32 %v2121_v59, %v14827_v24  ;;  %v2251_v59 = vld [vmem:[%s19181_s6 + $0x28] sm:$0xff] }
 0x7b0   :  { %2153 = vadd.xlane.f32.xlu0 %v2152_v48  ;;  %v2248_v48 = vld [vmem:[%s19181_s6 + $0x10] sm:$0xff] }
 0x7b1   :  { %v2149_v43 = vsel %vm1540_vm1, %v2133_v37, 0.0 }
 0x7b2   :  { %2150 = vadd.xlane.f32.xlu1 %v2149_v43  ;;  %v2246_v43 = vld [vmem:[%s19181_s6] sm:$0xff] }
 0x82e   :  { %v2142_v39 = vpop.xlane.xlu0 %2141 }
 0x82f   :  { %v2157_v36 = vmul.f32 0.015625, %v2142_v39  ;;  %v2436_v39 = vld [vmem:[%s19182_s17 + $0xf8] sm:$0xff] }
 0x830   :  { %v2139_v18 = vpop.xlane.xlu1 %2138  ;;  %11625 = vmatprep.subr.mxu1 %v2436_v39 }
 0x831   :  { %v14938_v38 = vsub.f32 %v2130_v31, %v2157_v36  ;;  %v2156_v19 = vmul.f32 0.015625, %v2139_v18  ;;  %v2420_v36 = vld [vmem:[%s19182_s17 + $0x78] sm:$0xff]  ;;  %v2435_v18 = vld [vmem:[%s19182_s17 + $0xf0] sm:$0xff] }
 0x832   :  { %11626 = vmatpush3.msra.mxu1 %v2420_v36 }
 0x833   :  { %v14940_v20 = vsub.f32 %v2129_v3, %v2156_v19  ;;  %v2169_v4 = vmul.f32 %v14938_v38, %v14938_v38  ;;  %v2419_v19 = vld [vmem:[%s19182_s17 + $0x70] sm:$0xff]  ;;  %11627 = vmatprep.subr.mxu1 %v2435_v18 }
 0x834   :  { %11628 = vmatpush3.msra.mxu1 %v2419_v19 }
 0x835   :  { %v2148_v21 = vpop.xlane.xlu0 %2147  ;;  %v2177_v50 = vsel %vm1540_vm1, %v2169_v4, 0.0  ;;  %v2168_v24 = vmul.f32 %v14940_v20, %v14940_v20  ;;  %v2434_v4 = vld [vmem:[%s19182_s17 + $0xe8] sm:$0xff] }
 0x836   :  { %v2159_v55 = vmul.f32 0.015625, %v2148_v21  ;;  %2178 = vadd.xlane.f32.xlu0 %v2177_v50  ;;  %v2418_v21 = vld [vmem:[%s19182_s17 + $0x68] sm:$0xff]  ;;  %v2433_v50 = vld [vmem:[%s19182_s17 + $0xe0] sm:$0xff]  ;;  %11629 = vmatprep.subr.mxu1 %v2434_v4 }
 0x837   :  { %v2145_v23 = vpop.xlane.xlu1 %2144  ;;  %v2174_v60 = vsel %vm1540_vm1, %v2168_v24, 0.0  ;;  %v2417_v24 = vld [vmem:[%s19182_s17 + $0x60] sm:$0xff]  ;;  %11630 = vmatpush3.msra.mxu1 %v2418_v21 }
 0x838   :  { %v14948_v54 = vsub.f32 %v2132_v27, %v2159_v55  ;;  %v2158_v62 = vmul.f32 0.015625, %v2145_v23  ;;  %2175 = vadd.xlane.f32.xlu1 %v2174_v60  ;;  %v2257_v27 = vld [vmem:[%s19181_s6 + $0x58] sm:$0xff]  ;;  %11631 = vmatprep.subr.mxu1 %v2433_v50  ;;  %v2431_v60 = vld [vmem:[%s19182_s17 + $0xd0] sm:$0xff]  ;;  %v10742_v21 = vld [vmem:[%s19183_s24] ss:$0 sm:$0xff]  ;;  %s453_s24 = sld [smem:[#allocation4]] }
 0x839   :  { %v2154_v49 = vpop.xlane.xlu0 %2153  ;;  %2312 = vmatprep.subr.mxu0 %v2257_v27  ;;  %v2432_v55 = vld [vmem:[%s19182_s17 + $0xd8] sm:$0xff]  ;;  %11632 = vmatpush3.msra.mxu1 %v2417_v24 }
 0x83a   :  { %v14950_v12 = vsub.f32 %v2131_v15, %v2158_v62  ;;  %v2161_v5 = vmul.f32 0.015625, %v2154_v49  ;;  %v2171_v7 = vmul.f32 %v14948_v54, %v14948_v54  ;;  %2313 = vmatpush1.msra.mxu0 %v2256_v32  ;;  %v2253_v15 = vld [vmem:[%s19181_s6 + $0x38] sm:$0xff]  ;;  %11633 = vmatprep.subr.mxu1 %v2432_v55  ;;  %v2415_v62 = vld [vmem:[%s19182_s17 + $0x50] sm:$0xff]  ;;  %v2430_v49 = vld [vmem:[%s19182_s17 + $0xc8] sm:$0xff] }
 0x83b   :  { %v2151_v8 = vpop.xlane.xlu1 %2150  ;;  %2314 = vmatprep.subr.mxu0 %v2255_v28  ;;  %v2416_v23 = vld [vmem:[%s19182_s17 + $0x58] sm:$0xff] }
 0x83c   :  { %v14954_v56 = vsub.f32 %v2134_v61, %v2161_v5  ;;  %v2160_v58 = vmul.f32 0.015625, %v2151_v8  ;;  %v2183_v46 = vsel %vm1540_vm1, %v2171_v7, 0.0  ;;  %v2170_v45 = vmul.f32 %v14950_v12, %v14950_v12  ;;  %2315 = vmatpush1.msra.mxu0 %v2254_v30  ;;  %v2249_v61 = vld [vmem:[%s19181_s6 + $0x18] sm:$0xff]  ;;  %11634 = vmatpush3.msra.mxu1 %v2416_v23  ;;  %v2414_v5 = vld [vmem:[%s19182_s17 + $0x48] sm:$0xff]  ;;  %v2429_v7 = vld [vmem:[%s19182_s17 + $0xc0] sm:$0xff] }
 0x83d   :  { %2184 = vadd.xlane.f32.xlu0 %v2183_v46  ;;  %2316 = vmatprep.subr.mxu0 %v2253_v15  ;;  %v2413_v8 = vld [vmem:[%s19182_s17 + $0x40] sm:$0xff]  ;;  %v2412_v46 = vld [vmem:[%s19182_s17 + $0x38] sm:$0xff] }
 0x83e   :  { %v14959_v47 = vsub.f32 %v2133_v37, %v2160_v58  ;;  %v2180_v9 = vsel %vm1540_vm1, %v2170_v45, 0.0  ;;  %v2173_v31 = vmul.f32 %v14954_v56, %v14954_v56  ;;  %2317 = vmatpush1.msra.mxu0 %v2252_v34  ;;  %v2247_v37 = vld [vmem:[%s19181_s6 + $0x8] sm:$0xff]  ;;  %11635 = vmatprep.subr.mxu1 %v2431_v60  ;;  %v2428_v58 = vld [vmem:[%s19182_s17 + $0xb8] sm:$0xff]  ;;  %v2427_v45 = vld [vmem:[%s19182_s17 + $0xb0] sm:$0xff]  ;;  %s10707_s6 = sld [smem:[#allocation4 + $0x2]] }
 0x83f   :  { %2181 = vadd.xlane.f32.xlu1 %v2180_v9  ;;  %2318 = vmatprep.subr.mxu0 %v2251_v59  ;;  %v2411_v9 = vld [vmem:[%s19182_s17 + $0x30] sm:$0xff]  ;;  %v10743_v23 = vld [vmem:[%s19184_s11] ss:$0 sm:$0xff]  ;;  %s19349_s11 = sld [smem:[#allocation79_spill]] }
 0x840   :  { %v2189_v52 = vsel %vm1540_vm1, %v2173_v31, 0.0  ;;  %v2172_v3 = vmul.f32 %v14959_v47, %v14959_v47  ;;  %2319 = vmatpush1.msra.mxu0 %v2250_v1  ;;  %11636 = vmatpush3.msra.mxu1 %v2415_v62  ;;  %v2426_v31 = vld [vmem:[%s19182_s17 + $0xa8] sm:$0xff] }
 0x841   :  { %2190 = vadd.xlane.f32.xlu0 %v2189_v52  ;;  %2320 = vmatprep.subr.mxu0 %v2249_v61  ;;  %v2410_v52 = vld [vmem:[%s19182_s17 + $0x28] sm:$0xff] }
 0x842   :  { %v2186_v13 = vsel %vm1540_vm1, %v2172_v3, 0.0  ;;  %2321 = vmatpush1.msra.mxu0 %v2248_v48  ;;  %11637 = vmatprep.subr.mxu1 %v2430_v49  ;;  %v2425_v3 = vld [vmem:[%s19182_s17 + $0xa0] sm:$0xff] }
 0x843   :  { %2187 = vadd.xlane.f32.xlu1 %v2186_v13  ;;  %2322 = vmatprep.subr.mxu0 %v2247_v37  ;;  %v2409_v13 = vld [vmem:[%s19182_s17 + $0x20] sm:$0xff] }
 0x844   :  { %2323 = vmatpush1.msra.mxu0 %v2246_v43  ;;  %11638 = vmatpush3.msra.mxu1 %v2414_v5 }
 0x845   :  { %11639 = vmatprep.subr.mxu1 %v2429_v7 }
 0x846   :  { %11640 = vmatpush3.msra.mxu1 %v2413_v8 }
 0x847   :  { %11641 = vmatprep.subr.mxu1 %v2428_v58 }
 0x848   :  { %11642 = vmatpush3.msra.mxu1 %v2412_v46 }
 0x849   :  { %11643 = vmatprep.subr.mxu1 %v2427_v45 }
 0x84a   :  { %11644 = vmatpush3.msra.mxu1 %v2411_v9 }
 0x84b   :  { %11645 = vmatprep.subr.mxu1 %v2426_v31 }
 0x84c   :  { %11646 = vmatpush3.msra.mxu1 %v2410_v52 }
 0x84d   :  { %11647 = vmatprep.subr.mxu1 %v2425_v3 }
 0x84e   :  { %11648 = vmatpush3.msra.mxu1 %v2409_v13 }
 0x8bf   :  { %v2179_v14 = vpop.xlane.xlu0 %2178 }
 0x8c0   :  { %v2193_v16 = vmul.f32 0.015625, %v2179_v14 }
 0x8c1   :  { %v2176_v17 = vpop.xlane.xlu1 %2175 }
 0x8c2   :  { %v2199_v25 = vadd.f32 1e-05, %v2193_v16  ;;  %v2192_v27 = vmul.f32 0.015625, %v2176_v17 }
 0x8c4   :  { %13408 = vrsqrt.f32 %v2199_v25  ;;  %v2198_v32 = vadd.f32 1e-05, %v2192_v27  ;;  %v2424_v27 = vld [vmem:[%s19182_s17 + $0x98] sm:$0xff] }
 0x8c5   :  { %11649 = vmatprep.subr.mxu1 %v2424_v27 }
 0x8c6   :  { %13410 = vrsqrt.f32 %v2198_v32  ;;  %v2185_v28 = vpop.xlane.xlu0 %2184  ;;  %v2408_v32 = vld [vmem:[%s19182_s17 + $0x18] sm:$0xff] }
 0x8c7   :  { %v2195_v30 = vmul.f32 0.015625, %v2185_v28  ;;  %11650 = vmatpush3.msra.mxu1 %v2408_v32  ;;  %v2423_v28 = vld [vmem:[%s19182_s17 + $0x90] sm:$0xff] }
 0x8c8   :  { %v2182_v15 = vpop.xlane.xlu1 %2181  ;;  %11651 = vmatprep.subr.mxu1 %v2423_v28 }
 0x8c9   :  { %v2201_v34 = vadd.f32 1e-05, %v2195_v30  ;;  %v2194_v59 = vmul.f32 0.015625, %v2182_v15  ;;  %v2407_v30 = vld [vmem:[%s19182_s17 + $0x10] sm:$0xff]  ;;  %v2422_v15 = vld [vmem:[%s19182_s17 + $0x88] sm:$0xff] }
 0x8ca   :  { %v2191_v1 = vpop.xlane.xlu0 %2190  ;;  %11652 = vmatpush3.msra.mxu1 %v2407_v30 }
 0x8cb   :  { %13412 = vrsqrt.f32 %v2201_v34  ;;  %v2200_v61 = vadd.f32 1e-05, %v2194_v59  ;;  %v2197_v48 = vmul.f32 0.015625, %v2191_v1  ;;  %11653 = vmatprep.subr.mxu1 %v2422_v15  ;;  %v2406_v34 = vld [vmem:[%s19182_s17 + $0x8] sm:$0xff]  ;;  %v2421_v59 = vld [vmem:[%s19182_s17 + $0x80] sm:$0xff] }
 0x8cc   :  { %v2188_v37 = vpop.xlane.xlu1 %2187  ;;  %11654 = vmatpush3.msra.mxu1 %v2406_v34  ;;  %v2405_v1 = vld [vmem:[%s19182_s17] sm:$0xff]  ;;  %s19348_s17 = sld [smem:[#allocation43_spill]] }
 0x8cd   :  { %13414 = vrsqrt.f32 %v2200_v61  ;;  %v2196_v43 = vmul.f32 0.015625, %v2188_v37  ;;  %v2203_v39 = vadd.f32 1e-05, %v2197_v48  ;;  %11655 = vmatprep.subr.mxu1 %v2421_v59  ;;  %v2262_v61 = vld [vmem:[%s19185_s25] sm:$0x3]  ;;  %s13927_s25 = smov 32  }
 0x8ce   :  { %11656 = vmatpush3.msra.mxu1 %v2405_v1  ;;  %v2267_v48 = vrot.slane %v2262_v61, %v14841_v2  ;;  %v2271_v37 = vrot.slane %v2262_v61, %v1536_v57  ;;  %v10750_v1 = vld [vmem:[%s19186_s13] ss:$0 sm:$0xff]  ;;  %s19397_s13 = sld [smem:[#allocation75_spill]] }
 0x8cf   :  { %v2202_v36 = vadd.f32 1e-05, %v2196_v43 }
 0x8d1   :  { %v13409_v18 = vpop.eup %13408  ;;  %13416 = vrsqrt.f32 %v2202_v36 }
 0x8d2   :  { %13418 = vrsqrt.f32 %v2203_v39  ;;  %v2211_v19 = vmul.f32 %v13409_v18, %v14938_v38 }
 0x8d3   :  { %v13411_v4 = vpop.eup %13410 }
 0x8d4   :  { %v2210_v50 = vmul.f32 %v13411_v4, %v14940_v20  ;;  %v2223_v55 = vmul.f32 %v10742_v21, %v2211_v19 }
 0x8d6   :  { %v2222_v24 = vmul.f32 %v10742_v21, %v2210_v50  ;;  %v15016_v7 = vadd.f32 %v10743_v23, %v2223_v55 }
 0x8d8   :  { %v13413_v60 = vpop.eup %13412  ;;  %v15012_v62 = vadd.f32 %v10743_v23, %v2222_v24  ;;  %v2241_v46 = vmul.f32 %v15016_v7, %v14766_v63 }
 0x8d9   :  { %v2213_v8 = vmul.f32 %v13413_v60, %v14948_v54 }
 0x8da   :  { %v13415_v49 = vpop.eup %13414  ;;  %v2240_v5 = vmul.f32 %v15012_v62, %v14711_v53 }
 0x8db   :  { %v2212_v38 = vmul.f32 %v13415_v49, %v14950_v12  ;;  %v2225_v45 = vmul.f32 %v10742_v21, %v2213_v8 }
 0x8dc   :  { %10744 = vmatmul.mubr.msk.f32.vlgmr.msra.gmra.mxu0 %vm1540_vm1, %v2240_v5 }
 0x8dd   :  { %2362 = vmatprep.mubr.f32.mxu0 %v19165_v51  ;;  %v2224_v20 = vmul.f32 %v10742_v21, %v2212_v38  ;;  %v15031_v12 = vadd.f32 %v10743_v23, %v2225_v45 }
 0x8de   :  { %v13417_v58 = vpop.eup %13416 }
 0x8df   :  { %v13419_v9 = vpop.eup %13418  ;;  %v15024_v31 = vadd.f32 %v10743_v23, %v2224_v20  ;;  %v2214_v52 = vmul.f32 %v13417_v58, %v14959_v47  ;;  %v2243_v47 = vmul.f32 %v15031_v12, %v14802_v29 }
 0x8e0   :  { %10745 = vmatmul.mubr.msk.f32.gmra.mxu0 %vm1540_vm1, %v2241_v46  ;;  %v2215_v13 = vmul.f32 %v13419_v9, %v14954_v56 }
 0x8e1   :  { %2368 = vmatprep.mubr.f32.mxu0 %v19165_v51  ;;  %v2242_v54 = vmul.f32 %v15024_v31, %v14779_v11  ;;  %v2226_v3 = vmul.f32 %v10742_v21, %v2214_v52 }
 0x8e2   :  { %v2227_v16 = vmul.f32 %v10742_v21, %v2215_v13 }
 0x8e3   :  { %v15038_v14 = vadd.f32 %v10743_v23, %v2226_v3 }
 0x8e4   :  { %10746 = vmatmul.mubr.msk.f32.gmra.mxu0 %vm1540_vm1, %v2242_v54  ;;  %v15044_v17 = vadd.f32 %v10743_v23, %v2227_v16 }
 0x8e5   :  { %2374 = vmatprep.mubr.f32.mxu0 %v19165_v51  ;;  %v2244_v56 = vmul.f32 %v15038_v14, %v14818_v22 }
 0x8e6   :  { %v2245_v25 = vmul.f32 %v15044_v17, %v14830_v26 }
 0x8e8   :  { %10747 = vmatmul.mubr.msk.f32.gmra.mxu0 %vm1540_vm1, %v2243_v47 }
 0x8e9   :  { %2380 = vmatprep.mubr.f32.mxu0 %v19165_v51 }
 0x8ec   :  { %10748 = vmatmul.mubr.msk.f32.gmra.mxu0 %vm1540_vm1, %v2244_v56 }
 0x8ed   :  { %2386 = vmatprep.mubr.f32.mxu0 %v19165_v51 }
 0x8f0   :  { %10749 = vmatmul.mubr.msk.f32.gmra.mxu0 %vm1540_vm1, %v2245_v25 }
 0x99c   :  { %v2358_v43 = vpop.f32.mrf.mxu0 }
 0x99d   :  { %v2359_v39 = vadd.f32 %v2358_v43, %v2267_v48 }
 0x99e   :  { %v2360_v36 = vpop.f32.mrf.mxu0 }
 0x99f   :  { %v2361_v18 = vadd.f32 %v2360_v36, %v2271_v37  ;;  %v2393_v21 = vmax.f32 %v2359_v39, 0.0 }
 0x9a0   :  { %v2364_v19 = vpop.f32.mrf.mxu0 }
 0x9a1   :  { %v2394_v4 = vmax.f32 %v2361_v18, 0.0  ;;  %v2365_v50 = vadd.f32 %v2364_v19, %v2267_v48 }
 0x9a2   :  { %v2366_v24 = vpop.f32.mrf.mxu0 }
 0x9a3   :  { %v2367_v55 = vadd.f32 %v2366_v24, %v2271_v37  ;;  %2508 = vmatprep.mubr.f32.mxu1 %v2394_v4  ;;  %v2395_v49 = vmax.f32 %v2365_v50, 0.0 }
 0x9a4   :  { %v2370_v23 = vpop.f32.mrf.mxu0  ;;  %2509 = vmatmul.mubr.f32.vlgmr.msra.gmra.mxu1 %v2393_v21 }
 0x9a5   :  { %v2396_v60 = vmax.f32 %v2367_v55, 0.0  ;;  %v2371_v5 = vadd.f32 %v2370_v23, %v2267_v48 }
 0x9a6   :  { %v2372_v8 = vpop.f32.mrf.mxu0 }
 0x9a7   :  { %v2373_v38 = vadd.f32 %v2372_v8, %v2271_v37  ;;  %2513 = vmatprep.mubr.f32.mxu1 %v2396_v60  ;;  %v2397_v58 = vmax.f32 %v2371_v5, 0.0 }
 0x9a8   :  { %v2376_v57 = vpop.f32.mrf.mxu0  ;;  %2514 = vmatmul.mubr.f32.gmra.mxu1 %v2395_v49 }
 0x9a9   :  { %v2398_v20 = vmax.f32 %v2373_v38, 0.0  ;;  %v2377_v46 = vadd.f32 %v2376_v57, %v2267_v48 }
 0x9aa   :  { %v2378_v45 = vpop.f32.mrf.mxu0 }
 0x9ab   :  { %v2379_v9 = vadd.f32 %v2378_v45, %v2271_v37  ;;  %2518 = vmatprep.mubr.f32.mxu1 %v2398_v20  ;;  %v2399_v3 = vmax.f32 %v2377_v46, 0.0 }
 0x9ac   :  { %v2382_v52 = vpop.f32.mrf.mxu0  ;;  %2519 = vmatmul.mubr.f32.gmra.mxu1 %v2397_v58 }
 0x9ad   :  { %v2400_v54 = vmax.f32 %v2379_v9, 0.0  ;;  %v2383_v13 = vadd.f32 %v2382_v52, %v2267_v48 }
 0x9ae   :  { %v2384_v47 = vpop.f32.mrf.mxu0 }
 0x9af   :  { %v2385_v16 = vadd.f32 %v2384_v47, %v2271_v37  ;;  %2523 = vmatprep.mubr.f32.mxu1 %v2400_v54  ;;  %v2401_v27 = vmax.f32 %v2383_v13, 0.0 }
 0x9b0   :  { %v2388_v56 = vpop.f32.mrf.mxu0  ;;  %2524 = vmatmul.mubr.f32.gmra.mxu1 %v2399_v3 }
 0x9b1   :  { %v2402_v25 = vmax.f32 %v2385_v16, 0.0  ;;  %v2389_v32 = vadd.f32 %v2388_v56, %v2267_v48 }
 0x9b2   :  { %v2390_v28 = vpop.f32.mrf.mxu0 }
 0x9b3   :  { %v2391_v30 = vadd.f32 %v2390_v28, %v2271_v37  ;;  %2528 = vmatprep.mubr.f32.mxu1 %v2402_v25  ;;  %v2403_v34 = vmax.f32 %v2389_v32, 0.0 }
 0x9b4   :  { %2529 = vmatmul.mubr.f32.gmra.mxu1 %v2401_v27 }
 0x9b5   :  { %v2404_v15 = vmax.f32 %v2391_v30, 0.0 }
 0x9b7   :  { %2533 = vmatprep.mubr.f32.mxu1 %v2404_v15 }
 0x9b8   :  { %2534 = vmatmul.mubr.f32.gmra.mxu1 %v2403_v34 }
 0xa64   :  { %v11657_v59 = vpop.f32.mrf.mxu1 }
 0xa66   :  { %v11658_v61 = vpop.f32.mrf.mxu1 }
 0xa67   :  { %v11659_v43 = vadd.f32 %v11658_v61, %v11657_v59 }
 0xa68   :  { %v11660_v39 = vpop.f32.mrf.mxu1 }
 0xa69   :  { %v2511_v36 = vadd.f32 %v11659_v43, %v10750_v1 }
 0xa6a   :  { %v11661_v18 = vpop.f32.mrf.mxu1 }
 0xa6b   :  { %v11662_v19 = vadd.f32 %v11661_v18, %v11660_v39  ;;  %v2539_v4 = vadd.f32 %v2511_v36, %v15012_v62 }
 0xa6c   :  { %v11663_v21 = vpop.f32.mrf.mxu1 }
 0xa6d   :  { %v2516_v48 = vadd.f32 %v11662_v19, %v10750_v1  ;;  %v2547_v37 = vsel %vm1540_vm1, %v2539_v4, 0.0 }
 0xa6e   :  { %2548 = vadd.xlane.f32.xlu1 %v2547_v37  ;;  %v11664_v50 = vpop.f32.mrf.mxu1 }
 0xa6f   :  { %v11665_v24 = vadd.f32 %v11664_v50, %v11663_v21  ;;  %v2540_v55 = vadd.f32 %v2516_v48, %v15016_v7 }
 0xa70   :  { %v11666_v23 = vpop.f32.mrf.mxu1 }
 0xa71   :  { %v2521_v60 = vadd.f32 %v11665_v24, %v10750_v1  ;;  %v2550_v49 = vsel %vm1540_vm1, %v2540_v55, 0.0 }
 0xa72   :  { %2551 = vadd.xlane.f32.xlu0 %v2550_v49  ;;  %v11667_v5 = vpop.f32.mrf.mxu1 }
 0xa73   :  { %v11668_v8 = vadd.f32 %v11667_v5, %v11666_v23  ;;  %v2541_v38 = vadd.f32 %v2521_v60, %v15024_v31 }
 0xa74   :  { %v11669_v57 = vpop.f32.mrf.mxu1 }
 0xa75   :  { %v2526_v62 = vadd.f32 %v11668_v8, %v10750_v1  ;;  %v2553_v20 = vsel %vm1540_vm1, %v2541_v38, 0.0 }
 0xa76   :  { %2554 = vadd.xlane.f32.xlu1 %v2553_v20  ;;  %v11670_v58 = vpop.f32.mrf.mxu1  ;;  %v2659_v20 = vld [vmem:[%s19187_s12 + $0x20] sm:$0xff] }
 0xa77   :  { %v11671_v46 = vadd.f32 %v11670_v58, %v11669_v57  ;;  %v2542_v45 = vadd.f32 %v2526_v62, %v15031_v12  ;;  %v2661_v57 = vld [vmem:[%s19187_s12 + $0x30] sm:$0xff]  ;;  %v2660_v62 = vld [vmem:[%s19187_s12 + $0x28] sm:$0xff]  ;;  %v2658_v58 = vld [vmem:[%s19187_s12 + $0x18] sm:$0xff] }
 0xa78   :  { %v11672_v9 = vpop.f32.mrf.mxu1 }
 0xa79   :  { %v2531_v7 = vadd.f32 %v11671_v46, %v10750_v1  ;;  %v2556_v52 = vsel %vm1540_vm1, %v2542_v45, 0.0  ;;  %v2657_v46 = vld [vmem:[%s19187_s12 + $0x10] sm:$0xff] }
 0xa7a   :  { %2557 = vadd.xlane.f32.xlu0 %v2556_v52  ;;  %v11673_v54 = vpop.f32.mrf.mxu1 }
 0xa7b   :  { %v11674_v3 = vadd.f32 %v11673_v54, %v11672_v9  ;;  %v2543_v13 = vadd.f32 %v2531_v7, %v15038_v14  ;;  %v2655_v9 = vld [vmem:[%s19187_s12] sm:$0xff] }
 0xa7d   :  { %v2536_v47 = vadd.f32 %v11674_v3, %v10750_v1  ;;  %v2559_v31 = vsel %vm1540_vm1, %v2543_v13, 0.0 }
 0xa7e   :  { %2560 = vadd.xlane.f32.xlu1 %v2559_v31 }
 0xa7f   :  { %v2544_v16 = vadd.f32 %v2536_v47, %v15044_v17 }
 0xa81   :  { %v2562_v56 = vsel %vm1540_vm1, %v2544_v16, 0.0 }
 0xa82   :  { %2563 = vadd.xlane.f32.xlu0 %v2562_v56 }
 0xaf7   :  { %v2549_v25 = vpop.xlane.xlu1 %2548 }
 0xaf8   :  { %v2565_v12 = vmul.f32 0.015625, %v2549_v25 }
 0xafa   :  { %v15076_v27 = vsub.f32 %v2539_v4, %v2565_v12 }
 0xafb   :  { %v2552_v32 = vpop.xlane.xlu0 %2551 }
 0xafc   :  { %v2566_v28 = vmul.f32 0.015625, %v2552_v32  ;;  %v2577_v30 = vmul.f32 %v15076_v27, %v15076_v27 }
 0xafe   :  { %v15080_v15 = vsub.f32 %v2540_v55, %v2566_v28  ;;  %v2583_v14 = vsel %vm1540_vm1, %v2577_v30, 0.0 }
 0xaff   :  { %2584 = vadd.xlane.f32.xlu1 %v2583_v14  ;;  %v2555_v34 = vpop.xlane.xlu1 %2554 }
 0xb00   :  { %v2567_v59 = vmul.f32 0.015625, %v2555_v34  ;;  %v2578_v17 = vmul.f32 %v15080_v15, %v15080_v15  ;;  %v10751_v34 = vld [vmem:[%s19188_s16] ss:$0 sm:$0xff]  ;;  %s19419_s16 = sld [smem:[#allocation77_spill]] }
 0xb02   :  { %v15085_v1 = vsub.f32 %v2541_v38, %v2567_v59  ;;  %v2586_v61 = vsel %vm1540_vm1, %v2578_v17, 0.0  ;;  %v2662_v38 = vld [vmem:[%s19187_s12 + $0x38] sm:$0xff] }
 0xb03   :  { %v2558_v43 = vpop.xlane.xlu0 %2557  ;;  %2587 = vadd.xlane.f32.xlu0 %v2586_v61  ;;  %12348 = vmatprep.subr.mxu0 %v2662_v38 }
 0xb04   :  { %v2568_v39 = vmul.f32 0.015625, %v2558_v43  ;;  %v2579_v36 = vmul.f32 %v15085_v1, %v15085_v1  ;;  %12349 = vmatpush3.msra.mxu0 %v2662_v38  ;;  %v10752_v43 = vld [vmem:[%s19189_s15] ss:$0 sm:$0xff]  ;;  %s19442_s15 = sld [smem:[#allocation81_spill]] }
 0xb05   :  { %12350 = vmatprep.subr.mxu0 %v2661_v57 }
 0xb06   :  { %v15090_v18 = vsub.f32 %v2542_v45, %v2568_v39  ;;  %v2589_v19 = vsel %vm1540_vm1, %v2579_v36, 0.0  ;;  %12351 = vmatpush3.msra.mxu0 %v2661_v57  ;;  %v2656_v45 = vld [vmem:[%s19187_s12 + $0x8] sm:$0xff]  ;;  %s19398_s12 = sld [smem:[#allocation76_spill]] }
 0xb07   :  { %2590 = vadd.xlane.f32.xlu1 %v2589_v19  ;;  %v2561_v4 = vpop.xlane.xlu1 %2560  ;;  %12352 = vmatprep.subr.mxu0 %v2660_v62 }
 0xb08   :  { %v2569_v21 = vmul.f32 0.015625, %v2561_v4  ;;  %v2580_v48 = vmul.f32 %v15090_v18, %v15090_v18  ;;  %12353 = vmatpush3.msra.mxu0 %v2660_v62  ;;  %v2791_v62 = vld [vmem:[%s19190_s18 + $0x10] sm:$0xff] }
 0xb09   :  { %12354 = vmatprep.subr.mxu0 %v2659_v20 }
 0xb0a   :  { %v15095_v37 = vsub.f32 %v2543_v13, %v2569_v21  ;;  %v2592_v50 = vsel %vm1540_vm1, %v2580_v48, 0.0  ;;  %12355 = vmatpush3.msra.mxu0 %v2659_v20 }
 0xb0b   :  { %2593 = vadd.xlane.f32.xlu0 %v2592_v50  ;;  %v2564_v24 = vpop.xlane.xlu0 %2563  ;;  %12356 = vmatprep.subr.mxu0 %v2658_v58 }
 0xb0c   :  { %v2570_v55 = vmul.f32 0.015625, %v2564_v24  ;;  %v2581_v23 = vmul.f32 %v15095_v37, %v15095_v37  ;;  %12357 = vmatpush3.msra.mxu0 %v2658_v58 }
 0xb0d   :  { %12358 = vmatprep.subr.mxu0 %v2657_v46 }
 0xb0e   :  { %v15100_v60 = vsub.f32 %v2544_v16, %v2570_v55  ;;  %v2595_v49 = vsel %vm1540_vm1, %v2581_v23, 0.0  ;;  %12359 = vmatpush3.msra.mxu0 %v2657_v46 }
 0xb0f   :  { %2596 = vadd.xlane.f32.xlu1 %v2595_v49  ;;  %12360 = vmatprep.subr.mxu0 %v2656_v45 }
 0xb10   :  { %v2582_v5 = vmul.f32 %v15100_v60, %v15100_v60  ;;  %12361 = vmatpush3.msra.mxu0 %v2656_v45 }
 0xb11   :  { %12362 = vmatprep.subr.mxu0 %v2655_v9 }
 0xb12   :  { %v2598_v8 = vsel %vm1540_vm1, %v2582_v5, 0.0  ;;  %12363 = vmatpush3.msra.mxu0 %v2655_v9  ;;  %v2792_v5 = vld [vmem:[%s19190_s18 + $0x18] sm:$0xff] }
 0xb13   :  { %2599 = vadd.xlane.f32.xlu0 %v2598_v8  ;;  %12373 = vmatprep.subr.mxu0 %v19165_v51 }
 0xb88   :  { %v2585_v7 = vpop.xlane.xlu1 %2584 }
 0xb89   :  { %v2601_v52 = vmul.f32 0.015625, %v2585_v7 }
 0xb8b   :  { %v2607_v54 = vadd.f32 1e-05, %v2601_v52 }
 0xb8c   :  { %v2588_v3 = vpop.xlane.xlu0 %2587 }
 0xb8d   :  { %13420 = vrsqrt.f32 %v2607_v54  ;;  %v2602_v13 = vmul.f32 0.015625, %v2588_v3 }
 0xb8f   :  { %v2608_v47 = vadd.f32 1e-05, %v2602_v13 }
 0xb90   :  { %v2591_v31 = vpop.xlane.xlu1 %2590 }
 0xb91   :  { %13422 = vrsqrt.f32 %v2608_v47  ;;  %v2603_v16 = vmul.f32 0.015625, %v2591_v31 }
 0xb93   :  { %v2609_v56 = vadd.f32 1e-05, %v2603_v16 }
 0xb94   :  { %v2594_v25 = vpop.xlane.xlu0 %2593 }
 0xb95   :  { %13424 = vrsqrt.f32 %v2609_v56  ;;  %v2604_v12 = vmul.f32 0.015625, %v2594_v25  ;;  %v2890_v56 = vld [vmem:[%s19192_s22 + $0x38] sm:$0xff]  ;;  %v2889_v25 = vld [vmem:[%s19192_s22 + $0x30] sm:$0xff] }
 0xb96   :  { %12384 = vmatprep.subr.mxu1 %v2890_v56 }
 0xb97   :  { %v2610_v32 = vadd.f32 1e-05, %v2604_v12  ;;  %12385 = vmatpush3.msra.mxu1 %v2890_v56  ;;  %v2888_v12 = vld [vmem:[%s19192_s22 + $0x28] sm:$0xff] }
 0xb98   :  { %v2597_v28 = vpop.xlane.xlu1 %2596  ;;  %12386 = vmatprep.subr.mxu1 %v2889_v25 }
 0xb99   :  { %13426 = vrsqrt.f32 %v2610_v32  ;;  %v2605_v30 = vmul.f32 0.015625, %v2597_v28  ;;  %12387 = vmatpush3.msra.mxu1 %v2889_v25  ;;  %v2887_v32 = vld [vmem:[%s19192_s22 + $0x20] sm:$0xff]  ;;  %v2886_v28 = vld [vmem:[%s19192_s22 + $0x18] sm:$0xff] }
 0xb9a   :  { %v13421_v14 = vpop.eup %13420  ;;  %12388 = vmatprep.subr.mxu1 %v2888_v12 }
 0xb9b   :  { %v2611_v59 = vadd.f32 1e-05, %v2605_v30  ;;  %v2619_v17 = vmul.f32 %v13421_v14, %v15076_v27  ;;  %12389 = vmatpush3.msra.mxu1 %v2888_v12  ;;  %v2885_v30 = vld [vmem:[%s19192_s22 + $0x10] sm:$0xff]  ;;  %v2884_v14 = vld [vmem:[%s19192_s22 + $0x8] sm:$0xff] }
 0xb9c   :  { %v2600_v61 = vpop.xlane.xlu0 %2599  ;;  %12390 = vmatprep.subr.mxu1 %v2887_v32 }
 0xb9d   :  { %13428 = vrsqrt.f32 %v2611_v59  ;;  %v2606_v39 = vmul.f32 0.015625, %v2600_v61  ;;  %v2631_v36 = vmul.f32 %v10751_v34, %v2619_v17  ;;  %12391 = vmatpush3.msra.mxu1 %v2887_v32 }
 0xb9e   :  { %v13423_v19 = vpop.eup %13422  ;;  %12392 = vmatprep.subr.mxu1 %v2886_v28 }
 0xb9f   :  { %v2620_v4 = vmul.f32 %v13423_v19, %v15080_v15  ;;  %v2612_v21 = vadd.f32 1e-05, %v2606_v39  ;;  %v2643_v48 = vadd.f32 %v10752_v43, %v2631_v36  ;;  %12393 = vmatpush3.msra.mxu1 %v2886_v28 }
 0xba0   :  { %12394 = vmatprep.subr.mxu1 %v2885_v30 }
 0xba1   :  { %v2632_v50 = vmul.f32 %v10751_v34, %v2620_v4  ;;  %13430 = vrsqrt.f32 %v2612_v21  ;;  %v15120_v24 = vmul.f32 %v2643_v48, %v14711_v53  ;;  %12395 = vmatpush3.msra.mxu1 %v2885_v30 }
 0xba2   :  { %v13425_v55 = vpop.eup %13424  ;;  %12396 = vmatprep.subr.mxu1 %v2884_v14 }
 0xba3   :  { %12364 = vmatprep.mubr.msk.f32.mxu0 %vm1540_vm1, %v15120_v24  ;;  %v2644_v27 = vadd.f32 %v10752_v43, %v2632_v50  ;;  %v2621_v23 = vmul.f32 %v13425_v55, %v15085_v1  ;;  %v2790_v1 = vld [vmem:[%s19190_s18 + $0x8] sm:$0xff]  ;;  %12397 = vmatpush3.msra.mxu1 %v2884_v14 }
 0xba5   :  { %v15126_v49 = vmul.f32 %v2644_v27, %v14766_v63  ;;  %v2633_v15 = vmul.f32 %v10751_v34, %v2621_v23 }
 0xba6   :  { %v13427_v8 = vpop.eup %13426 }
 0xba7   :  { %12365 = vmatmul.mubr.msk.f32.vlgmr.msra.gmra.mxu0 %vm1540_vm1, %v15126_v49  ;;  %v2645_v38 = vadd.f32 %v10752_v43, %v2633_v15  ;;  %v2622_v57 = vmul.f32 %v13427_v8, %v15090_v18  ;;  %v2789_v18 = vld [vmem:[%s19190_s18] sm:$0xff]  ;;  %s19443_s18 = sld [smem:[#allocation82_spill]] }
 0xba8   :  { %12374 = vmatpush3.msra.mxu0 %v2792_v5  ;;  %v3368_v5 = vld [vmem:[%s19193_s20 + $0x18] sm:$0xff] }
 0xba9   :  { %v15134_v20 = vmul.f32 %v2645_v38, %v14779_v11  ;;  %v2634_v58 = vmul.f32 %v10751_v34, %v2622_v57  ;;  %12375 = vmatprep.subr.mxu0 %v19165_v51  ;;  %v3367_v57 = vld [vmem:[%s19193_s20 + $0x10] sm:$0xff] }
 0xbaa   :  { %v13429_v46 = vpop.eup %13428  ;;  %12376 = vmatpush3.msra.mxu0 %v2791_v62 }
 0xbab   :  { %12367 = vmatprep.mubr.msk.f32.mxu0 %vm1540_vm1, %v15134_v20  ;;  %v2646_v45 = vadd.f32 %v10752_v43, %v2634_v58  ;;  %v2623_v9 = vmul.f32 %v13429_v46, %v15095_v37  ;;  %12377 = vmatprep.subr.mxu0 %v19165_v51 }
 0xbac   :  { %12378 = vmatpush3.msra.mxu0 %v2790_v1  ;;  %v3366_v1 = vld [vmem:[%s19193_s20 + $0x8] sm:$0xff] }
 0xbad   :  { %v15144_v7 = vmul.f32 %v2646_v45, %v14802_v29  ;;  %v2635_v52 = vmul.f32 %v10751_v34, %v2623_v9  ;;  %12379 = vmatprep.subr.mxu0 %v19165_v51  ;;  %v3365_v45 = vld [vmem:[%s19193_s20] sm:$0xff]  ;;  %s19468_s20 = sld [smem:[#allocation85_spill]] }
 0xbae   :  { %v13431_v54 = vpop.eup %13430  ;;  %12380 = vmatpush3.msra.mxu0 %v2789_v18  ;;  %v10761_v18 = vld [vmem:[%s19194_s26] ss:$0 sm:$0xff]  ;;  %s19469_s26 = sld [smem:[#allocation86_spill]] }
 0xbaf   :  { %12368 = vmatmul.mubr.msk.f32.gmra.mxu0 %vm1540_vm1, %v15144_v7  ;;  %v2647_v3 = vadd.f32 %v10752_v43, %v2635_v52  ;;  %v2624_v37 = vmul.f32 %v13431_v54, %v15100_v60  ;;  %v15163_v60 = vld [vmem:[%s19191_s23] sm:$0x1] }
 0xbb1   :  { %v15151_v13 = vmul.f32 %v2647_v3, %v14818_v22  ;;  %v2636_v47 = vmul.f32 %v10751_v34, %v2624_v37  ;;  %v2883_v34 = vld [vmem:[%s19192_s22] sm:$0xff]  ;;  %s19467_s22 = sld [smem:[#allocation84_spill]] }
 0xbb2   :  { %12398 = vmatprep.subr.mxu1 %v2883_v34 }
 0xbb3   :  { %12370 = vmatprep.mubr.msk.f32.mxu0 %vm1540_vm1, %v15151_v13  ;;  %v2648_v31 = vadd.f32 %v10752_v43, %v2636_v47  ;;  %12399 = vmatpush3.msra.mxu1 %v2883_v34 }
 0xbb4   :  { %12434 = vmatprep.subr.mxu1 %v19165_v51 }
 0xbb5   :  { %v15156_v16 = vmul.f32 %v2648_v31, %v14830_v26 }
 0xbb7   :  { %12371 = vmatmul.mubr.msk.f32.gmra.mxu0 %vm1540_vm1, %v15156_v16 }
 0xbb8   :  { %12381 = vmatprep.mubr.msk.f32.mxu0 %vm13923_vm15, %v19165_v51 }
 0xbbb   :  { %12382 = vmatmul.mubr.msk.f32.vlgmr.msra.gmra.mxu0 %vm2793_vm0, %v15163_v60 }
 0xc67   :  { %v15176_v59 = vpop.f32.mrf.mxu0 }
 0xc69   :  { %v15178_v17 = vpop.f32.mrf.mxu0 }
 0xc6f   :  { %v15180_v61 = vpop.f32.mrf.mxu0 }
 0xc71   :  { %v15182_v43 = vpop.f32.mrf.mxu0 }
 0xc77   :  { %v15184_v39 = vpop.f32.mrf.mxu0 }
 0xc79   :  { %v15186_v36 = vpop.f32.mrf.mxu0 }
 0xc7b   :  { %v2863_v19 = vpop.f32.mrf.mxu0 }
 0xc7c   :  { %v2870_v4 = vrot.slane %v2863_v19, %v14841_v2 }
 0xc7d   :  { %v12383_v21 = vpop.f32.mrf.mxu0 }
 0xc7e   :  { %v2872_v48 = vadd.f32 %v2870_v4, %v15126_v49  ;;  %v2871_v50 = vadd.f32 %v2870_v4, %v15120_v24  ;;  %v2873_v55 = vadd.f32 %v2870_v4, %v15134_v20  ;;  %v2874_v15 = vadd.f32 %v2870_v4, %v15144_v7 }
 0xc7f   :  { %v2875_v38 = vadd.f32 %v2870_v4, %v15151_v13  ;;  %v2876_v58 = vadd.f32 %v2870_v4, %v15156_v16 }
 0xc80   :  { %v2877_v27 = vmul.f32 %v2871_v50, %v14711_v53  ;;  %v2878_v23 = vmul.f32 %v2872_v48, %v14766_v63  ;;  %v2879_v8 = vmul.f32 %v2873_v55, %v14779_v11  ;;  %v2880_v62 = vmul.f32 %v2874_v15, %v14802_v29 }
 0xc81   :  { %v2881_v46 = vmul.f32 %v2875_v38, %v14818_v22  ;;  %v2882_v9 = vmul.f32 %v2876_v58, %v14830_v26 }
 0xc82   :  { %12400 = vmatprep.mubr.msk.f32.mxu1 %vm1540_vm1, %v2877_v27 }
 0xc83   :  { %12401 = vmatmul.mubr.msk.f32.vlgmr.msra.gmra.mxu1 %vm1540_vm1, %v2878_v23 }
 0xc84   :  { %12403 = vmatprep.mubr.msk.f32.mxu1 %vm1540_vm1, %v2879_v8  ;;  %12435 = vmatpush3.msra.mxu1 %v3368_v5 }
 0xc85   :  { %12436 = vmatprep.subr.mxu1 %v19165_v51 }
 0xc86   :  { %12437 = vmatpush3.msra.mxu1 %v3367_v57 }
 0xc87   :  { %12404 = vmatmul.mubr.msk.f32.gmra.mxu1 %vm1540_vm1, %v2880_v62  ;;  %12438 = vmatprep.subr.mxu1 %v19165_v51 }
 0xc88   :  { %12406 = vmatprep.mubr.msk.f32.mxu1 %vm1540_vm1, %v2881_v46  ;;  %12439 = vmatpush3.msra.mxu1 %v3366_v1 }
 0xc89   :  { %12440 = vmatprep.subr.mxu1 %v19165_v51 }
 0xc8a   :  { %12441 = vmatpush3.msra.mxu1 %v3365_v45 }
 0xc8b   :  { %12407 = vmatmul.mubr.msk.f32.gmra.mxu1 %vm1540_vm1, %v2882_v9 }
 0xc8c   :  { %12442 = vmatprep.mubr.msk.f32.mxu1 %vm13923_vm15, %v19165_v51 }
 0xc8f   :  { %12443 = vmatmul.mubr.msk.f32.vlgmr.msra.gmra.mxu1 %vm2793_vm0, %v15163_v60 }
 0xd43   :  { %v12402_v52 = vpop.f32.mrf.mxu1 }
 0xd44   :  { %v2988_v54 = vadd.f32 %v12402_v52, %v10761_v18 }
 0xd45   :  { %v2982_v3 = vpop.f32.mrf.mxu1 }
 0xd46   :  { %v3012_v37 = vmax.f32 %v2988_v54, 0.0  ;;  %v2983_v47 = vadd.f32 %v10761_v18, %v2982_v3 }
 0xd47   :  { %v12405_v31 = vpop.f32.mrf.mxu1 }
 0xd48   :  { %v3011_v56 = vmax.f32 %v2983_v47, 0.0  ;;  %v2998_v25 = vadd.f32 %v12405_v31, %v10761_v18  ;;  %v3022_v12 = vsel %vm1540_vm1, %v3012_v37, 0.0 }
 0xd49   :  { %3023 = vadd.xlane.f32.xlu0 %v3022_v12  ;;  %v2992_v32 = vpop.f32.mrf.mxu1 }
 0xd4a   :  { %v3014_v28 = vmax.f32 %v2998_v25, 0.0  ;;  %v2993_v30 = vadd.f32 %v10761_v18, %v2992_v32  ;;  %v3019_v14 = vsel %vm1540_vm1, %v3011_v56, 0.0 }
 0xd4b   :  { %v12408_v34 = vpop.f32.mrf.mxu1  ;;  %3020 = vadd.xlane.f32.xlu1 %v3019_v14 }
 0xd4c   :  { %v3013_v60 = vmax.f32 %v2993_v30, 0.0  ;;  %v3008_v19 = vadd.f32 %v12408_v34, %v10761_v18  ;;  %v3028_v4 = vsel %vm1540_vm1, %v3014_v28, 0.0 }
 0xd4d   :  { %3029 = vadd.xlane.f32.xlu0 %v3028_v4  ;;  %v3002_v21 = vpop.f32.mrf.mxu1 }
 0xd4e   :  { %v3016_v48 = vmax.f32 %v3008_v19, 0.0  ;;  %v3003_v50 = vadd.f32 %v10761_v18, %v3002_v21  ;;  %v3025_v55 = vsel %vm1540_vm1, %v3013_v60, 0.0 }
 0xd4f   :  { %v15223_v27 = vpop.f32.mrf.mxu1  ;;  %3026 = vadd.xlane.f32.xlu1 %v3025_v55 }
 0xd50   :  { %v3015_v23 = vmax.f32 %v3003_v50, 0.0  ;;  %v3034_v15 = vsel %vm1540_vm1, %v3016_v48, 0.0 }
 0xd51   :  { %3035 = vadd.xlane.f32.xlu0 %v3034_v15  ;;  %v12444_v5 = vpop.f32.mrf.mxu1  ;;  %v3133_v15 = vld [vmem:[%s19195_s14 + $0x30] sm:$0xff] }
 0xd52   :  { %v3031_v8 = vsel %vm1540_vm1, %v3015_v23, 0.0  ;;  %v3132_v5 = vld [vmem:[%s19195_s14 + $0x28] sm:$0xff] }
 0xd53   :  { %3032 = vadd.xlane.f32.xlu1 %v3031_v8  ;;  %v3131_v8 = vld [vmem:[%s19195_s14 + $0x20] sm:$0xff] }
 0xdd2   :  { %v3024_v38 = vpop.xlane.xlu0 %3023 }
 0xdd3   :  { %v3038_v57 = vmul.f32 0.015625, %v3024_v38  ;;  %v3130_v38 = vld [vmem:[%s19195_s14 + $0x18] sm:$0xff] }
 0xdd4   :  { %v3021_v62 = vpop.xlane.xlu1 %3020 }
 0xdd5   :  { %v15227_v58 = vsub.f32 %v3012_v37, %v3038_v57  ;;  %v3037_v1 = vmul.f32 0.015625, %v3021_v62  ;;  %v3129_v57 = vld [vmem:[%s19195_s14 + $0x10] sm:$0xff]  ;;  %v3128_v62 = vld [vmem:[%s19195_s14 + $0x8] sm:$0xff] }
 0xdd6   :  { %v3030_v46 = vpop.xlane.xlu0 %3029 }
 0xdd7   :  { %v15229_v45 = vsub.f32 %v3011_v56, %v3037_v1  ;;  %v3040_v9 = vmul.f32 0.015625, %v3030_v46  ;;  %v3050_v18 = vmul.f32 %v15227_v58, %v15227_v58  ;;  %v3127_v1 = vld [vmem:[%s19195_s14] sm:$0xff]  ;;  %v3462_v46 = vld [vmem:[%s19196_s19 + $0x38] sm:$0xff] }
 0xdd8   :  { %v3027_v52 = vpop.xlane.xlu1 %3026 }
 0xdd9   :  { %v15233_v54 = vsub.f32 %v3014_v28, %v3040_v9  ;;  %v3039_v3 = vmul.f32 0.015625, %v3027_v52  ;;  %v3058_v47 = vsel %vm1540_vm1, %v3050_v18, 0.0  ;;  %v3049_v31 = vmul.f32 %v15229_v45, %v15229_v45 }
 0xdda   :  { %3059 = vadd.xlane.f32.xlu0 %v3058_v47  ;;  %v3036_v37 = vpop.xlane.xlu0 %3035 }
 0xddb   :  { %v15238_v25 = vsub.f32 %v3013_v60, %v3039_v3  ;;  %v3042_v12 = vmul.f32 0.015625, %v3036_v37  ;;  %v3055_v56 = vsel %vm1540_vm1, %v3049_v31, 0.0  ;;  %v3052_v32 = vmul.f32 %v15233_v54, %v15233_v54 }
 0xddc   :  { %3056 = vadd.xlane.f32.xlu1 %v3055_v56  ;;  %v3033_v28 = vpop.xlane.xlu1 %3032 }
 0xddd   :  { %v15243_v30 = vsub.f32 %v3016_v48, %v3042_v12  ;;  %v3041_v14 = vmul.f32 0.015625, %v3033_v28  ;;  %v3064_v34 = vsel %vm1540_vm1, %v3052_v32, 0.0  ;;  %v3051_v19 = vmul.f32 %v15238_v25, %v15238_v25 }
 0xdde   :  { %3065 = vadd.xlane.f32.xlu0 %v3064_v34 }
 0xddf   :  { %v15248_v60 = vsub.f32 %v3015_v23, %v3041_v14  ;;  %v3061_v4 = vsel %vm1540_vm1, %v3051_v19, 0.0  ;;  %v3054_v21 = vmul.f32 %v15243_v30, %v15243_v30  ;;  %v3134_v23 = vld [vmem:[%s19195_s14 + $0x38] sm:$0xff] }
 0xde0   :  { %3062 = vadd.xlane.f32.xlu1 %v3061_v4  ;;  %12409 = vmatprep.subr.mxu0 %v3134_v23 }
 0xde1   :  { %v3070_v48 = vsel %vm1540_vm1, %v3054_v21, 0.0  ;;  %v3053_v50 = vmul.f32 %v15248_v60, %v15248_v60  ;;  %12410 = vmatpush3.msra.mxu0 %v3134_v23  ;;  %v10768_v23 = vld [vmem:[%s19197_s5] ss:$0 sm:$0xff] }
 0xde2   :  { %3071 = vadd.xlane.f32.xlu0 %v3070_v48  ;;  %12411 = vmatprep.subr.mxu0 %v3133_v15 }
 0xde3   :  { %v3067_v55 = vsel %vm1540_vm1, %v3053_v50, 0.0  ;;  %12412 = vmatpush3.msra.mxu0 %v3133_v15 }
 0xde4   :  { %3068 = vadd.xlane.f32.xlu1 %v3067_v55  ;;  %12413 = vmatprep.subr.mxu0 %v3132_v5 }
 0xde5   :  { %12414 = vmatpush3.msra.mxu0 %v3132_v5 }
 0xde6   :  { %12415 = vmatprep.subr.mxu0 %v3131_v8 }
 0xde7   :  { %12416 = vmatpush3.msra.mxu0 %v3131_v8  ;;  %v10769_v8 = vld [vmem:[%s19198_s21] ss:$0 sm:$0xff] }
 0xde8   :  { %12417 = vmatprep.subr.mxu0 %v3130_v38 }
 0xde9   :  { %12418 = vmatpush3.msra.mxu0 %v3130_v38 }
 0xdea   :  { %12419 = vmatprep.subr.mxu0 %v3129_v57 }
 0xdeb   :  { %12420 = vmatpush3.msra.mxu0 %v3129_v57 }
 0xdec   :  { %12421 = vmatprep.subr.mxu0 %v3128_v62 }
 0xded   :  { %12422 = vmatpush3.msra.mxu0 %v3128_v62 }
 0xdee   :  { %12423 = vmatprep.subr.mxu0 %v3127_v1 }
 0xdef   :  { %12424 = vmatpush3.msra.mxu0 %v3127_v1 }
 0xdf0   :  { %12445 = vmatprep.subr.mxu0 %v3462_v46 }
 0xe63   :  { %v3060_v9 = vpop.xlane.xlu0 %3059 }
 0xe64   :  { %v3074_v18 = vmul.f32 0.015625, %v3060_v9 }
 0xe65   :  { %v3057_v52 = vpop.xlane.xlu1 %3056 }
 0xe66   :  { %v3080_v3 = vadd.f32 1e-05, %v3074_v18  ;;  %v3073_v47 = vmul.f32 0.015625, %v3057_v52 }
 0xe67   :  { %v3066_v31 = vpop.xlane.xlu0 %3065 }
 0xe68   :  { %13432 = vrsqrt.f32 %v3080_v3  ;;  %v3079_v37 = vadd.f32 1e-05, %v3073_v47  ;;  %v3076_v12 = vmul.f32 0.015625, %v3066_v31 }
 0xe69   :  { %v3063_v56 = vpop.xlane.xlu1 %3062 }
 0xe6a   :  { %13434 = vrsqrt.f32 %v3079_v37  ;;  %v3082_v32 = vadd.f32 1e-05, %v3076_v12  ;;  %v3075_v28 = vmul.f32 0.015625, %v3063_v56 }
 0xe6b   :  { %v3072_v14 = vpop.xlane.xlu0 %3071 }
 0xe6c   :  { %13436 = vrsqrt.f32 %v3082_v32  ;;  %v3081_v34 = vadd.f32 1e-05, %v3075_v28  ;;  %v3078_v19 = vmul.f32 0.015625, %v3072_v14  ;;  %v3461_v14 = vld [vmem:[%s19196_s19 + $0x30] sm:$0xff] }
 0xe6d   :  { %v3069_v4 = vpop.xlane.xlu1 %3068 }
 0xe6e   :  { %13438 = vrsqrt.f32 %v3081_v34  ;;  %v3084_v21 = vadd.f32 1e-05, %v3078_v19  ;;  %v3077_v48 = vmul.f32 0.015625, %v3069_v4  ;;  %v3460_v4 = vld [vmem:[%s19196_s19 + $0x28] sm:$0xff] }
 0xe70   :  { %13440 = vrsqrt.f32 %v3084_v21  ;;  %v3083_v50 = vadd.f32 1e-05, %v3077_v48 }
 0xe72   :  { %13442 = vrsqrt.f32 %v3083_v50  ;;  %v3459_v50 = vld [vmem:[%s19196_s19 + $0x20] sm:$0xff] }
 0xe75   :  { %v13433_v55 = vpop.eup %13432 }
 0xe76   :  { %v3092_v15 = vmul.f32 %v13433_v55, %v15227_v58 }
 0xe77   :  { %v13435_v5 = vpop.eup %13434 }
 0xe78   :  { %v3091_v38 = vmul.f32 %v13435_v5, %v15229_v45  ;;  %v3104_v57 = vmul.f32 %v10768_v23, %v3092_v15  ;;  %v3457_v5 = vld [vmem:[%s19196_s19 + $0x10] sm:$0xff] }
 0xe79   :  { %v13437_v62 = vpop.eup %13436 }
 0xe7a   :  { %v3103_v1 = vmul.f32 %v10768_v23, %v3091_v38  ;;  %v3094_v9 = vmul.f32 %v13437_v62, %v15233_v54  ;;  %v3116_v52 = vadd.f32 %v10769_v8, %v3104_v57  ;;  %v3442_v54 = vrot.slane %v15223_v27, %v14841_v2  ;;  %v3455_v57 = vld [vmem:[%s19196_s19] sm:$0xff] }
 0xe7b   :  { %v13439_v18 = vpop.eup %13438 }
 0xe7c   :  { %v3115_v3 = vadd.f32 %v10769_v8, %v3103_v1  ;;  %v3093_v47 = vmul.f32 %v13439_v18, %v15238_v25  ;;  %v3106_v31 = vmul.f32 %v10768_v23, %v3094_v9  ;;  %v3122_v32 = vmul.f32 %v3116_v52, %v14766_v63 }
 0xe7d   :  { %v13441_v37 = vpop.eup %13440  ;;  %v3444_v38 = vadd.f32 %v3442_v54, %v15126_v49  ;;  %v3445_v62 = vadd.f32 %v3442_v54, %v15134_v20  ;;  %v3446_v9 = vadd.f32 %v3442_v54, %v15144_v7  ;;  %v3447_v52 = vadd.f32 %v3442_v54, %v15151_v13 }
 0xe7e   :  { %v3121_v58 = vmul.f32 %v3115_v3, %v14711_v53  ;;  %v3105_v12 = vmul.f32 %v10768_v23, %v3093_v47  ;;  %v3096_v56 = vmul.f32 %v13441_v37, %v15243_v30  ;;  %v3118_v28 = vadd.f32 %v10769_v8, %v3106_v31  ;;  %v3602_v3 = vld [vmem:[%s19199_s27 + $0x38] sm:$0xff]  ;;  %v3600_v47 = vld [vmem:[%s19199_s27 + $0x28] sm:$0xff]  ;;  %v3599_v31 = vld [vmem:[%s19199_s27 + $0x20] sm:$0xff] }
 0xe7f   :  { %v13443_v45 = vpop.eup %13442  ;;  %v3450_v1 = vmul.f32 %v3444_v38, %v14766_v63  ;;  %v3451_v18 = vmul.f32 %v3445_v62, %v14779_v11  ;;  %v3452_v49 = vmul.f32 %v3446_v9, %v14802_v29  ;;  %v3448_v20 = vadd.f32 %v3442_v54, %v15156_v16  ;;  %12470 = vmatprep.subr.mxu1 %v3602_v3  ;;  %v3601_v16 = vld [vmem:[%s19199_s27 + $0x30] sm:$0xff]  ;;  %v3598_v37 = vld [vmem:[%s19199_s27 + $0x18] sm:$0xff] }
 0xe80   :  { %12425 = vmatprep.mubr.msk.f32.mxu0 %vm1540_vm1, %v3121_v58  ;;  %v3117_v25 = vadd.f32 %v10769_v8, %v3105_v12  ;;  %v3095_v34 = vmul.f32 %v13443_v45, %v15248_v60  ;;  %v3108_v19 = vmul.f32 %v10768_v23, %v3096_v56  ;;  %v3124_v48 = vmul.f32 %v3118_v28, %v14802_v29  ;;  %v3597_v58 = vld [vmem:[%s19199_s27 + $0x10] sm:$0xff]  ;;  %v3596_v12 = vld [vmem:[%s19199_s27 + $0x8] sm:$0xff]  ;;  %v3595_v56 = vld [vmem:[%s19199_s27] sm:$0xff] }
 0xe81   :  { %12426 = vmatmul.mubr.msk.f32.vlgmr.msra.gmra.mxu0 %vm1540_vm1, %v3122_v32  ;;  %v3443_v60 = vadd.f32 %v3442_v54, %v15120_v24  ;;  %v3456_v24 = vld [vmem:[%s19196_s19 + $0x8] sm:$0xff]  ;;  %v3453_v7 = vmul.f32 %v3447_v52, %v14818_v22  ;;  %v3454_v13 = vmul.f32 %v3448_v20, %v14830_v26  ;;  %12471 = vmatpush3.msra.mxu1 %v3602_v3 }
 0xe82   :  { %12446 = vmatpush3.msra.mxu0 %v3462_v46  ;;  %v3123_v30 = vmul.f32 %v3117_v25, %v14779_v11  ;;  %v3107_v21 = vmul.f32 %v10768_v23, %v3095_v34  ;;  %v3120_v27 = vadd.f32 %v10769_v8, %v3108_v19  ;;  %v3458_v23 = vld [vmem:[%s19196_s19 + $0x18] sm:$0xff]  ;;  %12472 = vmatprep.subr.mxu1 %v3601_v16 }
 0xe83   :  { %12447 = vmatprep.subr.mxu0 %v3461_v14  ;;  %12473 = vmatpush3.msra.mxu1 %v3601_v16 }
 0xe84   :  { %12448 = vmatpush3.msra.mxu0 %v3461_v14  ;;  %12428 = vmatprep.mubr.msk.f32.mxu0 %vm1540_vm1, %v3123_v30  ;;  %v3119_v55 = vadd.f32 %v10769_v8, %v3107_v21  ;;  %v3126_v15 = vmul.f32 %v3120_v27, %v14830_v26  ;;  %v3449_v8 = vmul.f32 %v3443_v60, %v14711_v53  ;;  %v10770_v14 = vld [vmem:[%s19200_s28] ss:$0 sm:$0xff] }
 0xe85   :  { %12449 = vmatprep.subr.mxu0 %v3460_v4  ;;  %12429 = vmatmul.mubr.msk.f32.gmra.mxu0 %vm1540_vm1, %v3124_v48 }
 0xe86   :  { %12450 = vmatpush3.msra.mxu0 %v3460_v4  ;;  %v3125_v46 = vmul.f32 %v3119_v55, %v14818_v22  ;;  %12474 = vmatprep.subr.mxu1 %v3600_v47 }
 0xe87   :  { %12451 = vmatprep.subr.mxu0 %v3459_v50  ;;  %12475 = vmatpush3.msra.mxu1 %v3600_v47 }
 0xe88   :  { %12452 = vmatpush3.msra.mxu0 %v3459_v50  ;;  %12431 = vmatprep.mubr.msk.f32.mxu0 %vm1540_vm1, %v3125_v46  ;;  %v10780_v46 = vld [vmem:[#allocation10] ss:$0 sm:$0xff] }
 0xe89   :  { %12453 = vmatprep.subr.mxu0 %v3458_v23  ;;  %12432 = vmatmul.mubr.msk.f32.gmra.mxu0 %vm1540_vm1, %v3126_v15 }
 0xe8a   :  { %12454 = vmatpush3.msra.mxu0 %v3458_v23  ;;  %12461 = vmatprep.mubr.msk.f32.mxu0 %vm1540_vm1, %v3449_v8 }
 0xe8b   :  { %12455 = vmatprep.subr.mxu0 %v3457_v5  ;;  %12476 = vmatprep.subr.mxu1 %v3599_v31 }
 0xe8c   :  { %12456 = vmatpush3.msra.mxu0 %v3457_v5  ;;  %12477 = vmatpush3.msra.mxu1 %v3599_v31 }
 0xe8d   :  { %12457 = vmatprep.subr.mxu0 %v3456_v24  ;;  %12478 = vmatprep.subr.mxu1 %v3598_v37 }
 0xe8e   :  { %12458 = vmatpush3.msra.mxu0 %v3456_v24  ;;  %12479 = vmatpush3.msra.mxu1 %v3598_v37 }
 0xe8f   :  { %12459 = vmatprep.subr.mxu0 %v3455_v57  ;;  %12480 = vmatprep.subr.mxu1 %v3597_v58 }
 0xe90   :  { %12460 = vmatpush3.msra.mxu0 %v3455_v57  ;;  %12481 = vmatpush3.msra.mxu1 %v3597_v58 }
 0xe91   :  { %12462 = vmatmul.mubr.msk.f32.vlgmr.msra.gmra.mxu0 %vm1540_vm1, %v3450_v1  ;;  %12495 = vmatprep.subr.mxu0 %v19165_v51 }
 0xe92   :  { %12464 = vmatprep.mubr.msk.f32.mxu0 %vm1540_vm1, %v3451_v18  ;;  %12482 = vmatprep.subr.mxu1 %v3596_v12 }
 0xe93   :  { %12483 = vmatpush3.msra.mxu1 %v3596_v12 }
 0xe94   :  { %12484 = vmatprep.subr.mxu1 %v3595_v56 }
 0xe95   :  { %12465 = vmatmul.mubr.msk.f32.gmra.mxu0 %vm1540_vm1, %v3452_v49  ;;  %12485 = vmatpush3.msra.mxu1 %v3595_v56 }
 0xe96   :  { %12467 = vmatprep.mubr.msk.f32.mxu0 %vm1540_vm1, %v3453_v7  ;;  %12510 = vmatprep.subr.mxu1 %v19165_v51 }
 0xe99   :  { %12468 = vmatmul.mubr.msk.f32.gmra.mxu0 %vm1540_vm1, %v3454_v13 }
 0xe9a   :  { %12507 = vmatprep.mubr.msk.f32.mxu0 %vm13923_vm15, %v19165_v51 }
 0xf41   :  { %v12427_v45 = vpop.f32.mrf.mxu0 }
 0xf42   :  { %v15333_v27 = vadd.f32 %v12427_v45, %v10770_v14 }
 0xf43   :  { %v3226_v32 = vpop.f32.mrf.mxu0 }
 0xf44   :  { %v15337_v23 = vadd.f32 %v10770_v14, %v3226_v32  ;;  %v3256_v24 = vmax.f32 %v15333_v27, 0.0 }
 0xf45   :  { %v12430_v28 = vpop.f32.mrf.mxu0 }
 0xf46   :  { %v15326_v34 = vadd.f32 %v12430_v28, %v10770_v14  ;;  %v3255_v1 = vmax.f32 %v15337_v23, 0.0  ;;  %v3266_v13 = vsel %vm1540_vm1, %v3256_v24, 0.0 }
 0xf47   :  { %v3236_v54 = vpop.f32.mrf.mxu0 }
 0xf48   :  { %v15330_v4 = vadd.f32 %v10770_v14, %v3236_v54  ;;  %v3258_v50 = vmax.f32 %v15326_v34, 0.0  ;;  %v3263_v31 = vsel %vm1540_vm1, %v3255_v1, 0.0 }
 0xf49   :  { %v12433_v25 = vpop.f32.mrf.mxu0 }
 0xf4a   :  { %v15328_v19 = vadd.f32 %v12433_v25, %v10770_v14  ;;  %v3257_v15 = vmax.f32 %v15330_v4, 0.0  ;;  %v3272_v57 = vsel %vm1540_vm1, %v3258_v50, 0.0 }
 0xf4b   :  { %v3246_v30 = vpop.f32.mrf.mxu0 }
 0xf4c   :  { %v3260_v21 = vmax.f32 %v15328_v19, 0.0  ;;  %v3247_v48 = vadd.f32 %v10770_v14, %v3246_v30  ;;  %v3269_v18 = vsel %vm1540_vm1, %v3257_v15, 0.0 }
 0xf4e   :  { %v3259_v55 = vmax.f32 %v3247_v48, 0.0  ;;  %v3278_v60 = vsel %vm1540_vm1, %v3260_v21, 0.0 }
 0xf4f   :  { %3279 = vadd.xlane.f32.xlu1 %v3278_v60 }
 0xf50   :  { %v3275_v5 = vsel %vm1540_vm1, %v3259_v55, 0.0 }
 0xf51   :  { %v12463_v8 = vpop.f32.mrf.mxu0  ;;  %3276 = vadd.xlane.f32.xlu0 %v3275_v5 }
 0xf52   :  { %v3560_v38 = vadd.f32 %v12463_v8, %v10780_v46 }
 0xf53   :  { %v3554_v62 = vpop.f32.mrf.mxu0  ;;  %3273 = vadd.xlane.f32.xlu1 %v3272_v57 }
 0xf54   :  { %v3555_v9 = vadd.f32 %v10780_v46, %v3554_v62  ;;  %v3584_v52 = vmax.f32 %v3560_v38, 0.0 }
 0xf55   :  { %v12466_v49 = vpop.f32.mrf.mxu0  ;;  %3270 = vadd.xlane.f32.xlu0 %v3269_v18 }
 0xf56   :  { %v3583_v20 = vmax.f32 %v3555_v9, 0.0  ;;  %v3570_v7 = vadd.f32 %v12466_v49, %v10780_v46  ;;  %v3590_v37 = vmul.f32 %v3584_v52, %v14766_v63 }
 0xf57   :  { %v3564_v3 = vpop.f32.mrf.mxu0  ;;  %3267 = vadd.xlane.f32.xlu1 %v3266_v13 }
 0xf58   :  { %v3589_v16 = vmul.f32 %v3583_v20, %v14711_v53  ;;  %v3565_v47 = vadd.f32 %v10780_v46, %v3564_v3  ;;  %v3586_v58 = vmax.f32 %v3570_v7, 0.0 }
 0xf59   :  { %v12469_v12 = vpop.f32.mrf.mxu0  ;;  %3264 = vadd.xlane.f32.xlu0 %v3263_v31 }
 0xf5a   :  { %v3585_v56 = vmax.f32 %v3565_v47, 0.0  ;;  %v3580_v45 = vadd.f32 %v12469_v12, %v10780_v46  ;;  %12486 = vmatprep.mubr.msk.f32.mxu1 %vm1540_vm1, %v3589_v16  ;;  %v3592_v14 = vmul.f32 %v3586_v58, %v14802_v29 }
 0xf5b   :  { %v3574_v32 = vpop.f32.mrf.mxu0  ;;  %12487 = vmatmul.mubr.msk.f32.vlgmr.msra.gmra.mxu1 %vm1540_vm1, %v3590_v37 }
 0xf5c   :  { %v3591_v28 = vmul.f32 %v3585_v56, %v14779_v11  ;;  %v3575_v54 = vadd.f32 %v10780_v46, %v3574_v32  ;;  %v3588_v25 = vmax.f32 %v3580_v45, 0.0 }
 0xf5e   :  { %v3587_v34 = vmax.f32 %v3575_v54, 0.0  ;;  %12489 = vmatprep.mubr.msk.f32.mxu1 %vm1540_vm1, %v3591_v28  ;;  %v3594_v30 = vmul.f32 %v3588_v25, %v14830_v26  ;;  %v10787_v28 = vld [vmem:[#allocation11] ss:$0 sm:$0xff] }
 0xf5f   :  { %12490 = vmatmul.mubr.msk.f32.gmra.mxu1 %vm1540_vm1, %v3592_v14 }
 0xf60   :  { %v3593_v19 = vmul.f32 %v3587_v34, %v14818_v22 }
 0xf62   :  { %12492 = vmatprep.mubr.msk.f32.mxu1 %vm1540_vm1, %v3593_v19 }
 0xf63   :  { %12493 = vmatmul.mubr.msk.f32.gmra.mxu1 %vm1540_vm1, %v3594_v30 }
 0xf64   :  { %12522 = vmatprep.mubr.msk.f32.mxu1 %vm13923_vm15, %v19165_v51 }
 0xfd8   :  { %v3280_v4 = vpop.xlane.xlu1 %3279 }
 0xfd9   :  { %v3286_v48 = vmul.f32 0.015625, %v3280_v4 }
 0xfda   :  { %v3277_v27 = vpop.xlane.xlu0 %3276 }
 0xfdb   :  { %v3285_v60 = vmul.f32 0.015625, %v3277_v27  ;;  %v15363_v8 = vsub.f32 %v3260_v21, %v3286_v48 }
 0xfdc   :  { %v3274_v46 = vpop.xlane.xlu1 %3273 }
 0xfdd   :  { %v15361_v23 = vsub.f32 %v3259_v55, %v3285_v60  ;;  %v3284_v5 = vmul.f32 0.015625, %v3274_v46  ;;  %v3298_v21 = vmul.f32 %v15363_v8, %v15363_v8 }
 0xfde   :  { %v3271_v38 = vpop.xlane.xlu0 %3270 }
 0xfdf   :  { %v15365_v57 = vsub.f32 %v3258_v50, %v3284_v5  ;;  %v3283_v62 = vmul.f32 0.015625, %v3271_v38  ;;  %v3297_v9 = vmul.f32 %v15361_v23, %v15361_v23  ;;  %v3314_v31 = vsel %vm1540_vm1, %v3298_v21, 0.0 }
 0xfe0   :  { %v3268_v18 = vpop.xlane.xlu1 %3267 }
 0xfe1   :  { %v15369_v52 = vsub.f32 %v3257_v15, %v3283_v62  ;;  %v3282_v49 = vmul.f32 0.015625, %v3268_v18  ;;  %v3311_v20 = vsel %vm1540_vm1, %v3297_v9, 0.0  ;;  %v3296_v55 = vmul.f32 %v15365_v57, %v15365_v57  ;;  %v3766_v9 = vld [vmem:[%s19201_s29] sm:$0x3] }
 0xfe2   :  { %3312 = vadd.xlane.f32.xlu0 %v3311_v20  ;;  %v3265_v7 = vpop.xlane.xlu0 %3264  ;;  %v13924_v18 = vmov 0  }
 0xfe3   :  { %v15376_v50 = vsub.f32 %v3256_v24, %v3282_v49  ;;  %v3281_v13 = vmul.f32 0.015625, %v3265_v7  ;;  %v3308_v3 = vsel %vm1540_vm1, %v3296_v55, 0.0  ;;  %v3295_v15 = vmul.f32 %v15369_v52, %v15369_v52  ;;  %13383 = vset.pattern.permute.xlu0 %v13924_v18 }
 0xfe4   :  { %3309 = vadd.xlane.f32.xlu1 %v3308_v3 }
 0xfe5   :  { %v15381_v16 = vsub.f32 %v3255_v1, %v3281_v13  ;;  %v3305_v47 = vsel %vm1540_vm1, %v3295_v15, 0.0  ;;  %v3294_v24 = vmul.f32 %v15376_v50, %v15376_v50 }
 0xfe6   :  { %3306 = vadd.xlane.f32.xlu0 %v3305_v47 }
 0xfe7   :  { %v3293_v37 = vmul.f32 %v15381_v16, %v15381_v16  ;;  %v3302_v12 = vsel %vm1540_vm1, %v3294_v24, 0.0 }
 0xfe8   :  { %3315 = vadd.xlane.f32.xlu1 %v3314_v31 }
 0xfe9   :  { %v3299_v58 = vsel %vm1540_vm1, %v3293_v37, 0.0 }
 0xfea   :  { %3300 = vadd.xlane.f32.xlu0 %v3299_v58 }
 0xfec   :  { %3303 = vadd.xlane.f32.xlu1 %v3302_v12 }
0x101b   :  { %v12488_v1 = vpop.f32.mrf.mxu1 }
0x101c   :  { %v3700_v4 = vadd.f32 %v12488_v1, %v10787_v28 }
0x101d   :  { %v3694_v56 = vpop.f32.mrf.mxu1 }
0x101e   :  { %v3724_v46 = vmax.f32 %v3700_v4, 0.0  ;;  %v3695_v5 = vadd.f32 %v10787_v28, %v3694_v56 }
0x101f   :  { %v12491_v45 = vpop.f32.mrf.mxu1 }
0x1020   :  { %v3710_v34 = vadd.f32 %v12491_v45, %v10787_v28  ;;  %v3723_v62 = vmax.f32 %v3695_v5, 0.0 }
0x1021   :  { %v3704_v32 = vpop.f32.mrf.mxu1 }
0x1022   :  { %v3726_v27 = vmax.f32 %v3710_v34, 0.0  ;;  %v3705_v60 = vadd.f32 %v10787_v28, %v3704_v32 }
0x1023   :  { %v12494_v54 = vpop.f32.mrf.mxu1 }
0x1024   :  { %v3720_v14 = vadd.f32 %v12494_v54, %v10787_v28  ;;  %v3725_v38 = vmax.f32 %v3705_v60, 0.0  ;;  %v10778_v60 = vld [vmem:[#allocation8] ss:$0 sm:$0xff] }
0x1025   :  { %v3714_v25 = vpop.f32.mrf.mxu1 }
0x1026   :  { %v3728_v19 = vmax.f32 %v3720_v14, 0.0  ;;  %v3715_v30 = vadd.f32 %v10787_v28, %v3714_v25 }
0x1028   :  { %v3727_v48 = vmax.f32 %v3715_v30, 0.0  ;;  %3745 = vrot.lane.b32.xlu1 %v3728_v19, %s13922_s7  ;;  %v10777_v19 = vld [vmem:[#allocation7] ss:$0 sm:$0xff] }
0x102a   :  { %3743 = vrot.lane.b32.xlu0 %v3727_v48, %s13922_s7 }
0x102c   :  { %3741 = vrot.lane.b32.xlu1 %v3726_v27, %s13922_s7 }
0x102e   :  { %3737 = vrot.lane.b32.xlu0 %v3724_v46, %s13922_s7 }
0x1030   :  { %3739 = vrot.lane.b32.xlu1 %v3725_v38, %s13922_s7 }
0x1032   :  { %3769 = vperm.xlu0 %13383, %v3766_v9  }
0x1034   :  { %3735 = vrot.lane.b32.xlu1 %v3723_v62, %s13922_s7 }
0x106b   :  { %v3313_v55 = vpop.xlane.xlu0 %3312 }
0x106c   :  { %v3321_v21 = vmul.f32 0.015625, %v3313_v55 }
0x106d   :  { %v3310_v49 = vpop.xlane.xlu1 %3309 }
0x106e   :  { %v3327_v3 = vadd.f32 1e-05, %v3321_v21  ;;  %v3320_v15 = vmul.f32 0.015625, %v3310_v49 }
0x106f   :  { %v3307_v47 = vpop.xlane.xlu0 %3306 }
0x1070   :  { %v3326_v31 = vadd.f32 1e-05, %v3320_v15  ;;  %v3319_v37 = vmul.f32 0.015625, %v3307_v47 }
0x1071   :  { %v3316_v20 = vpop.xlane.xlu1 %3315 }
0x1072   :  { %v3322_v7 = vmul.f32 0.015625, %v3316_v20  ;;  %v3325_v58 = vadd.f32 1e-05, %v3319_v37 }
0x1073   :  { %v3301_v1 = vpop.xlane.xlu0 %3300 }
0x1074   :  { %v3328_v13 = vadd.f32 1e-05, %v3322_v7  ;;  %v3317_v56 = vmul.f32 0.015625, %v3301_v1 }
0x1075   :  { %v3304_v24 = vpop.xlane.xlu1 %3303 }
0x1076   :  { %13444 = vrsqrt.f32 %v3328_v13  ;;  %v3318_v12 = vmul.f32 0.015625, %v3304_v24  ;;  %v3323_v28 = vadd.f32 1e-05, %v3317_v56 }
0x1077   :  { %13446 = vrsqrt.f32 %v3327_v3 }
0x1078   :  { %13448 = vrsqrt.f32 %v3326_v31  ;;  %v3324_v45 = vadd.f32 1e-05, %v3318_v12 }
0x1079   :  { %13450 = vrsqrt.f32 %v3325_v58 }
0x107a   :  { %13452 = vrsqrt.f32 %v3324_v45 }
0x107b   :  { %13454 = vrsqrt.f32 %v3323_v28 }
0x1083   :  { %v13445_v32 = vpop.eup %13444 }
0x1084   :  { %v13447_v54 = vpop.eup %13446  ;;  %v3340_v14 = vmul.f32 %v13445_v32, %v15363_v8 }
0x1085   :  { %v3339_v25 = vmul.f32 %v13447_v54, %v15361_v23  ;;  %v13449_v34 = vpop.eup %13448 }
0x1086   :  { %v3352_v30 = vmul.f32 %v10777_v19, %v3340_v14  ;;  %v3338_v48 = vmul.f32 %v13449_v34, %v15365_v57  ;;  %v13451_v27 = vpop.eup %13450 }
0x1087   :  { %v3351_v4 = vmul.f32 %v10777_v19, %v3339_v25  ;;  %v3337_v18 = vmul.f32 %v13451_v27, %v15369_v52  ;;  %v13453_v8 = vpop.eup %13452 }
0x1088   :  { %v3364_v46 = vadd.f32 %v10778_v60, %v3352_v30  ;;  %v3350_v9 = vmul.f32 %v10777_v19, %v3338_v48  ;;  %v3336_v57 = vmul.f32 %v13453_v8, %v15376_v50  ;;  %v13455_v13 = vpop.eup %13454 }
0x1089   :  { %v3363_v62 = vadd.f32 %v10778_v60, %v3351_v4  ;;  %v3349_v21 = vmul.f32 %v10777_v19, %v3337_v18  ;;  %v3335_v37 = vmul.f32 %v13455_v13, %v15381_v16  ;;  %v10753_v16 = vld [vmem:[%s19202_s1] ss:$0 sm:$0xff] }
0x108a   :  { %v3362_v7 = vadd.f32 %v10778_v60, %v3350_v9  ;;  %v3348_v47 = vmul.f32 %v10777_v19, %v3336_v57  ;;  %v2780_v14 = vadd.f32 %v15184_v39, %v10753_v16  ;;  %v2775_v30 = vadd.f32 %v10753_v16, %v15186_v36  ;;  %v3765_v4 = vld [vmem:[%s19203_s2] sm:$0x3] }
0x108b   :  { %v3361_v31 = vadd.f32 %v10778_v60, %v3349_v21  ;;  %v3347_v1 = vmul.f32 %v10777_v19, %v3335_v37  ;;  %v2770_v48 = vadd.f32 %v15180_v61, %v10753_v16  ;;  %v2765_v27 = vadd.f32 %v10753_v16, %v15182_v43 }
0x108c   :  { %v3360_v12 = vadd.f32 %v10778_v60, %v3348_v47  ;;  %v2788_v19 = vmul.f32 %v2780_v14, %v14830_v26  ;;  %v2787_v39 = vmul.f32 %v2775_v30, %v14818_v22  ;;  %v3868_v57 = vstv %s3867_s0 }
0x108d   :  { %v3359_v28 = vadd.f32 %v10778_v60, %v3347_v1  ;;  %v2760_v60 = vadd.f32 %v15176_v59, %v10753_v16  ;;  %v2785_v36 = vmul.f32 %v2765_v27, %v14779_v11  ;;  %v15500_v1 = vcvt.s32.f32 %v14717_v41 }
0x108e   :  { %v15512_v14 = vcvt.s32.f32 %v14769_v44  ;;  %v15515_v41 = vcvt.s32.f32 %v14789_v33  ;;  %v4060_v30 = vadd.s32 120, %v14691_v10  ;;  %v4062_v33 = vadd.s32 136, %v14691_v10 }
0x108f   :  { %v2784_v61 = vmul.f32 %v2760_v60, %v14766_v63  ;;  %v4063_v27 = vadd.s32 144, %v14691_v10 }
0x1090   :  { %19206 = vst [vmem:[#allocation89_spill] sm:$0xff] %v15512_v14  ;;  %19207 = vst [vmem:[#allocation91_spill] sm:$0xff] %v15515_v41 }
0x109a   :  { %v3746_v5 = vpop.permute.xlu1 %3745 }
0x109b   :  { %v3758_v38 = vsel %vm1540_vm1, %v3364_v46, %v3746_v5  ;;  %v2786_v46 = vmul.f32 %v2770_v48, %v14802_v29  ;;  %v15526_v48 = vcvt.s32.f32 %v4052_v40 }
0x109c   :  { %v3764_v49 = vmul.f32 %v3758_v38, %v14830_v26  ;;  %v3744_v23 = vpop.permute.xlu0 %3743  ;;  %v2755_v26 = vadd.f32 %v10753_v16, %v15178_v17  ;;  %v3843_v38 = vld [vmem:[%s19204_s10] sm:$0x1]  ;;  %v4056_v16 = vadd.s32 88, %v14691_v10 }
0x109d   :  { %v3757_v20 = vsel %vm1540_vm1, %v3363_v62, %v3744_v23  ;;  %v3844_v62 = vstv %s10706_s4  ;;  %19210 = vst [vmem:[#allocation92_spill] sm:$0xff] %v15526_v48 }
0x109e   :  { %12496 = vmatpush3.xpose.msra.mxu0 %v3764_v49  ;;  %v3742_v55 = vpop.permute.xlu1 %3741  ;;  %v3763_v3 = vmul.f32 %v3757_v20, %v14818_v22  ;;  %v2783_v22 = vmul.f32 %v2755_v26, %v14711_v53  ;;  %v3845_v8 = vmul.f32 %v3844_v62, %v3843_v38  ;;  %v15536_v60 = vcvt.s32.f32 %v4056_v16 }
0x109f   :  { %12497 = vmatprep.subr.mxu0 %v19165_v51  ;;  %v3756_v15 = vsel %vm1540_vm1, %v3362_v7, %v3742_v55  ;;  %v3865_v7 = vstv %s10708_s3  ;;  %v4069_v38 = vadd.s32 192, %v14691_v10 }
0x10a0   :  { %v3762_v24 = vmul.f32 %v3756_v15, %v14802_v29  ;;  %v3738_v58 = vpop.permute.xlu0 %3737  ;;  %v13925_v29 = vmov 1.0  }
0x10a1   :  { %v3754_v45 = vsel %vm1540_vm1, %v3360_v12, %v3738_v58  ;;  %12511 = vmatpush3.msk.msra.mxu1 %vm3882_vm2, %v13925_v29  ;;  %v15496_v58 = vcvt.s32.f32 %v14691_v10  ;;  %v4051_v12 = vadd.s32 48, %v14691_v10  ;;  %vm4046_vm2 = vcmask 385024  }
0x10a2   :  { %v3740_v52 = vpop.permute.xlu1 %3739  ;;  %12498 = vmatpush3.xpose.msra.mxu0 %v3763_v3  ;;  %v3760_v54 = vmul.f32 %v3754_v45, %v14766_v63  ;;  %12512 = vmatprep.subr.mxu1 %v19165_v51  ;;  %v4053_v45 = vadd.s32 64, %v14691_v10 }
0x10a3   :  { %12499 = vmatprep.subr.mxu0 %v19165_v51  ;;  %v3755_v50 = vsel %vm1540_vm1, %v3361_v31, %v3740_v52  ;;  %12513 = vmatpush3.msk.msra.mxu1 %vm3881_vm3, %v13925_v29  ;;  %v3874_v31 = vstv %s10707_s6 }
0x10a4   :  { %v3761_v56 = vmul.f32 %v3755_v50, %v14779_v11  ;;  %12514 = vmatprep.subr.mxu1 %v19165_v51  ;;  %v15528_v44 = vcvt.s32.f32 %v4053_v45 }
0x10a5   :  { %12515 = vmatpush3.msk.msra.mxu1 %vm3880_vm4, %v13925_v29 }
0x10a6   :  { %12500 = vmatpush3.xpose.msra.mxu0 %v3762_v24  ;;  %v3736_v32 = vpop.permute.xlu1 %3735  ;;  %12516 = vmatprep.subr.mxu1 %v19165_v51  ;;  %19211 = vst [vmem:[#allocation93_spill] sm:$0xff] %v15528_v44 }
0x10a7   :  { %12501 = vmatprep.subr.mxu0 %v19165_v51  ;;  %v3753_v25 = vsel %vm1540_vm1, %v3359_v28, %v3736_v32  ;;  %12517 = vmatpush3.msk.msra.mxu1 %vm3879_vm5, %v13925_v29  ;;  %v4054_v32 = vadd.s32 72, %v14691_v10  ;;  %v4055_v28 = vadd.s32 80, %v14691_v10 }
0x10a8   :  { %v3759_v34 = vmul.f32 %v3753_v25, %v14711_v53  ;;  %12518 = vmatprep.subr.mxu1 %v19165_v51  ;;  %v13926_v53 = vmov 1966171168   ;;  %v4058_v25 = vadd.s32 104, %v14691_v10 }
0x10a9   :  { %12519 = vmatpush3.msk.msra.mxu1 %vm3878_vm6, %v13925_v29  ;;  %v3848_v63 = vunpack.c.l.s4 %v13926_v53  ;;  %v15547_v53 = vcvt.s32.f32 %v4060_v30 }
0x10aa   :  { %12502 = vmatpush3.xpose.msra.mxu0 %v3761_v56  ;;  %12520 = vmatprep.subr.mxu1 %v19165_v51  ;;  %v15503_v56 = vcvt.s32.f32 %v14725_v6  ;;  %v15518_v6 = vcvt.s32.f32 %v14807_v35  ;;  %v15532_v35 = vcvt.s32.f32 %v4054_v32  ;;  %v15540_v26 = vcvt.s32.f32 %v4058_v25 }
0x10ab   :  { %12503 = vmatprep.subr.mxu0 %v19165_v51  ;;  %12521 = vmatpush3.msk.msra.mxu1 %vm3877_vm7, %v13925_v29  ;;  %v3849_v11 = vunpack.c.0.s8 %v3848_v63 }
0x10ac   :  { %12525 = vmatprep.subr.mxu1 %v19165_v51  ;;  %19208 = vst [vmem:[#allocation95_spill] sm:$0xff] %v15518_v6  ;;  %19212 = vst [vmem:[#allocation97_spill] sm:$0xff] %v15532_v35 }
0x10ad   :  { %v3770_v59 = vpop.permute.xlu0 %3769  ;;  %v15460_v17 = vsub.s32 %v3849_v11, %v14691_v10  ;;  %19215 = vst [vmem:[#allocation100_spill] sm:$0xff] %v15540_v26  ;;  %v4067_v11 = vadd.s32 176, %v14691_v10 }
0x10ae   :  { %12504 = vmatpush3.xpose.msra.mxu0 %v3760_v54  ;;  %v4057_v54 = vadd.s32 96, %v14691_v10 }
0x10af   :  { %12505 = vmatprep.subr.mxu0 %v19165_v51  ;;  %19205 = vst [vmem:[#allocation90_spill] sm:$0xff] %v15460_v17 }
0x10b2   :  { %12506 = vmatpush3.xpose.msra.mxu0 %v3759_v34  ;;  %v15521_v34 = vcvt.s32.f32 %v4051_v12 }
0x10b3   :  { %12540 = vmatprep.subr.mxu0 %v2788_v19 }
0x10b4   :  { %19209 = vst [vmem:[#allocation96_spill] sm:$0xff] %v15521_v34 }
0x10b5   :  { %12508 = vmatmul.mubr.f32.vlgmr.msra.gmra.mxu0 %v3765_v4  ;;  %v4061_v4 = vadd.s32 128, %v14691_v10 }
0x10b6   :  { %12541 = vmatpush3.msra.mxu0 %v2788_v19  ;;  %v4059_v19 = vadd.s32 112, %v14691_v10 }
0x10b7   :  { %12542 = vmatprep.subr.mxu0 %v2787_v39  ;;  %v15549_v63 = vcvt.s32.f32 %v4061_v4 }
0x10b8   :  { %12543 = vmatpush3.msra.mxu0 %v2787_v39  ;;  %v15534_v39 = vcvt.s32.f32 %v4055_v28 }
0x10b9   :  { %12544 = vmatprep.subr.mxu0 %v2786_v46  ;;  %19217 = vst [vmem:[#allocation102_spill] sm:$0xff] %v15549_v63 }
0x10ba   :  { %12545 = vmatpush3.msra.mxu0 %v2786_v46  ;;  %19213 = vst [vmem:[#allocation98_spill] sm:$0xff] %v15534_v39  ;;  %v15538_v46 = vcvt.s32.f32 %v4057_v54 }
0x10bb   :  { %12546 = vmatprep.subr.mxu0 %v2785_v36 }
0x10bc   :  { %12547 = vmatpush3.msra.mxu0 %v2785_v36  ;;  %19214 = vst [vmem:[#allocation99_spill] sm:$0xff] %v15538_v46  ;;  %v4064_v36 = vadd.s32 152, %v14691_v10 }
0x10bd   :  { %12548 = vmatprep.subr.mxu0 %v2784_v61 }
0x10be   :  { %12549 = vmatpush3.msra.mxu0 %v2784_v61  ;;  %v4065_v61 = vadd.s32 160, %v14691_v10 }
0x10bf   :  { %12550 = vmatprep.subr.mxu0 %v2783_v22 }
0x10c0   :  { %12551 = vmatpush3.msra.mxu0 %v2783_v22  ;;  %v4066_v22 = vadd.s32 168, %v14691_v10 }
0x1175   :  { %v3838_v43 = vpop.f32.mrf.mxu0 }
0x1176   :  { %v3839_v5 = vadd.f32 %v3838_v43, %v3770_v59  ;;  %v15552_v59 = vcvt.s32.f32 %v4062_v33  ;;  %v15554_v43 = vcvt.s32.f32 %v4063_v27 }
0x1177   :  { %v12509_v9 = vpop.f32.mrf.mxu0 }
0x1178   :  { %v3853_v18 = vrot.slane %v3839_v5, %v15460_v17  ;;  %v3842_v20 = vmul.f32 %v3839_v5, %v14878_v42  ;;  %19218 = vst [vmem:[#allocation103_spill] sm:$0xff] %v15552_v59  ;;  %19219 = vst [vmem:[#allocation104_spill] sm:$0xff] %v15554_v43  ;;  %v4068_v5 = vadd.s32 184, %v14691_v10  ;;  %v4070_v9 = vadd.s32 200, %v14691_v10 }
0x117a   :  { %v3854_v49 = vcombine.high %v3853_v18, %v3853_v18  ;;  %v3869_v3 = vmul.f32 %v3868_v57, %v3842_v20  ;;  %v4071_v18 = vadd.s32 208, %v14691_v10  ;;  %v15562_v20 = vcvt.s32.f32 %v4064_v36 }
0x117c   :  { %v3861_v23 = vrot.slane %v3854_v49, %v15460_v17  ;;  %v4073_v49 = vadd.s32 224, %v14691_v10 }
0x117e   :  { %v3863_v55 = vadd.f32 %v3861_v23, %v3845_v8  ;;  %v4072_v8 = vadd.s32 216, %v14691_v10  ;;  %v15587_v40 = vcvt.s32.f32 %v4073_v49 }
0x1180   :  { %v3864_v21 = vmul.f32 %v3863_v55, %v14878_v42  ;;  %v15564_v55 = vcvt.s32.f32 %v4065_v61  ;;  %v15585_v12 = vcvt.s32.f32 %v4072_v8  ;;  %19226 = vst [vmem:[#allocation111_spill] sm:$0xff] %v15587_v40 }
0x1182   :  { %v3866_v13 = vmul.f32 %v3865_v7, %v3864_v21  ;;  %19220 = vst [vmem:[#allocation105_spill] sm:$0xff] %v15564_v55  ;;  %v15566_v7 = vcvt.s32.f32 %v4066_v22  ;;  %v15568_v21 = vcvt.s32.f32 %v4067_v11 }
0x1184   :  { %v3870_v15 = vadd.f32 %v3869_v3, %v3866_v13  ;;  %19221 = vst [vmem:[#allocation106_spill] sm:$0xff] %v15566_v7  ;;  %19222 = vst [vmem:[#allocation107_spill] sm:$0xff] %v15568_v21  ;;  %v4074_v13 = vadd.s32 232, %v14691_v10  ;;  %v4075_v3 = vadd.s32 240, %v14691_v10 }
0x1186   :  { %v3871_v52 = vmul.f32 1.442695, %v3870_v15  ;;  %v4076_v15 = vadd.s32 248, %v14691_v10  ;;  %v15600_v45 = vcvt.s32.f32 %v4074_v13  ;;  %v15602_v32 = vcvt.s32.f32 %v4075_v3 }
0x1188   :  { %13456 = vpow2.f32 %v3871_v52  ;;  %19227 = vst [vmem:[#allocation112_spill] sm:$0xff] %v15600_v45  ;;  %19228 = vst [vmem:[#allocation113_spill] sm:$0xff] %v15602_v32  ;;  %v15604_v28 = vcvt.s32.f32 %v4076_v15 }
0x1195   :  { %v13457_v47 = vpop.eup %13456 }
0x1196   :  { %v3873_v37 = vmul.f32 %v13457_v47, %v14878_v42 }
0x1198   :  { %v3875_v24 = vmul.f32 %v3874_v31, %v3873_v37  ;;  %v15577_v31 = vcvt.s32.f32 %v4068_v5  ;;  %v15579_v37 = vcvt.s32.f32 %v4069_v38 }
0x119a   :  { %v3876_v50 = vceil.f32 %v3875_v24  ;;  %19223 = vst [vmem:[#allocation108_spill] sm:$0xff] %v15579_v37  ;;  %v15581_v24 = vcvt.s32.f32 %v4070_v9 }
0x119c   :  { %12523 = vmatmul.mubr.msk.f32.vlgmr.msra.gmra.mxu1 %vm1821_vm9, %v3876_v50  ;;  %19224 = vst [vmem:[#allocation109_spill] sm:$0xff] %v15581_v24 }
0x119d   :  { %12526 = vmatpush3.msk.msra.mxu1 %vm3968_vm8, %v13925_v29  ;;  %12537 = vmatprep.mubr.msk.f32.mxu1 %vm13923_vm15, %v19165_v51 }
0x119e   :  { %12527 = vmatprep.subr.mxu1 %v19165_v51 }
0x119f   :  { %12528 = vmatpush3.msk.msra.mxu1 %vm3967_vm10, %v13925_v29 }
0x11a0   :  { %12529 = vmatprep.subr.mxu1 %v19165_v51 }
0x11a1   :  { %12530 = vmatpush3.msk.msra.mxu1 %vm3966_vm11, %v13925_v29 }
0x11a2   :  { %12531 = vmatprep.subr.mxu1 %v19165_v51 }
0x11a3   :  { %12532 = vmatpush3.msk.msra.mxu1 %vm3965_vm12, %v13925_v29 }
0x11a4   :  { %12533 = vmatprep.subr.mxu1 %v19165_v51 }
0x11a5   :  { %12534 = vmatpush3.msk.msra.mxu1 %vm3964_vm13, %v13925_v29 }
0x11a6   :  { %12535 = vmatprep.subr.mxu1 %v19165_v51 }
0x11a7   :  { %12536 = vmatpush3.msk.msra.mxu1 %vm3963_vm14, %v13925_v29  ;;  %v15545_v29 = vcvt.s32.f32 %v4059_v19 }
0x11a8   :  { %12538 = vmatmul.mubr.msk.f32.vlgmr.msra.gmra.mxu1 %vm1821_vm9, %v3876_v50  ;;  %v15583_v50 = vcvt.s32.f32 %v4071_v18 }
0x11a9   :  { %19216 = vst [vmem:[#allocation101_spill] sm:$0xff] %v15545_v29 }
0x11aa   :  { %19225 = vst [vmem:[#allocation110_spill] sm:$0xff] %v15583_v50 }
0x125c   :  { %v3958_v62 = vpop.f32.mrf.mxu1 }
0x125d   :  { %v3962_v23 = vmin.f32 %v3958_v62, 256.0 }
0x125e   :  { %v12524_v57 = vpop.f32.mrf.mxu1 }
0x125f   :  { %v15574_v52 = vrot.slane %v3962_v23, %v14841_v2  ;;  %v4047_v47 = vsel %vm4046_vm2, %v3962_v23, -inf }
0x1260   :  { %4048 = vmax.xlane.f32.xlu1 %v4047_v47 }
0x1261   :  { %vm4181_vm3 = vcmp.lt.f32.partialorder %v15496_v58, %v15574_v52  ;;  %vm4182_vm4 = vcmp.lt.f32.partialorder %v15500_v1, %v15574_v52  ;;  %vm4183_vm5 = vcmp.lt.f32.partialorder %v15503_v56, %v15574_v52  ;;  %vm4184_vm6 = vcmp.lt.f32.partialorder %v15512_v14, %v15574_v52 }
0x1262   :  { %v15598_v10 = vsel %vm4181_vm3, 1.0, %v19165_v51  ;;  %vm4185_vm7 = vcmp.lt.f32.partialorder %v15515_v41, %v15574_v52  ;;  %vm4186_vm8 = vcmp.lt.f32.partialorder %v15518_v6, %v15574_v52  ;;  %vm4187_vm10 = vcmp.lt.f32.partialorder %v15521_v34, %v15574_v52 }
0x1263   :  { %vm4188_vm11 = vcmp.lt.f32.partialorder %v15526_v48, %v15574_v52  ;;  %v15615_v16 = vsel %vm4182_vm4, 1.0, %v19165_v51  ;;  %v15618_v54 = vsel %vm4183_vm5, 1.0, %v19165_v51  ;;  %v15621_v25 = vsel %vm4184_vm6, 1.0, %v19165_v51 }
0x1264   :  { %v15624_v19 = vsel %vm4185_vm7, 1.0, %v19165_v51  ;;  %vm4189_vm12 = vcmp.lt.f32.partialorder %v15528_v44, %v15574_v52  ;;  %vm4190_vm13 = vcmp.lt.f32.partialorder %v15532_v35, %v15574_v52  ;;  %vm4191_vm14 = vcmp.lt.f32.partialorder %v15534_v39, %v15574_v52 }
0x1265   :  { %vm4192_vm2 = vcmp.lt.f32.partialorder %v15536_v60, %v15574_v52  ;;  %v15635_v30 = vsel %vm4186_vm8, 1.0, %v19165_v51  ;;  %v15638_v4 = vsel %vm4187_vm10, 1.0, %v19165_v51  ;;  %v15641_v33 = vsel %vm4188_vm11, 1.0, %v19165_v51 }
0x1266   :  { %v15644_v27 = vsel %vm4189_vm12, 1.0, %v19165_v51  ;;  %vm4193_vm3 = vcmp.lt.f32.partialorder %v15538_v46, %v15574_v52  ;;  %vm4194_vm4 = vcmp.lt.f32.partialorder %v15540_v26, %v15574_v52  ;;  %vm4195_vm5 = vcmp.lt.f32.partialorder %v15545_v29, %v15574_v52 }
0x1267   :  { %vm4196_vm6 = vcmp.lt.f32.partialorder %v15547_v53, %v15574_v52  ;;  %v15655_v61 = vsel %vm4190_vm13, 1.0, %v19165_v51  ;;  %v15658_v22 = vsel %vm4191_vm14, 1.0, %v19165_v51  ;;  %v15661_v11 = vsel %vm4192_vm2, 1.0, %v19165_v51 }
0x1268   :  { %v4041_v36 = vpop.f32.mrf.mxu1  ;;  %v15664_v5 = vsel %vm4193_vm3, 1.0, %v19165_v51  ;;  %vm4197_vm7 = vcmp.lt.f32.partialorder %v15549_v63, %v15574_v52  ;;  %vm4198_vm8 = vcmp.lt.f32.partialorder %v15552_v59, %v15574_v52  ;;  %vm4199_vm10 = vcmp.lt.f32.partialorder %v15554_v43, %v15574_v52 }
0x1269   :  { %v4045_v38 = vmin.f32 %v4041_v36, 256.0  ;;  %v15673_v9 = vsel %vm4194_vm4, 1.0, %v19165_v51  ;;  %v15676_v18 = vsel %vm4195_vm5, 1.0, %v19165_v51  ;;  %v15679_v8 = vsel %vm4196_vm6, 1.0, %v19165_v51 }
0x126a   :  { %v12539_v62 = vpop.f32.mrf.mxu1  ;;  %vm4200_vm11 = vcmp.lt.f32.partialorder %v15562_v20, %v15574_v52  ;;  %v15687_v23 = vsel %vm4197_vm7, 1.0, %v19165_v51  ;;  %v15690_v57 = vsel %vm4198_vm8, 1.0, %v19165_v51  ;;  %vm4201_vm12 = vcmp.lt.f32.partialorder %v15564_v55, %v15574_v52 }
0x126b   :  { %v15684_v49 = vrot.slane %v4045_v38, %v14841_v2  ;;  %v15695_v13 = vsel %vm4199_vm10, 1.0, %v19165_v51  ;;  %v15698_v3 = vsel %vm4200_vm11, 1.0, %v19165_v51  ;;  %v15701_v15 = vsel %vm4201_vm12, 1.0, %v19165_v51 }
0x126c   :  { %19229 = vst [vmem:[#allocation114_spill] sm:$0xff] %v15698_v3  ;;  %vm4202_vm13 = vcmp.lt.f32.partialorder %v15566_v7, %v15574_v52  ;;  %vm4203_vm10 = vcmp.lt.f32.partialorder %v15568_v21, %v15574_v52  ;;  %vm4204_vm11 = vcmp.lt.f32.partialorder %v15577_v31, %v15574_v52 }
0x126d   :  { %vm4249_vm14 = vcmp.lt.f32.partialorder %v15496_v58, %v15684_v49  ;;  %vm4250_vm2 = vcmp.lt.f32.partialorder %v15500_v1, %v15684_v49  ;;  %vm4251_vm3 = vcmp.lt.f32.partialorder %v15503_v56, %v15684_v49  ;;  %vm4252_vm4 = vcmp.lt.f32.partialorder %v15512_v14, %v15684_v49 }
0x126e   :  { %v15714_v47 = vsel %vm4249_vm14, 1.0, %v19165_v51  ;;  %v15717_v36 = vsel %vm4250_vm2, 1.0, %v19165_v51  ;;  %v15720_v38 = vsel %vm4251_vm3, 1.0, %v19165_v51  ;;  %v15723_v62 = vsel %vm4252_vm4, 1.0, %v19165_v51 }
0x126f   :  { %19230 = vst [vmem:[#allocation115_spill] sm:$0xff] %v15723_v62  ;;  %vm4253_vm5 = vcmp.lt.f32.partialorder %v15515_v41, %v15684_v49  ;;  %vm4254_vm6 = vcmp.lt.f32.partialorder %v15518_v6, %v15684_v49  ;;  %vm4255_vm7 = vcmp.lt.f32.partialorder %v15521_v34, %v15684_v49  ;;  %v15743_v17 = vsel %vm4202_vm13, 1.0, %v19165_v51 }
0x1270   :  { %v15746_v42 = vsel %vm4253_vm5, 1.0, %v19165_v51  ;;  %v15749_v14 = vsel %vm4254_vm6, 1.0, %v19165_v51  ;;  %v15752_v0 = vsel %vm4255_vm7, 1.0, %v19165_v51  ;;  %vm4256_vm8 = vcmp.lt.f32.partialorder %v15526_v48, %v15684_v49 }
0x1271   :  { %v15765_v62 = vsel %vm4256_vm8, 1.0, %v19165_v51  ;;  %vm4257_vm12 = vcmp.lt.f32.partialorder %v15528_v44, %v15684_v49  ;;  %vm4258_vm13 = vcmp.lt.f32.partialorder %v15532_v35, %v15684_v49  ;;  %vm4259_vm14 = vcmp.lt.f32.partialorder %v15534_v39, %v15684_v49 }
0x1272   :  { %19231 = vst [vmem:[#allocation116_spill] sm:$0xff] %v15765_v62  ;;  %v15778_v41 = vsel %vm4257_vm12, 1.0, %v19165_v51  ;;  %v15781_v6 = vsel %vm4258_vm13, 1.0, %v19165_v51  ;;  %v15784_v34 = vsel %vm4259_vm14, 1.0, %v19165_v51  ;;  %vm4260_vm2 = vcmp.lt.f32.partialorder %v15536_v60, %v15684_v49 }
0x1273   :  { %v15795_v44 = vsel %vm4260_vm2, 1.0, %v19165_v51  ;;  %vm4261_vm3 = vcmp.lt.f32.partialorder %v15538_v46, %v15684_v49  ;;  %vm4262_vm4 = vcmp.lt.f32.partialorder %v15540_v26, %v15684_v49  ;;  %vm4263_vm5 = vcmp.lt.f32.partialorder %v15545_v29, %v15684_v49 }
0x1274   :  { %19232 = vst [vmem:[#allocation117_spill] sm:$0xff] %v15795_v44  ;;  %v15806_v35 = vsel %vm4261_vm3, 1.0, %v19165_v51  ;;  %v15809_v39 = vsel %vm4262_vm4, 1.0, %v19165_v51  ;;  %v15812_v48 = vsel %vm4263_vm5, 1.0, %v19165_v51  ;;  %vm4264_vm6 = vcmp.lt.f32.partialorder %v15547_v53, %v15684_v49 }
0x1275   :  { %v15823_v46 = vsel %vm4264_vm6, 1.0, %v19165_v51  ;;  %vm4265_vm7 = vcmp.lt.f32.partialorder %v15549_v63, %v15684_v49  ;;  %vm4266_vm8 = vcmp.lt.f32.partialorder %v15552_v59, %v15684_v49  ;;  %vm4267_vm12 = vcmp.lt.f32.partialorder %v15554_v43, %v15684_v49 }
0x1276   :  { %19233 = vst [vmem:[#allocation118_spill] sm:$0xff] %v15823_v46  ;;  %v15834_v26 = vsel %vm4265_vm7, 1.0, %v19165_v51  ;;  %v15837_v29 = vsel %vm4266_vm8, 1.0, %v19165_v51  ;;  %v15840_v62 = vsel %vm4267_vm12, 1.0, %v19165_v51  ;;  %vm4268_vm13 = vcmp.lt.f32.partialorder %v15562_v20, %v15684_v49 }
0x1277   :  { %v15851_v63 = vsel %vm4268_vm13, 1.0, %v19165_v51  ;;  %vm4269_vm14 = vcmp.lt.f32.partialorder %v15564_v55, %v15684_v49  ;;  %vm4270_vm2 = vcmp.lt.f32.partialorder %v15566_v7, %v15684_v49  ;;  %v15863_v59 = vsel %vm4203_vm10, 1.0, %v19165_v51 }
0x1278   :  { %19234 = vst [vmem:[#allocation119_spill] sm:$0xff] %v15851_v63  ;;  %v15866_v43 = vsel %vm4269_vm14, 1.0, %v19165_v51  ;;  %v15869_v44 = vsel %vm4270_vm2, 1.0, %v19165_v51  ;;  %vm4271_vm3 = vcmp.lt.f32.partialorder %v15568_v21, %v15684_v49  ;;  %v15877_v46 = vsel %vm4204_vm11, 1.0, %v19165_v51 }
0x1279   :  { %19235 = vst [vmem:[#allocation120_spill] sm:$0xff] %v15869_v44  ;;  %v15884_v63 = vsel %vm4271_vm3, 1.0, %v19165_v51  ;;  %vm4272_vm10 = vcmp.lt.f32.partialorder %v15577_v31, %v15684_v49  ;;  %vm4205_vm11 = vcmp.lt.f32.partialorder %v15579_v37, %v15574_v52  ;;  %vm4273_vm4 = vcmp.lt.f32.partialorder %v15579_v37, %v15684_v49 }
0x127a   :  { %19236 = vst [vmem:[#allocation121_spill] sm:$0xff] %v15884_v63  ;;  %v15891_v3 = vsel %vm4272_vm10, 1.0, %v19165_v51  ;;  %v15900_v7 = vsel %vm4205_vm11, 1.0, %v19165_v51  ;;  %v15903_v44 = vsel %vm4273_vm4, 1.0, %v19165_v51  ;;  %vm4206_vm5 = vcmp.lt.f32.partialorder %v15581_v24, %v15574_v52 }
0x127b   :  { %19237 = vst [vmem:[#allocation122_spill] sm:$0xff] %v15900_v7  ;;  %19238 = vst [vmem:[#allocation123_spill] sm:$0xff] %v15903_v44  ;;  %v15910_v63 = vsel %vm4206_vm5, 1.0, %v19165_v51  ;;  %vm4274_vm6 = vcmp.lt.f32.partialorder %v15581_v24, %v15684_v49  ;;  %vm4207_vm7 = vcmp.lt.f32.partialorder %v15583_v50, %v15574_v52  ;;  %vm4275_vm8 = vcmp.lt.f32.partialorder %v15583_v50, %v15684_v49 }
0x127c   :  { %19239 = vst [vmem:[#allocation124_spill] sm:$0xff] %v15910_v63  ;;  %v15917_v55 = vsel %vm4274_vm6, 1.0, %v19165_v51  ;;  %v15920_v37 = vsel %vm4207_vm7, 1.0, %v19165_v51  ;;  %vm4208_vm12 = vcmp.lt.f32.partialorder %v15585_v12, %v15574_v52  ;;  %v15929_v44 = vsel %vm4275_vm8, 1.0, %v19165_v51 }
0x127d   :  { %19240 = vst [vmem:[#allocation125_spill] sm:$0xff] %v15917_v55  ;;  %v15932_v7 = vsel %vm4208_vm12, 1.0, %v19165_v51  ;;  %vm4276_vm13 = vcmp.lt.f32.partialorder %v15585_v12, %v15684_v49  ;;  %vm4209_vm14 = vcmp.lt.f32.partialorder %v15587_v40, %v15574_v52  ;;  %vm4277_vm2 = vcmp.lt.f32.partialorder %v15587_v40, %v15684_v49 }
0x127e   :  { %v15939_v50 = vsel %vm4276_vm13, 1.0, %v19165_v51  ;;  %v15948_v55 = vsel %vm4209_vm14, 1.0, %v19165_v51  ;;  %v15951_v63 = vsel %vm4277_vm2, 1.0, %v19165_v51  ;;  %vm4210_vm3 = vcmp.lt.f32.partialorder %v15600_v45, %v15574_v52 }
0x127f   :  { %19241 = vst [vmem:[#allocation126_spill] sm:$0xff] %v15939_v50  ;;  %19242 = vst [vmem:[#allocation127_spill] sm:$0xff] %v15948_v55  ;;  %vm4278_vm10 = vcmp.lt.f32.partialorder %v15600_v45, %v15684_v49  ;;  %vm4211_vm11 = vcmp.lt.f32.partialorder %v15602_v32, %v15574_v52  ;;  %v15962_v21 = vsel %vm4210_vm3, 1.0, %v19165_v51  ;;  %vm4279_vm4 = vcmp.lt.f32.partialorder %v15602_v32, %v15684_v49 }
0x1280   :  { %19243 = vst [vmem:[#allocation128_spill] sm:$0xff] %v15951_v63  ;;  %19244 = vst [vmem:[#allocation129_spill] sm:$0xff] %v15962_v21  ;;  %v15965_v40 = vsel %vm4278_vm10, 1.0, %v19165_v51  ;;  %vm4212_vm5 = vcmp.lt.f32.partialorder %v15604_v28, %v15574_v52  ;;  %v15974_v63 = vsel %vm4211_vm11, 1.0, %v19165_v51  ;;  %v15977_v55 = vsel %vm4279_vm4, 1.0, %v19165_v51 }
0x1281   :  { %19245 = vst [vmem:[#allocation130_spill] sm:$0xff] %v15965_v40  ;;  %vm4280_vm6 = vcmp.lt.f32.partialorder %v15604_v28, %v15684_v49  ;;  %v15984_v32 = vsel %vm4212_vm5, 1.0, %v19165_v51  ;;  %vm10584_vm7 = vcmask 7168   ;;  %v19247_v49 = vld [vmem:[#allocation89_spill] sm:$0xff] }
0x1282   :  { %v15987_v52 = vsel %vm4280_vm6, 1.0, %v19165_v51 }
0x1283   :  { %19246 = vst [vmem:[#allocation131_spill] sm:$0xff] %v15987_v52 }
0x12e9   :  { %v4049_v40 = vpop.xlane.xlu1 %4048 }
0x12ea   :  { %v4050_v21 = vmax.f32 %v4049_v40, 1.0 }
0x12ec   :  { %v15992_v50 = vrot.slane %v4050_v21, %v14841_v2  ;;  %v19251_v2 = vsub.f32 %v15618_v54, %v15720_v38  ;;  %v19255_v54 = vld [vmem:[#allocation95_spill] sm:$0xff] }
0x12ee   :  { %vm4113_vm8 = vcmp.lt.f32.partialorder %v15496_v58, %v15992_v50  ;;  %vm4114_vm12 = vcmp.lt.f32.partialorder %v15500_v1, %v15992_v50  ;;  %vm4115_vm13 = vcmp.lt.f32.partialorder %v15503_v56, %v15992_v50  ;;  %vm4116_vm14 = vcmp.lt.f32.partialorder %v19247_v49, %v15992_v50 }
0x12ef   :  { %v16003_v40 = vsel %vm4113_vm8, 1.0, %v19165_v51  ;;  %v16006_v21 = vsel %vm4114_vm12, 1.0, %v19165_v51  ;;  %v16009_v24 = vsel %vm4115_vm13, 1.0, %v19165_v51  ;;  %v16012_v58 = vsel %vm4116_vm14, 1.0, %v19165_v51 }
0x12f0   :  { %19248 = vst [vmem:[#allocation89_spill] sm:$0xff] %v16012_v58  ;;  %v19249_v1 = vsub.f32 %v15598_v10, %v15714_v47  ;;  %10585 = vst.msk [vmem:[%s14274_s9] sm:$0xff] %vm10584_vm7, %v16003_v40  ;;  %v19250_v49 = vsub.f32 %v15615_v16, %v15717_v36  ;;  %v4347_v52 = vmul.f32 %v19251_v2, %v16009_v24  ;;  %v19252_v10 = vld [vmem:[#allocation115_spill] sm:$0xff]  ;;  %v19256_v2 = vld [vmem:[#allocation96_spill] sm:$0xff] }
0x12f1   :  { %10586 = vst.msk [vmem:[%s14274_s9 + $0x8] sm:$0xff] %vm10584_vm7, %v16006_v21  ;;  %10587 = vst.msk [vmem:[%s14274_s9 + $0x10] sm:$0xff] %vm10584_vm7, %v16009_v24  ;;  %v19253_v47 = vsub.f32 %v15621_v25, %v19252_v10  ;;  %v19254_v16 = vld [vmem:[#allocation91_spill] sm:$0xff]  ;;  %vm4118_vm3 = vcmp.lt.f32.partialorder %v19255_v54, %v15992_v50  ;;  %vm4119_vm10 = vcmp.lt.f32.partialorder %v19256_v2, %v15992_v50  ;;  %v19257_v36 = vld [vmem:[#allocation92_spill] sm:$0xff] }
0x12f2   :  { %v4345_v56 = vmul.f32 %v19249_v1, %v16003_v40  ;;  %v4346_v45 = vmul.f32 %v19250_v49, %v16006_v21  ;;  %10588 = vst.msk [vmem:[%s14274_s9 + $0x18] sm:$0xff] %vm10584_vm7, %v16012_v58  ;;  %vm4117_vm2 = vcmp.lt.f32.partialorder %v19254_v16, %v15992_v50  ;;  %vm4120_vm11 = vcmp.lt.f32.partialorder %v19257_v36, %v15992_v50  ;;  %v19258_v25 = vld [vmem:[#allocation88_spill] sm:$0xff] }
0x12f3   :  { %v4348_v1 = vmul.f32 %v19253_v47, %v16012_v58  ;;  %v4379_v10 = vmul.f32 %v4347_v52, %v19258_v25  ;;  %v16055_v16 = vsel %vm4117_vm2, 1.0, %v19165_v51  ;;  %v16058_v54 = vsel %vm4118_vm3, 1.0, %v19165_v51 }
0x12f4   :  { %v4377_v38 = vmul.f32 %v4345_v56, %v19258_v25  ;;  %v4378_v49 = vmul.f32 %v4346_v45, %v19258_v25  ;;  %v16061_v2 = vsel %vm4119_vm10, 1.0, %v19165_v51  ;;  %v16064_v56 = vsel %vm4120_vm11, 1.0, %v19165_v51  ;;  %10589 = vst.msk [vmem:[%s14274_s9 + $0x20] sm:$0xff] %vm10584_vm7, %v16055_v16  ;;  %10590 = vst.msk [vmem:[%s14274_s9 + $0x28] sm:$0xff] %vm10584_vm7, %v16058_v54 }
0x12f5   :  { %v4380_v47 = vmul.f32 %v4348_v1, %v19258_v25  ;;  %10554 = vst.msk [vmem:[%s14269_s8 + $0x10] sm:$0xff] %vm1821_vm9, %v4379_v10  ;;  %v19259_v45 = vsub.f32 %v15624_v19, %v15746_v42  ;;  %v19260_v1 = vsub.f32 %v15635_v30, %v15749_v14  ;;  %v19262_v42 = vld [vmem:[#allocation116_spill] sm:$0xff]  ;;  %v19264_v14 = vld [vmem:[#allocation93_spill] sm:$0xff]  ;;  %v19266_v30 = vld [vmem:[#allocation98_spill] sm:$0xff]  ;;  %vm4124_vm8 = vcmp.lt.f32.partialorder %v15536_v60, %v15992_v50 }
0x12f6   :  { %12552 = vmatprep.mubr.msk.f32.mxu0 %vm1821_vm9, %v4377_v38  ;;  %10552 = vst.msk [vmem:[%s14269_s8] sm:$0xff] %vm1821_vm9, %v4377_v38  ;;  %10553 = vst.msk [vmem:[%s14269_s8 + $0x8] sm:$0xff] %vm1821_vm9, %v4378_v49  ;;  %v19261_v38 = vsub.f32 %v15638_v4, %v15752_v0  ;;  %v19263_v19 = vsub.f32 %v15641_v33, %v19262_v42  ;;  %vm4121_vm4 = vcmp.lt.f32.partialorder %v19264_v14, %v15992_v50  ;;  %v19265_v0 = vld [vmem:[#allocation97_spill] sm:$0xff] }
0x12f7   :  { %10555 = vst.msk [vmem:[%s14269_s8 + $0x18] sm:$0xff] %vm1821_vm9, %v4380_v47  ;;  %v4349_v52 = vmul.f32 %v19259_v45, %v16055_v16  ;;  %v4350_v36 = vmul.f32 %v19260_v1, %v16058_v54  ;;  %12553 = vmatmul.mubr.msk.f32.vlgmr.msra.gmra.mxu0 %vm1821_vm9, %v4378_v49  ;;  %vm4122_vm5 = vcmp.lt.f32.partialorder %v19265_v0, %v15992_v50 }
0x12f8   :  { %v4351_v58 = vmul.f32 %v19261_v38, %v16061_v2  ;;  %10591 = vst.msk [vmem:[%s14274_s9 + $0x30] sm:$0xff] %vm10584_vm7, %v16061_v2  ;;  %v4352_v45 = vmul.f32 %v19263_v19, %v16064_v56  ;;  %10592 = vst.msk [vmem:[%s14274_s9 + $0x38] sm:$0xff] %vm10584_vm7, %v16064_v56  ;;  %vm4123_vm6 = vcmp.lt.f32.partialorder %v19266_v30, %v15992_v50  ;;  %12555 = vmatprep.mubr.msk.f32.mxu0 %vm1821_vm9, %v4379_v10 }
0x12f9   :  { %v4381_v4 = vmul.f32 %v4349_v52, %v19258_v25  ;;  %v4382_v33 = vmul.f32 %v4350_v36, %v19258_v25  ;;  %v16120_v38 = vsel %vm4121_vm4, 1.0, %v19165_v51  ;;  %v16123_v42 = vsel %vm4122_vm5, 1.0, %v19165_v51 }
0x12fa   :  { %v4383_v49 = vmul.f32 %v4351_v58, %v19258_v25  ;;  %v16117_v1 = vmul.f32 %v4352_v45, %v19258_v25  ;;  %v16126_v60 = vsel %vm4123_vm6, 1.0, %v19165_v51  ;;  %v16129_v10 = vsel %vm4124_vm8, 1.0, %v19165_v51  ;;  %10593 = vst.msk [vmem:[%s14274_s9 + $0x40] sm:$0xff] %vm10584_vm7, %v16120_v38  ;;  %10594 = vst.msk [vmem:[%s14274_s9 + $0x48] sm:$0xff] %vm10584_vm7, %v16123_v42 }
0x12fb   :  { %10556 = vst.msk [vmem:[%s14269_s8 + $0x20] sm:$0xff] %vm1821_vm9, %v4381_v4  ;;  %10557 = vst.msk [vmem:[%s14269_s8 + $0x28] sm:$0xff] %vm1821_vm9, %v4382_v33  ;;  %v19267_v58 = vsub.f32 %v15644_v27, %v15778_v41  ;;  %v19268_v36 = vsub.f32 %v15655_v61, %v15781_v6  ;;  %v19269_v45 = vsub.f32 %v15658_v22, %v15784_v34  ;;  %v19270_v41 = vld [vmem:[#allocation117_spill] sm:$0xff]  ;;  %12556 = vmatmul.mubr.msk.f32.gmra.mxu0 %vm1821_vm9, %v4380_v47  ;;  %v19272_v6 = vld [vmem:[#allocation99_spill] sm:$0xff] }
0x12fc   :  { %10558 = vst.msk [vmem:[%s14269_s8 + $0x30] sm:$0xff] %vm1821_vm9, %v4383_v49  ;;  %10559 = vst.msk [vmem:[%s14269_s8 + $0x38] sm:$0xff] %vm1821_vm9, %v16117_v1  ;;  %v19271_v27 = vsub.f32 %v15661_v11, %v19270_v41  ;;  %vm4125_vm12 = vcmp.lt.f32.partialorder %v19272_v6, %v15992_v50  ;;  %v19273_v34 = vld [vmem:[#allocation100_spill] sm:$0xff]  ;;  %v19274_v61 = vld [vmem:[#allocation101_spill] sm:$0xff]  ;;  %vm4128_vm2 = vcmp.lt.f32.partialorder %v15547_v53, %v15992_v50  ;;  %12558 = vmatprep.mubr.msk.f32.mxu0 %vm1821_vm9, %v4381_v4 }
0x12fd   :  { %v4353_v52 = vmul.f32 %v19267_v58, %v16120_v38  ;;  %v4354_v19 = vmul.f32 %v19268_v36, %v16123_v42  ;;  %v4355_v14 = vmul.f32 %v19269_v45, %v16126_v60  ;;  %10595 = vst.msk [vmem:[%s14274_s9 + $0x50] sm:$0xff] %vm10584_vm7, %v16126_v60  ;;  %10596 = vst.msk [vmem:[%s14274_s9 + $0x58] sm:$0xff] %vm10584_vm7, %v16129_v10  ;;  %v16189_v58 = vsel %vm4125_vm12, 1.0, %v19165_v51 }
0x12fe   :  { %v4356_v0 = vmul.f32 %v19271_v27, %v16129_v10  ;;  %vm4126_vm13 = vcmp.lt.f32.partialorder %v19273_v34, %v15992_v50  ;;  %vm4127_vm14 = vcmp.lt.f32.partialorder %v19274_v61, %v15992_v50  ;;  %v19275_v36 = vsub.f32 %v15664_v5, %v15806_v35  ;;  %10597 = vst.msk [vmem:[%s14274_s9 + $0x60] sm:$0xff] %vm10584_vm7, %v16189_v58  ;;  %v19278_v35 = vld [vmem:[#allocation118_spill] sm:$0xff] }
0x12ff   :  { %v4385_v22 = vmul.f32 %v4353_v52, %v19258_v25  ;;  %v16180_v11 = vmul.f32 %v4354_v19, %v19258_v25  ;;  %v16183_v47 = vmul.f32 %v4355_v14, %v19258_v25  ;;  %v16192_v53 = vsel %vm4126_vm13, 1.0, %v19165_v51  ;;  %12559 = vmatmul.mubr.msk.f32.gmra.mxu0 %vm1821_vm9, %v4382_v33 }
0x1300   :  { %v16186_v30 = vmul.f32 %v4356_v0, %v19258_v25  ;;  %v16195_v4 = vsel %vm4127_vm14, 1.0, %v19165_v51  ;;  %v16198_v52 = vsel %vm4128_vm2, 1.0, %v19165_v51  ;;  %v4357_v19 = vmul.f32 %v19275_v36, %v16189_v58  ;;  %10598 = vst.msk [vmem:[%s14274_s9 + $0x68] sm:$0xff] %vm10584_vm7, %v16192_v53  ;;  %12561 = vmatprep.mubr.msk.f32.mxu0 %vm1821_vm9, %v4383_v49 }
0x1301   :  { %10560 = vst.msk [vmem:[%s14269_s8 + $0x40] sm:$0xff] %vm1821_vm9, %v4385_v22  ;;  %10561 = vst.msk [vmem:[%s14269_s8 + $0x48] sm:$0xff] %vm1821_vm9, %v16180_v11  ;;  %v19276_v45 = vsub.f32 %v15673_v9, %v15809_v39  ;;  %v19277_v41 = vsub.f32 %v15676_v18, %v15812_v48  ;;  %v19279_v5 = vsub.f32 %v15679_v8, %v19278_v35  ;;  %v19280_v39 = vld [vmem:[#allocation102_spill] sm:$0xff]  ;;  %v19281_v48 = vld [vmem:[#allocation103_spill] sm:$0xff] }
0x1302   :  { %10562 = vst.msk [vmem:[%s14269_s8 + $0x50] sm:$0xff] %vm1821_vm9, %v16183_v47  ;;  %10563 = vst.msk [vmem:[%s14269_s8 + $0x58] sm:$0xff] %vm1821_vm9, %v16186_v30  ;;  %vm4129_vm3 = vcmp.lt.f32.partialorder %v19280_v39, %v15992_v50  ;;  %vm4130_vm10 = vcmp.lt.f32.partialorder %v19281_v48, %v15992_v50  ;;  %v19282_v9 = vld [vmem:[#allocation104_spill] sm:$0xff]  ;;  %vm4132_vm4 = vcmp.lt.f32.partialorder %v15562_v20, %v15992_v50 }
0x1303   :  { %v4358_v14 = vmul.f32 %v19276_v45, %v16192_v53  ;;  %v4359_v27 = vmul.f32 %v19277_v41, %v16195_v4  ;;  %10599 = vst.msk [vmem:[%s14274_s9 + $0x70] sm:$0xff] %vm10584_vm7, %v16195_v4  ;;  %v4360_v0 = vmul.f32 %v19279_v5, %v16198_v52  ;;  %10600 = vst.msk [vmem:[%s14274_s9 + $0x78] sm:$0xff] %vm10584_vm7, %v16198_v52  ;;  %v16262_v34 = vsel %vm4129_vm3, 1.0, %v19165_v51 }
0x1304   :  { %vm4131_vm11 = vcmp.lt.f32.partialorder %v19282_v9, %v15992_v50  ;;  %v16250_v18 = vmul.f32 %v4357_v19, %v19258_v25  ;;  %v16265_v20 = vsel %vm4130_vm10, 1.0, %v19165_v51  ;;  %v16271_v61 = vsel %vm4132_vm4, 1.0, %v19165_v51  ;;  %10601 = vst.msk [vmem:[%s14274_s9 + $0x80] sm:$0xff] %vm10584_vm7, %v16262_v34  ;;  %12562 = vmatmul.mubr.msk.f32.gmra.mxu0 %vm1821_vm9, %v16117_v1 }
0x1305   :  { %v16253_v8 = vmul.f32 %v4358_v14, %v19258_v25  ;;  %v16256_v33 = vmul.f32 %v4359_v27, %v19258_v25  ;;  %v16259_v6 = vmul.f32 %v4360_v0, %v19258_v25  ;;  %v16268_v49 = vsel %vm4131_vm11, 1.0, %v19165_v51  ;;  %10602 = vst.msk [vmem:[%s14274_s9 + $0x88] sm:$0xff] %vm10584_vm7, %v16265_v20  ;;  %10604 = vst.msk [vmem:[%s14274_s9 + $0x98] sm:$0xff] %vm10584_vm7, %v16271_v61 }
0x1306   :  { %10564 = vst.msk [vmem:[%s14269_s8 + $0x60] sm:$0xff] %vm1821_vm9, %v16250_v18  ;;  %v19283_v36 = vsub.f32 %v15687_v23, %v15834_v26  ;;  %v19284_v45 = vsub.f32 %v15690_v57, %v15837_v29  ;;  %v19285_v41 = vsub.f32 %v15695_v13, %v15840_v62  ;;  %v19286_v26 = vld [vmem:[#allocation114_spill] sm:$0xff]  ;;  %v19287_v23 = vld [vmem:[#allocation119_spill] sm:$0xff]  ;;  %v19289_v29 = vld [vmem:[#allocation105_spill] sm:$0xff]  ;;  %vm4136_vm12 = vcmp.lt.f32.partialorder %v15577_v31, %v15992_v50 }
0x1307   :  { %10565 = vst.msk [vmem:[%s14269_s8 + $0x68] sm:$0xff] %vm1821_vm9, %v16253_v8  ;;  %10566 = vst.msk [vmem:[%s14269_s8 + $0x70] sm:$0xff] %vm1821_vm9, %v16256_v33  ;;  %v19288_v35 = vsub.f32 %v19286_v26, %v19287_v23  ;;  %vm4133_vm5 = vcmp.lt.f32.partialorder %v19289_v29, %v15992_v50  ;;  %v19290_v57 = vld [vmem:[#allocation106_spill] sm:$0xff]  ;;  %v19291_v13 = vld [vmem:[#allocation107_spill] sm:$0xff]  ;;  %12564 = vmatprep.mubr.msk.f32.mxu0 %vm1821_vm9, %v4385_v22  ;;  %v16346_v9 = vsel %vm4136_vm12, 1.0, %v19165_v51 }
0x1308   :  { %10567 = vst.msk [vmem:[%s14269_s8 + $0x78] sm:$0xff] %vm1821_vm9, %v16259_v6  ;;  %v4361_v19 = vmul.f32 %v19283_v36, %v16262_v34  ;;  %v4362_v14 = vmul.f32 %v19284_v45, %v16265_v20  ;;  %v4363_v27 = vmul.f32 %v19285_v41, %v16268_v49  ;;  %vm4134_vm6 = vcmp.lt.f32.partialorder %v19290_v57, %v15992_v50  ;;  %v19293_v45 = vld [vmem:[#allocation120_spill] sm:$0xff] }
0x1309   :  { %10603 = vst.msk [vmem:[%s14274_s9 + $0x90] sm:$0xff] %vm10584_vm7, %v16268_v49  ;;  %v4364_v5 = vmul.f32 %v19288_v35, %v16271_v61  ;;  %vm4135_vm8 = vcmp.lt.f32.partialorder %v19291_v13, %v15992_v50  ;;  %v16337_v48 = vsel %vm4133_vm5, 1.0, %v19165_v51  ;;  %v16340_v31 = vsel %vm4134_vm6, 1.0, %v19165_v51  ;;  %10608 = vst.msk [vmem:[%s14274_s9 + $0xb8] sm:$0xff] %vm10584_vm7, %v16346_v9  ;;  %12565 = vmatmul.mubr.msk.f32.gmra.mxu0 %vm1821_vm9, %v16180_v11  ;;  %v19300_v35 = vld [vmem:[#allocation110_spill] sm:$0xff] }
0x130a   :  { %v16325_v62 = vmul.f32 %v4361_v19, %v19258_v25  ;;  %v16328_v1 = vmul.f32 %v4362_v14, %v19258_v25  ;;  %v16331_v0 = vmul.f32 %v4363_v27, %v19258_v25  ;;  %v16343_v22 = vsel %vm4135_vm8, 1.0, %v19165_v51  ;;  %10605 = vst.msk [vmem:[%s14274_s9 + $0xa0] sm:$0xff] %vm10584_vm7, %v16337_v48  ;;  %10606 = vst.msk [vmem:[%s14274_s9 + $0xa8] sm:$0xff] %vm10584_vm7, %v16340_v31  ;;  %v19295_v27 = vld [vmem:[#allocation121_spill] sm:$0xff]  ;;  %v19305_v13 = vld [vmem:[#allocation122_spill] sm:$0xff] }
0x130b   :  { %v16334_v39 = vmul.f32 %v4364_v5, %v19258_v25  ;;  %v19292_v36 = vsub.f32 %v15701_v15, %v15866_v43  ;;  %v19294_v14 = vsub.f32 %v15743_v17, %v19293_v45  ;;  %v19296_v26 = vsub.f32 %v15863_v59, %v19295_v27  ;;  %10607 = vst.msk [vmem:[%s14274_s9 + $0xb0] sm:$0xff] %vm10584_vm7, %v16343_v22  ;;  %v19298_v17 = vld [vmem:[#allocation108_spill] sm:$0xff]  ;;  %v19299_v59 = vld [vmem:[#allocation109_spill] sm:$0xff] }
0x130c   :  { %10568 = vst.msk [vmem:[%s14269_s8 + $0x80] sm:$0xff] %vm1821_vm9, %v16325_v62  ;;  %10569 = vst.msk [vmem:[%s14269_s8 + $0x88] sm:$0xff] %vm1821_vm9, %v16328_v1  ;;  %v19297_v43 = vsub.f32 %v15877_v46, %v15891_v3  ;;  %vm4137_vm13 = vcmp.lt.f32.partialorder %v19298_v17, %v15992_v50  ;;  %vm4138_vm14 = vcmp.lt.f32.partialorder %v19299_v59, %v15992_v50  ;;  %12567 = vmatprep.mubr.msk.f32.mxu0 %vm1821_vm9, %v16183_v47 }
0x130d   :  { %10570 = vst.msk [vmem:[%s14269_s8 + $0x90] sm:$0xff] %vm1821_vm9, %v16331_v0  ;;  %10571 = vst.msk [vmem:[%s14269_s8 + $0x98] sm:$0xff] %vm1821_vm9, %v16334_v39  ;;  %v4365_v19 = vmul.f32 %v19292_v36, %v16337_v48  ;;  %v4366_v41 = vmul.f32 %v19294_v14, %v16340_v31  ;;  %v4367_v23 = vmul.f32 %v19296_v26, %v16343_v22  ;;  %v16405_v29 = vsel %vm4137_vm13, 1.0, %v19165_v51  ;;  %v19306_v36 = vld [vmem:[#allocation123_spill] sm:$0xff]  ;;  %v19308_v14 = vld [vmem:[#allocation124_spill] sm:$0xff] }
0x130e   :  { %v4368_v15 = vmul.f32 %v19297_v43, %v16346_v9  ;;  %vm4139_vm2 = vcmp.lt.f32.partialorder %v19300_v35, %v15992_v50  ;;  %vm4140_vm3 = vcmp.lt.f32.partialorder %v15585_v12, %v15992_v50  ;;  %19301 = vst [vmem:[#allocation115_spill] sm:$0xff] %v16405_v29  ;;  %v16408_v57 = vsel %vm4138_vm14, 1.0, %v19165_v51  ;;  %10609 = vst.msk [vmem:[%s14274_s9 + $0xc0] sm:$0xff] %vm10584_vm7, %v16405_v29  ;;  %v19314_v35 = vld [vmem:[#allocation111_spill] sm:$0xff] }
0x130f   :  { %v4397_v46 = vmul.f32 %v4365_v19, %v19258_v25  ;;  %v4398_v3 = vmul.f32 %v4366_v41, %v19258_v25  ;;  %v4399_v11 = vmul.f32 %v4367_v23, %v19258_v25  ;;  %19302 = vst [vmem:[#allocation91_spill] sm:$0xff] %v16408_v57  ;;  %v16411_v12 = vsel %vm4139_vm2, 1.0, %v19165_v51  ;;  %v19309_v41 = vld [vmem:[#allocation125_spill] sm:$0xff]  ;;  %10610 = vst.msk [vmem:[%s14274_s9 + $0xc8] sm:$0xff] %vm10584_vm7, %v16408_v57 }
0x1310   :  { %v4400_v5 = vmul.f32 %v4368_v15, %v19258_v25  ;;  %19303 = vst [vmem:[#allocation95_spill] sm:$0xff] %v16411_v12  ;;  %v16414_v47 = vsel %vm4140_vm3, 1.0, %v19165_v51  ;;  %v19307_v19 = vsub.f32 %v19305_v13, %v19306_v36  ;;  %v19310_v27 = vsub.f32 %v19308_v14, %v19309_v41  ;;  %10611 = vst.msk [vmem:[%s14274_s9 + $0xd0] sm:$0xff] %vm10584_vm7, %v16411_v12  ;;  %v19312_v15 = vld [vmem:[#allocation126_spill] sm:$0xff] }
0x1311   :  { %19304 = vst [vmem:[#allocation96_spill] sm:$0xff] %v16414_v47  ;;  %10572 = vst.msk [vmem:[%s14269_s8 + $0xa0] sm:$0xff] %vm1821_vm9, %v4397_v46  ;;  %v19311_v23 = vsub.f32 %v15920_v37, %v15929_v44  ;;  %v19313_v17 = vsub.f32 %v15932_v7, %v19312_v15  ;;  %12568 = vmatmul.mubr.msk.f32.gmra.mxu0 %vm1821_vm9, %v16186_v30  ;;  %vm4141_vm10 = vcmp.lt.f32.partialorder %v19314_v35, %v15992_v50  ;;  %v19315_v44 = vld [vmem:[#allocation112_spill] sm:$0xff]  ;;  %v19316_v37 = vld [vmem:[#allocation113_spill] sm:$0xff] }
0x1312   :  { %10573 = vst.msk [vmem:[%s14269_s8 + $0xa8] sm:$0xff] %vm1821_vm9, %v4398_v3  ;;  %10574 = vst.msk [vmem:[%s14269_s8 + $0xb0] sm:$0xff] %vm1821_vm9, %v4399_v11  ;;  %v4369_v45 = vmul.f32 %v19307_v19, %v16405_v29  ;;  %v4370_v26 = vmul.f32 %v19310_v27, %v16408_v57  ;;  %vm4142_vm11 = vcmp.lt.f32.partialorder %v19315_v44, %v15992_v50  ;;  %12570 = vmatprep.mubr.msk.f32.mxu0 %vm1821_vm9, %v16250_v18  ;;  %v19321_v18 = vld [vmem:[#allocation127_spill] sm:$0xff] }
0x1313   :  { %10575 = vst.msk [vmem:[%s14269_s8 + $0xb8] sm:$0xff] %vm1821_vm9, %v4400_v5  ;;  %v4371_v43 = vmul.f32 %v19311_v23, %v16411_v12  ;;  %v4372_v59 = vmul.f32 %v19313_v17, %v16414_v47  ;;  %vm4143_vm4 = vcmp.lt.f32.partialorder %v19316_v37, %v15992_v50  ;;  %vm4144_vm5 = vcmp.lt.f32.partialorder %v15604_v28, %v15992_v50  ;;  %v19325_v23 = vld [vmem:[#allocation130_spill] sm:$0xff]  ;;  %v19328_v35 = vld [vmem:[#allocation131_spill] sm:$0xff] }
0x1314   :  { %10612 = vst.msk [vmem:[%s14274_s9 + $0xd8] sm:$0xff] %vm10584_vm7, %v16414_v47  ;;  %v4401_v7 = vmul.f32 %v4369_v45, %v19258_v25  ;;  %v4402_v30 = vmul.f32 %v4370_v26, %v19258_v25  ;;  %v16469_v19 = vsel %vm4141_vm10, 1.0, %v19165_v51  ;;  %v16472_v14 = vsel %vm4142_vm11, 1.0, %v19165_v51  ;;  %v19322_v45 = vld [vmem:[#allocation128_spill] sm:$0xff]  ;;  %v19324_v26 = vld [vmem:[#allocation129_spill] sm:$0xff] }
0x1315   :  { %v4403_v13 = vmul.f32 %v4371_v43, %v19258_v25  ;;  %v4404_v36 = vmul.f32 %v4372_v59, %v19258_v25  ;;  %19317 = vst [vmem:[#allocation92_spill] sm:$0xff] %v16469_v19  ;;  %19318 = vst [vmem:[#allocation88_spill] sm:$0xff] %v16472_v14  ;;  %v16475_v50 = vsel %vm4143_vm4, 1.0, %v19165_v51  ;;  %v16478_v28 = vsel %vm4144_vm5, 1.0, %v19165_v51  ;;  %12571 = vmatmul.mubr.msk.f32.gmra.mxu0 %vm1821_vm9, %v16253_v8 }
0x1316   :  { %19319 = vst [vmem:[#allocation116_spill] sm:$0xff] %v16475_v50  ;;  %19320 = vst [vmem:[#allocation93_spill] sm:$0xff] %v16478_v28  ;;  %v19323_v41 = vsub.f32 %v19321_v18, %v19322_v45  ;;  %v19326_v43 = vsub.f32 %v19324_v26, %v19325_v23  ;;  %v19327_v17 = vsub.f32 %v15974_v63, %v15977_v55  ;;  %12573 = vmatprep.mubr.msk.f32.mxu0 %vm1821_vm9, %v16256_v33 }
0x1317   :  { %10576 = vst.msk [vmem:[%s14269_s8 + $0xc0] sm:$0xff] %vm1821_vm9, %v4401_v7  ;;  %10577 = vst.msk [vmem:[%s14269_s8 + $0xc8] sm:$0xff] %vm1821_vm9, %v4402_v30  ;;  %v19329_v44 = vsub.f32 %v15984_v32, %v19328_v35 }
0x1318   :  { %10578 = vst.msk [vmem:[%s14269_s8 + $0xd0] sm:$0xff] %vm1821_vm9, %v4403_v13  ;;  %10579 = vst.msk [vmem:[%s14269_s8 + $0xd8] sm:$0xff] %vm1821_vm9, %v4404_v36  ;;  %v4373_v27 = vmul.f32 %v19323_v41, %v16469_v19  ;;  %v4374_v15 = vmul.f32 %v19326_v43, %v16472_v14  ;;  %v4375_v59 = vmul.f32 %v19327_v17, %v16475_v50 }
0x1319   :  { %10613 = vst.msk [vmem:[%s14274_s9 + $0xe0] sm:$0xff] %vm10584_vm7, %v16469_v19  ;;  %10614 = vst.msk [vmem:[%s14274_s9 + $0xe8] sm:$0xff] %vm10584_vm7, %v16472_v14  ;;  %v4376_v37 = vmul.f32 %v19329_v44, %v16478_v28  ;;  %12574 = vmatmul.mubr.msk.f32.gmra.mxu0 %vm1821_vm9, %v16259_v6 }
0x131a   :  { %10615 = vst.msk [vmem:[%s14274_s9 + $0xf0] sm:$0xff] %vm10584_vm7, %v16475_v50  ;;  %10616 = vst.msk [vmem:[%s14274_s9 + $0xf8] sm:$0xff] %vm10584_vm7, %v16478_v28  ;;  %v4405_v63 = vmul.f32 %v4373_v27, %v19258_v25  ;;  %v4406_v55 = vmul.f32 %v4374_v15, %v19258_v25  ;;  %v4407_v18 = vmul.f32 %v4375_v59, %v19258_v25  ;;  %12576 = vmatprep.mubr.msk.f32.mxu0 %vm1821_vm9, %v16325_v62  ;;  %s19330_s9 = sld [smem:[#allocation74_spill]] }
0x131b   :  { %v4408_v45 = vmul.f32 %v4376_v37, %v19258_v25 }
0x131c   :  { %10580 = vst.msk [vmem:[%s14269_s8 + $0xe0] sm:$0xff] %vm1821_vm9, %v4405_v63  ;;  %10581 = vst.msk [vmem:[%s14269_s8 + $0xe8] sm:$0xff] %vm1821_vm9, %v4406_v55 }
0x131d   :  { %10582 = vst.msk [vmem:[%s14269_s8 + $0xf0] sm:$0xff] %vm1821_vm9, %v4407_v18  ;;  %10583 = vst.msk [vmem:[%s14269_s8 + $0xf8] sm:$0xff] %vm1821_vm9, %v4408_v45  ;;  %12577 = vmatmul.mubr.msk.f32.gmra.mxu0 %vm1821_vm9, %v16328_v1  ;;  %s19346_s8 = sld [smem:[#allocation78_spill]] }
0x131e   :  { %12579 = vmatprep.mubr.msk.f32.mxu0 %vm1821_vm9, %v16331_v0 }
0x1320   :  { %v16555_v32 = vld [vmem:[%s19330_s9 + $0x38] sm:$0xff]  ;;  %v16558_v25 = vld [vmem:[%s19330_s9 + $0x30] sm:$0xff]  ;;  %v16606_v43 = vld [vmem:[%s19330_s9 + $0x8] sm:$0xff] }
0x1321   :  { %12580 = vmatmul.mubr.msk.f32.gmra.mxu0 %vm1821_vm9, %v16334_v39  ;;  %19331 = vst [vmem:[#allocation97_spill] sm:$0xff] %v16555_v32  ;;  %19332 = vst [vmem:[#allocation98_spill] sm:$0xff] %v16558_v25  ;;  %12600 = vmatprep.subr.mxu1 %v16555_v32  ;;  %v16598_v41 = vld [vmem:[%s19330_s9 + $0x10] sm:$0xff]  ;;  %v16614_v17 = vld [vmem:[%s19330_s9] sm:$0xff] }
0x1322   :  { %12582 = vmatprep.mubr.msk.f32.mxu0 %vm1821_vm9, %v4397_v46  ;;  %12601 = vmatpush3.msra.mxu1 %v16555_v32  ;;  %19336 = vst [vmem:[#allocation101_spill] sm:$0xff] %v16598_v41  ;;  %19337 = vst [vmem:[#allocation118_spill] sm:$0xff] %v16606_v43 }
0x1323   :  { %12602 = vmatprep.subr.mxu1 %v16558_v25  ;;  %19338 = vst [vmem:[#allocation102_spill] sm:$0xff] %v16614_v17 }
0x1324   :  { %12603 = vmatpush3.msra.mxu1 %v16558_v25 }
0x1325   :  { %12583 = vmatmul.mubr.msk.f32.gmra.mxu0 %vm1821_vm9, %v4398_v3 }
0x1326   :  { %12585 = vmatprep.mubr.msk.f32.mxu0 %vm1821_vm9, %v4399_v11  ;;  %v16580_v11 = vld [vmem:[%s19330_s9 + $0x28] sm:$0xff] }
0x1327   :  { %19333 = vst [vmem:[#allocation117_spill] sm:$0xff] %v16580_v11  ;;  %12604 = vmatprep.subr.mxu1 %v16580_v11 }
0x1328   :  { %12605 = vmatpush3.msra.mxu1 %v16580_v11 }
0x1329   :  { %12586 = vmatmul.mubr.msk.f32.gmra.mxu0 %vm1821_vm9, %v4400_v5  ;;  %v16583_v5 = vld [vmem:[%s19330_s9 + $0x20] sm:$0xff] }
0x132a   :  { %12588 = vmatprep.mubr.msk.f32.mxu0 %vm1821_vm9, %v4401_v7  ;;  %19334 = vst [vmem:[#allocation99_spill] sm:$0xff] %v16583_v5  ;;  %12606 = vmatprep.subr.mxu1 %v16583_v5 }
0x132b   :  { %12607 = vmatpush3.msra.mxu1 %v16583_v5 }
0x132d   :  { %12589 = vmatmul.mubr.msk.f32.gmra.mxu0 %vm1821_vm9, %v4402_v30 }
0x132e   :  { %12591 = vmatprep.mubr.msk.f32.mxu0 %vm1821_vm9, %v4403_v13  ;;  %v16591_v13 = vld [vmem:[%s19330_s9 + $0x18] sm:$0xff] }
0x132f   :  { %19335 = vst [vmem:[#allocation100_spill] sm:$0xff] %v16591_v13  ;;  %12608 = vmatprep.subr.mxu1 %v16591_v13 }
0x1330   :  { %12609 = vmatpush3.msra.mxu1 %v16591_v13 }
0x1331   :  { %12592 = vmatmul.mubr.msk.f32.gmra.mxu0 %vm1821_vm9, %v4404_v36  ;;  %12610 = vmatprep.subr.mxu1 %v16598_v41 }
0x1332   :  { %12594 = vmatprep.mubr.msk.f32.mxu0 %vm1821_vm9, %v4405_v63  ;;  %12611 = vmatpush3.msra.mxu1 %v16598_v41 }
0x1333   :  { %12612 = vmatprep.subr.mxu1 %v16606_v43 }
0x1334   :  { %12613 = vmatpush3.msra.mxu1 %v16606_v43 }
0x1335   :  { %12595 = vmatmul.mubr.msk.f32.gmra.mxu0 %vm1821_vm9, %v4406_v55  ;;  %12614 = vmatprep.subr.mxu1 %v16614_v17 }
0x1336   :  { %12597 = vmatprep.mubr.msk.f32.mxu0 %vm1821_vm9, %v4407_v18  ;;  %12615 = vmatpush3.msra.mxu1 %v16614_v17 }
0x1337   :  { %12720 = vmatprep.subr.mxu1 %v19165_v51 }
0x1339   :  { %12598 = vmatmul.mubr.msk.f32.gmra.mxu0 %vm1821_vm9, %v4408_v45 }
0x13b7   :  { %v16564_v8 = vpop.f32.mrf.mxu0 }
0x13b8   :  { %v4764_v33 = vmul.f32 1.442695, %v16564_v8 }
0x13b9   :  { %v16567_v6 = vpop.f32.mrf.mxu0 }
0x13ba   :  { %13458 = vpow2.f32 %v4764_v33  ;;  %v4762_v62 = vmul.f32 1.442695, %v16567_v6 }
0x13bb   :  { %v16570_v1 = vpop.f32.mrf.mxu0 }
0x13bc   :  { %13460 = vpow2.f32 %v4762_v62  ;;  %v4768_v39 = vmul.f32 1.442695, %v16570_v1 }
0x13bd   :  { %v16572_v0 = vpop.f32.mrf.mxu0 }
0x13be   :  { %13462 = vpow2.f32 %v4768_v39  ;;  %v4766_v7 = vmul.f32 1.442695, %v16572_v0 }
0x13bf   :  { %v16575_v46 = vpop.f32.mrf.mxu0 }
0x13c0   :  { %13464 = vpow2.f32 %v4766_v7  ;;  %v4772_v27 = vmul.f32 1.442695, %v16575_v46 }
0x13c1   :  { %v16577_v3 = vpop.f32.mrf.mxu0 }
0x13c2   :  { %13466 = vpow2.f32 %v4772_v27  ;;  %v4770_v59 = vmul.f32 1.442695, %v16577_v3 }
0x13c4   :  { %v16587_v30 = vpop.f32.mrf.mxu0 }
0x13c5   :  { %v4776_v63 = vmul.f32 1.442695, %v16587_v30 }
0x13c6   :  { %v16594_v36 = vpop.f32.mrf.mxu0 }
0x13c7   :  { %v13459_v26 = vpop.eup %13458  ;;  %v4774_v62 = vmul.f32 1.442695, %v16594_v36 }
0x13c8   :  { %4860 = vrot.lane.b32.xlu0 %v13459_v26, %s13922_s7 }
0x13c9   :  { %v16602_v23 = vpop.f32.mrf.mxu0  ;;  %v13461_v44 = vpop.eup %13460 }
0x13cb   :  { %v16610_v15 = vpop.f32.mrf.mxu0  ;;  %v13463_v18 = vpop.eup %13462 }
0x13cc   :  { %v4778_v35 = vmul.f32 1.442695, %v16610_v15  ;;  %4858 = vrot.lane.b32.xlu0 %v13461_v44, %s13922_s7 }
0x13cd   :  { %v13465_v7 = vpop.eup %13464 }
0x13ce   :  { %13468 = vpow2.f32 %v4778_v35 }
0x13cf   :  { %13470 = vpow2.f32 %v4770_v59  ;;  %v4780_v59 = vmul.f32 1.442695, %v16602_v23  ;;  %v13467_v44 = vpop.eup %13466 }
0x13d0   :  { %4864 = vrot.lane.b32.xlu0 %v13463_v18, %s13922_s7  ;;  %13472 = vpow2.f32 %v4776_v63 }
0x13d1   :  { %v16619_v37 = vpop.f32.mrf.mxu0 }
0x13d2   :  { %v4784_v17 = vmul.f32 1.442695, %v16619_v37 }
0x13d3   :  { %v16625_v55 = vpop.f32.mrf.mxu0 }
0x13d4   :  { %4862 = vrot.lane.b32.xlu0 %v13465_v7, %s13922_s7  ;;  %v4782_v41 = vmul.f32 1.442695, %v16625_v55 }
0x13d5   :  { %v16629_v45 = vpop.f32.mrf.mxu0 }
0x13d6   :  { %v4788_v33 = vmul.f32 1.442695, %v16629_v45 }
0x13d7   :  { %v16634_v39 = vpop.f32.mrf.mxu0 }
0x13d8   :  { %13474 = vpow2.f32 %v4788_v33  ;;  %4868 = vrot.lane.b32.xlu0 %v13467_v44, %s13922_s7 }
0x13d9   :  { %v16636_v27 = vpop.f32.mrf.mxu0  ;;  %13476 = vpow2.f32 %v4774_v62 }
0x13da   :  { %v4792_v26 = vmul.f32 1.442695, %v16636_v27 }
0x13db   :  { %v16641_v35 = vpop.f32.mrf.mxu0  ;;  %v13469_v33 = vpop.eup %13468 }
0x13dc   :  { %13478 = vpow2.f32 %v4792_v26  ;;  %4874 = vrot.lane.b32.xlu1 %v13469_v33, %s13922_s7  ;;  %v13471_v62 = vpop.eup %13470  ;;  %v4786_v33 = vmul.f32 1.442695, %v16634_v39 }
0x13dd   :  { %v16643_v63 = vpop.f32.mrf.mxu0  ;;  %13480 = vpow2.f32 %v4780_v59  ;;  %4866 = vrot.lane.b32.xlu0 %v13471_v62, %s13922_s7  ;;  %v13473_v59 = vpop.eup %13472 }
0x13de   :  { %v4796_v18 = vmul.f32 1.442695, %v16643_v63 }
0x13df   :  { %v16648_v43 = vpop.f32.mrf.mxu0 }
0x13e0   :  { %13482 = vpow2.f32 %v4796_v18 }
0x13e1   :  { %v16651_v7 = vpop.f32.mrf.mxu0  ;;  %13484 = vpow2.f32 %v4784_v17  ;;  %4872 = vrot.lane.b32.xlu0 %v13473_v59, %s13922_s7  ;;  %v4790_v59 = vmul.f32 1.442695, %v16641_v35 }
0x13e2   :  { %v4800_v26 = vmul.f32 1.442695, %v16651_v7 }
0x13e3   :  { %v16656_v44 = vpop.f32.mrf.mxu0 }
0x13e4   :  { %13486 = vpow2.f32 %v4800_v26 }
0x13e5   :  { %v13475_v13 = vpop.eup %13474  ;;  %v16658_v5 = vpop.f32.mrf.mxu0  ;;  %13488 = vpow2.f32 %v4782_v41 }
0x13e6   :  { %v4804_v18 = vmul.f32 1.442695, %v16658_v5  ;;  %4884 = vrot.lane.b32.xlu1 %v13475_v13, %s13922_s7  ;;  %v13477_v17 = vpop.eup %13476 }
0x13e7   :  { %v16664_v62 = vpop.f32.mrf.mxu0  ;;  %4870 = vrot.lane.b32.xlu0 %v13477_v17, %s13922_s7  ;;  %v4794_v17 = vmul.f32 1.442695, %v16648_v43 }
0x13e8   :  { %13490 = vpow2.f32 %v4804_v18 }
0x13e9   :  { %v13479_v11 = vpop.eup %13478  ;;  %v16666_v25 = vpop.f32.mrf.mxu0  ;;  %13492 = vpow2.f32 %v4786_v33 }
0x13ea   :  { %v4808_v26 = vmul.f32 1.442695, %v16666_v25  ;;  %4888 = vrot.lane.b32.xlu1 %v13479_v11, %s13922_s7  ;;  %v13481_v41 = vpop.eup %13480 }
0x13eb   :  { %v16672_v13 = vpop.f32.mrf.mxu0  ;;  %4876 = vrot.lane.b32.xlu0 %v13481_v41, %s13922_s7  ;;  %v4798_v41 = vmul.f32 1.442695, %v16656_v44 }
0x13ec   :  { %13494 = vpow2.f32 %v4808_v26 }
0x13ed   :  { %v13483_v28 = vpop.eup %13482  ;;  %v16674_v50 = vpop.f32.mrf.mxu0  ;;  %13496 = vpow2.f32 %v4790_v59 }
0x13ee   :  { %19339 = vst [vmem:[#allocation103_spill] sm:$0xff] %v16674_v50  ;;  %v4812_v18 = vmul.f32 1.442695, %v16674_v50  ;;  %4892 = vrot.lane.b32.xlu1 %v13483_v28, %s13922_s7  ;;  %v13485_v33 = vpop.eup %13484 }
0x13ef   :  { %v16680_v11 = vpop.f32.mrf.mxu0  ;;  %4880 = vrot.lane.b32.xlu0 %v13485_v33, %s13922_s7  ;;  %v4802_v33 = vmul.f32 1.442695, %v16664_v62 }
0x13f0   :  { %19340 = vst [vmem:[#allocation104_spill] sm:$0xff] %v16680_v11  ;;  %13498 = vpow2.f32 %v4812_v18 }
0x13f1   :  { %v13487_v32 = vpop.eup %13486  ;;  %v16682_v14 = vpop.f32.mrf.mxu0  ;;  %13500 = vpow2.f32 %v4794_v17 }
0x13f2   :  { %19341 = vst [vmem:[#allocation114_spill] sm:$0xff] %v16682_v14  ;;  %v4816_v26 = vmul.f32 1.442695, %v16682_v14  ;;  %4896 = vrot.lane.b32.xlu1 %v13487_v32, %s13922_s7  ;;  %v13489_v59 = vpop.eup %13488 }
0x13f3   :  { %v16688_v28 = vpop.f32.mrf.mxu0  ;;  %4878 = vrot.lane.b32.xlu0 %v13489_v59, %s13922_s7 }
0x13f4   :  { %19342 = vst [vmem:[#allocation119_spill] sm:$0xff] %v16688_v28  ;;  %13502 = vpow2.f32 %v4816_v26 }
0x13f5   :  { %v13491_v19 = vpop.eup %13490  ;;  %v16690_v47 = vpop.f32.mrf.mxu0  ;;  %13504 = vpow2.f32 %v4798_v41 }
0x13f6   :  { %19343 = vst [vmem:[#allocation105_spill] sm:$0xff] %v16690_v47  ;;  %v4820_v18 = vmul.f32 1.442695, %v16690_v47  ;;  %4900 = vrot.lane.b32.xlu1 %v13491_v19, %s13922_s7  ;;  %v13493_v17 = vpop.eup %13492  ;;  %v4806_v19 = vmul.f32 1.442695, %v16672_v13 }
0x13f7   :  { %v16696_v32 = vpop.f32.mrf.mxu0  ;;  %4882 = vrot.lane.b32.xlu0 %v13493_v17, %s13922_s7  ;;  %v4810_v47 = vmul.f32 1.442695, %v16680_v11 }
0x13f8   :  { %19344 = vst [vmem:[#allocation106_spill] sm:$0xff] %v16696_v32  ;;  %13506 = vpow2.f32 %v4820_v18 }
0x13f9   :  { %v13495_v12 = vpop.eup %13494  ;;  %v16698_v14 = vpop.f32.mrf.mxu0  ;;  %13508 = vpow2.f32 %v4802_v33  ;;  %v4814_v33 = vmul.f32 1.442695, %v16688_v28 }
0x13fa   :  { %19345 = vst [vmem:[#allocation107_spill] sm:$0xff] %v16698_v14  ;;  %v4824_v26 = vmul.f32 1.442695, %v16698_v14  ;;  %4904 = vrot.lane.b32.xlu1 %v13495_v12, %s13922_s7  ;;  %v13497_v59 = vpop.eup %13496 }
0x13fb   :  { %4886 = vrot.lane.b32.xlu0 %v13497_v59, %s13922_s7  ;;  %v4818_v59 = vmul.f32 1.442695, %v16696_v32  ;;  %v4733_v32 = vld [vmem:[%s19348_s17 + $0x18] sm:$0xff] }
0x13fc   :  { %13510 = vpow2.f32 %v4824_v26 }
0x13fd   :  { %v13499_v41 = vpop.eup %13498  ;;  %13512 = vpow2.f32 %v4806_v19 }
0x13fe   :  { %4908 = vrot.lane.b32.xlu1 %v13499_v41, %s13922_s7  ;;  %v13501_v18 = vpop.eup %13500  ;;  %13514 = vpow2.f32 %v4810_v47  ;;  %v16713_v41 = vpop.f32.mrf.mxu0 }
0x13ff   :  { %4890 = vrot.lane.b32.xlu0 %v13501_v18, %s13922_s7  ;;  %13516 = vpow2.f32 %v4814_v33  ;;  %19347 = vst [vmem:[#allocation120_spill] sm:$0xff] %v16713_v41 }
0x1400   :  { %13518 = vpow2.f32 %v4818_v59  ;;  %v5413_v59 = vld [vmem:[%s19346_s8 + $0x8] sm:$0xff] }
0x1401   :  { %v13503_v57 = vpop.eup %13502 }
0x1402   :  { %4912 = vrot.lane.b32.xlu1 %v13503_v57, %s13922_s7  ;;  %v13505_v12 = vpop.eup %13504  ;;  %v4822_v57 = vmul.f32 1.442695, %v16713_v41 }
0x1403   :  { %4894 = vrot.lane.b32.xlu0 %v13505_v12, %s13922_s7 }
0x1404   :  { %13520 = vpow2.f32 %v4822_v57  ;;  %v4731_v57 = vld [vmem:[%s19348_s17 + $0x8] sm:$0xff] }
0x1405   :  { %v13507_v17 = vpop.eup %13506 }
0x1406   :  { %4916 = vrot.lane.b32.xlu1 %v13507_v17, %s13922_s7  ;;  %v13509_v26 = vpop.eup %13508  ;;  %v5415_v17 = vld [vmem:[%s19346_s8 + $0x18] sm:$0xff] }
0x1407   :  { %4898 = vrot.lane.b32.xlu0 %v13509_v26, %s13922_s7  ;;  %v5414_v26 = vld [vmem:[%s19346_s8 + $0x10] sm:$0xff]  ;;  %12664 = vmatprep.subr.mxu0 %v5415_v17 }
0x1408   :  { %12665 = vmatpush3.msra.mxu0 %v5415_v17 }
0x1409   :  { %v13511_v19 = vpop.eup %13510  ;;  %12666 = vmatprep.subr.mxu0 %v5414_v26 }
0x140a   :  { %4920 = vrot.lane.b32.xlu1 %v13511_v19, %s13922_s7  ;;  %v13513_v47 = vpop.eup %13512  ;;  %12667 = vmatpush3.msra.mxu0 %v5414_v26 }
0x140b   :  { %4902 = vrot.lane.b32.xlu0 %v13513_v47, %s13922_s7  ;;  %v13515_v18 = vpop.eup %13514  ;;  %12668 = vmatprep.subr.mxu0 %v5413_v59 }
0x140c   :  { %v13517_v12 = vpop.eup %13516  ;;  %12669 = vmatpush3.msra.mxu0 %v5413_v59 }
0x140d   :  { %v13519_v33 = vpop.eup %13518 }
0x140f   :  { %4906 = vrot.lane.b32.xlu0 %v13515_v18, %s13922_s7 }
0x1411   :  { %v13521_v19 = vpop.eup %13520 }
0x1413   :  { %4910 = vrot.lane.b32.xlu0 %v13517_v12, %s13922_s7  ;;  %v16727_v12 = vstv %s453_s24 }
0x1417   :  { %4914 = vrot.lane.b32.xlu0 %v13519_v33, %s13922_s7  ;;  %v4730_v33 = vld [vmem:[%s19348_s17] sm:$0xff] }
0x141b   :  { %4918 = vrot.lane.b32.xlu0 %v13521_v19, %s13922_s7  ;;  %s19362_s7 = sld [smem:[#allocation80_spill]] }
0x143a   :  { %v4861_v47 = vpop.permute.xlu0 %4860 }
0x143b   :  { %v4955_v18 = vmul.f32 %v4861_v47, %v4731_v57  ;;  %v4732_v57 = vld [vmem:[%s19348_s17 + $0x10] sm:$0xff] }
0x143d   :  { %v4988_v17 = vmul.f32 %v16727_v12, %v4955_v18 }
0x143e   :  { %v4859_v41 = vpop.permute.xlu0 %4858 }
0x143f   :  { %v4954_v14 = vmul.f32 %v4859_v41, %v4730_v33  ;;  %v5020_v59 = vadd.f32 %v16564_v8, %v4988_v17  ;;  %v5420_v33 = vld [vmem:[%s19349_s11 + $0x18] sm:$0xff]  ;;  %v5419_v8 = vld [vmem:[%s19349_s11 + $0x10] sm:$0xff] }
0x1441   :  { %v4987_v26 = vmul.f32 %v16727_v12, %v4954_v14  ;;  %v5052_v11 = vmul.f32 %v5020_v59, %v16006_v21  ;;  %v4735_v14 = vld [vmem:[%s19348_s17 + $0x28] sm:$0xff]  ;;  %v4734_v59 = vld [vmem:[%s19348_s17 + $0x20] sm:$0xff] }
0x1442   :  { %v4865_v19 = vpop.permute.xlu0 %4864 }
0x1443   :  { %v5019_v28 = vadd.f32 %v4987_v26, %v16567_v6  ;;  %v4957_v29 = vmul.f32 %v4865_v19, %v4733_v32 }
0x1445   :  { %v5051_v47 = vmul.f32 %v5019_v28, %v16003_v40  ;;  %v4990_v18 = vmul.f32 %v16727_v12, %v4957_v29  ;;  %v5418_v29 = vld [vmem:[%s19349_s11 + $0x8] sm:$0xff] }
0x1446   :  { %v4863_v41 = vpop.permute.xlu0 %4862 }
0x1447   :  { %v4956_v50 = vmul.f32 %v4863_v41, %v4732_v57  ;;  %12616 = vmatprep.mubr.msk.f32.mxu1 %vm1540_vm1, %v5051_v47  ;;  %v5022_v32 = vadd.f32 %v16570_v1, %v4990_v18  ;;  %v19350_v57 = vld [vmem:[#allocation89_spill] sm:$0xff]  ;;  %v4737_v41 = vld [vmem:[%s19348_s17 + $0x38] sm:$0xff] }
0x1448   :  { %12617 = vmatmul.mubr.msk.f32.vlgmr.msra.gmra.mxu1 %vm1540_vm1, %v5052_v11 }
0x1449   :  { %v4989_v6 = vmul.f32 %v16727_v12, %v4956_v50  ;;  %12721 = vmatpush3.msra.mxu1 %v5420_v33  ;;  %v5054_v47 = vmul.f32 %v5022_v32, %v19350_v57 }
0x144a   :  { %v4869_v28 = vpop.permute.xlu0 %4868  ;;  %12722 = vmatprep.subr.mxu1 %v19165_v51 }
0x144b   :  { %v5021_v17 = vadd.f32 %v4989_v6, %v16572_v0  ;;  %v4959_v26 = vmul.f32 %v4869_v28, %v4735_v14  ;;  %12723 = vmatpush3.msra.mxu1 %v5419_v8  ;;  %v4738_v0 = vld [vmem:[%s19348_s17 + $0x40] sm:$0xff] }
0x144c   :  { %12724 = vmatprep.subr.mxu1 %v19165_v51 }
0x144d   :  { %v5053_v11 = vmul.f32 %v5021_v17, %v16009_v24  ;;  %12725 = vmatpush3.msra.mxu1 %v5418_v29  ;;  %v4992_v50 = vmul.f32 %v16727_v12, %v4959_v26  ;;  %v4736_v17 = vld [vmem:[%s19348_s17 + $0x30] sm:$0xff] }
0x144e   :  { %v4875_v19 = vpop.permute.xlu1 %4874  ;;  %12726 = vmatprep.subr.mxu1 %v19165_v51 }
0x144f   :  { %v4867_v1 = vpop.permute.xlu0 %4866  ;;  %12619 = vmatprep.mubr.msk.f32.mxu1 %vm1540_vm1, %v5053_v11  ;;  %v5024_v14 = vadd.f32 %v16575_v46, %v4992_v50  ;;  %v4962_v28 = vmul.f32 %v4875_v19, %v4738_v0 }
0x1450   :  { %v4958_v18 = vmul.f32 %v4867_v1, %v4734_v59  ;;  %12620 = vmatmul.mubr.msk.f32.gmra.mxu1 %vm1540_vm1, %v5054_v47 }
0x1451   :  { %v5056_v47 = vmul.f32 %v5024_v14, %v16058_v54 }
0x1452   :  { %v4991_v33 = vmul.f32 %v16727_v12, %v4958_v18  ;;  %v4995_v18 = vmul.f32 %v16727_v12, %v4962_v28  ;;  %v4741_v28 = vld [vmem:[%s19348_s17 + $0x58] sm:$0xff] }
0x1453   :  { %v4873_v8 = vpop.permute.xlu0 %4872 }
0x1454   :  { %v5023_v29 = vadd.f32 %v4991_v33, %v16577_v3  ;;  %v4961_v32 = vmul.f32 %v4873_v8, %v4737_v41  ;;  %v4739_v3 = vld [vmem:[%s19348_s17 + $0x48] sm:$0xff]  ;;  %v5027_v33 = vadd.f32 %v4995_v18, %v16610_v15 }
0x1456   :  { %v5055_v26 = vmul.f32 %v5023_v29, %v16055_v16  ;;  %v4994_v59 = vmul.f32 %v16727_v12, %v4961_v32 }
0x1458   :  { %v4885_v6 = vpop.permute.xlu1 %4884  ;;  %12622 = vmatprep.mubr.msk.f32.mxu1 %vm1540_vm1, %v5055_v26  ;;  %v5026_v19 = vadd.f32 %v16587_v30, %v4994_v59  ;;  %v4743_v30 = vld [vmem:[%s19348_s17 + $0x68] sm:$0xff] }
0x1459   :  { %v4871_v11 = vpop.permute.xlu0 %4870  ;;  %12623 = vmatmul.mubr.msk.f32.gmra.mxu1 %vm1540_vm1, %v5056_v47 }
0x145a   :  { %v4960_v46 = vmul.f32 %v4871_v11, %v4736_v17  ;;  %v5058_v17 = vmul.f32 %v5026_v19, %v16064_v56  ;;  %v5059_v11 = vmul.f32 %v5027_v33, %v16120_v38  ;;  %v4745_v19 = vld [vmem:[%s19348_s17 + $0x78] sm:$0xff] }
0x145c   :  { %v4889_v1 = vpop.permute.xlu1 %4888  ;;  %v4993_v50 = vmul.f32 %v16727_v12, %v4960_v46  ;;  %v4967_v46 = vmul.f32 %v4885_v6, %v4743_v30  ;;  %v4747_v6 = vld [vmem:[%s19348_s17 + $0x88] sm:$0xff] }
0x145d   :  { %v4877_v0 = vpop.permute.xlu0 %4876 }
0x145e   :  { %v5025_v14 = vadd.f32 %v4993_v50, %v16594_v36  ;;  %v4963_v8 = vmul.f32 %v4877_v0, %v4739_v3  ;;  %v4740_v36 = vld [vmem:[%s19348_s17 + $0x50] sm:$0xff] }
0x1460   :  { %v4893_v41 = vpop.permute.xlu1 %4892  ;;  %v5057_v29 = vmul.f32 %v5025_v14, %v16061_v2  ;;  %v4996_v32 = vmul.f32 %v16727_v12, %v4963_v8  ;;  %v5000_v8 = vmul.f32 %v16727_v12, %v4967_v46  ;;  %v4749_v46 = vld [vmem:[%s19348_s17 + $0x98] sm:$0xff] }
0x1461   :  { %v4881_v26 = vpop.permute.xlu0 %4880 }
0x1462   :  { %v5028_v59 = vadd.f32 %v16602_v23, %v4996_v32  ;;  %v4965_v47 = vmul.f32 %v4881_v26, %v4741_v28  ;;  %12625 = vmatprep.mubr.msk.f32.mxu1 %vm1540_vm1, %v5057_v29  ;;  %v4742_v23 = vld [vmem:[%s19348_s17 + $0x60] sm:$0xff]  ;;  %v4969_v28 = vmul.f32 %v4889_v1, %v4745_v19 }
0x1463   :  { %12626 = vmatmul.mubr.msk.f32.gmra.mxu1 %vm1540_vm1, %v5058_v17  ;;  %v4746_v19 = vld [vmem:[%s19348_s17 + $0x80] sm:$0xff] }
0x1464   :  { %v4897_v15 = vpop.permute.xlu1 %4896  ;;  %v5060_v18 = vmul.f32 %v5028_v59, %v16123_v42  ;;  %12628 = vmatprep.mubr.msk.f32.mxu1 %vm1540_vm1, %v5059_v11  ;;  %v4998_v3 = vmul.f32 %v16727_v12, %v4965_v47  ;;  %v4744_v11 = vld [vmem:[%s19348_s17 + $0x70] sm:$0xff]  ;;  %v5032_v47 = vadd.f32 %v16629_v45, %v5000_v8 }
0x1465   :  { %v4879_v50 = vpop.permute.xlu0 %4878  ;;  %v4973_v8 = vmul.f32 %v4897_v15, %v4749_v46 }
0x1466   :  { %v4964_v0 = vmul.f32 %v4879_v50, %v4740_v36  ;;  %v5030_v29 = vadd.f32 %v16619_v37, %v4998_v3  ;;  %v5002_v36 = vmul.f32 %v16727_v12, %v4969_v28  ;;  %v4751_v28 = vld [vmem:[%s19348_s17 + $0xa8] sm:$0xff] }
0x1467   :  { %12629 = vmatmul.mubr.msk.f32.gmra.mxu1 %vm1540_vm1, %v5060_v18  ;;  %v4971_v18 = vmul.f32 %v4893_v41, %v4747_v6  ;;  %v5064_v41 = vmul.f32 %v5032_v47, %v16192_v53  ;;  %v4748_v6 = vld [vmem:[%s19348_s17 + $0x90] sm:$0xff]  ;;  %v4753_v47 = vld [vmem:[%s19348_s17 + $0xb8] sm:$0xff] }
0x1468   :  { %v4997_v33 = vmul.f32 %v16727_v12, %v4964_v0  ;;  %v4901_v14 = vpop.permute.xlu1 %4900  ;;  %v5062_v1 = vmul.f32 %v5030_v29, %v16129_v10 }
0x1469   :  { %v4883_v32 = vpop.permute.xlu0 %4882 }
0x146a   :  { %v5029_v17 = vadd.f32 %v4997_v33, %v16625_v55  ;;  %v4966_v26 = vmul.f32 %v4883_v32, %v4742_v23  ;;  %v5034_v23 = vadd.f32 %v16636_v27, %v5002_v36  ;;  %v5004_v33 = vmul.f32 %v16727_v12, %v4971_v18 }
0x146c   :  { %v5061_v30 = vmul.f32 %v5029_v17, %v16126_v60  ;;  %v4999_v59 = vmul.f32 %v16727_v12, %v4966_v26  ;;  %v4905_v55 = vpop.permute.xlu1 %4904  ;;  %v5036_v15 = vadd.f32 %v16643_v63, %v5004_v33 }
0x146d   :  { %v4887_v37 = vpop.permute.xlu0 %4886 }
0x146e   :  { %v5031_v3 = vadd.f32 %v4999_v59, %v16634_v39  ;;  %v4968_v50 = vmul.f32 %v4887_v37, %v4744_v11  ;;  %12631 = vmatprep.mubr.msk.f32.mxu1 %vm1540_vm1, %v5061_v30  ;;  %v5066_v11 = vmul.f32 %v5034_v23, %v16198_v52  ;;  %v5006_v30 = vmul.f32 %v16727_v12, %v4973_v8  ;;  %v4752_v23 = vld [vmem:[%s19348_s17 + $0xb0] sm:$0xff] }
0x146f   :  { %12632 = vmatmul.mubr.msk.f32.gmra.mxu1 %vm1540_vm1, %v5062_v1  ;;  %v4750_v1 = vld [vmem:[%s19348_s17 + $0xa0] sm:$0xff]  ;;  %v5068_v63 = vmul.f32 %v5036_v15, %v16265_v20 }
0x1470   :  { %v5063_v45 = vmul.f32 %v5031_v3, %v16189_v58  ;;  %v5001_v0 = vmul.f32 %v16727_v12, %v4968_v50  ;;  %v4909_v26 = vpop.permute.xlu1 %4908  ;;  %v5038_v3 = vadd.f32 %v16651_v7, %v5006_v30  ;;  %v4977_v50 = vmul.f32 %v4905_v55, %v4753_v47 }
0x1471   :  { %v4891_v39 = vpop.permute.xlu0 %4890 }
0x1472   :  { %v5033_v29 = vadd.f32 %v5001_v0, %v16641_v35  ;;  %v4970_v32 = vmul.f32 %v4891_v39, %v4746_v19  ;;  %12634 = vmatprep.mubr.msk.f32.mxu1 %vm1540_vm1, %v5063_v45  ;;  %v4975_v35 = vmul.f32 %v4901_v14, %v4751_v28  ;;  %v4755_v19 = vld [vmem:[%s19348_s17 + $0xc8] sm:$0xff]  ;;  %v5070_v8 = vmul.f32 %v5038_v3, %v16271_v61 }
0x1473   :  { %12635 = vmatmul.mubr.msk.f32.gmra.mxu1 %vm1540_vm1, %v5064_v41  ;;  %v5010_v39 = vmul.f32 %v16727_v12, %v4977_v50  ;;  %v4979_v28 = vmul.f32 %v4909_v26, %v4755_v19  ;;  %v19352_v19 = vld [vmem:[#allocation104_spill] sm:$0xff] }
0x1474   :  { %v5065_v17 = vmul.f32 %v5033_v29, %v16195_v4  ;;  %v5003_v27 = vmul.f32 %v16727_v12, %v4970_v32  ;;  %v5008_v14 = vmul.f32 %v16727_v12, %v4975_v35  ;;  %v4913_v45 = vpop.permute.xlu1 %4912  ;;  %v4757_v29 = vld [vmem:[%s19348_s17 + $0xd8] sm:$0xff] }
0x1475   :  { %v4895_v59 = vpop.permute.xlu0 %4894  ;;  %v5042_v26 = vadd.f32 %v16666_v25, %v5010_v39  ;;  %v5012_v30 = vmul.f32 %v16727_v12, %v4979_v28  ;;  %v19355_v39 = vld [vmem:[#allocation114_spill] sm:$0xff] }
0x1476   :  { %v5035_v36 = vadd.f32 %v5003_v27, %v16648_v43  ;;  %v4972_v18 = vmul.f32 %v4895_v59, %v4748_v6  ;;  %12637 = vmatprep.mubr.msk.f32.mxu1 %vm1540_vm1, %v5065_v17  ;;  %v5040_v55 = vadd.f32 %v16658_v5, %v5008_v14  ;;  %v4754_v17 = vld [vmem:[%s19348_s17 + $0xc0] sm:$0xff]  ;;  %v4759_v59 = vld [vmem:[%s19348_s17 + $0xe8] sm:$0xff] }
0x1477   :  { %12638 = vmatmul.mubr.msk.f32.gmra.mxu1 %vm1540_vm1, %v5066_v11  ;;  %v5074_v25 = vmul.f32 %v5042_v26, %v16346_v9 }
0x1478   :  { %v5067_v37 = vmul.f32 %v5035_v36, %v16262_v34  ;;  %v5005_v46 = vmul.f32 %v16727_v12, %v4972_v18  ;;  %v4917_v27 = vpop.permute.xlu1 %4916  ;;  %v5072_v15 = vmul.f32 %v5040_v55, %v16340_v31  ;;  %v4756_v18 = vld [vmem:[%s19348_s17 + $0xd0] sm:$0xff] }
0x1479   :  { %v4899_v43 = vpop.permute.xlu0 %4898  ;;  %v4983_v14 = vmul.f32 %v4917_v27, %v4759_v59 }
0x147a   :  { %v5037_v0 = vadd.f32 %v5005_v46, %v16656_v44  ;;  %v4974_v41 = vmul.f32 %v4899_v43, %v4750_v1  ;;  %12640 = vmatprep.mubr.msk.f32.mxu1 %vm1540_vm1, %v5067_v37  ;;  %v19351_v46 = vld [vmem:[#allocation103_spill] sm:$0xff] }
0x147b   :  { %12641 = vmatmul.mubr.msk.f32.gmra.mxu1 %vm1540_vm1, %v5068_v63  ;;  %v5044_v63 = vadd.f32 %v19351_v46, %v5012_v30  ;;  %v19358_v30 = vld [vmem:[#allocation96_spill] sm:$0xff] }
0x147c   :  { %v5069_v33 = vmul.f32 %v5037_v0, %v16268_v49  ;;  %v5007_v7 = vmul.f32 %v16727_v12, %v4974_v41  ;;  %v4921_v43 = vpop.permute.xlu1 %4920  ;;  %v4758_v41 = vld [vmem:[%s19348_s17 + $0xe0] sm:$0xff] }
0x147d   :  { %v4903_v44 = vpop.permute.xlu0 %4902  ;;  %v19361_v46 = vld [vmem:[#allocation92_spill] sm:$0xff] }
0x147e   :  { %v5039_v32 = vadd.f32 %v5007_v7, %v16664_v62  ;;  %v4976_v6 = vmul.f32 %v4903_v44, %v4752_v23  ;;  %12643 = vmatprep.mubr.msk.f32.mxu1 %vm1540_vm1, %v5069_v33  ;;  %v4981_v62 = vmul.f32 %v4913_v45, %v4757_v29  ;;  %v19353_v23 = vld [vmem:[#allocation115_spill] sm:$0xff]  ;;  %v5016_v44 = vmul.f32 %v16727_v12, %v4983_v14  ;;  %v5417_v14 = vld [vmem:[%s19349_s11] sm:$0xff] }
0x147f   :  { %12644 = vmatmul.mubr.msk.f32.gmra.mxu1 %vm1540_vm1, %v5070_v8  ;;  %v19354_v8 = vld [vmem:[#allocation91_spill] sm:$0xff] }
0x1480   :  { %v5071_v11 = vmul.f32 %v5039_v32, %v16337_v48  ;;  %v5009_v5 = vmul.f32 %v16727_v12, %v4976_v6  ;;  %v5014_v3 = vmul.f32 %v16727_v12, %v4981_v62  ;;  %v5076_v55 = vmul.f32 %v5044_v63, %v19354_v8  ;;  %v19356_v6 = vld [vmem:[#allocation119_spill] sm:$0xff]  ;;  %12727 = vmatpush3.msra.mxu1 %v5417_v14 }
0x1481   :  { %v4907_v35 = vpop.permute.xlu0 %4906 }
0x1482   :  { %v5041_v47 = vadd.f32 %v5009_v5, %v16672_v13  ;;  %v4978_v36 = vmul.f32 %v4907_v35, %v4754_v17  ;;  %12646 = vmatprep.mubr.msk.f32.mxu1 %vm1540_vm1, %v5071_v11  ;;  %v4761_v13 = vld [vmem:[%s19348_s17 + $0xf8] sm:$0xff]  ;;  %v5046_v28 = vadd.f32 %v19355_v39, %v5014_v3  ;;  %v4760_v11 = vld [vmem:[%s19348_s17 + $0xf0] sm:$0xff]  ;;  %v19359_v35 = vld [vmem:[#allocation105_spill] sm:$0xff] }
0x1483   :  { %12647 = vmatmul.mubr.msk.f32.gmra.mxu1 %vm1540_vm1, %v5072_v15  ;;  %v4985_v29 = vmul.f32 %v4921_v43, %v4761_v13  ;;  %v19357_v5 = vld [vmem:[#allocation95_spill] sm:$0xff]  ;;  %v5048_v59 = vadd.f32 %v19359_v35, %v5016_v44  ;;  %v13526_v39 = vld [vmem:[%s19191_s23] sm:$0x1] }
0x1484   :  { %v5073_v1 = vmul.f32 %v5041_v47, %v16343_v22  ;;  %v5011_v37 = vmul.f32 %v16727_v12, %v4978_v36  ;;  %v5078_v62 = vmul.f32 %v5046_v28, %v19358_v30  ;;  %v19364_v43 = vld [vmem:[#allocation107_spill] sm:$0xff] }
0x1485   :  { %v4911_v50 = vpop.permute.xlu0 %4910  ;;  %v5018_v47 = vmul.f32 %v16727_v12, %v4985_v29  ;;  %v5428_v28 = vld [vmem:[%s19362_s7 + $0x38] sm:$0xff]  ;;  %v5427_v44 = vld [vmem:[%s19362_s7 + $0x30] sm:$0xff] }
0x1486   :  { %v5043_v45 = vadd.f32 %v5011_v37, %v19352_v19  ;;  %v4980_v0 = vmul.f32 %v4911_v50, %v4756_v18  ;;  %12649 = vmatprep.mubr.msk.f32.mxu1 %vm1540_vm1, %v5073_v1  ;;  %v19360_v18 = vld [vmem:[#allocation106_spill] sm:$0xff]  ;;  %v19363_v50 = vld [vmem:[#allocation88_spill] sm:$0xff]  ;;  %12731 = vmatprep.subr.mxu1 %v5428_v28 }
0x1487   :  { %12650 = vmatmul.mubr.msk.f32.gmra.mxu1 %vm1540_vm1, %v5074_v25  ;;  %v5412_v25 = vld [vmem:[%s19346_s8] sm:$0xff]  ;;  %v5080_v13 = vmul.f32 %v5048_v59, %v19363_v50  ;;  %v5050_v19 = vadd.f32 %v19364_v43, %v5018_v47  ;;  %v19371_v59 = vld [vmem:[#allocation99_spill] sm:$0xff] }
0x1488   :  { %v5075_v33 = vmul.f32 %v5043_v45, %v19353_v23  ;;  %v5013_v7 = vmul.f32 %v16727_v12, %v4980_v0  ;;  %12670 = vmatprep.subr.mxu0 %v5412_v25  ;;  %v19365_v45 = vld [vmem:[#allocation97_spill] sm:$0xff]  ;;  %v19366_v0 = vld [vmem:[#allocation120_spill] sm:$0xff] }
0x1489   :  { %v4915_v32 = vpop.permute.xlu0 %4914  ;;  %12671 = vmatpush3.msra.mxu0 %v5412_v25  ;;  %v19372_v47 = vld [vmem:[#allocation100_spill] sm:$0xff] }
0x148a   :  { %v5045_v17 = vadd.f32 %v5013_v7, %v19356_v6  ;;  %v4982_v27 = vmul.f32 %v4915_v32, %v4758_v41  ;;  %12652 = vmatprep.mubr.msk.f32.mxu1 %vm1540_vm1, %v5075_v33  ;;  %12795 = vmatprep.subr.mxu0 %v19365_v45  ;;  %v19367_v33 = vld [vmem:[#allocation116_spill] sm:$0xff] }
0x148b   :  { %12653 = vmatmul.mubr.msk.f32.gmra.mxu1 %vm1540_vm1, %v5076_v55 }
0x148c   :  { %v5077_v15 = vmul.f32 %v5045_v17, %v19357_v5  ;;  %v5015_v26 = vmul.f32 %v16727_v12, %v4982_v27 }
0x148d   :  { %v4919_v36 = vpop.permute.xlu0 %4918 }
0x148e   :  { %v5047_v1 = vadd.f32 %v5015_v26, %v19360_v18  ;;  %v4984_v37 = vmul.f32 %v4919_v36, %v4760_v11  ;;  %12655 = vmatprep.mubr.msk.f32.mxu1 %vm1540_vm1, %v5077_v15  ;;  %v19369_v11 = vld [vmem:[#allocation98_spill] sm:$0xff]  ;;  %v19370_v26 = vld [vmem:[#allocation117_spill] sm:$0xff] }
0x148f   :  { %12656 = vmatmul.mubr.msk.f32.gmra.mxu1 %vm1540_vm1, %v5078_v62  ;;  %v19373_v18 = vld [vmem:[#allocation101_spill] sm:$0xff] }
0x1490   :  { %v5079_v63 = vmul.f32 %v5047_v1, %v19361_v46  ;;  %v5017_v3 = vmul.f32 %v16727_v12, %v4984_v37  ;;  %v19368_v12 = vld [vmem:[#allocation93_spill] sm:$0xff]  ;;  %v19374_v37 = vld [vmem:[#allocation118_spill] sm:$0xff] }
0x1491   :  { %v5082_v55 = vmul.f32 %v5050_v19, %v19368_v12 }
0x1492   :  { %v5049_v41 = vadd.f32 %v5017_v3, %v19366_v0  ;;  %12658 = vmatprep.mubr.msk.f32.mxu1 %vm1540_vm1, %v5079_v63  ;;  %v19375_v3 = vld [vmem:[#allocation102_spill] sm:$0xff] }
0x1493   :  { %12659 = vmatmul.mubr.msk.f32.gmra.mxu1 %vm1540_vm1, %v5080_v13 }
0x1494   :  { %v5081_v7 = vmul.f32 %v5049_v41, %v19367_v33 }
0x1496   :  { %12661 = vmatprep.mubr.msk.f32.mxu1 %vm1540_vm1, %v5081_v7 }
0x1497   :  { %12662 = vmatmul.mubr.msk.f32.gmra.mxu1 %vm1540_vm1, %v5082_v55 }
0x1498   :  { %12728 = vmatprep.mubr.msk.f32.mxu1 %vm13923_vm15, %v19165_v51 }
0x149b   :  { %12729 = vmatmul.mubr.msk.f32.vlgmr.msra.gmra.mxu1 %vm2793_vm0, %v13526_v39 }
0x149c   :  { %12732 = vmatpush3.msra.mxu1 %v5428_v28 }
0x149d   :  { %12733 = vmatprep.subr.mxu1 %v5427_v44 }
0x149e   :  { %12734 = vmatpush3.msra.mxu1 %v5427_v44 }
0x1508   :  { %v16903_v29 = vpop.f32.mrf.mxu1 }
0x1509   :  { %v5431_v17 = vmul.f32 %v16903_v29, %v16006_v21 }
0x150a   :  { %v16905_v32 = vpop.f32.mrf.mxu1 }
0x150b   :  { %v5430_v6 = vmul.f32 %v16905_v32, %v16003_v40 }
0x150d   :  { %12672 = vmatprep.mubr.msk.f32.mxu0 %vm2793_vm0, %v5430_v6 }
0x150e   :  { %12673 = vmatmul.mubr.msk.f32.vlgmr.msra.gmra.mxu0 %vm2793_vm0, %v5431_v17 }
0x150f   :  { %12796 = vmatpush3.msra.mxu0 %v19365_v45 }
0x1510   :  { %v16914_v27 = vpop.f32.mrf.mxu1  ;;  %12797 = vmatprep.subr.mxu0 %v19369_v11 }
0x1511   :  { %12798 = vmatpush3.msra.mxu0 %v19369_v11  ;;  %v5433_v35 = vmul.f32 %v16914_v27, %v19350_v57 }
0x1512   :  { %v16918_v15 = vpop.f32.mrf.mxu1  ;;  %12799 = vmatprep.subr.mxu0 %v19370_v26 }
0x1513   :  { %v5432_v62 = vmul.f32 %v16918_v15, %v16009_v24  ;;  %12800 = vmatpush3.msra.mxu0 %v19370_v26 }
0x1514   :  { %12801 = vmatprep.subr.mxu0 %v19371_v59 }
0x1515   :  { %12675 = vmatprep.mubr.msk.f32.mxu0 %vm2793_vm0, %v5432_v62  ;;  %12802 = vmatpush3.msra.mxu0 %v19371_v59 }
0x1516   :  { %12676 = vmatmul.mubr.msk.f32.gmra.mxu0 %vm2793_vm0, %v5433_v35  ;;  %12803 = vmatprep.subr.mxu0 %v19372_v47 }
0x1517   :  { %12804 = vmatpush3.msra.mxu0 %v19372_v47 }
0x1518   :  { %12805 = vmatprep.subr.mxu0 %v19373_v18 }
0x1519   :  { %v16932_v36 = vpop.f32.mrf.mxu1  ;;  %12806 = vmatpush3.msra.mxu0 %v19373_v18 }
0x151a   :  { %12807 = vmatprep.subr.mxu0 %v19374_v37  ;;  %v5435_v63 = vmul.f32 %v16932_v36, %v16058_v54 }
0x151b   :  { %v16936_v1 = vpop.f32.mrf.mxu1  ;;  %12808 = vmatpush3.msra.mxu0 %v19374_v37 }
0x151c   :  { %v5434_v25 = vmul.f32 %v16936_v1, %v16055_v16  ;;  %12809 = vmatprep.subr.mxu0 %v19375_v3 }
0x151d   :  { %12810 = vmatpush3.msra.mxu0 %v19375_v3 }
0x151e   :  { %12678 = vmatprep.mubr.msk.f32.mxu0 %vm2793_vm0, %v5434_v25  ;;  %12915 = vmatprep.subr.mxu0 %v19165_v51 }
0x151f   :  { %12679 = vmatmul.mubr.msk.f32.gmra.mxu0 %vm2793_vm0, %v5435_v63 }
0x1523   :  { %v16949_v14 = vpop.f32.mrf.mxu1 }
0x1524   :  { %v5437_v19 = vmul.f32 %v16949_v14, %v16064_v56 }
0x1525   :  { %v16951_v13 = vpop.f32.mrf.mxu1 }
0x1526   :  { %v5436_v43 = vmul.f32 %v16951_v13, %v16061_v2 }
0x1527   :  { %v16957_v45 = vpop.f32.mrf.mxu1 }
0x1528   :  { %12681 = vmatprep.mubr.msk.f32.mxu0 %vm2793_vm0, %v5436_v43  ;;  %v5439_v7 = vmul.f32 %v16957_v45, %v16123_v42 }
0x1529   :  { %v16960_v0 = vpop.f32.mrf.mxu1  ;;  %12682 = vmatmul.mubr.msk.f32.gmra.mxu0 %vm2793_vm0, %v5437_v19 }
0x152a   :  { %v5438_v41 = vmul.f32 %v16960_v0, %v16120_v38 }
0x152c   :  { %12684 = vmatprep.mubr.msk.f32.mxu0 %vm2793_vm0, %v5438_v41 }
0x152d   :  { %12685 = vmatmul.mubr.msk.f32.gmra.mxu0 %vm2793_vm0, %v5439_v7 }
0x152f   :  { %v16969_v55 = vpop.f32.mrf.mxu1 }
0x1530   :  { %v5441_v44 = vmul.f32 %v16969_v55, %v16129_v10 }
0x1531   :  { %v16971_v39 = vpop.f32.mrf.mxu1 }
0x1532   :  { %v5440_v28 = vmul.f32 %v16971_v39, %v16126_v60 }
0x1533   :  { %v16977_v6 = vpop.f32.mrf.mxu1 }
0x1534   :  { %19376 = vst [vmem:[#allocation121_spill] sm:$0xff] %v16977_v6  ;;  %12687 = vmatprep.mubr.msk.f32.mxu0 %vm2793_vm0, %v5440_v28  ;;  %v5443_v26 = vmul.f32 %v16977_v6, %v16192_v53 }
0x1535   :  { %v16980_v17 = vpop.f32.mrf.mxu1  ;;  %12688 = vmatmul.mubr.msk.f32.gmra.mxu0 %vm2793_vm0, %v5441_v44 }
0x1536   :  { %19377 = vst [vmem:[#allocation108_spill] sm:$0xff] %v16980_v17  ;;  %v5442_v11 = vmul.f32 %v16980_v17, %v16189_v58 }
0x1537   :  { %v16987_v62 = vpop.f32.mrf.mxu1 }
0x1538   :  { %19378 = vst [vmem:[#allocation109_spill] sm:$0xff] %v16987_v62  ;;  %12690 = vmatprep.mubr.msk.f32.mxu0 %vm2793_vm0, %v5442_v11  ;;  %v5445_v47 = vmul.f32 %v16987_v62, %v16198_v52 }
0x1539   :  { %v16990_v35 = vpop.f32.mrf.mxu1  ;;  %12691 = vmatmul.mubr.msk.f32.gmra.mxu0 %vm2793_vm0, %v5443_v26 }
0x153a   :  { %19379 = vst [vmem:[#allocation110_spill] sm:$0xff] %v16990_v35  ;;  %v5444_v59 = vmul.f32 %v16990_v35, %v16195_v4 }
0x153b   :  { %v16997_v18 = vpop.f32.mrf.mxu1 }
0x153c   :  { %19380 = vst [vmem:[#allocation122_spill] sm:$0xff] %v16997_v18  ;;  %12693 = vmatprep.mubr.msk.f32.mxu0 %vm2793_vm0, %v5444_v59  ;;  %v5447_v63 = vmul.f32 %v16997_v18, %v16265_v20 }
0x153d   :  { %v17000_v37 = vpop.f32.mrf.mxu1  ;;  %12694 = vmatmul.mubr.msk.f32.gmra.mxu0 %vm2793_vm0, %v5445_v47 }
0x153e   :  { %19381 = vst [vmem:[#allocation123_spill] sm:$0xff] %v17000_v37  ;;  %v5446_v25 = vmul.f32 %v17000_v37, %v16262_v34 }
0x153f   :  { %v17007_v3 = vpop.f32.mrf.mxu1 }
0x1540   :  { %19382 = vst [vmem:[#allocation124_spill] sm:$0xff] %v17007_v3  ;;  %12696 = vmatprep.mubr.msk.f32.mxu0 %vm2793_vm0, %v5446_v25  ;;  %v5449_v41 = vmul.f32 %v17007_v3, %v16271_v61 }
0x1541   :  { %v17010_v43 = vpop.f32.mrf.mxu1  ;;  %12697 = vmatmul.mubr.msk.f32.gmra.mxu0 %vm2793_vm0, %v5447_v63 }
0x1542   :  { %19383 = vst [vmem:[#allocation125_spill] sm:$0xff] %v17010_v43  ;;  %v5448_v19 = vmul.f32 %v17010_v43, %v16268_v49 }
0x1543   :  { %v17017_v7 = vpop.f32.mrf.mxu1 }
0x1544   :  { %19384 = vst [vmem:[#allocation126_spill] sm:$0xff] %v17017_v7  ;;  %12699 = vmatprep.mubr.msk.f32.mxu0 %vm2793_vm0, %v5448_v19  ;;  %v5451_v11 = vmul.f32 %v17017_v7, %v16340_v31  ;;  %v19396_v7 = vld [vmem:[#allocation94_spill] sm:$0xff] }
0x1545   :  { %v17020_v28 = vpop.f32.mrf.mxu1  ;;  %12700 = vmatmul.mubr.msk.f32.gmra.mxu0 %vm2793_vm0, %v5449_v41 }
0x1546   :  { %19385 = vst [vmem:[#allocation111_spill] sm:$0xff] %v17020_v28  ;;  %v5450_v44 = vmul.f32 %v17020_v28, %v16337_v48  ;;  %v5424_v28 = vld [vmem:[%s19362_s7 + $0x18] sm:$0xff] }
0x1547   :  { %v17027_v26 = vpop.f32.mrf.mxu1 }
0x1548   :  { %19386 = vst [vmem:[#allocation112_spill] sm:$0xff] %v17027_v26  ;;  %12702 = vmatprep.mubr.msk.f32.mxu0 %vm2793_vm0, %v5450_v44  ;;  %v5453_v25 = vmul.f32 %v17027_v26, %v16346_v9 }
0x1549   :  { %v17030_v59 = vpop.f32.mrf.mxu1  ;;  %12703 = vmatmul.mubr.msk.f32.gmra.mxu0 %vm2793_vm0, %v5451_v11 }
0x154a   :  { %19387 = vst [vmem:[#allocation113_spill] sm:$0xff] %v17030_v59  ;;  %v5452_v47 = vmul.f32 %v17030_v59, %v16343_v22 }
0x154b   :  { %v17037_v63 = vpop.f32.mrf.mxu1 }
0x154c   :  { %19388 = vst [vmem:[#allocation127_spill] sm:$0xff] %v17037_v63  ;;  %12705 = vmatprep.mubr.msk.f32.mxu0 %vm2793_vm0, %v5452_v47  ;;  %v5455_v44 = vmul.f32 %v17037_v63, %v19354_v8  ;;  %v5426_v63 = vld [vmem:[%s19362_s7 + $0x28] sm:$0xff] }
0x154d   :  { %v17040_v19 = vpop.f32.mrf.mxu1  ;;  %12706 = vmatmul.mubr.msk.f32.gmra.mxu0 %vm2793_vm0, %v5453_v25  ;;  %12735 = vmatprep.subr.mxu1 %v5426_v63 }
0x154e   :  { %19389 = vst [vmem:[#allocation128_spill] sm:$0xff] %v17040_v19  ;;  %v5454_v41 = vmul.f32 %v17040_v19, %v19353_v23  ;;  %12736 = vmatpush3.msra.mxu1 %v5426_v63 }
0x154f   :  { %v17047_v11 = vpop.f32.mrf.mxu1 }
0x1550   :  { %19390 = vst [vmem:[#allocation129_spill] sm:$0xff] %v17047_v11  ;;  %12708 = vmatprep.mubr.msk.f32.mxu0 %vm2793_vm0, %v5454_v41  ;;  %v5457_v25 = vmul.f32 %v17047_v11, %v19358_v30 }
0x1551   :  { %v17050_v59 = vpop.f32.mrf.mxu1  ;;  %12709 = vmatmul.mubr.msk.f32.gmra.mxu0 %vm2793_vm0, %v5455_v44 }
0x1552   :  { %19391 = vst [vmem:[#allocation130_spill] sm:$0xff] %v17050_v59  ;;  %v5456_v47 = vmul.f32 %v17050_v59, %v19357_v5 }
0x1553   :  { %v17057_v19 = vpop.f32.mrf.mxu1 }
0x1554   :  { %19392 = vst [vmem:[#allocation131_spill] sm:$0xff] %v17057_v19  ;;  %12711 = vmatprep.mubr.msk.f32.mxu0 %vm2793_vm0, %v5456_v47  ;;  %v5459_v44 = vmul.f32 %v17057_v19, %v19363_v50  ;;  %v5421_v19 = vld [vmem:[%s19362_s7] sm:$0xff] }
0x1555   :  { %v17061_v26 = vpop.f32.mrf.mxu1  ;;  %12712 = vmatmul.mubr.msk.f32.gmra.mxu0 %vm2793_vm0, %v5457_v25  ;;  %v5425_v25 = vld [vmem:[%s19362_s7 + $0x20] sm:$0xff] }
0x1556   :  { %19393 = vst [vmem:[#allocation89_spill] sm:$0xff] %v17061_v26  ;;  %v5458_v41 = vmul.f32 %v17061_v26, %v19361_v46  ;;  %12737 = vmatprep.subr.mxu1 %v5425_v25 }
0x1557   :  { %v17068_v59 = vpop.f32.mrf.mxu1  ;;  %12738 = vmatpush3.msra.mxu1 %v5425_v25 }
0x1558   :  { %19394 = vst [vmem:[#allocation103_spill] sm:$0xff] %v17068_v59  ;;  %12714 = vmatprep.mubr.msk.f32.mxu0 %vm2793_vm0, %v5458_v41  ;;  %v5461_v63 = vmul.f32 %v17068_v59, %v19368_v12  ;;  %v5423_v41 = vld [vmem:[%s19362_s7 + $0x10] sm:$0xff]  ;;  %12739 = vmatprep.subr.mxu1 %v5424_v28  ;;  %v17085_v59 = vld [vmem:[#allocation16] ss:$0 sm:$0xff] }
0x1559   :  { %v17071_v11 = vpop.f32.mrf.mxu1  ;;  %12715 = vmatmul.mubr.msk.f32.gmra.mxu0 %vm2793_vm0, %v5459_v44  ;;  %12740 = vmatpush3.msra.mxu1 %v5424_v28 }
0x155a   :  { %19395 = vst [vmem:[#allocation104_spill] sm:$0xff] %v17071_v11  ;;  %v5460_v47 = vmul.f32 %v17071_v11, %v19367_v33  ;;  %12741 = vmatprep.subr.mxu1 %v5423_v41  ;;  %v5422_v11 = vld [vmem:[%s19362_s7 + $0x8] sm:$0xff] }
0x155b   :  { %v5855_v26 = vpop.f32.mrf.mxu1  ;;  %12742 = vmatpush3.msra.mxu1 %v5423_v41 }
0x155c   :  { %12717 = vmatprep.mubr.msk.f32.mxu0 %vm2793_vm0, %v5460_v47  ;;  %12743 = vmatprep.subr.mxu1 %v5422_v11  ;;  %v17088_v43 = vrot.slane %v5855_v26, %v19396_v7 }
0x155d   :  { %12718 = vmatmul.mubr.msk.f32.gmra.mxu0 %vm2793_vm0, %v5461_v63  ;;  %v12730_v44 = vpop.f32.mrf.mxu1  ;;  %12744 = vmatpush3.msra.mxu1 %v5422_v11 }
0x155e   :  { %12745 = vmatprep.subr.mxu1 %v5421_v19 }
0x155f   :  { %12746 = vmatpush3.msra.mxu1 %v5421_v19 }
0x15ce   :  { %v12674_v47 = vpop.f32.mrf.mxu0 }
0x15cf   :  { %v5636_v25 = vadd.f32 %v12674_v47, %v17085_v59 }
0x15d0   :  { %v5630_v63 = vpop.f32.mrf.mxu0 }
0x15d1   :  { %v5864_v44 = vadd.f32 %v17088_v43, %v5636_v25  ;;  %v5631_v28 = vadd.f32 %v17085_v59, %v5630_v63 }
0x15d3   :  { %v5863_v41 = vadd.f32 %v17088_v43, %v5631_v28  ;;  %v5896_v3 = vmax.f32 %v5864_v44, 0.0 }
0x15d5   :  { %v5895_v11 = vmax.f32 %v5863_v41, 0.0  ;;  %v5928_v26 = vmul.f32 %v5896_v3, %v16006_v21 }
0x15d6   :  { %v12677_v37 = vpop.f32.mrf.mxu0 }
0x15d7   :  { %v5927_v19 = vmul.f32 %v5895_v11, %v16003_v40  ;;  %v5646_v18 = vadd.f32 %v12677_v37, %v17085_v59 }
0x15d8   :  { %v5640_v7 = vpop.f32.mrf.mxu0 }
0x15d9   :  { %v5866_v35 = vadd.f32 %v17088_v43, %v5646_v18  ;;  %v5641_v47 = vadd.f32 %v17085_v59, %v5640_v7  ;;  %12747 = vmatprep.mubr.msk.f32.mxu1 %vm1540_vm1, %v5927_v19 }
0x15da   :  { %12748 = vmatmul.mubr.msk.f32.vlgmr.msra.gmra.mxu1 %vm1540_vm1, %v5928_v26 }
0x15db   :  { %v5865_v25 = vadd.f32 %v17088_v43, %v5641_v47  ;;  %v5898_v63 = vmax.f32 %v5866_v35, 0.0 }
0x15dd   :  { %v5897_v44 = vmax.f32 %v5865_v25, 0.0  ;;  %v5930_v3 = vmul.f32 %v5898_v63, %v19350_v57 }
0x15df   :  { %v12680_v28 = vpop.f32.mrf.mxu0  ;;  %v5929_v41 = vmul.f32 %v5897_v44, %v16009_v24 }
0x15e0   :  { %v5656_v37 = vadd.f32 %v12680_v28, %v17085_v59 }
0x15e1   :  { %v5650_v11 = vpop.f32.mrf.mxu0  ;;  %12750 = vmatprep.mubr.msk.f32.mxu1 %vm1540_vm1, %v5929_v41 }
0x15e2   :  { %v5868_v18 = vadd.f32 %v17088_v43, %v5656_v37  ;;  %v5651_v7 = vadd.f32 %v17085_v59, %v5650_v11  ;;  %12751 = vmatmul.mubr.msk.f32.gmra.mxu1 %vm1540_vm1, %v5930_v3 }
0x15e4   :  { %v5867_v19 = vadd.f32 %v17088_v43, %v5651_v7  ;;  %v5900_v35 = vmax.f32 %v5868_v18, 0.0 }
0x15e6   :  { %v5899_v26 = vmax.f32 %v5867_v19, 0.0  ;;  %v5932_v63 = vmul.f32 %v5900_v35, %v16058_v54 }
0x15e8   :  { %v5931_v25 = vmul.f32 %v5899_v26, %v16055_v16 }
0x15e9   :  { %v12683_v47 = vpop.f32.mrf.mxu0 }
0x15ea   :  { %v5666_v44 = vadd.f32 %v12683_v47, %v17085_v59  ;;  %12753 = vmatprep.mubr.msk.f32.mxu1 %vm1540_vm1, %v5931_v25 }
0x15eb   :  { %v5660_v28 = vpop.f32.mrf.mxu0  ;;  %12754 = vmatmul.mubr.msk.f32.gmra.mxu1 %vm1540_vm1, %v5932_v63 }
0x15ec   :  { %v5870_v37 = vadd.f32 %v17088_v43, %v5666_v44  ;;  %v5661_v11 = vadd.f32 %v17085_v59, %v5660_v28 }
0x15ed   :  { %v12686_v41 = vpop.f32.mrf.mxu0 }
0x15ee   :  { %v5869_v3 = vadd.f32 %v17088_v43, %v5661_v11  ;;  %v5676_v18 = vadd.f32 %v12686_v41, %v17085_v59  ;;  %v5902_v7 = vmax.f32 %v5870_v37, 0.0 }
0x15ef   :  { %v5670_v19 = vpop.f32.mrf.mxu0 }
0x15f0   :  { %v5901_v26 = vmax.f32 %v5869_v3, 0.0  ;;  %v5872_v47 = vadd.f32 %v17088_v43, %v5676_v18  ;;  %v5671_v35 = vadd.f32 %v17085_v59, %v5670_v19  ;;  %v5934_v25 = vmul.f32 %v5902_v7, %v16064_v56 }
0x15f2   :  { %v5933_v44 = vmul.f32 %v5901_v26, %v16061_v2  ;;  %v5871_v28 = vadd.f32 %v17088_v43, %v5671_v35  ;;  %v5904_v62 = vmax.f32 %v5872_v47, 0.0 }
0x15f4   :  { %v5903_v17 = vmax.f32 %v5871_v28, 0.0  ;;  %12756 = vmatprep.mubr.msk.f32.mxu1 %vm1540_vm1, %v5933_v44  ;;  %v5936_v41 = vmul.f32 %v5904_v62, %v16123_v42 }
0x15f5   :  { %v12689_v63 = vpop.f32.mrf.mxu0  ;;  %12757 = vmatmul.mubr.msk.f32.gmra.mxu1 %vm1540_vm1, %v5934_v25 }
0x15f6   :  { %v5935_v37 = vmul.f32 %v5903_v17, %v16120_v38  ;;  %v5686_v11 = vadd.f32 %v12689_v63, %v17085_v59 }
0x15f7   :  { %v5680_v3 = vpop.f32.mrf.mxu0 }
0x15f8   :  { %v5874_v18 = vadd.f32 %v17088_v43, %v5686_v11  ;;  %v5681_v19 = vadd.f32 %v17085_v59, %v5680_v3  ;;  %12759 = vmatprep.mubr.msk.f32.mxu1 %vm1540_vm1, %v5935_v37 }
0x15f9   :  { %v12692_v7 = vpop.f32.mrf.mxu0  ;;  %12760 = vmatmul.mubr.msk.f32.gmra.mxu1 %vm1540_vm1, %v5936_v41 }
0x15fa   :  { %v5873_v26 = vadd.f32 %v17088_v43, %v5681_v19  ;;  %v5696_v47 = vadd.f32 %v12692_v7, %v17085_v59  ;;  %v5906_v35 = vmax.f32 %v5874_v18, 0.0 }
0x15fb   :  { %v5690_v17 = vpop.f32.mrf.mxu0 }
0x15fc   :  { %v5905_v44 = vmax.f32 %v5873_v26, 0.0  ;;  %v5876_v28 = vadd.f32 %v17088_v43, %v5696_v47  ;;  %v5691_v62 = vadd.f32 %v17085_v59, %v5690_v17  ;;  %v5938_v41 = vmul.f32 %v5906_v35, %v16129_v10 }
0x15fd   :  { %v12695_v25 = vpop.f32.mrf.mxu0 }
0x15fe   :  { %v5937_v63 = vmul.f32 %v5905_v44, %v16126_v60  ;;  %v5875_v11 = vadd.f32 %v17088_v43, %v5691_v62  ;;  %v5706_v37 = vadd.f32 %v12695_v25, %v17085_v59  ;;  %v5908_v3 = vmax.f32 %v5876_v28, 0.0 }
0x15ff   :  { %v5700_v19 = vpop.f32.mrf.mxu0 }
0x1600   :  { %v5907_v6 = vmax.f32 %v5875_v11, 0.0  ;;  %v5878_v18 = vadd.f32 %v17088_v43, %v5706_v37  ;;  %v5701_v7 = vadd.f32 %v17085_v59, %v5700_v19  ;;  %12762 = vmatprep.mubr.msk.f32.mxu1 %vm1540_vm1, %v5937_v63  ;;  %v5940_v35 = vmul.f32 %v5908_v3, %v16192_v53 }
0x1601   :  { %v12698_v26 = vpop.f32.mrf.mxu0  ;;  %12763 = vmatmul.mubr.msk.f32.gmra.mxu1 %vm1540_vm1, %v5938_v41 }
0x1602   :  { %v5939_v47 = vmul.f32 %v5907_v6, %v16189_v58  ;;  %v5877_v17 = vadd.f32 %v17088_v43, %v5701_v7  ;;  %v5716_v44 = vadd.f32 %v12698_v26, %v17085_v59  ;;  %v5910_v28 = vmax.f32 %v5878_v18, 0.0 }
0x1603   :  { %v5710_v62 = vpop.f32.mrf.mxu0 }
0x1604   :  { %v5909_v25 = vmax.f32 %v5877_v17, 0.0  ;;  %v5880_v11 = vadd.f32 %v17088_v43, %v5716_v44  ;;  %v5711_v37 = vadd.f32 %v17085_v59, %v5710_v62  ;;  %12765 = vmatprep.mubr.msk.f32.mxu1 %vm1540_vm1, %v5939_v47  ;;  %v5942_v3 = vmul.f32 %v5910_v28, %v16198_v52 }
0x1605   :  { %v12701_v63 = vpop.f32.mrf.mxu0  ;;  %12766 = vmatmul.mubr.msk.f32.gmra.mxu1 %vm1540_vm1, %v5940_v35 }
0x1606   :  { %v5941_v6 = vmul.f32 %v5909_v25, %v16195_v4  ;;  %v5879_v41 = vadd.f32 %v17088_v43, %v5711_v37  ;;  %v5726_v19 = vadd.f32 %v12701_v63, %v17085_v59  ;;  %v5912_v18 = vmax.f32 %v5880_v11, 0.0 }
0x1607   :  { %v5720_v7 = vpop.f32.mrf.mxu0 }
0x1608   :  { %v5911_v26 = vmax.f32 %v5879_v41, 0.0  ;;  %v5882_v17 = vadd.f32 %v17088_v43, %v5726_v19  ;;  %v5721_v44 = vadd.f32 %v17085_v59, %v5720_v7  ;;  %12768 = vmatprep.mubr.msk.f32.mxu1 %vm1540_vm1, %v5941_v6  ;;  %v5944_v28 = vmul.f32 %v5912_v18, %v16265_v20 }
0x1609   :  { %v12704_v47 = vpop.f32.mrf.mxu0  ;;  %12769 = vmatmul.mubr.msk.f32.gmra.mxu1 %vm1540_vm1, %v5942_v3 }
0x160a   :  { %v5943_v35 = vmul.f32 %v5911_v26, %v16262_v34  ;;  %v5881_v62 = vadd.f32 %v17088_v43, %v5721_v44  ;;  %v5736_v25 = vadd.f32 %v12704_v47, %v17085_v59  ;;  %v5914_v11 = vmax.f32 %v5882_v17, 0.0 }
0x160b   :  { %v5730_v37 = vpop.f32.mrf.mxu0 }
0x160c   :  { %v5913_v63 = vmax.f32 %v5881_v62, 0.0  ;;  %v5884_v41 = vadd.f32 %v17088_v43, %v5736_v25  ;;  %v5731_v19 = vadd.f32 %v17085_v59, %v5730_v37  ;;  %12771 = vmatprep.mubr.msk.f32.mxu1 %vm1540_vm1, %v5943_v35  ;;  %v5946_v18 = vmul.f32 %v5914_v11, %v16271_v61 }
0x160d   :  { %v12707_v6 = vpop.f32.mrf.mxu0  ;;  %12772 = vmatmul.mubr.msk.f32.gmra.mxu1 %vm1540_vm1, %v5944_v28 }
0x160e   :  { %v5945_v3 = vmul.f32 %v5913_v63, %v16268_v49  ;;  %v5883_v7 = vadd.f32 %v17088_v43, %v5731_v19  ;;  %v5746_v26 = vadd.f32 %v12707_v6, %v17085_v59  ;;  %v5916_v17 = vmax.f32 %v5884_v41, 0.0 }
0x160f   :  { %v5740_v44 = vpop.f32.mrf.mxu0 }
0x1610   :  { %v5915_v47 = vmax.f32 %v5883_v7, 0.0  ;;  %v5886_v62 = vadd.f32 %v17088_v43, %v5746_v26  ;;  %v5741_v25 = vadd.f32 %v17085_v59, %v5740_v44  ;;  %12774 = vmatprep.mubr.msk.f32.mxu1 %vm1540_vm1, %v5945_v3  ;;  %v5948_v11 = vmul.f32 %v5916_v17, %v16340_v31 }
0x1611   :  { %v12710_v35 = vpop.f32.mrf.mxu0  ;;  %12775 = vmatmul.mubr.msk.f32.gmra.mxu1 %vm1540_vm1, %v5946_v18 }
0x1612   :  { %v5947_v28 = vmul.f32 %v5915_v47, %v16337_v48  ;;  %v5885_v37 = vadd.f32 %v17088_v43, %v5741_v25  ;;  %v5756_v63 = vadd.f32 %v12710_v35, %v17085_v59  ;;  %v5918_v41 = vmax.f32 %v5886_v62, 0.0 }
0x1613   :  { %v5750_v19 = vpop.f32.mrf.mxu0 }
0x1614   :  { %v5917_v6 = vmax.f32 %v5885_v37, 0.0  ;;  %v5888_v7 = vadd.f32 %v17088_v43, %v5756_v63  ;;  %v5751_v26 = vadd.f32 %v17085_v59, %v5750_v19  ;;  %12777 = vmatprep.mubr.msk.f32.mxu1 %vm1540_vm1, %v5947_v28  ;;  %v5950_v17 = vmul.f32 %v5918_v41, %v16346_v9 }
0x1615   :  { %v12713_v3 = vpop.f32.mrf.mxu0  ;;  %12778 = vmatmul.mubr.msk.f32.gmra.mxu1 %vm1540_vm1, %v5948_v11 }
0x1616   :  { %v5949_v18 = vmul.f32 %v5917_v6, %v16343_v22  ;;  %v5887_v44 = vadd.f32 %v17088_v43, %v5751_v26  ;;  %v5766_v47 = vadd.f32 %v12713_v3, %v17085_v59  ;;  %v5920_v62 = vmax.f32 %v5888_v7, 0.0 }
0x1617   :  { %v5760_v25 = vpop.f32.mrf.mxu0 }
0x1618   :  { %v5919_v35 = vmax.f32 %v5887_v44, 0.0  ;;  %v5890_v37 = vadd.f32 %v17088_v43, %v5766_v47  ;;  %v5761_v63 = vadd.f32 %v17085_v59, %v5760_v25  ;;  %12780 = vmatprep.mubr.msk.f32.mxu1 %vm1540_vm1, %v5949_v18  ;;  %v5952_v41 = vmul.f32 %v5920_v62, %v19354_v8 }
0x1619   :  { %v12716_v28 = vpop.f32.mrf.mxu0  ;;  %12781 = vmatmul.mubr.msk.f32.gmra.mxu1 %vm1540_vm1, %v5950_v17 }
0x161a   :  { %v5951_v11 = vmul.f32 %v5919_v35, %v19353_v23  ;;  %v5889_v19 = vadd.f32 %v17088_v43, %v5761_v63  ;;  %v5776_v6 = vadd.f32 %v12716_v28, %v17085_v59  ;;  %v5922_v7 = vmax.f32 %v5890_v37, 0.0 }
0x161b   :  { %v5770_v26 = vpop.f32.mrf.mxu0 }
0x161c   :  { %v5921_v3 = vmax.f32 %v5889_v19, 0.0  ;;  %v5892_v44 = vadd.f32 %v17088_v43, %v5776_v6  ;;  %v5771_v47 = vadd.f32 %v17085_v59, %v5770_v26  ;;  %12783 = vmatprep.mubr.msk.f32.mxu1 %vm1540_vm1, %v5951_v11  ;;  %v5954_v62 = vmul.f32 %v5922_v7, %v19358_v30 }
0x161d   :  { %v12719_v18 = vpop.f32.mrf.mxu0  ;;  %12784 = vmatmul.mubr.msk.f32.gmra.mxu1 %vm1540_vm1, %v5952_v41 }
0x161e   :  { %v5953_v17 = vmul.f32 %v5921_v3, %v19357_v5  ;;  %v5891_v25 = vadd.f32 %v17088_v43, %v5771_v47  ;;  %v5786_v35 = vadd.f32 %v12719_v18, %v17085_v59  ;;  %v5924_v37 = vmax.f32 %v5892_v44, 0.0  ;;  %v17218_v44 = vld [vmem:[#allocation17] ss:$0 sm:$0xff] }
0x161f   :  { %v5780_v63 = vpop.f32.mrf.mxu0 }
0x1620   :  { %v5923_v28 = vmax.f32 %v5891_v25, 0.0  ;;  %v5894_v19 = vadd.f32 %v17088_v43, %v5786_v35  ;;  %v5781_v6 = vadd.f32 %v17085_v59, %v5780_v63  ;;  %12786 = vmatprep.mubr.msk.f32.mxu1 %vm1540_vm1, %v5953_v17  ;;  %v5956_v26 = vmul.f32 %v5924_v37, %v19363_v50 }
0x1621   :  { %12787 = vmatmul.mubr.msk.f32.gmra.mxu1 %vm1540_vm1, %v5954_v62 }
0x1622   :  { %v5955_v11 = vmul.f32 %v5923_v28, %v19361_v46  ;;  %v5893_v41 = vadd.f32 %v17088_v43, %v5781_v6  ;;  %v5926_v3 = vmax.f32 %v5894_v19, 0.0 }
0x1624   :  { %v5925_v47 = vmax.f32 %v5893_v41, 0.0  ;;  %12789 = vmatprep.mubr.msk.f32.mxu1 %vm1540_vm1, %v5955_v11  ;;  %v5958_v59 = vmul.f32 %v5926_v3, %v19368_v12 }
0x1625   :  { %12790 = vmatmul.mubr.msk.f32.gmra.mxu1 %vm1540_vm1, %v5956_v26 }
0x1626   :  { %v5957_v7 = vmul.f32 %v5925_v47, %v19367_v33 }
0x1628   :  { %12792 = vmatprep.mubr.msk.f32.mxu1 %vm1540_vm1, %v5957_v7 }
0x1629   :  { %12793 = vmatmul.mubr.msk.f32.gmra.mxu1 %vm1540_vm1, %v5958_v59 }
0x169a   :  { %v12749_v18 = vpop.f32.mrf.mxu1 }
0x169b   :  { %v6133_v43 = vadd.f32 %v12749_v18, %v17218_v44 }
0x169c   :  { %v6127_v17 = vpop.f32.mrf.mxu1 }
0x169d   :  { %v6128_v25 = vadd.f32 %v17218_v44, %v6127_v17  ;;  %6320 = vrot.lane.b32.xlu1 %v6133_v43, %s13927_s25 }
0x169f   :  { %6318 = vrot.lane.b32.xlu0 %v6128_v25, %s13927_s25 }
0x16a2   :  { %v12752_v35 = vpop.f32.mrf.mxu1 }
0x16a3   :  { %v6143_v62 = vadd.f32 %v12752_v35, %v17218_v44 }
0x16a4   :  { %v6137_v37 = vpop.f32.mrf.mxu1 }
0x16a5   :  { %v6138_v63 = vadd.f32 %v17218_v44, %v6137_v37  ;;  %6324 = vrot.lane.b32.xlu1 %v6143_v62, %s13927_s25 }
0x16a7   :  { %6322 = vrot.lane.b32.xlu0 %v6138_v63, %s13927_s25 }
0x16ab   :  { %v12755_v28 = vpop.f32.mrf.mxu1 }
0x16ac   :  { %v6153_v19 = vadd.f32 %v12755_v28, %v17218_v44 }
0x16ad   :  { %v6147_v6 = vpop.f32.mrf.mxu1 }
0x16ae   :  { %v6148_v11 = vadd.f32 %v17218_v44, %v6147_v6  ;;  %6328 = vrot.lane.b32.xlu1 %v6153_v19, %s13927_s25 }
0x16b0   :  { %6326 = vrot.lane.b32.xlu0 %v6148_v11, %s13927_s25 }
0x16b5   :  { %v12758_v41 = vpop.f32.mrf.mxu1 }
0x16b6   :  { %v6163_v26 = vadd.f32 %v12758_v41, %v17218_v44 }
0x16b7   :  { %v6157_v3 = vpop.f32.mrf.mxu1 }
0x16b8   :  { %v6158_v47 = vadd.f32 %v17218_v44, %v6157_v3  ;;  %6332 = vrot.lane.b32.xlu1 %v6163_v26, %s13927_s25 }
0x16b9   :  { %v12761_v7 = vpop.f32.mrf.mxu1 }
0x16ba   :  { %v6173_v59 = vadd.f32 %v12761_v7, %v17218_v44  ;;  %6330 = vrot.lane.b32.xlu0 %v6158_v47, %s13927_s25 }
0x16bb   :  { %v6167_v18 = vpop.f32.mrf.mxu1 }
0x16bc   :  { %v6168_v43 = vadd.f32 %v17218_v44, %v6167_v18  ;;  %6336 = vrot.lane.b32.xlu1 %v6173_v59, %s13927_s25 }
0x16be   :  { %6334 = vrot.lane.b32.xlu0 %v6168_v43, %s13927_s25 }
0x16c1   :  { %v12764_v17 = vpop.f32.mrf.mxu1 }
0x16c2   :  { %v6183_v25 = vadd.f32 %v12764_v17, %v17218_v44 }
0x16c3   :  { %v6177_v35 = vpop.f32.mrf.mxu1 }
0x16c4   :  { %v6178_v62 = vadd.f32 %v17218_v44, %v6177_v35  ;;  %6340 = vrot.lane.b32.xlu1 %v6183_v25, %s13927_s25 }
0x16c5   :  { %v12767_v37 = vpop.f32.mrf.mxu1 }
0x16c6   :  { %v6193_v63 = vadd.f32 %v12767_v37, %v17218_v44  ;;  %6338 = vrot.lane.b32.xlu0 %v6178_v62, %s13927_s25 }
0x16c7   :  { %v6187_v28 = vpop.f32.mrf.mxu1 }
0x16c8   :  { %v6188_v19 = vadd.f32 %v17218_v44, %v6187_v28  ;;  %6344 = vrot.lane.b32.xlu1 %v6193_v63, %s13927_s25 }
0x16c9   :  { %v12770_v6 = vpop.f32.mrf.mxu1 }
0x16ca   :  { %v6203_v11 = vadd.f32 %v12770_v6, %v17218_v44  ;;  %6342 = vrot.lane.b32.xlu0 %v6188_v19, %s13927_s25 }
0x16cb   :  { %v6197_v41 = vpop.f32.mrf.mxu1 }
0x16cc   :  { %v6198_v26 = vadd.f32 %v17218_v44, %v6197_v41  ;;  %6348 = vrot.lane.b32.xlu1 %v6203_v11, %s13927_s25 }
0x16cd   :  { %v12773_v3 = vpop.f32.mrf.mxu1 }
0x16ce   :  { %v6213_v47 = vadd.f32 %v12773_v3, %v17218_v44  ;;  %6346 = vrot.lane.b32.xlu0 %v6198_v26, %s13927_s25 }
0x16cf   :  { %v6207_v7 = vpop.f32.mrf.mxu1 }
0x16d0   :  { %v6208_v59 = vadd.f32 %v17218_v44, %v6207_v7  ;;  %6352 = vrot.lane.b32.xlu1 %v6213_v47, %s13927_s25 }
0x16d1   :  { %v12776_v18 = vpop.f32.mrf.mxu1 }
0x16d2   :  { %v6223_v43 = vadd.f32 %v12776_v18, %v17218_v44  ;;  %6350 = vrot.lane.b32.xlu0 %v6208_v59, %s13927_s25 }
0x16d3   :  { %v6217_v17 = vpop.f32.mrf.mxu1 }
0x16d4   :  { %v6218_v25 = vadd.f32 %v17218_v44, %v6217_v17  ;;  %6356 = vrot.lane.b32.xlu1 %v6223_v43, %s13927_s25 }
0x16d5   :  { %v12779_v35 = vpop.f32.mrf.mxu1 }
0x16d6   :  { %v6233_v62 = vadd.f32 %v12779_v35, %v17218_v44  ;;  %6354 = vrot.lane.b32.xlu0 %v6218_v25, %s13927_s25 }
0x16d7   :  { %v6227_v37 = vpop.f32.mrf.mxu1 }
0x16d8   :  { %v6228_v63 = vadd.f32 %v17218_v44, %v6227_v37  ;;  %6360 = vrot.lane.b32.xlu1 %v6233_v62, %s13927_s25  ;;  %v6834_v62 = vld [vmem:[%s19397_s13 + $0x18] sm:$0xff]  ;;  %v6833_v37 = vld [vmem:[%s19397_s13 + $0x10] sm:$0xff] }
0x16d9   :  { %v12782_v28 = vpop.f32.mrf.mxu1  ;;  %12859 = vmatprep.subr.mxu1 %v6834_v62 }
0x16da   :  { %v6243_v19 = vadd.f32 %v12782_v28, %v17218_v44  ;;  %6358 = vrot.lane.b32.xlu0 %v6228_v63, %s13927_s25  ;;  %12860 = vmatpush3.msra.mxu1 %v6834_v62  ;;  %v6838_v62 = vld [vmem:[%s19398_s12 + $0x10] sm:$0xff] }
0x16db   :  { %v6237_v6 = vpop.f32.mrf.mxu1  ;;  %12861 = vmatprep.subr.mxu1 %v6833_v37 }
0x16dc   :  { %v6238_v11 = vadd.f32 %v17218_v44, %v6237_v6  ;;  %6364 = vrot.lane.b32.xlu1 %v6243_v19, %s13927_s25  ;;  %v6832_v19 = vld [vmem:[%s19397_s13 + $0x8] sm:$0xff]  ;;  %12862 = vmatpush3.msra.mxu1 %v6833_v37 }
0x16dd   :  { %v12785_v41 = vpop.f32.mrf.mxu1  ;;  %12863 = vmatprep.subr.mxu1 %v6832_v19 }
0x16de   :  { %v6253_v26 = vadd.f32 %v12785_v41, %v17218_v44  ;;  %6362 = vrot.lane.b32.xlu0 %v6238_v11, %s13927_s25  ;;  %12864 = vmatpush3.msra.mxu1 %v6832_v19 }
0x16df   :  { %v6247_v3 = vpop.f32.mrf.mxu1 }
0x16e0   :  { %v6248_v47 = vadd.f32 %v17218_v44, %v6247_v3  ;;  %6368 = vrot.lane.b32.xlu1 %v6253_v26, %s13927_s25 }
0x16e1   :  { %v12788_v7 = vpop.f32.mrf.mxu1 }
0x16e2   :  { %v6263_v59 = vadd.f32 %v12788_v7, %v17218_v44  ;;  %6366 = vrot.lane.b32.xlu0 %v6248_v47, %s13927_s25 }
0x16e3   :  { %v6257_v18 = vpop.f32.mrf.mxu1 }
0x16e4   :  { %v6258_v43 = vadd.f32 %v17218_v44, %v6257_v18  ;;  %6372 = vrot.lane.b32.xlu1 %v6263_v59, %s13927_s25 }
0x16e5   :  { %v12791_v17 = vpop.f32.mrf.mxu1 }
0x16e6   :  { %v6273_v25 = vadd.f32 %v12791_v17, %v17218_v44  ;;  %6370 = vrot.lane.b32.xlu0 %v6258_v43, %s13927_s25  ;;  %v6839_v43 = vld [vmem:[%s19398_s12 + $0x18] sm:$0xff] }
0x16e7   :  { %v6267_v35 = vpop.f32.mrf.mxu1 }
0x16e8   :  { %v6268_v63 = vadd.f32 %v17218_v44, %v6267_v35  ;;  %6376 = vrot.lane.b32.xlu1 %v6273_v25, %s13927_s25 }
0x16e9   :  { %v12794_v28 = vpop.f32.mrf.mxu1 }
0x16ea   :  { %v6283_v6 = vadd.f32 %v12794_v28, %v17218_v44  ;;  %6374 = vrot.lane.b32.xlu0 %v6268_v63, %s13927_s25  ;;  %v6837_v28 = vld [vmem:[%s19398_s12 + $0x8] sm:$0xff] }
0x16eb   :  { %v6277_v11 = vpop.f32.mrf.mxu1 }
0x16ec   :  { %v6278_v41 = vadd.f32 %v17218_v44, %v6277_v11  ;;  %6380 = vrot.lane.b32.xlu1 %v6283_v6, %s13927_s25 }
0x16ee   :  { %6378 = vrot.lane.b32.xlu0 %v6278_v41, %s13927_s25 }
0x170f   :  { %v6321_v26 = vpop.permute.xlu1 %6320 }
0x1710   :  { %v6415_v3 = vsub.f32 %v16903_v29, %v6321_v26 }
0x1711   :  { %v6319_v47 = vpop.permute.xlu0 %6318 }
0x1712   :  { %v6414_v7 = vsub.f32 %v16905_v32, %v6319_v47  ;;  %v6447_v59 = vmul.f32 %v6415_v3, %v16006_v21 }
0x1714   :  { %v6446_v18 = vmul.f32 %v6414_v7, %v16003_v40  ;;  %v6479_v17 = vsel %vm2793_vm0, %v16903_v29, %v6447_v59 }
0x1716   :  { %v6478_v44 = vsel %vm2793_vm0, %v16905_v32, %v6446_v18 }
0x1717   :  { %v6325_v25 = vpop.permute.xlu1 %6324  ;;  %12811 = vmatprep.mubr.msk.f32.mxu0 %vm1540_vm1, %v6478_v44 }
0x1718   :  { %v6417_v35 = vsub.f32 %v16914_v27, %v6325_v25  ;;  %12812 = vmatmul.mubr.msk.f32.vlgmr.msra.gmra.mxu0 %vm1540_vm1, %v6479_v17 }
0x1719   :  { %v6323_v37 = vpop.permute.xlu0 %6322  ;;  %12916 = vmatpush3.msra.mxu0 %v6839_v43 }
0x171a   :  { %v6416_v63 = vsub.f32 %v16918_v15, %v6323_v37  ;;  %12917 = vmatprep.subr.mxu0 %v19165_v51  ;;  %v6449_v32 = vmul.f32 %v6417_v35, %v19350_v57 }
0x171b   :  { %12918 = vmatpush3.msra.mxu0 %v6838_v62 }
0x171c   :  { %v6448_v29 = vmul.f32 %v6416_v63, %v16009_v24  ;;  %12919 = vmatprep.subr.mxu0 %v19165_v51  ;;  %v6481_v11 = vsel %vm2793_vm0, %v16914_v27, %v6449_v32 }
0x171d   :  { %12920 = vmatpush3.msra.mxu0 %v6837_v28 }
0x171e   :  { %v6480_v19 = vsel %vm2793_vm0, %v16918_v15, %v6448_v29  ;;  %12921 = vmatprep.subr.mxu0 %v19165_v51 }
0x171f   :  { %12814 = vmatprep.mubr.msk.f32.mxu0 %vm1540_vm1, %v6480_v19 }
0x1720   :  { %v6329_v6 = vpop.permute.xlu1 %6328  ;;  %12815 = vmatmul.mubr.msk.f32.gmra.mxu0 %vm1540_vm1, %v6481_v11 }
0x1721   :  { %v6419_v41 = vsub.f32 %v16932_v36, %v6329_v6 }
0x1722   :  { %v6327_v26 = vpop.permute.xlu0 %6326 }
0x1723   :  { %v6418_v3 = vsub.f32 %v16936_v1, %v6327_v26  ;;  %v6451_v47 = vmul.f32 %v6419_v41, %v16058_v54 }
0x1725   :  { %v6450_v7 = vmul.f32 %v6418_v3, %v16055_v16  ;;  %v6483_v27 = vsel %vm2793_vm0, %v16932_v36, %v6451_v47  ;;  %v19399_v47 = vld [vmem:[#allocation121_spill] sm:$0xff] }
0x1727   :  { %v6482_v15 = vsel %vm2793_vm0, %v16936_v1, %v6450_v7 }
0x1728   :  { %12817 = vmatprep.mubr.msk.f32.mxu0 %vm1540_vm1, %v6482_v15  ;;  %v19400_v15 = vld [vmem:[#allocation108_spill] sm:$0xff] }
0x1729   :  { %12818 = vmatmul.mubr.msk.f32.gmra.mxu0 %vm1540_vm1, %v6483_v27 }
0x172a   :  { %v6333_v59 = vpop.permute.xlu1 %6332 }
0x172b   :  { %v6421_v18 = vsub.f32 %v16949_v14, %v6333_v59 }
0x172c   :  { %v6331_v44 = vpop.permute.xlu0 %6330 }
0x172d   :  { %v6420_v43 = vsub.f32 %v16951_v13, %v6331_v44  ;;  %v6453_v17 = vmul.f32 %v6421_v18, %v16064_v56 }
0x172e   :  { %v6337_v25 = vpop.permute.xlu1 %6336 }
0x172f   :  { %v6452_v35 = vmul.f32 %v6420_v43, %v16061_v2  ;;  %v6423_v1 = vsub.f32 %v16957_v45, %v6337_v25  ;;  %v6485_v28 = vsel %vm2793_vm0, %v16949_v14, %v6453_v17  ;;  %v19401_v17 = vld [vmem:[#allocation109_spill] sm:$0xff] }
0x1730   :  { %v6335_v62 = vpop.permute.xlu0 %6334 }
0x1731   :  { %v6422_v37 = vsub.f32 %v16960_v0, %v6335_v62  ;;  %v6484_v36 = vsel %vm2793_vm0, %v16951_v13, %v6452_v35  ;;  %v6455_v63 = vmul.f32 %v6423_v1, %v16123_v42  ;;  %v19402_v1 = vld [vmem:[#allocation110_spill] sm:$0xff] }
0x1732   :  { %12820 = vmatprep.mubr.msk.f32.mxu0 %vm1540_vm1, %v6484_v36 }
0x1733   :  { %v6454_v32 = vmul.f32 %v6422_v37, %v16120_v38  ;;  %12821 = vmatmul.mubr.msk.f32.gmra.mxu0 %vm1540_vm1, %v6485_v28  ;;  %v6487_v13 = vsel %vm2793_vm0, %v16957_v45, %v6455_v63  ;;  %v19403_v28 = vld [vmem:[#allocation122_spill] sm:$0xff] }
0x1735   :  { %v6486_v29 = vsel %vm2793_vm0, %v16960_v0, %v6454_v32 }
0x1736   :  { %v6341_v19 = vpop.permute.xlu1 %6340  ;;  %12823 = vmatprep.mubr.msk.f32.mxu0 %vm1540_vm1, %v6486_v29 }
0x1737   :  { %v6425_v6 = vsub.f32 %v16969_v55, %v6341_v19  ;;  %12824 = vmatmul.mubr.msk.f32.gmra.mxu0 %vm1540_vm1, %v6487_v13  ;;  %v19404_v19 = vld [vmem:[#allocation123_spill] sm:$0xff] }
0x1738   :  { %v6339_v11 = vpop.permute.xlu0 %6338 }
0x1739   :  { %v6424_v14 = vsub.f32 %v16971_v39, %v6339_v11  ;;  %v6457_v41 = vmul.f32 %v6425_v6, %v16129_v10 }
0x173a   :  { %v6345_v26 = vpop.permute.xlu1 %6344 }
0x173b   :  { %v6456_v3 = vmul.f32 %v6424_v14, %v16126_v60  ;;  %v6427_v0 = vsub.f32 %v19399_v47, %v6345_v26  ;;  %v6489_v44 = vsel %vm2793_vm0, %v16969_v55, %v6457_v41 }
0x173c   :  { %v6343_v7 = vpop.permute.xlu0 %6342 }
0x173d   :  { %v6426_v59 = vsub.f32 %v19400_v15, %v6343_v7  ;;  %v6488_v45 = vsel %vm2793_vm0, %v16971_v39, %v6456_v3  ;;  %v6459_v27 = vmul.f32 %v6427_v0, %v16192_v53  ;;  %v19405_v3 = vld [vmem:[#allocation124_spill] sm:$0xff]  ;;  %v19406_v7 = vld [vmem:[#allocation125_spill] sm:$0xff] }
0x173e   :  { %v6349_v18 = vpop.permute.xlu1 %6348  ;;  %12826 = vmatprep.mubr.msk.f32.mxu0 %vm1540_vm1, %v6488_v45 }
0x173f   :  { %v6458_v43 = vmul.f32 %v6426_v59, %v16189_v58  ;;  %v6429_v25 = vsub.f32 %v19401_v17, %v6349_v18  ;;  %12827 = vmatmul.mubr.msk.f32.gmra.mxu0 %vm1540_vm1, %v6489_v44  ;;  %v6491_v55 = vsel %vm2793_vm0, %v19399_v47, %v6459_v27 }
0x1740   :  { %v6347_v35 = vpop.permute.xlu0 %6346 }
0x1741   :  { %v6428_v62 = vsub.f32 %v19402_v1, %v6347_v35  ;;  %v6490_v39 = vsel %vm2793_vm0, %v19400_v15, %v6458_v43  ;;  %v6461_v37 = vmul.f32 %v6429_v25, %v16198_v52  ;;  %v19407_v43 = vld [vmem:[#allocation126_spill] sm:$0xff]  ;;  %v19408_v35 = vld [vmem:[#allocation111_spill] sm:$0xff] }
0x1742   :  { %v6353_v36 = vpop.permute.xlu1 %6352  ;;  %12829 = vmatprep.mubr.msk.f32.mxu0 %vm1540_vm1, %v6490_v39 }
0x1743   :  { %v6460_v63 = vmul.f32 %v6428_v62, %v16195_v4  ;;  %v6431_v32 = vsub.f32 %v19403_v28, %v6353_v36  ;;  %12830 = vmatmul.mubr.msk.f32.gmra.mxu0 %vm1540_vm1, %v6491_v55  ;;  %v6493_v41 = vsel %vm2793_vm0, %v19401_v17, %v6461_v37 }
0x1744   :  { %v6351_v29 = vpop.permute.xlu0 %6350 }
0x1745   :  { %v6430_v13 = vsub.f32 %v19404_v19, %v6351_v29  ;;  %v6492_v6 = vsel %vm2793_vm0, %v19402_v1, %v6460_v63  ;;  %v6463_v11 = vmul.f32 %v6431_v32, %v16265_v20  ;;  %v19409_v63 = vld [vmem:[#allocation112_spill] sm:$0xff]  ;;  %v19410_v29 = vld [vmem:[#allocation113_spill] sm:$0xff] }
0x1746   :  { %v6357_v14 = vpop.permute.xlu1 %6356  ;;  %12832 = vmatprep.mubr.msk.f32.mxu0 %vm1540_vm1, %v6492_v6 }
0x1747   :  { %v6462_v26 = vmul.f32 %v6430_v13, %v16262_v34  ;;  %v6433_v47 = vsub.f32 %v19405_v3, %v6357_v14  ;;  %12833 = vmatmul.mubr.msk.f32.gmra.mxu0 %vm1540_vm1, %v6493_v41  ;;  %v6495_v18 = vsel %vm2793_vm0, %v19403_v28, %v6463_v11 }
0x1748   :  { %v6355_v0 = vpop.permute.xlu0 %6354 }
0x1749   :  { %v6432_v15 = vsub.f32 %v19406_v7, %v6355_v0  ;;  %v6494_v59 = vsel %vm2793_vm0, %v19404_v19, %v6462_v26  ;;  %v6465_v45 = vmul.f32 %v6433_v47, %v16271_v61  ;;  %v19411_v26 = vld [vmem:[#allocation127_spill] sm:$0xff]  ;;  %v19412_v0 = vld [vmem:[#allocation128_spill] sm:$0xff] }
0x174a   :  { %v6361_v27 = vpop.permute.xlu1 %6360  ;;  %12835 = vmatprep.mubr.msk.f32.mxu0 %vm1540_vm1, %v6494_v59 }
0x174b   :  { %v6464_v44 = vmul.f32 %v6432_v15, %v16268_v49  ;;  %v6435_v17 = vsub.f32 %v19407_v43, %v6361_v27  ;;  %12836 = vmatmul.mubr.msk.f32.gmra.mxu0 %vm1540_vm1, %v6495_v18  ;;  %v6497_v36 = vsel %vm2793_vm0, %v19405_v3, %v6465_v45 }
0x174c   :  { %v6359_v25 = vpop.permute.xlu0 %6358 }
0x174d   :  { %v6434_v1 = vsub.f32 %v19408_v35, %v6359_v25  ;;  %v6496_v62 = vsel %vm2793_vm0, %v19406_v7, %v6464_v44  ;;  %v6467_v39 = vmul.f32 %v6435_v17, %v16340_v31  ;;  %v19413_v44 = vld [vmem:[#allocation129_spill] sm:$0xff]  ;;  %v19414_v25 = vld [vmem:[#allocation130_spill] sm:$0xff] }
0x174e   :  { %v6365_v37 = vpop.permute.xlu1 %6364  ;;  %12838 = vmatprep.mubr.msk.f32.mxu0 %vm1540_vm1, %v6496_v62 }
0x174f   :  { %v6466_v55 = vmul.f32 %v6434_v1, %v16337_v48  ;;  %v6437_v28 = vsub.f32 %v19409_v63, %v6365_v37  ;;  %12839 = vmatmul.mubr.msk.f32.gmra.mxu0 %vm1540_vm1, %v6497_v36  ;;  %v6499_v14 = vsel %vm2793_vm0, %v19407_v43, %v6467_v39 }
0x1750   :  { %v6363_v32 = vpop.permute.xlu0 %6362 }
0x1751   :  { %v6436_v19 = vsub.f32 %v19410_v29, %v6363_v32  ;;  %v6498_v13 = vsel %vm2793_vm0, %v19408_v35, %v6466_v55  ;;  %v6469_v6 = vmul.f32 %v6437_v28, %v16346_v9  ;;  %v19415_v55 = vld [vmem:[#allocation131_spill] sm:$0xff]  ;;  %v19416_v32 = vld [vmem:[#allocation89_spill] sm:$0xff] }
0x1752   :  { %v6369_v11 = vpop.permute.xlu1 %6368  ;;  %12841 = vmatprep.mubr.msk.f32.mxu0 %vm1540_vm1, %v6498_v13 }
0x1753   :  { %v6468_v41 = vmul.f32 %v6436_v19, %v16343_v22  ;;  %v6439_v3 = vsub.f32 %v19411_v26, %v6369_v11  ;;  %12842 = vmatmul.mubr.msk.f32.gmra.mxu0 %vm1540_vm1, %v6499_v14  ;;  %v6501_v27 = vsel %vm2793_vm0, %v19409_v63, %v6469_v6  ;;  %v6831_v14 = vld [vmem:[%s19397_s13] sm:$0xff] }
0x1754   :  { %v6367_v47 = vpop.permute.xlu0 %6366  ;;  %12865 = vmatprep.subr.mxu1 %v6831_v14 }
0x1755   :  { %v6438_v7 = vsub.f32 %v19412_v0, %v6367_v47  ;;  %v6500_v15 = vsel %vm2793_vm0, %v19410_v29, %v6468_v41  ;;  %v6471_v59 = vmul.f32 %v6439_v3, %v19354_v8  ;;  %12866 = vmatpush3.msra.mxu1 %v6831_v14 }
0x1756   :  { %v6373_v45 = vpop.permute.xlu1 %6372  ;;  %12844 = vmatprep.mubr.msk.f32.mxu0 %vm1540_vm1, %v6500_v15 }
0x1757   :  { %v6470_v18 = vmul.f32 %v6438_v7, %v19353_v23  ;;  %v6441_v43 = vsub.f32 %v19413_v44, %v6373_v45  ;;  %12845 = vmatmul.mubr.msk.f32.gmra.mxu0 %vm1540_vm1, %v6501_v27  ;;  %v6503_v37 = vsel %vm2793_vm0, %v19411_v26, %v6471_v59  ;;  %v19417_v26 = vld [vmem:[#allocation103_spill] sm:$0xff]  ;;  %v19418_v7 = vld [vmem:[#allocation104_spill] sm:$0xff] }
0x1758   :  { %v6371_v17 = vpop.permute.xlu0 %6370 }
0x1759   :  { %v6440_v35 = vsub.f32 %v19414_v25, %v6371_v17  ;;  %v6502_v1 = vsel %vm2793_vm0, %v19412_v0, %v6470_v18  ;;  %v6473_v62 = vmul.f32 %v6441_v43, %v19358_v30  ;;  %v6836_v0 = vld [vmem:[%s19398_s12] sm:$0xff] }
0x175a   :  { %v6377_v39 = vpop.permute.xlu1 %6376  ;;  %12847 = vmatprep.mubr.msk.f32.mxu0 %vm1540_vm1, %v6502_v1  ;;  %12922 = vmatpush3.msra.mxu0 %v6836_v0  ;;  %v17458_v17 = vld [vmem:[%s19191_s23] sm:$0x1]  ;;  %s19444_s23 = sld [smem:[#allocation83_spill]] }
0x175b   :  { %v6472_v36 = vmul.f32 %v6440_v35, %v19357_v5  ;;  %v6443_v63 = vsub.f32 %v19415_v55, %v6377_v39  ;;  %12848 = vmatmul.mubr.msk.f32.gmra.mxu0 %vm1540_vm1, %v6503_v37  ;;  %v6505_v11 = vsel %vm2793_vm0, %v19413_v44, %v6473_v62  ;;  %v6846_v35 = vld [vmem:[%s19419_s16 + $0x30] sm:$0xff] }
0x175c   :  { %v6375_v28 = vpop.permute.xlu0 %6374 }
0x175d   :  { %v6442_v29 = vsub.f32 %v19416_v32, %v6375_v28  ;;  %v6504_v19 = vsel %vm2793_vm0, %v19414_v25, %v6472_v36  ;;  %v6475_v13 = vmul.f32 %v6443_v63, %v19363_v50  ;;  %v6847_v25 = vld [vmem:[%s19419_s16 + $0x38] sm:$0xff] }
0x175e   :  { %12850 = vmatprep.mubr.msk.f32.mxu0 %vm1540_vm1, %v6504_v19  ;;  %v6381_v6 = vpop.permute.xlu1 %6380  ;;  %12926 = vmatprep.subr.mxu0 %v6847_v25 }
0x175f   :  { %v6474_v41 = vmul.f32 %v6442_v29, %v19361_v46  ;;  %v6445_v3 = vsub.f32 %v19417_v26, %v6381_v6  ;;  %12851 = vmatmul.mubr.msk.f32.gmra.mxu0 %vm1540_vm1, %v6505_v11  ;;  %v6507_v27 = vsel %vm2793_vm0, %v19415_v55, %v6475_v13 }
0x1760   :  { %v6379_v47 = vpop.permute.xlu0 %6378 }
0x1761   :  { %v6444_v15 = vsub.f32 %v19418_v7, %v6379_v47  ;;  %v6506_v59 = vsel %vm2793_vm0, %v19416_v32, %v6474_v41  ;;  %v6477_v45 = vmul.f32 %v6445_v3, %v19368_v12 }
0x1762   :  { %12853 = vmatprep.mubr.msk.f32.mxu0 %vm1540_vm1, %v6506_v59 }
0x1763   :  { %v6476_v18 = vmul.f32 %v6444_v15, %v19367_v33  ;;  %12854 = vmatmul.mubr.msk.f32.gmra.mxu0 %vm1540_vm1, %v6507_v27  ;;  %v6509_v43 = vsel %vm2793_vm0, %v19417_v26, %v6477_v45 }
0x1765   :  { %v6508_v44 = vsel %vm2793_vm0, %v19418_v7, %v6476_v18 }
0x1766   :  { %12856 = vmatprep.mubr.msk.f32.mxu0 %vm1540_vm1, %v6508_v44 }
0x1767   :  { %12857 = vmatmul.mubr.msk.f32.gmra.mxu0 %vm1540_vm1, %v6509_v43 }
0x1768   :  { %12923 = vmatprep.mubr.msk.f32.mxu0 %vm13923_vm15, %v19165_v51 }
0x176b   :  { %12924 = vmatmul.mubr.msk.f32.vlgmr.msra.gmra.mxu0 %vm2793_vm0, %v17458_v17 }
0x176c   :  { %12927 = vmatpush3.msra.mxu0 %v6847_v25 }
0x176d   :  { %12928 = vmatprep.subr.mxu0 %v6846_v35 }
0x176e   :  { %12929 = vmatpush3.msra.mxu0 %v6846_v35 }
0x17d8   :  { %v17464_v1 = vpop.f32.mrf.mxu0 }
0x17d9   :  { %v6850_v37 = vmul.f32 %v17464_v1, %v16006_v21 }
0x17da   :  { %v17466_v62 = vpop.f32.mrf.mxu0 }
0x17db   :  { %v6849_v39 = vmul.f32 %v17466_v62, %v16003_v40 }
0x17dd   :  { %12867 = vmatprep.mubr.msk.f32.mxu1 %vm2793_vm0, %v6849_v39 }
0x17de   :  { %12868 = vmatmul.mubr.msk.f32.vlgmr.msra.gmra.mxu1 %vm2793_vm0, %v6850_v37 }
0x17e0   :  { %v17474_v36 = vpop.f32.mrf.mxu0 }
0x17e1   :  { %v6852_v28 = vmul.f32 %v17474_v36, %v19350_v57 }
0x17e2   :  { %v17476_v55 = vpop.f32.mrf.mxu0 }
0x17e3   :  { %v6851_v63 = vmul.f32 %v17476_v55, %v16009_v24 }
0x17e5   :  { %12870 = vmatprep.mubr.msk.f32.mxu1 %vm2793_vm0, %v6851_v63 }
0x17e6   :  { %12871 = vmatmul.mubr.msk.f32.gmra.mxu1 %vm2793_vm0, %v6852_v28 }
0x17e9   :  { %v17484_v32 = vpop.f32.mrf.mxu0 }
0x17ea   :  { %v6854_v13 = vmul.f32 %v17484_v32, %v16058_v54 }
0x17eb   :  { %v17486_v29 = vpop.f32.mrf.mxu0 }
0x17ec   :  { %v6853_v19 = vmul.f32 %v17486_v29, %v16055_v16 }
0x17ee   :  { %12873 = vmatprep.mubr.msk.f32.mxu1 %vm2793_vm0, %v6853_v19 }
0x17ef   :  { %12874 = vmatmul.mubr.msk.f32.gmra.mxu1 %vm2793_vm0, %v6854_v13 }
0x17f3   :  { %v17494_v6 = vpop.f32.mrf.mxu0 }
0x17f4   :  { %v6856_v41 = vmul.f32 %v17494_v6, %v16064_v56 }
0x17f5   :  { %v17496_v11 = vpop.f32.mrf.mxu0 }
0x17f6   :  { %v6855_v14 = vmul.f32 %v17496_v11, %v16061_v2 }
0x17f7   :  { %v17502_v26 = vpop.f32.mrf.mxu0 }
0x17f8   :  { %12876 = vmatprep.mubr.msk.f32.mxu1 %vm2793_vm0, %v6855_v14  ;;  %v6858_v0 = vmul.f32 %v17502_v26, %v16123_v42 }
0x17f9   :  { %v17505_v3 = vpop.f32.mrf.mxu0  ;;  %12877 = vmatmul.mubr.msk.f32.gmra.mxu1 %vm2793_vm0, %v6856_v41 }
0x17fa   :  { %v6857_v47 = vmul.f32 %v17505_v3, %v16120_v38 }
0x17fc   :  { %12879 = vmatprep.mubr.msk.f32.mxu1 %vm2793_vm0, %v6857_v47 }
0x17fd   :  { %12880 = vmatmul.mubr.msk.f32.gmra.mxu1 %vm2793_vm0, %v6858_v0 }
0x17ff   :  { %v17514_v7 = vpop.f32.mrf.mxu0 }
0x1800   :  { %v6860_v45 = vmul.f32 %v17514_v7, %v16129_v10 }
0x1801   :  { %v17516_v15 = vpop.f32.mrf.mxu0 }
0x1802   :  { %19420 = vst [vmem:[#allocation115_spill] sm:$0xff] %v17516_v15  ;;  %v6859_v59 = vmul.f32 %v17516_v15, %v16126_v60 }
0x1803   :  { %v17522_v27 = vpop.f32.mrf.mxu0 }
0x1804   :  { %19421 = vst [vmem:[#allocation91_spill] sm:$0xff] %v17522_v27  ;;  %12882 = vmatprep.mubr.msk.f32.mxu1 %vm2793_vm0, %v6859_v59  ;;  %v6862_v43 = vmul.f32 %v17522_v27, %v16192_v53 }
0x1805   :  { %v17525_v18 = vpop.f32.mrf.mxu0  ;;  %12883 = vmatmul.mubr.msk.f32.gmra.mxu1 %vm2793_vm0, %v6860_v45 }
0x1806   :  { %19422 = vst [vmem:[#allocation114_spill] sm:$0xff] %v17525_v18  ;;  %v6861_v44 = vmul.f32 %v17525_v18, %v16189_v58 }
0x1807   :  { %v17532_v25 = vpop.f32.mrf.mxu0 }
0x1808   :  { %19423 = vst [vmem:[#allocation119_spill] sm:$0xff] %v17532_v25  ;;  %12885 = vmatprep.mubr.msk.f32.mxu1 %vm2793_vm0, %v6861_v44  ;;  %v6864_v37 = vmul.f32 %v17532_v25, %v16198_v52 }
0x1809   :  { %v17535_v35 = vpop.f32.mrf.mxu0  ;;  %12886 = vmatmul.mubr.msk.f32.gmra.mxu1 %vm2793_vm0, %v6862_v43 }
0x180a   :  { %19424 = vst [vmem:[#allocation95_spill] sm:$0xff] %v17535_v35  ;;  %v6863_v39 = vmul.f32 %v17535_v35, %v16195_v4 }
0x180b   :  { %v17542_v63 = vpop.f32.mrf.mxu0 }
0x180c   :  { %19425 = vst [vmem:[#allocation96_spill] sm:$0xff] %v17542_v63  ;;  %12888 = vmatprep.mubr.msk.f32.mxu1 %vm2793_vm0, %v6863_v39  ;;  %v6866_v13 = vmul.f32 %v17542_v63, %v16265_v20 }
0x180d   :  { %v17545_v28 = vpop.f32.mrf.mxu0  ;;  %12889 = vmatmul.mubr.msk.f32.gmra.mxu1 %vm2793_vm0, %v6864_v37 }
0x180e   :  { %19426 = vst [vmem:[#allocation105_spill] sm:$0xff] %v17545_v28  ;;  %v6865_v19 = vmul.f32 %v17545_v28, %v16262_v34 }
0x180f   :  { %v17552_v14 = vpop.f32.mrf.mxu0 }
0x1810   :  { %19427 = vst [vmem:[#allocation106_spill] sm:$0xff] %v17552_v14  ;;  %12891 = vmatprep.mubr.msk.f32.mxu1 %vm2793_vm0, %v6865_v19  ;;  %v6868_v0 = vmul.f32 %v17552_v14, %v16271_v61 }
0x1811   :  { %v17555_v41 = vpop.f32.mrf.mxu0  ;;  %12892 = vmatmul.mubr.msk.f32.gmra.mxu1 %vm2793_vm0, %v6866_v13 }
0x1812   :  { %19428 = vst [vmem:[#allocation92_spill] sm:$0xff] %v17555_v41  ;;  %v6867_v47 = vmul.f32 %v17555_v41, %v16268_v49 }
0x1813   :  { %v17562_v59 = vpop.f32.mrf.mxu0 }
0x1814   :  { %19429 = vst [vmem:[#allocation88_spill] sm:$0xff] %v17562_v59  ;;  %12894 = vmatprep.mubr.msk.f32.mxu1 %vm2793_vm0, %v6867_v47  ;;  %v6870_v43 = vmul.f32 %v17562_v59, %v16340_v31  ;;  %v6843_v59 = vld [vmem:[%s19419_s16 + $0x18] sm:$0xff] }
0x1815   :  { %v17565_v45 = vpop.f32.mrf.mxu0  ;;  %12895 = vmatmul.mubr.msk.f32.gmra.mxu1 %vm2793_vm0, %v6868_v0 }
0x1816   :  { %19430 = vst [vmem:[#allocation107_spill] sm:$0xff] %v17565_v45  ;;  %v6869_v44 = vmul.f32 %v17565_v45, %v16337_v48 }
0x1817   :  { %v17572_v39 = vpop.f32.mrf.mxu0 }
0x1818   :  { %19431 = vst [vmem:[#allocation97_spill] sm:$0xff] %v17572_v39  ;;  %12897 = vmatprep.mubr.msk.f32.mxu1 %vm2793_vm0, %v6869_v44  ;;  %v6872_v13 = vmul.f32 %v17572_v39, %v16346_v9 }
0x1819   :  { %v17575_v37 = vpop.f32.mrf.mxu0  ;;  %12898 = vmatmul.mubr.msk.f32.gmra.mxu1 %vm2793_vm0, %v6870_v43 }
0x181a   :  { %19432 = vst [vmem:[#allocation120_spill] sm:$0xff] %v17575_v37  ;;  %v6871_v19 = vmul.f32 %v17575_v37, %v16343_v22 }
0x181b   :  { %v17582_v47 = vpop.f32.mrf.mxu0 }
0x181c   :  { %19433 = vst [vmem:[#allocation116_spill] sm:$0xff] %v17582_v47  ;;  %12900 = vmatprep.mubr.msk.f32.mxu1 %vm2793_vm0, %v6871_v19  ;;  %v6874_v43 = vmul.f32 %v17582_v47, %v19354_v8  ;;  %v6845_v47 = vld [vmem:[%s19419_s16 + $0x28] sm:$0xff] }
0x181d   :  { %v17585_v0 = vpop.f32.mrf.mxu0  ;;  %12901 = vmatmul.mubr.msk.f32.gmra.mxu1 %vm2793_vm0, %v6872_v13  ;;  %12930 = vmatprep.subr.mxu0 %v6845_v47 }
0x181e   :  { %19434 = vst [vmem:[#allocation93_spill] sm:$0xff] %v17585_v0  ;;  %v6873_v44 = vmul.f32 %v17585_v0, %v19353_v23  ;;  %12931 = vmatpush3.msra.mxu0 %v6845_v47 }
0x181f   :  { %v17592_v45 = vpop.f32.mrf.mxu0 }
0x1820   :  { %19435 = vst [vmem:[#allocation98_spill] sm:$0xff] %v17592_v45  ;;  %12903 = vmatprep.mubr.msk.f32.mxu1 %vm2793_vm0, %v6873_v44  ;;  %v6876_v13 = vmul.f32 %v17592_v45, %v19358_v30 }
0x1821   :  { %v17595_v37 = vpop.f32.mrf.mxu0  ;;  %12904 = vmatmul.mubr.msk.f32.gmra.mxu1 %vm2793_vm0, %v6874_v43 }
0x1822   :  { %19436 = vst [vmem:[#allocation117_spill] sm:$0xff] %v17595_v37  ;;  %v6875_v19 = vmul.f32 %v17595_v37, %v19357_v5 }
0x1823   :  { %v17602_v0 = vpop.f32.mrf.mxu0 }
0x1824   :  { %19437 = vst [vmem:[#allocation99_spill] sm:$0xff] %v17602_v0  ;;  %12906 = vmatprep.mubr.msk.f32.mxu1 %vm2793_vm0, %v6875_v19  ;;  %v6878_v43 = vmul.f32 %v17602_v0, %v19363_v50  ;;  %v6840_v0 = vld [vmem:[%s19419_s16] sm:$0xff] }
0x1825   :  { %v17606_v39 = vpop.f32.mrf.mxu0  ;;  %12907 = vmatmul.mubr.msk.f32.gmra.mxu1 %vm2793_vm0, %v6876_v13  ;;  %v6844_v13 = vld [vmem:[%s19419_s16 + $0x20] sm:$0xff] }
0x1826   :  { %19438 = vst [vmem:[#allocation100_spill] sm:$0xff] %v17606_v39  ;;  %v6877_v44 = vmul.f32 %v17606_v39, %v19361_v46  ;;  %12932 = vmatprep.subr.mxu0 %v6844_v13 }
0x1827   :  { %v17613_v37 = vpop.f32.mrf.mxu0  ;;  %12933 = vmatpush3.msra.mxu0 %v6844_v13 }
0x1828   :  { %19439 = vst [vmem:[#allocation101_spill] sm:$0xff] %v17613_v37  ;;  %12909 = vmatprep.mubr.msk.f32.mxu1 %vm2793_vm0, %v6877_v44  ;;  %v6880_v47 = vmul.f32 %v17613_v37, %v19368_v12  ;;  %v6842_v44 = vld [vmem:[%s19419_s16 + $0x10] sm:$0xff]  ;;  %12934 = vmatprep.subr.mxu0 %v6843_v59  ;;  %v17631_v37 = vld [vmem:[#allocation13] ss:$0 sm:$0xff] }
0x1829   :  { %v17616_v45 = vpop.f32.mrf.mxu0  ;;  %12910 = vmatmul.mubr.msk.f32.gmra.mxu1 %vm2793_vm0, %v6878_v43  ;;  %12935 = vmatpush3.msra.mxu0 %v6843_v59 }
0x182a   :  { %19440 = vst [vmem:[#allocation118_spill] sm:$0xff] %v17616_v45  ;;  %v6879_v19 = vmul.f32 %v17616_v45, %v19367_v33  ;;  %12936 = vmatprep.subr.mxu0 %v6842_v44  ;;  %v6841_v45 = vld [vmem:[%s19419_s16 + $0x8] sm:$0xff] }
0x182b   :  { %v7274_v39 = vpop.f32.mrf.mxu0  ;;  %12937 = vmatpush3.msra.mxu0 %v6842_v44 }
0x182c   :  { %12912 = vmatprep.mubr.msk.f32.mxu1 %vm2793_vm0, %v6879_v19  ;;  %12938 = vmatprep.subr.mxu0 %v6841_v45  ;;  %v19441_v19 = vld [vmem:[#allocation94_spill] sm:$0xff] }
0x182d   :  { %12913 = vmatmul.mubr.msk.f32.gmra.mxu1 %vm2793_vm0, %v6880_v47  ;;  %v12925_v43 = vpop.f32.mrf.mxu0  ;;  %12939 = vmatpush3.msra.mxu0 %v6841_v45  ;;  %v17634_v13 = vrot.slane %v7274_v39, %v19441_v19 }
0x182e   :  { %12940 = vmatprep.subr.mxu0 %v6840_v0 }
0x182f   :  { %12941 = vmatpush3.msra.mxu0 %v6840_v0 }
0x1830   :  { %13054 = vmatprep.subr.mxu0 %v19165_v51 }
0x189e   :  { %v12869_v41 = vpop.f32.mrf.mxu1 }
0x189f   :  { %v7055_v47 = vadd.f32 %v12869_v41, %v17631_v37 }
0x18a0   :  { %v7049_v43 = vpop.f32.mrf.mxu1 }
0x18a1   :  { %v7283_v59 = vadd.f32 %v17634_v13, %v7055_v47  ;;  %v7050_v44 = vadd.f32 %v17631_v37, %v7049_v43 }
0x18a3   :  { %v7282_v45 = vadd.f32 %v17634_v13, %v7050_v44  ;;  %v7315_v14 = vmax.f32 %v7283_v59, 0.0 }
0x18a5   :  { %v7314_v28 = vmax.f32 %v7282_v45, 0.0  ;;  %v7347_v39 = vmul.f32 %v7315_v14, %v16006_v21 }
0x18a6   :  { %v12872_v0 = vpop.f32.mrf.mxu1 }
0x18a7   :  { %v7346_v63 = vmul.f32 %v7314_v28, %v16003_v40  ;;  %v7065_v35 = vadd.f32 %v12872_v0, %v17631_v37 }
0x18a8   :  { %v7059_v19 = vpop.f32.mrf.mxu1 }
0x18a9   :  { %v7285_v25 = vadd.f32 %v17634_v13, %v7065_v35  ;;  %v7060_v41 = vadd.f32 %v17631_v37, %v7059_v19  ;;  %12942 = vmatprep.mubr.msk.f32.mxu0 %vm1540_vm1, %v7346_v63 }
0x18aa   :  { %12943 = vmatmul.mubr.msk.f32.vlgmr.msra.gmra.mxu0 %vm1540_vm1, %v7347_v39 }
0x18ab   :  { %v7284_v47 = vadd.f32 %v17634_v13, %v7060_v41  ;;  %v7317_v43 = vmax.f32 %v7285_v25, 0.0 }
0x18ad   :  { %v7316_v59 = vmax.f32 %v7284_v47, 0.0  ;;  %v7349_v14 = vmul.f32 %v7317_v43, %v19350_v57 }
0x18af   :  { %v12875_v44 = vpop.f32.mrf.mxu1  ;;  %v7348_v28 = vmul.f32 %v7316_v59, %v16009_v24 }
0x18b0   :  { %v7075_v45 = vadd.f32 %v12875_v44, %v17631_v37 }
0x18b1   :  { %v7069_v0 = vpop.f32.mrf.mxu1  ;;  %12945 = vmatprep.mubr.msk.f32.mxu0 %vm1540_vm1, %v7348_v28 }
0x18b2   :  { %v7287_v35 = vadd.f32 %v17634_v13, %v7075_v45  ;;  %v7070_v19 = vadd.f32 %v17631_v37, %v7069_v0  ;;  %12946 = vmatmul.mubr.msk.f32.gmra.mxu0 %vm1540_vm1, %v7349_v14 }
0x18b4   :  { %v7286_v63 = vadd.f32 %v17634_v13, %v7070_v19  ;;  %v7319_v25 = vmax.f32 %v7287_v35, 0.0 }
0x18b6   :  { %v7318_v39 = vmax.f32 %v7286_v63, 0.0  ;;  %v7351_v43 = vmul.f32 %v7319_v25, %v16058_v54 }
0x18b8   :  { %v7350_v47 = vmul.f32 %v7318_v39, %v16055_v16 }
0x18b9   :  { %v12878_v41 = vpop.f32.mrf.mxu1 }
0x18ba   :  { %v7085_v59 = vadd.f32 %v12878_v41, %v17631_v37  ;;  %12948 = vmatprep.mubr.msk.f32.mxu0 %vm1540_vm1, %v7350_v47 }
0x18bb   :  { %v7079_v44 = vpop.f32.mrf.mxu1  ;;  %12949 = vmatmul.mubr.msk.f32.gmra.mxu0 %vm1540_vm1, %v7351_v43 }
0x18bc   :  { %v7289_v45 = vadd.f32 %v17634_v13, %v7085_v59  ;;  %v7080_v0 = vadd.f32 %v17631_v37, %v7079_v44 }
0x18bd   :  { %v12881_v28 = vpop.f32.mrf.mxu1 }
0x18be   :  { %v7288_v14 = vadd.f32 %v17634_v13, %v7080_v0  ;;  %v7095_v35 = vadd.f32 %v12881_v28, %v17631_v37  ;;  %v7321_v19 = vmax.f32 %v7289_v45, 0.0 }
0x18bf   :  { %v7089_v63 = vpop.f32.mrf.mxu1 }
0x18c0   :  { %v7320_v39 = vmax.f32 %v7288_v14, 0.0  ;;  %v7291_v41 = vadd.f32 %v17634_v13, %v7095_v35  ;;  %v7090_v25 = vadd.f32 %v17631_v37, %v7089_v63  ;;  %v7353_v47 = vmul.f32 %v7321_v19, %v16064_v56 }
0x18c2   :  { %v7352_v59 = vmul.f32 %v7320_v39, %v16061_v2  ;;  %v7290_v44 = vadd.f32 %v17634_v13, %v7090_v25  ;;  %v7323_v18 = vmax.f32 %v7291_v41, 0.0 }
0x18c4   :  { %v7322_v27 = vmax.f32 %v7290_v44, 0.0  ;;  %12951 = vmatprep.mubr.msk.f32.mxu0 %vm1540_vm1, %v7352_v59  ;;  %v7355_v28 = vmul.f32 %v7323_v18, %v16123_v42 }
0x18c5   :  { %v12884_v43 = vpop.f32.mrf.mxu1  ;;  %12952 = vmatmul.mubr.msk.f32.gmra.mxu0 %vm1540_vm1, %v7353_v47 }
0x18c6   :  { %v7354_v45 = vmul.f32 %v7322_v27, %v16120_v38  ;;  %v7105_v0 = vadd.f32 %v12884_v43, %v17631_v37 }
0x18c7   :  { %v7099_v14 = vpop.f32.mrf.mxu1 }
0x18c8   :  { %v7293_v35 = vadd.f32 %v17634_v13, %v7105_v0  ;;  %v7100_v63 = vadd.f32 %v17631_v37, %v7099_v14  ;;  %12954 = vmatprep.mubr.msk.f32.mxu0 %vm1540_vm1, %v7354_v45 }
0x18c9   :  { %v12887_v19 = vpop.f32.mrf.mxu1  ;;  %12955 = vmatmul.mubr.msk.f32.gmra.mxu0 %vm1540_vm1, %v7355_v28 }
0x18ca   :  { %v7292_v39 = vadd.f32 %v17634_v13, %v7100_v63  ;;  %v7115_v41 = vadd.f32 %v12887_v19, %v17631_v37  ;;  %v7325_v25 = vmax.f32 %v7293_v35, 0.0 }
0x18cb   :  { %v7109_v27 = vpop.f32.mrf.mxu1 }
0x18cc   :  { %v7324_v59 = vmax.f32 %v7292_v39, 0.0  ;;  %v7295_v44 = vadd.f32 %v17634_v13, %v7115_v41  ;;  %v7110_v18 = vadd.f32 %v17631_v37, %v7109_v27  ;;  %v7357_v28 = vmul.f32 %v7325_v25, %v16129_v10 }
0x18cd   :  { %v12890_v47 = vpop.f32.mrf.mxu1 }
0x18ce   :  { %v7356_v43 = vmul.f32 %v7324_v59, %v16126_v60  ;;  %v7294_v0 = vadd.f32 %v17634_v13, %v7110_v18  ;;  %v7125_v45 = vadd.f32 %v12890_v47, %v17631_v37  ;;  %v7327_v14 = vmax.f32 %v7295_v44, 0.0 }
0x18cf   :  { %v7119_v63 = vpop.f32.mrf.mxu1 }
0x18d0   :  { %v7326_v15 = vmax.f32 %v7294_v0, 0.0  ;;  %v7297_v35 = vadd.f32 %v17634_v13, %v7125_v45  ;;  %v7120_v19 = vadd.f32 %v17631_v37, %v7119_v63  ;;  %12957 = vmatprep.mubr.msk.f32.mxu0 %vm1540_vm1, %v7356_v43  ;;  %v7359_v25 = vmul.f32 %v7327_v14, %v16192_v53 }
0x18d1   :  { %v12893_v39 = vpop.f32.mrf.mxu1  ;;  %12958 = vmatmul.mubr.msk.f32.gmra.mxu0 %vm1540_vm1, %v7357_v28 }
0x18d2   :  { %v7358_v41 = vmul.f32 %v7326_v15, %v16189_v58  ;;  %v7296_v27 = vadd.f32 %v17634_v13, %v7120_v19  ;;  %v7135_v59 = vadd.f32 %v12893_v39, %v17631_v37  ;;  %v7329_v44 = vmax.f32 %v7297_v35, 0.0 }
0x18d3   :  { %v7129_v18 = vpop.f32.mrf.mxu1 }
0x18d4   :  { %v7328_v47 = vmax.f32 %v7296_v27, 0.0  ;;  %v7299_v0 = vadd.f32 %v17634_v13, %v7135_v59  ;;  %v7130_v45 = vadd.f32 %v17631_v37, %v7129_v18  ;;  %12960 = vmatprep.mubr.msk.f32.mxu0 %vm1540_vm1, %v7358_v41  ;;  %v7361_v14 = vmul.f32 %v7329_v44, %v16198_v52 }
0x18d5   :  { %v12896_v43 = vpop.f32.mrf.mxu1  ;;  %12961 = vmatmul.mubr.msk.f32.gmra.mxu0 %vm1540_vm1, %v7359_v25 }
0x18d6   :  { %v7360_v15 = vmul.f32 %v7328_v47, %v16195_v4  ;;  %v7298_v28 = vadd.f32 %v17634_v13, %v7130_v45  ;;  %v7145_v63 = vadd.f32 %v12896_v43, %v17631_v37  ;;  %v7331_v35 = vmax.f32 %v7299_v0, 0.0 }
0x18d7   :  { %v7139_v19 = vpop.f32.mrf.mxu1 }
0x18d8   :  { %v7330_v39 = vmax.f32 %v7298_v28, 0.0  ;;  %v7301_v27 = vadd.f32 %v17634_v13, %v7145_v63  ;;  %v7140_v59 = vadd.f32 %v17631_v37, %v7139_v19  ;;  %12963 = vmatprep.mubr.msk.f32.mxu0 %vm1540_vm1, %v7360_v15  ;;  %v7363_v44 = vmul.f32 %v7331_v35, %v16265_v20 }
0x18d9   :  { %v12899_v41 = vpop.f32.mrf.mxu1  ;;  %12964 = vmatmul.mubr.msk.f32.gmra.mxu0 %vm1540_vm1, %v7361_v14 }
0x18da   :  { %v7362_v25 = vmul.f32 %v7330_v39, %v16262_v34  ;;  %v7300_v18 = vadd.f32 %v17634_v13, %v7140_v59  ;;  %v7155_v47 = vadd.f32 %v12899_v41, %v17631_v37  ;;  %v7333_v0 = vmax.f32 %v7301_v27, 0.0 }
0x18db   :  { %v7149_v45 = vpop.f32.mrf.mxu1 }
0x18dc   :  { %v7332_v43 = vmax.f32 %v7300_v18, 0.0  ;;  %v7303_v28 = vadd.f32 %v17634_v13, %v7155_v47  ;;  %v7150_v63 = vadd.f32 %v17631_v37, %v7149_v45  ;;  %12966 = vmatprep.mubr.msk.f32.mxu0 %vm1540_vm1, %v7362_v25  ;;  %v7365_v35 = vmul.f32 %v7333_v0, %v16271_v61 }
0x18dd   :  { %v12902_v15 = vpop.f32.mrf.mxu1  ;;  %12967 = vmatmul.mubr.msk.f32.gmra.mxu0 %vm1540_vm1, %v7363_v44 }
0x18de   :  { %v7364_v14 = vmul.f32 %v7332_v43, %v16268_v49  ;;  %v7302_v19 = vadd.f32 %v17634_v13, %v7150_v63  ;;  %v7165_v39 = vadd.f32 %v12902_v15, %v17631_v37  ;;  %v7335_v27 = vmax.f32 %v7303_v28, 0.0 }
0x18df   :  { %v7159_v59 = vpop.f32.mrf.mxu1 }
0x18e0   :  { %v7334_v41 = vmax.f32 %v7302_v19, 0.0  ;;  %v7305_v18 = vadd.f32 %v17634_v13, %v7165_v39  ;;  %v7160_v47 = vadd.f32 %v17631_v37, %v7159_v59  ;;  %12969 = vmatprep.mubr.msk.f32.mxu0 %vm1540_vm1, %v7364_v14  ;;  %v7367_v0 = vmul.f32 %v7335_v27, %v16340_v31 }
0x18e1   :  { %v12905_v25 = vpop.f32.mrf.mxu1  ;;  %12970 = vmatmul.mubr.msk.f32.gmra.mxu0 %vm1540_vm1, %v7365_v35 }
0x18e2   :  { %v7366_v44 = vmul.f32 %v7334_v41, %v16337_v48  ;;  %v7304_v45 = vadd.f32 %v17634_v13, %v7160_v47  ;;  %v7175_v43 = vadd.f32 %v12905_v25, %v17631_v37  ;;  %v7337_v28 = vmax.f32 %v7305_v18, 0.0 }
0x18e3   :  { %v7169_v63 = vpop.f32.mrf.mxu1 }
0x18e4   :  { %v7336_v15 = vmax.f32 %v7304_v45, 0.0  ;;  %v7307_v19 = vadd.f32 %v17634_v13, %v7175_v43  ;;  %v7170_v39 = vadd.f32 %v17631_v37, %v7169_v63  ;;  %12972 = vmatprep.mubr.msk.f32.mxu0 %vm1540_vm1, %v7366_v44  ;;  %v7369_v27 = vmul.f32 %v7337_v28, %v16346_v9 }
0x18e5   :  { %v12908_v14 = vpop.f32.mrf.mxu1  ;;  %12973 = vmatmul.mubr.msk.f32.gmra.mxu0 %vm1540_vm1, %v7367_v0 }
0x18e6   :  { %v7368_v35 = vmul.f32 %v7336_v15, %v16343_v22  ;;  %v7306_v59 = vadd.f32 %v17634_v13, %v7170_v39  ;;  %v7185_v41 = vadd.f32 %v12908_v14, %v17631_v37  ;;  %v7339_v18 = vmax.f32 %v7307_v19, 0.0 }
0x18e7   :  { %v7179_v47 = vpop.f32.mrf.mxu1 }
0x18e8   :  { %v7338_v25 = vmax.f32 %v7306_v59, 0.0  ;;  %v7309_v45 = vadd.f32 %v17634_v13, %v7185_v41  ;;  %v7180_v43 = vadd.f32 %v17631_v37, %v7179_v47  ;;  %12975 = vmatprep.mubr.msk.f32.mxu0 %vm1540_vm1, %v7368_v35  ;;  %v7371_v28 = vmul.f32 %v7339_v18, %v19354_v8 }
0x18e9   :  { %v12911_v44 = vpop.f32.mrf.mxu1  ;;  %12976 = vmatmul.mubr.msk.f32.gmra.mxu0 %vm1540_vm1, %v7369_v27 }
0x18ea   :  { %v7370_v0 = vmul.f32 %v7338_v25, %v19353_v23  ;;  %v7308_v63 = vadd.f32 %v17634_v13, %v7180_v43  ;;  %v7195_v15 = vadd.f32 %v12911_v44, %v17631_v37  ;;  %v7341_v19 = vmax.f32 %v7309_v45, 0.0 }
0x18eb   :  { %v7189_v39 = vpop.f32.mrf.mxu1 }
0x18ec   :  { %v7340_v14 = vmax.f32 %v7308_v63, 0.0  ;;  %v7311_v59 = vadd.f32 %v17634_v13, %v7195_v15  ;;  %v7190_v41 = vadd.f32 %v17631_v37, %v7189_v39  ;;  %12978 = vmatprep.mubr.msk.f32.mxu0 %vm1540_vm1, %v7370_v0  ;;  %v7373_v18 = vmul.f32 %v7341_v19, %v19358_v30 }
0x18ed   :  { %v12914_v35 = vpop.f32.mrf.mxu1  ;;  %12979 = vmatmul.mubr.msk.f32.gmra.mxu0 %vm1540_vm1, %v7371_v28 }
0x18ee   :  { %v7372_v27 = vmul.f32 %v7340_v14, %v19357_v5  ;;  %v7310_v47 = vadd.f32 %v17634_v13, %v7190_v41  ;;  %v7205_v25 = vadd.f32 %v12914_v35, %v17631_v37  ;;  %v7343_v45 = vmax.f32 %v7311_v59, 0.0  ;;  %v8300_v41 = vld [vmem:[%s19443_s18 + $0x18] sm:$0xff]  ;;  %v7967_v35 = vld [vmem:[%s19442_s15 + $0x30] sm:$0xff] }
0x18ef   :  { %v7199_v43 = vpop.f32.mrf.mxu1  ;;  %13055 = vmatpush3.msra.mxu0 %v8300_v41 }
0x18f0   :  { %v7342_v44 = vmax.f32 %v7310_v47, 0.0  ;;  %v7313_v63 = vadd.f32 %v17634_v13, %v7205_v25  ;;  %v7200_v15 = vadd.f32 %v17631_v37, %v7199_v43  ;;  %12981 = vmatprep.mubr.msk.f32.mxu0 %vm1540_vm1, %v7372_v27  ;;  %v7375_v39 = vmul.f32 %v7343_v45, %v19363_v50  ;;  %13056 = vmatprep.subr.mxu0 %v19165_v51  ;;  %v7966_v27 = vld [vmem:[%s19442_s15 + $0x28] sm:$0xff]  ;;  %v8299_v47 = vld [vmem:[%s19443_s18 + $0x10] sm:$0xff]  ;;  %v7964_v45 = vld [vmem:[%s19442_s15 + $0x18] sm:$0xff] }
0x18f1   :  { %12982 = vmatmul.mubr.msk.f32.gmra.mxu0 %vm1540_vm1, %v7373_v18  ;;  %v8298_v25 = vld [vmem:[%s19443_s18 + $0x8] sm:$0xff]  ;;  %v7965_v18 = vld [vmem:[%s19442_s15 + $0x20] sm:$0xff]  ;;  %v7963_v43 = vld [vmem:[%s19442_s15 + $0x10] sm:$0xff] }
0x18f2   :  { %v7374_v0 = vmul.f32 %v7342_v44, %v19361_v46  ;;  %v7312_v28 = vadd.f32 %v17634_v13, %v7200_v15  ;;  %v7345_v19 = vmax.f32 %v7313_v63, 0.0  ;;  %v7968_v13 = vld [vmem:[%s19442_s15 + $0x38] sm:$0xff]  ;;  %13057 = vmatpush3.msra.mxu0 %v8299_v47  ;;  %v7962_v44 = vld [vmem:[%s19442_s15 + $0x8] sm:$0xff] }
0x18f3   :  { %12990 = vmatprep.subr.mxu1 %v7968_v13  ;;  %13058 = vmatprep.subr.mxu0 %v19165_v51  ;;  %v17779_v63 = vld [vmem:[#allocation14] ss:$0 sm:$0xff] }
0x18f4   :  { %v7344_v14 = vmax.f32 %v7312_v28, 0.0  ;;  %12984 = vmatprep.mubr.msk.f32.mxu0 %vm1540_vm1, %v7374_v0  ;;  %v7377_v59 = vmul.f32 %v7345_v19, %v19368_v12  ;;  %12991 = vmatpush3.msra.mxu1 %v7968_v13  ;;  %v8297_v19 = vld [vmem:[%s19443_s18] sm:$0xff] }
0x18f5   :  { %12985 = vmatmul.mubr.msk.f32.gmra.mxu0 %vm1540_vm1, %v7375_v39  ;;  %12992 = vmatprep.subr.mxu1 %v7967_v35  ;;  %v7961_v39 = vld [vmem:[%s19442_s15] sm:$0xff] }
0x18f6   :  { %v7376_v37 = vmul.f32 %v7344_v14, %v19367_v33  ;;  %12993 = vmatpush3.msra.mxu1 %v7967_v35  ;;  %13059 = vmatpush3.msra.mxu0 %v8298_v25 }
0x18f7   :  { %12994 = vmatprep.subr.mxu1 %v7966_v27  ;;  %13060 = vmatprep.subr.mxu0 %v19165_v51 }
0x18f8   :  { %12987 = vmatprep.mubr.msk.f32.mxu0 %vm1540_vm1, %v7376_v37  ;;  %12995 = vmatpush3.msra.mxu1 %v7966_v27 }
0x18f9   :  { %12988 = vmatmul.mubr.msk.f32.gmra.mxu0 %vm1540_vm1, %v7377_v59  ;;  %12996 = vmatprep.subr.mxu1 %v7965_v18 }
0x18fa   :  { %13062 = vmatprep.mubr.msk.f32.mxu0 %vm13923_vm15, %v19165_v51  ;;  %12997 = vmatpush3.msra.mxu1 %v7965_v18 }
0x18fb   :  { %12998 = vmatprep.subr.mxu1 %v7964_v45  ;;  %13061 = vmatpush3.msra.mxu0 %v8297_v19 }
0x18fc   :  { %12999 = vmatpush3.msra.mxu1 %v7964_v45 }
0x18fd   :  { %13000 = vmatprep.subr.mxu1 %v7963_v43  ;;  %13063 = vmatmul.mubr.msk.f32.vlgmr.msra.gmra.mxu0 %vm2793_vm0, %v17458_v17 }
0x18fe   :  { %13001 = vmatpush3.msra.mxu1 %v7963_v43 }
0x18ff   :  { %13002 = vmatprep.subr.mxu1 %v7962_v44 }
0x1900   :  { %13003 = vmatpush3.msra.mxu1 %v7962_v44 }
0x1901   :  { %13004 = vmatprep.subr.mxu1 %v7961_v39 }
0x1902   :  { %13005 = vmatpush3.msra.mxu1 %v7961_v39 }
0x196a   :  { %v12944_v15 = vpop.f32.mrf.mxu0 }
0x196b   :  { %v7552_v0 = vadd.f32 %v12944_v15, %v17779_v63 }
0x196c   :  { %v7546_v28 = vpop.f32.mrf.mxu0 }
0x196d   :  { %v7547_v51 = vadd.f32 %v17779_v63, %v7546_v28  ;;  %7739 = vrot.lane.b32.xlu1 %v7552_v0, %s13927_s25 }
0x196f   :  { %7737 = vrot.lane.b32.xlu0 %v7547_v51, %s13927_s25 }
0x1972   :  { %v12947_v14 = vpop.f32.mrf.mxu0 }
0x1973   :  { %v7562_v37 = vadd.f32 %v12947_v14, %v17779_v63 }
0x1974   :  { %v7556_v59 = vpop.f32.mrf.mxu0 }
0x1975   :  { %v7557_v13 = vadd.f32 %v17779_v63, %v7556_v59  ;;  %7743 = vrot.lane.b32.xlu1 %v7562_v37, %s13927_s25 }
0x1977   :  { %7741 = vrot.lane.b32.xlu0 %v7557_v13, %s13927_s25 }
0x197b   :  { %v12950_v41 = vpop.f32.mrf.mxu0 }
0x197c   :  { %v7572_v35 = vadd.f32 %v12950_v41, %v17779_v63 }
0x197d   :  { %v7566_v27 = vpop.f32.mrf.mxu0 }
0x197e   :  { %v7567_v47 = vadd.f32 %v17779_v63, %v7566_v27  ;;  %7747 = vrot.lane.b32.xlu1 %v7572_v35, %s13927_s25 }
0x1980   :  { %7745 = vrot.lane.b32.xlu0 %v7567_v47, %s13927_s25 }
0x1985   :  { %v12953_v17 = vpop.f32.mrf.mxu0 }
0x1986   :  { %v7582_v25 = vadd.f32 %v12953_v17, %v17779_v63 }
0x1987   :  { %v7576_v18 = vpop.f32.mrf.mxu0 }
0x1988   :  { %v7577_v45 = vadd.f32 %v17779_v63, %v7576_v18  ;;  %7751 = vrot.lane.b32.xlu1 %v7582_v25, %s13927_s25 }
0x1989   :  { %v12956_v43 = vpop.f32.mrf.mxu0 }
0x198a   :  { %v7592_v44 = vadd.f32 %v12956_v43, %v17779_v63  ;;  %7749 = vrot.lane.b32.xlu0 %v7577_v45, %s13927_s25 }
0x198b   :  { %v7586_v15 = vpop.f32.mrf.mxu0 }
0x198c   :  { %v7587_v0 = vadd.f32 %v17779_v63, %v7586_v15  ;;  %7755 = vrot.lane.b32.xlu1 %v7592_v44, %s13927_s25 }
0x198e   :  { %7753 = vrot.lane.b32.xlu0 %v7587_v0, %s13927_s25 }
0x1991   :  { %v12959_v28 = vpop.f32.mrf.mxu0 }
0x1992   :  { %v7602_v51 = vadd.f32 %v12959_v28, %v17779_v63 }
0x1993   :  { %v7596_v39 = vpop.f32.mrf.mxu0 }
0x1994   :  { %v7597_v19 = vadd.f32 %v17779_v63, %v7596_v39  ;;  %7759 = vrot.lane.b32.xlu1 %v7602_v51, %s13927_s25 }
0x1995   :  { %v12962_v14 = vpop.f32.mrf.mxu0 }
0x1996   :  { %v7612_v37 = vadd.f32 %v12962_v14, %v17779_v63  ;;  %7757 = vrot.lane.b32.xlu0 %v7597_v19, %s13927_s25 }
0x1997   :  { %v7606_v59 = vpop.f32.mrf.mxu0 }
0x1998   :  { %v7607_v13 = vadd.f32 %v17779_v63, %v7606_v59  ;;  %7763 = vrot.lane.b32.xlu1 %v7612_v37, %s13927_s25 }
0x1999   :  { %v12965_v41 = vpop.f32.mrf.mxu0 }
0x199a   :  { %v7622_v35 = vadd.f32 %v12965_v41, %v17779_v63  ;;  %7761 = vrot.lane.b32.xlu0 %v7607_v13, %s13927_s25 }
0x199b   :  { %v7616_v27 = vpop.f32.mrf.mxu0 }
0x199c   :  { %v7617_v47 = vadd.f32 %v17779_v63, %v7616_v27  ;;  %7767 = vrot.lane.b32.xlu1 %v7622_v35, %s13927_s25 }
0x199d   :  { %v12968_v17 = vpop.f32.mrf.mxu0 }
0x199e   :  { %v7632_v25 = vadd.f32 %v12968_v17, %v17779_v63  ;;  %7765 = vrot.lane.b32.xlu0 %v7617_v47, %s13927_s25 }
0x199f   :  { %v7626_v18 = vpop.f32.mrf.mxu0 }
0x19a0   :  { %v7627_v45 = vadd.f32 %v17779_v63, %v7626_v18  ;;  %7771 = vrot.lane.b32.xlu1 %v7632_v25, %s13927_s25 }
0x19a1   :  { %v12971_v43 = vpop.f32.mrf.mxu0 }
0x19a2   :  { %v7642_v44 = vadd.f32 %v12971_v43, %v17779_v63  ;;  %7769 = vrot.lane.b32.xlu0 %v7627_v45, %s13927_s25 }
0x19a3   :  { %v7636_v15 = vpop.f32.mrf.mxu0 }
0x19a4   :  { %v7637_v0 = vadd.f32 %v17779_v63, %v7636_v15  ;;  %7775 = vrot.lane.b32.xlu1 %v7642_v44, %s13927_s25 }
0x19a5   :  { %v12974_v28 = vpop.f32.mrf.mxu0 }
0x19a6   :  { %v7652_v51 = vadd.f32 %v12974_v28, %v17779_v63  ;;  %7773 = vrot.lane.b32.xlu0 %v7637_v0, %s13927_s25 }
0x19a7   :  { %v7646_v39 = vpop.f32.mrf.mxu0 }
0x19a8   :  { %v7647_v19 = vadd.f32 %v17779_v63, %v7646_v39  ;;  %7779 = vrot.lane.b32.xlu1 %v7652_v51, %s13927_s25 }
0x19a9   :  { %v12977_v14 = vpop.f32.mrf.mxu0 }
0x19aa   :  { %v7662_v37 = vadd.f32 %v12977_v14, %v17779_v63  ;;  %7777 = vrot.lane.b32.xlu0 %v7647_v19, %s13927_s25  ;;  %v8510_v14 = vld [vmem:[%s19444_s23 + $0x38] sm:$0xff] }
0x19ab   :  { %v7656_v59 = vpop.f32.mrf.mxu0  ;;  %13065 = vmatprep.subr.mxu1 %v8510_v14 }
0x19ac   :  { %v7657_v13 = vadd.f32 %v17779_v63, %v7656_v59  ;;  %7783 = vrot.lane.b32.xlu1 %v7662_v37, %s13927_s25  ;;  %v10347_v37 = vld [vmem:[#allocation3] sm:$0x1] }
0x19ad   :  { %v12980_v41 = vpop.f32.mrf.mxu0 }
0x19ae   :  { %v7672_v35 = vadd.f32 %v12980_v41, %v17779_v63  ;;  %7781 = vrot.lane.b32.xlu0 %v7657_v13, %s13927_s25 }
0x19af   :  { %v7666_v27 = vpop.f32.mrf.mxu0 }
0x19b0   :  { %v7667_v47 = vadd.f32 %v17779_v63, %v7666_v27  ;;  %7787 = vrot.lane.b32.xlu1 %v7672_v35, %s13927_s25 }
0x19b1   :  { %v12983_v17 = vpop.f32.mrf.mxu0 }
0x19b2   :  { %v7682_v25 = vadd.f32 %v12983_v17, %v17779_v63  ;;  %7785 = vrot.lane.b32.xlu0 %v7667_v47, %s13927_s25 }
0x19b3   :  { %v7676_v18 = vpop.f32.mrf.mxu0 }
0x19b4   :  { %v7677_v45 = vadd.f32 %v17779_v63, %v7676_v18  ;;  %7791 = vrot.lane.b32.xlu1 %v7682_v25, %s13927_s25 }
0x19b5   :  { %v12986_v43 = vpop.f32.mrf.mxu0 }
0x19b6   :  { %v7692_v44 = vadd.f32 %v12986_v43, %v17779_v63  ;;  %7789 = vrot.lane.b32.xlu0 %v7677_v45, %s13927_s25 }
0x19b7   :  { %v7686_v15 = vpop.f32.mrf.mxu0 }
0x19b8   :  { %v7687_v0 = vadd.f32 %v17779_v63, %v7686_v15  ;;  %7795 = vrot.lane.b32.xlu1 %v7692_v44, %s13927_s25  ;;  %v8509_v15 = vld [vmem:[%s19444_s23 + $0x30] sm:$0xff] }
0x19b9   :  { %v12989_v28 = vpop.f32.mrf.mxu0 }
0x19ba   :  { %v7702_v51 = vadd.f32 %v12989_v28, %v17779_v63  ;;  %7793 = vrot.lane.b32.xlu0 %v7687_v0, %s13927_s25 }
0x19bb   :  { %v7696_v39 = vpop.f32.mrf.mxu0 }
0x19bc   :  { %v7697_v19 = vadd.f32 %v17779_v63, %v7696_v39  ;;  %7799 = vrot.lane.b32.xlu1 %v7702_v51, %s13927_s25 }
0x19be   :  { %7797 = vrot.lane.b32.xlu0 %v7697_v19, %s13927_s25 }
0x19c2   :  { %10350 = vperm.xlu0 %13383, %v10347_v37   ;;  %v8506_v37 = vld [vmem:[%s19444_s23 + $0x18] sm:$0xff] }
0x19df   :  { %v7740_v59 = vpop.permute.xlu1 %7739 }
0x19e0   :  { %v7834_v13 = vsub.f32 %v17464_v1, %v7740_v59 }
0x19e1   :  { %v7738_v41 = vpop.permute.xlu0 %7737 }
0x19e2   :  { %v7866_v35 = vmul.f32 %v7834_v13, %v16006_v21  ;;  %v7833_v27 = vsub.f32 %v17466_v62, %v7738_v41 }
0x19e4   :  { %v7865_v63 = vmul.f32 %v7833_v27, %v16003_v40  ;;  %v7898_v47 = vsel %vm2793_vm0, %v17464_v1, %v7866_v35 }
0x19e5   :  { %v7930_v45 = vmul.f32 %v7898_v47, %v16006_v21  ;;  %v8507_v21 = vld [vmem:[%s19444_s23 + $0x20] sm:$0xff] }
0x19e6   :  { %v7897_v17 = vsel %vm2793_vm0, %v17466_v62, %v7865_v63  ;;  %v8508_v62 = vld [vmem:[%s19444_s23 + $0x28] sm:$0xff] }
0x19e7   :  { %v7744_v25 = vpop.permute.xlu1 %7743  ;;  %v7929_v18 = vmul.f32 %v7897_v17, %v16003_v40 }
0x19e8   :  { %v7836_v43 = vsub.f32 %v17474_v36, %v7744_v25 }
0x19e9   :  { %v7742_v44 = vpop.permute.xlu0 %7741  ;;  %13006 = vmatprep.mubr.msk.f32.mxu1 %vm1540_vm1, %v7929_v18 }
0x19ea   :  { %v7868_v0 = vmul.f32 %v7836_v43, %v19350_v57  ;;  %v7835_v1 = vsub.f32 %v17476_v55, %v7742_v44  ;;  %13007 = vmatmul.mubr.msk.f32.vlgmr.msra.gmra.mxu1 %vm1540_vm1, %v7930_v45 }
0x19eb   :  { %13066 = vmatpush3.msra.mxu1 %v8510_v14 }
0x19ec   :  { %v7867_v28 = vmul.f32 %v7835_v1, %v16009_v24  ;;  %13067 = vmatprep.subr.mxu1 %v8509_v15  ;;  %v7900_v40 = vsel %vm2793_vm0, %v17474_v36, %v7868_v0 }
0x19ed   :  { %13068 = vmatpush3.msra.mxu1 %v8509_v15  ;;  %v7932_v14 = vmul.f32 %v7900_v40, %v19350_v57 }
0x19ee   :  { %v7899_v51 = vsel %vm2793_vm0, %v17476_v55, %v7867_v28  ;;  %13069 = vmatprep.subr.mxu1 %v8508_v62 }
0x19ef   :  { %v7931_v19 = vmul.f32 %v7899_v51, %v16009_v24  ;;  %13070 = vmatpush3.msra.mxu1 %v8508_v62 }
0x19f0   :  { %v7748_v39 = vpop.permute.xlu1 %7747  ;;  %13071 = vmatprep.subr.mxu1 %v8507_v21 }
0x19f1   :  { %v7838_v59 = vsub.f32 %v17484_v32, %v7748_v39  ;;  %13009 = vmatprep.mubr.msk.f32.mxu1 %vm1540_vm1, %v7931_v19  ;;  %13072 = vmatpush3.msra.mxu1 %v8507_v21 }
0x19f2   :  { %v7746_v13 = vpop.permute.xlu0 %7745  ;;  %13010 = vmatmul.mubr.msk.f32.gmra.mxu1 %vm1540_vm1, %v7932_v14  ;;  %13073 = vmatprep.subr.mxu1 %v8506_v37 }
0x19f3   :  { %v7870_v36 = vmul.f32 %v7838_v59, %v16058_v54  ;;  %v7837_v41 = vsub.f32 %v17486_v29, %v7746_v13  ;;  %13074 = vmatpush3.msra.mxu1 %v8506_v37  ;;  %v19446_v37 = vld [vmem:[#allocation91_spill] sm:$0xff] }
0x19f5   :  { %v7869_v24 = vmul.f32 %v7837_v41, %v16055_v16  ;;  %v7902_v57 = vsel %vm2793_vm0, %v17484_v32, %v7870_v36  ;;  %v19447_v36 = vld [vmem:[#allocation114_spill] sm:$0xff] }
0x19f6   :  { %v7934_v63 = vmul.f32 %v7902_v57, %v16058_v54 }
0x19f7   :  { %v7901_v55 = vsel %vm2793_vm0, %v17486_v29, %v7869_v24 }
0x19f8   :  { %v7933_v27 = vmul.f32 %v7901_v55, %v16055_v16 }
0x19fa   :  { %v7752_v35 = vpop.permute.xlu1 %7751  ;;  %13012 = vmatprep.mubr.msk.f32.mxu1 %vm1540_vm1, %v7933_v27  ;;  %v19448_v27 = vld [vmem:[#allocation119_spill] sm:$0xff] }
0x19fb   :  { %v7840_v47 = vsub.f32 %v17494_v6, %v7752_v35  ;;  %13013 = vmatmul.mubr.msk.f32.gmra.mxu1 %vm1540_vm1, %v7934_v63 }
0x19fc   :  { %v7750_v17 = vpop.permute.xlu0 %7749 }
0x19fd   :  { %v7872_v25 = vmul.f32 %v7840_v47, %v16064_v56  ;;  %v7839_v18 = vsub.f32 %v17496_v11, %v7750_v17 }
0x19fe   :  { %v7756_v32 = vpop.permute.xlu1 %7755 }
0x19ff   :  { %v7871_v45 = vmul.f32 %v7839_v18, %v16061_v2  ;;  %v7842_v29 = vsub.f32 %v17502_v26, %v7756_v32  ;;  %v7904_v16 = vsel %vm2793_vm0, %v17494_v6, %v7872_v25  ;;  %v19449_v18 = vld [vmem:[#allocation95_spill] sm:$0xff] }
0x1a00   :  { %v7754_v54 = vpop.permute.xlu0 %7753  ;;  %v7936_v1 = vmul.f32 %v7904_v16, %v16064_v56  ;;  %v19450_v16 = vld [vmem:[#allocation96_spill] sm:$0xff] }
0x1a01   :  { %v7903_v43 = vsel %vm2793_vm0, %v17496_v11, %v7871_v45  ;;  %v7874_v44 = vmul.f32 %v7842_v29, %v16123_v42  ;;  %v7841_v15 = vsub.f32 %v17505_v3, %v7754_v54 }
0x1a02   :  { %v7935_v0 = vmul.f32 %v7903_v43, %v16061_v2 }
0x1a03   :  { %v7873_v62 = vmul.f32 %v7841_v15, %v16120_v38  ;;  %v7906_v28 = vsel %vm2793_vm0, %v17502_v26, %v7874_v44  ;;  %v19445_v26 = vld [vmem:[#allocation115_spill] sm:$0xff] }
0x1a04   :  { %13015 = vmatprep.mubr.msk.f32.mxu1 %vm1540_vm1, %v7935_v0  ;;  %v7938_v21 = vmul.f32 %v7906_v28, %v16123_v42 }
0x1a05   :  { %v7905_v6 = vsel %vm2793_vm0, %v17505_v3, %v7873_v62  ;;  %13016 = vmatmul.mubr.msk.f32.gmra.mxu1 %vm1540_vm1, %v7936_v1  ;;  %v19451_v1 = vld [vmem:[#allocation105_spill] sm:$0xff] }
0x1a06   :  { %v7760_v11 = vpop.permute.xlu1 %7759  ;;  %v7937_v40 = vmul.f32 %v7905_v6, %v16120_v38 }
0x1a07   :  { %v7844_v2 = vsub.f32 %v17514_v7, %v7760_v11  ;;  %v19452_v11 = vld [vmem:[#allocation106_spill] sm:$0xff] }
0x1a08   :  { %v7758_v56 = vpop.permute.xlu0 %7757  ;;  %13018 = vmatprep.mubr.msk.f32.mxu1 %vm1540_vm1, %v7937_v40 }
0x1a09   :  { %v7876_v51 = vmul.f32 %v7844_v2, %v16129_v10  ;;  %v7843_v39 = vsub.f32 %v19445_v26, %v7758_v56  ;;  %13019 = vmatmul.mubr.msk.f32.gmra.mxu1 %vm1540_vm1, %v7938_v21 }
0x1a0a   :  { %v7764_v19 = vpop.permute.xlu1 %7763 }
0x1a0b   :  { %v7875_v3 = vmul.f32 %v7843_v39, %v16126_v60  ;;  %v7846_v14 = vsub.f32 %v19446_v37, %v7764_v19  ;;  %v7908_v38 = vsel %vm2793_vm0, %v17514_v7, %v7876_v51 }
0x1a0c   :  { %v7762_v42 = vpop.permute.xlu0 %7761  ;;  %v7940_v55 = vmul.f32 %v7908_v38, %v16129_v10 }
0x1a0d   :  { %v7907_v59 = vsel %vm2793_vm0, %v19445_v26, %v7875_v3  ;;  %v7878_v13 = vmul.f32 %v7846_v14, %v16192_v53  ;;  %v7845_v41 = vsub.f32 %v19447_v36, %v7762_v42  ;;  %v19453_v26 = vld [vmem:[#allocation92_spill] sm:$0xff] }
0x1a0e   :  { %v7768_v24 = vpop.permute.xlu1 %7767  ;;  %v7939_v57 = vmul.f32 %v7907_v59, %v16126_v60 }
0x1a0f   :  { %v7877_v35 = vmul.f32 %v7845_v41, %v16189_v58  ;;  %v7848_v63 = vsub.f32 %v19448_v27, %v7768_v24  ;;  %v7910_v7 = vsel %vm2793_vm0, %v19446_v37, %v7878_v13  ;;  %v19454_v37 = vld [vmem:[#allocation88_spill] sm:$0xff] }
0x1a10   :  { %v7766_v47 = vpop.permute.xlu0 %7765  ;;  %13021 = vmatprep.mubr.msk.f32.mxu1 %vm1540_vm1, %v7939_v57  ;;  %v7942_v45 = vmul.f32 %v7910_v7, %v16192_v53 }
0x1a11   :  { %v7909_v17 = vsel %vm2793_vm0, %v19447_v36, %v7877_v35  ;;  %v7880_v25 = vmul.f32 %v7848_v63, %v16198_v52  ;;  %v7847_v32 = vsub.f32 %v19449_v18, %v7766_v47  ;;  %13022 = vmatmul.mubr.msk.f32.gmra.mxu1 %vm1540_vm1, %v7940_v55  ;;  %v19455_v36 = vld [vmem:[#allocation107_spill] sm:$0xff]  ;;  %v19456_v55 = vld [vmem:[#allocation97_spill] sm:$0xff] }
0x1a12   :  { %v7772_v60 = vpop.permute.xlu1 %7771  ;;  %v7941_v10 = vmul.f32 %v7909_v17, %v16189_v58  ;;  %v19457_v17 = vld [vmem:[#allocation120_spill] sm:$0xff] }
0x1a13   :  { %v7879_v29 = vmul.f32 %v7847_v32, %v16195_v4  ;;  %v7850_v54 = vsub.f32 %v19450_v16, %v7772_v60  ;;  %v7912_v43 = vsel %vm2793_vm0, %v19448_v27, %v7880_v25  ;;  %v19458_v60 = vld [vmem:[#allocation116_spill] sm:$0xff] }
0x1a14   :  { %v7770_v44 = vpop.permute.xlu0 %7769  ;;  %13024 = vmatprep.mubr.msk.f32.mxu1 %vm1540_vm1, %v7941_v10  ;;  %v7944_v28 = vmul.f32 %v7912_v43, %v16198_v52  ;;  %v19459_v43 = vld [vmem:[#allocation93_spill] sm:$0xff] }
0x1a15   :  { %v7911_v15 = vsel %vm2793_vm0, %v19449_v18, %v7879_v29  ;;  %v7882_v0 = vmul.f32 %v7850_v54, %v16265_v20  ;;  %v7849_v62 = vsub.f32 %v19451_v1, %v7770_v44  ;;  %13025 = vmatmul.mubr.msk.f32.gmra.mxu1 %vm1540_vm1, %v7942_v45 }
0x1a16   :  { %v7776_v58 = vpop.permute.xlu1 %7775  ;;  %v7943_v53 = vmul.f32 %v7911_v15, %v16195_v4 }
0x1a17   :  { %v7881_v6 = vmul.f32 %v7849_v62, %v16262_v34  ;;  %v7852_v40 = vsub.f32 %v19452_v11, %v7776_v58  ;;  %v7914_v21 = vsel %vm2793_vm0, %v19450_v16, %v7882_v0 }
0x1a18   :  { %v7774_v2 = vpop.permute.xlu0 %7773  ;;  %13027 = vmatprep.mubr.msk.f32.mxu1 %vm1540_vm1, %v7943_v53  ;;  %v7946_v19 = vmul.f32 %v7914_v21, %v16265_v20 }
0x1a19   :  { %v7913_v56 = vsel %vm2793_vm0, %v19451_v1, %v7881_v6  ;;  %v7884_v51 = vmul.f32 %v7852_v40, %v16271_v61  ;;  %v7851_v39 = vsub.f32 %v19453_v26, %v7774_v2  ;;  %13028 = vmatmul.mubr.msk.f32.gmra.mxu1 %vm1540_vm1, %v7944_v28  ;;  %v19460_v1 = vld [vmem:[#allocation98_spill] sm:$0xff] }
0x1a1a   :  { %v7780_v4 = vpop.permute.xlu1 %7779  ;;  %v7945_v52 = vmul.f32 %v7913_v56, %v16262_v34  ;;  %v19462_v56 = vld [vmem:[#allocation99_spill] sm:$0xff] }
0x1a1b   :  { %v7883_v3 = vmul.f32 %v7851_v39, %v16268_v49  ;;  %v7854_v14 = vsub.f32 %v19454_v37, %v7780_v4  ;;  %v7916_v38 = vsel %vm2793_vm0, %v19452_v11, %v7884_v51  ;;  %v19461_v11 = vld [vmem:[#allocation117_spill] sm:$0xff] }
0x1a1c   :  { %v7778_v42 = vpop.permute.xlu0 %7777  ;;  %13030 = vmatprep.mubr.msk.f32.mxu1 %vm1540_vm1, %v7945_v52  ;;  %v7948_v24 = vmul.f32 %v7916_v38, %v16271_v61  ;;  %v19464_v38 = vld [vmem:[#allocation101_spill] sm:$0xff] }
0x1a1d   :  { %v7915_v59 = vsel %vm2793_vm0, %v19453_v26, %v7883_v3  ;;  %v7886_v13 = vmul.f32 %v7854_v14, %v16340_v31  ;;  %v7853_v41 = vsub.f32 %v19455_v36, %v7778_v42  ;;  %13031 = vmatmul.mubr.msk.f32.gmra.mxu1 %vm1540_vm1, %v7946_v19  ;;  %v19463_v19 = vld [vmem:[#allocation100_spill] sm:$0xff] }
0x1a1e   :  { %v7784_v34 = vpop.permute.xlu1 %7783  ;;  %v7947_v20 = vmul.f32 %v7915_v59, %v16268_v49 }
0x1a1f   :  { %v7885_v57 = vmul.f32 %v7853_v41, %v16337_v48  ;;  %v7856_v35 = vsub.f32 %v19456_v55, %v7784_v34  ;;  %v7918_v27 = vsel %vm2793_vm0, %v19454_v37, %v7886_v13 }
0x1a20   :  { %v7782_v63 = vpop.permute.xlu0 %7781  ;;  %13033 = vmatprep.mubr.msk.f32.mxu1 %vm1540_vm1, %v7947_v20  ;;  %v7950_v18 = vmul.f32 %v7918_v27, %v16340_v31  ;;  %v8504_v27 = vld [vmem:[%s19444_s23 + $0x8] sm:$0xff] }
0x1a21   :  { %v7917_v7 = vsel %vm2793_vm0, %v19455_v36, %v7885_v57  ;;  %v7888_v47 = vmul.f32 %v7856_v35, %v16346_v9  ;;  %v7855_v25 = vsub.f32 %v19457_v17, %v7782_v63  ;;  %13034 = vmatmul.mubr.msk.f32.gmra.mxu1 %vm1540_vm1, %v7948_v24  ;;  %v8367_v57 = vpop.f32.mrf.mxu0  ;;  %v8505_v35 = vld [vmem:[%s19444_s23 + $0x10] sm:$0xff] }
0x1a22   :  { %v7788_v49 = vpop.permute.xlu1 %7787  ;;  %v7949_v61 = vmul.f32 %v7917_v7, %v16337_v48  ;;  %13075 = vmatprep.subr.mxu1 %v8505_v35 }
0x1a23   :  { %v7887_v32 = vmul.f32 %v7855_v25, %v16343_v22  ;;  %v7858_v10 = vsub.f32 %v19458_v60, %v7788_v49  ;;  %v7920_v45 = vsel %vm2793_vm0, %v19456_v55, %v7888_v47  ;;  %13076 = vmatpush3.msra.mxu1 %v8505_v35  ;;  %v8503_v47 = vld [vmem:[%s19444_s23] sm:$0xff]  ;;  %v19466_v25 = vld [vmem:[#allocation94_spill] sm:$0xff] }
0x1a24   :  { %v7786_v29 = vpop.permute.xlu0 %7785  ;;  %13036 = vmatprep.mubr.msk.f32.mxu1 %vm1540_vm1, %v7949_v61  ;;  %v7952_v15 = vmul.f32 %v7920_v45, %v16346_v9  ;;  %13077 = vmatprep.subr.mxu1 %v8504_v27  ;;  %v18052_v49 = vrot.slane %v8367_v57, %v19466_v25 }
0x1a25   :  { %v7919_v16 = vsel %vm2793_vm0, %v19457_v17, %v7887_v32  ;;  %v7890_v54 = vmul.f32 %v7858_v10, %v19354_v8  ;;  %v7857_v44 = vsub.f32 %v19459_v43, %v7786_v29  ;;  %13037 = vmatmul.mubr.msk.f32.gmra.mxu1 %vm1540_vm1, %v7950_v18  ;;  %v18049_v17 = vld [vmem:[#allocation19] ss:$0 sm:$0xff] }
0x1a26   :  { %v7792_v48 = vpop.permute.xlu1 %7791  ;;  %v7951_v31 = vmul.f32 %v7919_v16, %v16343_v22  ;;  %13078 = vmatpush3.msra.mxu1 %v8504_v27 }
0x1a27   :  { %v7889_v0 = vmul.f32 %v7857_v44, %v19353_v23  ;;  %v7860_v62 = vsub.f32 %v19460_v1, %v7792_v48  ;;  %v7922_v58 = vsel %vm2793_vm0, %v19458_v60, %v7890_v54  ;;  %13079 = vmatprep.subr.mxu1 %v8503_v47 }
0x1a28   :  { %v7790_v53 = vpop.permute.xlu0 %7789  ;;  %13039 = vmatprep.mubr.msk.f32.mxu1 %vm1540_vm1, %v7951_v31  ;;  %v7954_v21 = vmul.f32 %v7922_v58, %v19354_v8  ;;  %13080 = vmatpush3.msra.mxu1 %v8503_v47 }
0x1a29   :  { %v7921_v28 = vsel %vm2793_vm0, %v19459_v43, %v7889_v0  ;;  %v7892_v6 = vmul.f32 %v7860_v62, %v19358_v30  ;;  %v7859_v40 = vsub.f32 %v19461_v11, %v7790_v53  ;;  %13040 = vmatmul.mubr.msk.f32.gmra.mxu1 %vm1540_vm1, %v7952_v15 }
0x1a2a   :  { %v7796_v22 = vpop.permute.xlu1 %7795  ;;  %v7953_v9 = vmul.f32 %v7921_v28, %v19353_v23 }
0x1a2b   :  { %v7891_v2 = vmul.f32 %v7859_v40, %v19357_v5  ;;  %v7862_v51 = vsub.f32 %v19462_v56, %v7796_v22  ;;  %v7924_v26 = vsel %vm2793_vm0, %v19460_v1, %v7892_v6 }
0x1a2c   :  { %v7794_v39 = vpop.permute.xlu0 %7793  ;;  %13042 = vmatprep.mubr.msk.f32.mxu1 %vm1540_vm1, %v7953_v9  ;;  %v7956_v37 = vmul.f32 %v7924_v26, %v19358_v30 }
0x1a2d   :  { %v7923_v4 = vsel %vm2793_vm0, %v19461_v11, %v7891_v2  ;;  %v7894_v52 = vmul.f32 %v7862_v51, %v19363_v50  ;;  %v7861_v3 = vsub.f32 %v19463_v19, %v7794_v39  ;;  %13043 = vmatmul.mubr.msk.f32.gmra.mxu1 %vm1540_vm1, %v7954_v21 }
0x1a2e   :  { %v7800_v23 = vpop.permute.xlu1 %7799  ;;  %v7955_v8 = vmul.f32 %v7923_v4, %v19357_v5  ;;  %v19465_v5 = vld [vmem:[#allocation118_spill] sm:$0xff] }
0x1a2f   :  { %v7893_v14 = vmul.f32 %v7861_v3, %v19361_v46  ;;  %v7864_v42 = vsub.f32 %v19464_v38, %v7800_v23  ;;  %v7926_v59 = vsel %vm2793_vm0, %v19462_v56, %v7894_v52 }
0x1a30   :  { %13045 = vmatprep.mubr.msk.f32.mxu1 %vm1540_vm1, %v7955_v8  ;;  %v7798_v13 = vpop.permute.xlu0 %7797  ;;  %v7958_v20 = vmul.f32 %v7926_v59, %v19363_v50 }
0x1a31   :  { %v7925_v36 = vsel %vm2793_vm0, %v19463_v19, %v7893_v14  ;;  %v7896_v41 = vmul.f32 %v7864_v42, %v19368_v12  ;;  %v7863_v34 = vsub.f32 %v19465_v5, %v7798_v13  ;;  %13046 = vmatmul.mubr.msk.f32.gmra.mxu1 %vm1540_vm1, %v7956_v37 }
0x1a32   :  { %v7957_v30 = vmul.f32 %v7925_v36, %v19361_v46  ;;  %v13064_v46 = vpop.f32.mrf.mxu0 }
0x1a33   :  { %v7895_v24 = vmul.f32 %v7863_v34, %v19367_v33  ;;  %v7928_v55 = vsel %vm2793_vm0, %v19464_v38, %v7896_v41 }
0x1a34   :  { %13048 = vmatprep.mubr.msk.f32.mxu1 %vm1540_vm1, %v7957_v30  ;;  %v7960_v7 = vmul.f32 %v7928_v55, %v19368_v12 }
0x1a35   :  { %v7927_v63 = vsel %vm2793_vm0, %v19465_v5, %v7895_v24  ;;  %13049 = vmatmul.mubr.msk.f32.gmra.mxu1 %vm1540_vm1, %v7958_v20 }
0x1a36   :  { %v7959_v50 = vmul.f32 %v7927_v63, %v19367_v33 }
0x1a38   :  { %13051 = vmatprep.mubr.msk.f32.mxu1 %vm1540_vm1, %v7959_v50 }
0x1a39   :  { %13052 = vmatmul.mubr.msk.f32.gmra.mxu1 %vm1540_vm1, %v7960_v7 }
0x1aaa   :  { %v13008_v61 = vpop.f32.mrf.mxu1 }
0x1aab   :  { %v8144_v33 = vadd.f32 %v13008_v61, %v18049_v17 }
0x1aac   :  { %v8138_v18 = vpop.f32.mrf.mxu1 }
0x1aad   :  { %v8376_v12 = vadd.f32 %v18052_v49, %v8144_v33  ;;  %v8139_v32 = vadd.f32 %v18049_v17, %v8138_v18 }
0x1aaf   :  { %v8375_v60 = vadd.f32 %v18052_v49, %v8139_v32  ;;  %v8440_v10 = vmul.f32 0.1, %v8376_v12  ;;  %vm8408_vm9 = vcmp.ge.f32.partialorder %v8376_v12, 0.0 }
0x1ab1   :  { %v8439_v45 = vmul.f32 0.1, %v8375_v60  ;;  %vm8407_vm15 = vcmp.ge.f32.partialorder %v8375_v60, 0.0  ;;  %v8472_v43 = vsel %vm8408_vm9, %v8376_v12, %v8440_v10 }
0x1ab2   :  { %v13011_v29 = vpop.f32.mrf.mxu1 }
0x1ab3   :  { %v8154_v16 = vadd.f32 %v13011_v29, %v18049_v17  ;;  %v8471_v54 = vsel %vm8407_vm15, %v8375_v60, %v8439_v45 }
0x1ab4   :  { %v8148_v44 = vpop.f32.mrf.mxu1  ;;  %13081 = vmatprep.mubr.msk.f32.mxu1 %vm1540_vm1, %v8471_v54 }
0x1ab5   :  { %v8378_v48 = vadd.f32 %v18052_v49, %v8154_v16  ;;  %v8149_v31 = vadd.f32 %v18049_v17, %v8148_v44  ;;  %13082 = vmatmul.mubr.msk.f32.vlgmr.msra.gmra.mxu1 %vm1540_vm1, %v8472_v43 }
0x1ab7   :  { %v8377_v15 = vadd.f32 %v18052_v49, %v8149_v31  ;;  %v8442_v0 = vmul.f32 0.1, %v8378_v48  ;;  %vm8410_vm7 = vcmp.ge.f32.partialorder %v8378_v48, 0.0 }
0x1ab9   :  { %v8441_v1 = vmul.f32 0.1, %v8377_v15  ;;  %vm8409_vm6 = vcmp.ge.f32.partialorder %v8377_v15, 0.0  ;;  %v8474_v6 = vsel %vm8410_vm7, %v8378_v48, %v8442_v0 }
0x1abb   :  { %v13014_v62 = vpop.f32.mrf.mxu1  ;;  %v8473_v53 = vsel %vm8409_vm6, %v8377_v15, %v8441_v1 }
0x1abc   :  { %v8164_v58 = vadd.f32 %v13014_v62, %v18049_v17  ;;  %13084 = vmatprep.mubr.msk.f32.mxu1 %vm1540_vm1, %v8473_v53 }
0x1abd   :  { %v8158_v28 = vpop.f32.mrf.mxu1  ;;  %13085 = vmatmul.mubr.msk.f32.gmra.mxu1 %vm1540_vm1, %v8474_v6 }
0x1abe   :  { %v8380_v11 = vadd.f32 %v18052_v49, %v8164_v58  ;;  %v8159_v40 = vadd.f32 %v18049_v17, %v8158_v28 }
0x1ac0   :  { %v8379_v22 = vadd.f32 %v18052_v49, %v8159_v40  ;;  %v8444_v9 = vmul.f32 0.1, %v8380_v11  ;;  %vm8412_vm8 = vcmp.ge.f32.partialorder %v8380_v11, 0.0 }
0x1ac2   :  { %v8443_v21 = vmul.f32 0.1, %v8379_v22  ;;  %vm8411_vm12 = vcmp.ge.f32.partialorder %v8379_v22, 0.0  ;;  %v8476_v39 = vsel %vm8412_vm8, %v8380_v11, %v8444_v9 }
0x1ac4   :  { %v8475_v51 = vsel %vm8411_vm12, %v8379_v22, %v8443_v21 }
0x1ac5   :  { %v13017_v2 = vpop.f32.mrf.mxu1  ;;  %13087 = vmatprep.mubr.msk.f32.mxu1 %vm1540_vm1, %v8475_v51 }
0x1ac6   :  { %v8174_v56 = vadd.f32 %v13017_v2, %v18049_v17  ;;  %13088 = vmatmul.mubr.msk.f32.gmra.mxu1 %vm1540_vm1, %v8476_v39 }
0x1ac7   :  { %v8168_v26 = vpop.f32.mrf.mxu1 }
0x1ac8   :  { %v8382_v4 = vadd.f32 %v18052_v49, %v8174_v56  ;;  %v8169_v52 = vadd.f32 %v18049_v17, %v8168_v26 }
0x1ac9   :  { %v13020_v19 = vpop.f32.mrf.mxu1 }
0x1aca   :  { %v8381_v3 = vadd.f32 %v18052_v49, %v8169_v52  ;;  %v8184_v23 = vadd.f32 %v13020_v19, %v18049_v17  ;;  %vm8414_vm13 = vcmp.ge.f32.partialorder %v8382_v4, 0.0  ;;  %v8446_v8 = vmul.f32 0.1, %v8382_v4 }
0x1acb   :  { %v8178_v37 = vpop.f32.mrf.mxu1 }
0x1acc   :  { %v8445_v14 = vmul.f32 0.1, %v8381_v3  ;;  %v8384_v38 = vadd.f32 %v18052_v49, %v8184_v23  ;;  %v8179_v42 = vadd.f32 %v18049_v17, %v8178_v37  ;;  %vm8413_vm14 = vcmp.ge.f32.partialorder %v8381_v3, 0.0 }
0x1acd   :  { %v8478_v41 = vsel %vm8414_vm13, %v8382_v4, %v8446_v8 }
0x1ace   :  { %v8383_v59 = vadd.f32 %v18052_v49, %v8179_v42  ;;  %v8477_v13 = vsel %vm8413_vm14, %v8381_v3, %v8445_v14  ;;  %v8448_v36 = vmul.f32 0.1, %v8384_v38  ;;  %vm8416_vm2 = vcmp.ge.f32.partialorder %v8384_v38, 0.0 }
0x1acf   :  { %13090 = vmatprep.mubr.msk.f32.mxu1 %vm1540_vm1, %v8477_v13 }
0x1ad0   :  { %v8447_v5 = vmul.f32 0.1, %v8383_v59  ;;  %13091 = vmatmul.mubr.msk.f32.gmra.mxu1 %vm1540_vm1, %v8478_v41  ;;  %vm8415_vm3 = vcmp.ge.f32.partialorder %v8383_v59, 0.0  ;;  %v8480_v57 = vsel %vm8416_vm2, %v8384_v38, %v8448_v36 }
0x1ad1   :  { %v13023_v34 = vpop.f32.mrf.mxu1 }
0x1ad2   :  { %v8194_v30 = vadd.f32 %v13023_v34, %v18049_v17  ;;  %v8479_v20 = vsel %vm8415_vm3, %v8383_v59, %v8447_v5 }
0x1ad3   :  { %v8188_v24 = vpop.f32.mrf.mxu1  ;;  %13093 = vmatprep.mubr.msk.f32.mxu1 %vm1540_vm1, %v8479_v20 }
0x1ad4   :  { %v8386_v55 = vadd.f32 %v18052_v49, %v8194_v30  ;;  %v8189_v35 = vadd.f32 %v18049_v17, %v8188_v24  ;;  %13094 = vmatmul.mubr.msk.f32.gmra.mxu1 %vm1540_vm1, %v8480_v57 }
0x1ad5   :  { %v13026_v27 = vpop.f32.mrf.mxu1 }
0x1ad6   :  { %v8385_v63 = vadd.f32 %v18052_v49, %v8189_v35  ;;  %v8204_v46 = vadd.f32 %v13026_v27, %v18049_v17  ;;  %vm8418_vm10 = vcmp.ge.f32.partialorder %v8386_v55, 0.0  ;;  %v8450_v50 = vmul.f32 0.1, %v8386_v55 }
0x1ad7   :  { %v8198_v7 = vpop.f32.mrf.mxu1 }
0x1ad8   :  { %v8449_v47 = vmul.f32 0.1, %v8385_v63  ;;  %v8388_v61 = vadd.f32 %v18052_v49, %v8204_v46  ;;  %v8199_v33 = vadd.f32 %v18049_v17, %v8198_v7  ;;  %vm8417_vm11 = vcmp.ge.f32.partialorder %v8385_v63, 0.0 }
0x1ad9   :  { %v13029_v18 = vpop.f32.mrf.mxu1  ;;  %v8482_v29 = vsel %vm8418_vm10, %v8386_v55, %v8450_v50 }
0x1ada   :  { %v8387_v12 = vadd.f32 %v18052_v49, %v8199_v33  ;;  %v8214_v32 = vadd.f32 %v13029_v18, %v18049_v17  ;;  %vm8420_vm4 = vcmp.ge.f32.partialorder %v8388_v61, 0.0  ;;  %v8452_v60 = vmul.f32 0.1, %v8388_v61 }
0x1adb   :  { %v8208_v10 = vpop.f32.mrf.mxu1  ;;  %v8481_v45 = vsel %vm8417_vm11, %v8385_v63, %v8449_v47 }
0x1adc   :  { %v8451_v16 = vmul.f32 0.1, %v8387_v12  ;;  %v8390_v54 = vadd.f32 %v18052_v49, %v8214_v32  ;;  %v8209_v43 = vadd.f32 %v18049_v17, %v8208_v10  ;;  %13096 = vmatprep.mubr.msk.f32.mxu1 %vm1540_vm1, %v8481_v45  ;;  %vm8419_vm5 = vcmp.ge.f32.partialorder %v8387_v12, 0.0 }
0x1add   :  { %13097 = vmatmul.mubr.msk.f32.gmra.mxu1 %vm1540_vm1, %v8482_v29  ;;  %v13032_v44 = vpop.f32.mrf.mxu1  ;;  %v8484_v62 = vsel %vm8420_vm4, %v8388_v61, %v8452_v60 }
0x1ade   :  { %v8389_v48 = vadd.f32 %v18052_v49, %v8209_v43  ;;  %v8224_v31 = vadd.f32 %v13032_v44, %v18049_v17  ;;  %vm8422_vm9 = vcmp.ge.f32.partialorder %v8390_v54, 0.0  ;;  %v8454_v15 = vmul.f32 0.1, %v8390_v54 }
0x1adf   :  { %v8218_v0 = vpop.f32.mrf.mxu1  ;;  %v8483_v1 = vsel %vm8419_vm5, %v8387_v12, %v8451_v16 }
0x1ae0   :  { %v8453_v58 = vmul.f32 0.1, %v8389_v48  ;;  %v8392_v53 = vadd.f32 %v18052_v49, %v8224_v31  ;;  %v8219_v28 = vadd.f32 %v18049_v17, %v8218_v0  ;;  %13099 = vmatprep.mubr.msk.f32.mxu1 %vm1540_vm1, %v8483_v1  ;;  %vm8421_vm15 = vcmp.ge.f32.partialorder %v8389_v48, 0.0 }
0x1ae1   :  { %13100 = vmatmul.mubr.msk.f32.gmra.mxu1 %vm1540_vm1, %v8484_v62  ;;  %v13035_v6 = vpop.f32.mrf.mxu1  ;;  %v8486_v2 = vsel %vm8422_vm9, %v8390_v54, %v8454_v15 }
0x1ae2   :  { %v8391_v11 = vadd.f32 %v18052_v49, %v8219_v28  ;;  %v8234_v40 = vadd.f32 %v13035_v6, %v18049_v17  ;;  %vm8424_vm7 = vcmp.ge.f32.partialorder %v8392_v53, 0.0  ;;  %v8456_v22 = vmul.f32 0.1, %v8392_v53 }
0x1ae3   :  { %v8228_v9 = vpop.f32.mrf.mxu1  ;;  %v8485_v21 = vsel %vm8421_vm15, %v8389_v48, %v8453_v58 }
0x1ae4   :  { %v8455_v56 = vmul.f32 0.1, %v8391_v11  ;;  %v8394_v51 = vadd.f32 %v18052_v49, %v8234_v40  ;;  %v8229_v26 = vadd.f32 %v18049_v17, %v8228_v9  ;;  %13102 = vmatprep.mubr.msk.f32.mxu1 %vm1540_vm1, %v8485_v21  ;;  %vm8423_vm6 = vcmp.ge.f32.partialorder %v8391_v11, 0.0 }
0x1ae5   :  { %13103 = vmatmul.mubr.msk.f32.gmra.mxu1 %vm1540_vm1, %v8486_v2  ;;  %v13038_v39 = vpop.f32.mrf.mxu1  ;;  %v8488_v8 = vsel %vm8424_vm7, %v8392_v53, %v8456_v22  ;;  %v8938_v2 = vld [vmem:[%s19467_s22 + $0x18] sm:$0xff] }
0x1ae6   :  { %v8393_v4 = vadd.f32 %v18052_v49, %v8229_v26  ;;  %v8244_v52 = vadd.f32 %v13038_v39, %v18049_v17  ;;  %vm8426_vm8 = vcmp.ge.f32.partialorder %v8394_v51, 0.0  ;;  %v8458_v19 = vmul.f32 0.1, %v8394_v51  ;;  %13129 = vmatprep.subr.mxu0 %v8938_v2 }
0x1ae7   :  { %v8238_v3 = vpop.f32.mrf.mxu1  ;;  %v8487_v23 = vsel %vm8423_vm6, %v8391_v11, %v8455_v56  ;;  %v8937_v56 = vld [vmem:[%s19467_s22 + $0x10] sm:$0xff]  ;;  %13130 = vmatpush3.msra.mxu0 %v8938_v2 }
0x1ae8   :  { %v8457_v37 = vmul.f32 0.1, %v8393_v4  ;;  %v8396_v14 = vadd.f32 %v18052_v49, %v8244_v52  ;;  %v8239_v38 = vadd.f32 %v18049_v17, %v8238_v3  ;;  %13105 = vmatprep.mubr.msk.f32.mxu1 %vm1540_vm1, %v8487_v23  ;;  %vm8425_vm12 = vcmp.ge.f32.partialorder %v8393_v4, 0.0  ;;  %13131 = vmatprep.subr.mxu0 %v8937_v56  ;;  %v8935_v3 = vld [vmem:[%s19467_s22] sm:$0xff] }
0x1ae9   :  { %13106 = vmatmul.mubr.msk.f32.gmra.mxu1 %vm1540_vm1, %v8488_v8  ;;  %v13041_v42 = vpop.f32.mrf.mxu1  ;;  %v8490_v34 = vsel %vm8426_vm8, %v8394_v51, %v8458_v19  ;;  %13132 = vmatpush3.msra.mxu0 %v8937_v56 }
0x1aea   :  { %v8395_v59 = vadd.f32 %v18052_v49, %v8239_v38  ;;  %v8254_v13 = vadd.f32 %v13041_v42, %v18049_v17  ;;  %vm8428_vm13 = vcmp.ge.f32.partialorder %v8396_v14, 0.0  ;;  %v8460_v36 = vmul.f32 0.1, %v8396_v14  ;;  %v18163_v38 = vld [vmem:[#allocation20] ss:$0 sm:$0xff] }
0x1aeb   :  { %v8248_v41 = vpop.f32.mrf.mxu1  ;;  %v8489_v5 = vsel %vm8425_vm12, %v8393_v4, %v8457_v37  ;;  %v8936_v4 = vld [vmem:[%s19467_s22 + $0x8] sm:$0xff] }
0x1aec   :  { %v8459_v30 = vmul.f32 0.1, %v8395_v59  ;;  %v8398_v20 = vadd.f32 %v18052_v49, %v8254_v13  ;;  %v8249_v24 = vadd.f32 %v18049_v17, %v8248_v41  ;;  %13108 = vmatprep.mubr.msk.f32.mxu1 %vm1540_vm1, %v8489_v5  ;;  %vm8427_vm14 = vcmp.ge.f32.partialorder %v8395_v59, 0.0  ;;  %13133 = vmatprep.subr.mxu0 %v8936_v4 }
0x1aed   :  { %13109 = vmatmul.mubr.msk.f32.gmra.mxu1 %vm1540_vm1, %v8490_v34  ;;  %v13044_v57 = vpop.f32.mrf.mxu1  ;;  %v8492_v50 = vsel %vm8428_vm13, %v8396_v14, %v8460_v36  ;;  %13134 = vmatpush3.msra.mxu0 %v8936_v4  ;;  %v9430_v14 = vld [vmem:[%s19468_s20 + $0x18] sm:$0xff] }
0x1aee   :  { %v8397_v55 = vadd.f32 %v18052_v49, %v8249_v24  ;;  %v8264_v35 = vadd.f32 %v13044_v57, %v18049_v17  ;;  %vm8430_vm2 = vcmp.ge.f32.partialorder %v8398_v20, 0.0  ;;  %v8462_v27 = vmul.f32 0.1, %v8398_v20  ;;  %13135 = vmatprep.subr.mxu0 %v8935_v3  ;;  %v9429_v24 = vld [vmem:[%s19468_s20 + $0x10] sm:$0xff] }
0x1aef   :  { %v8258_v63 = vpop.f32.mrf.mxu1  ;;  %v8491_v46 = vsel %vm8427_vm14, %v8395_v59, %v8459_v30  ;;  %13136 = vmatpush3.msra.mxu0 %v8935_v3 }
0x1af0   :  { %v8461_v7 = vmul.f32 0.1, %v8397_v55  ;;  %v8400_v47 = vadd.f32 %v18052_v49, %v8264_v35  ;;  %v8259_v61 = vadd.f32 %v18049_v17, %v8258_v63  ;;  %13111 = vmatprep.mubr.msk.f32.mxu1 %vm1540_vm1, %v8491_v46  ;;  %vm8429_vm3 = vcmp.ge.f32.partialorder %v8397_v55, 0.0  ;;  %13185 = vmatprep.subr.mxu0 %v9430_v14  ;;  %v9428_v35 = vld [vmem:[%s19468_s20 + $0x8] sm:$0xff] }
0x1af1   :  { %13112 = vmatmul.mubr.msk.f32.gmra.mxu1 %vm1540_vm1, %v8492_v50  ;;  %v13047_v33 = vpop.f32.mrf.mxu1  ;;  %v8494_v45 = vsel %vm8430_vm2, %v8398_v20, %v8462_v27 }
0x1af2   :  { %v8399_v18 = vadd.f32 %v18052_v49, %v8259_v61  ;;  %v8274_v12 = vadd.f32 %v13047_v33, %v18049_v17  ;;  %vm8432_vm10 = vcmp.ge.f32.partialorder %v8400_v47, 0.0  ;;  %v8464_v32 = vmul.f32 0.1, %v8400_v47 }
0x1af3   :  { %v8268_v60 = vpop.f32.mrf.mxu1  ;;  %v8493_v10 = vsel %vm8429_vm3, %v8397_v55, %v8461_v7 }
0x1af4   :  { %v8463_v29 = vmul.f32 0.1, %v8399_v18  ;;  %v8402_v16 = vadd.f32 %v18052_v49, %v8274_v12  ;;  %v8269_v54 = vadd.f32 %v18049_v17, %v8268_v60  ;;  %13114 = vmatprep.mubr.msk.f32.mxu1 %vm1540_vm1, %v8493_v10  ;;  %vm8431_vm11 = vcmp.ge.f32.partialorder %v8399_v18, 0.0 }
0x1af5   :  { %13115 = vmatmul.mubr.msk.f32.gmra.mxu1 %vm1540_vm1, %v8494_v45  ;;  %v13050_v43 = vpop.f32.mrf.mxu1  ;;  %v8496_v1 = vsel %vm8432_vm10, %v8400_v47, %v8464_v32 }
0x1af6   :  { %v8401_v44 = vadd.f32 %v18052_v49, %v8269_v54  ;;  %v8284_v48 = vadd.f32 %v13050_v43, %v18049_v17  ;;  %vm8434_vm4 = vcmp.ge.f32.partialorder %v8402_v16, 0.0  ;;  %v8466_v31 = vmul.f32 0.1, %v8402_v16 }
0x1af7   :  { %v8278_v15 = vpop.f32.mrf.mxu1  ;;  %v8495_v0 = vsel %vm8431_vm11, %v8399_v18, %v8463_v29 }
0x1af8   :  { %v8465_v62 = vmul.f32 0.1, %v8401_v44  ;;  %v8404_v58 = vadd.f32 %v18052_v49, %v8284_v48  ;;  %v8279_v53 = vadd.f32 %v18049_v17, %v8278_v15  ;;  %13117 = vmatprep.mubr.msk.f32.mxu1 %vm1540_vm1, %v8495_v0  ;;  %vm8433_vm5 = vcmp.ge.f32.partialorder %v8401_v44, 0.0 }
0x1af9   :  { %13118 = vmatmul.mubr.msk.f32.gmra.mxu1 %vm1540_vm1, %v8496_v1  ;;  %v13053_v28 = vpop.f32.mrf.mxu1  ;;  %v8498_v21 = vsel %vm8434_vm4, %v8402_v16, %v8466_v31 }
0x1afa   :  { %v8403_v6 = vadd.f32 %v18052_v49, %v8279_v53  ;;  %v8294_v11 = vadd.f32 %v13053_v28, %v18049_v17  ;;  %v8468_v40 = vmul.f32 0.1, %v8404_v58  ;;  %v8497_v9 = vsel %vm8433_vm5, %v8401_v44, %v8465_v62 }
0x1afb   :  { %v8288_v22 = vpop.f32.mrf.mxu1  ;;  %13120 = vmatprep.mubr.msk.f32.mxu1 %vm1540_vm1, %v8497_v9  ;;  %vm8436_vm15 = vcmp.ge.f32.partialorder %v8404_v58, 0.0 }
0x1afc   :  { %v8467_v51 = vmul.f32 0.1, %v8403_v6  ;;  %v8406_v26 = vadd.f32 %v18052_v49, %v8294_v11  ;;  %v8289_v39 = vadd.f32 %v18049_v17, %v8288_v22  ;;  %vm8435_vm9 = vcmp.ge.f32.partialorder %v8403_v6, 0.0 }
0x1afd   :  { %13121 = vmatmul.mubr.msk.f32.gmra.mxu1 %vm1540_vm1, %v8498_v21  ;;  %v8500_v8 = vsel %vm8436_vm15, %v8404_v58, %v8468_v40 }
0x1afe   :  { %v8405_v52 = vadd.f32 %v18052_v49, %v8289_v39  ;;  %v8499_v19 = vsel %vm8435_vm9, %v8403_v6, %v8467_v51  ;;  %v8470_v23 = vmul.f32 0.1, %v8406_v26  ;;  %vm8438_vm6 = vcmp.ge.f32.partialorder %v8406_v26, 0.0 }
0x1aff   :  { %13123 = vmatprep.mubr.msk.f32.mxu1 %vm1540_vm1, %v8499_v19 }
0x1b00   :  { %v8469_v17 = vmul.f32 0.1, %v8405_v52  ;;  %vm8437_vm7 = vcmp.ge.f32.partialorder %v8405_v52, 0.0  ;;  %v8502_v49 = vsel %vm8438_vm6, %v8406_v26, %v8470_v23 }
0x1b01   :  { %13124 = vmatmul.mubr.msk.f32.gmra.mxu1 %vm1540_vm1, %v8500_v8 }
0x1b02   :  { %v8501_v37 = vsel %vm8437_vm7, %v8405_v52, %v8469_v17 }
0x1b03   :  { %13126 = vmatprep.mubr.msk.f32.mxu1 %vm1540_vm1, %v8501_v37 }
0x1b05   :  { %13127 = vmatmul.mubr.msk.f32.gmra.mxu1 %vm1540_vm1, %v8502_v49 }
0x1b75   :  { %v13083_v42 = vpop.f32.mrf.mxu1 }
0x1b76   :  { %v18166_v59 = vadd.f32 %v13083_v42, %v18163_v38 }
0x1b77   :  { %v8680_v13 = vpop.f32.mrf.mxu1 }
0x1b78   :  { %v18169_v36 = vadd.f32 %v18163_v38, %v8680_v13  ;;  %v8872_v41 = vmul.f32 0.1, %v18166_v59  ;;  %vm8840_vm8 = vcmp.ge.f32.partialorder %v18166_v59, 0.0 }
0x1b7a   :  { %vm8839_vm1 = vcmp.ge.f32.partialorder %v18169_v36, 0.0  ;;  %v8871_v5 = vmul.f32 0.1, %v18169_v36  ;;  %v8904_v20 = vsel %vm8840_vm8, %v18166_v59, %v8872_v41 }
0x1b7c   :  { %v8903_v34 = vsel %vm8839_vm1, %v18169_v36, %v8871_v5 }
0x1b7d   :  { %v13086_v30 = vpop.f32.mrf.mxu1  ;;  %13137 = vmatprep.mubr.msk.f32.mxu0 %vm2793_vm0, %v8903_v34 }
0x1b7e   :  { %v18180_v57 = vadd.f32 %v13086_v30, %v18163_v38  ;;  %13138 = vmatmul.mubr.msk.f32.vlgmr.msra.gmra.mxu0 %vm2793_vm0, %v8904_v20 }
0x1b7f   :  { %v8690_v55 = vpop.f32.mrf.mxu1  ;;  %13186 = vmatpush3.msra.mxu0 %v9430_v14 }
0x1b80   :  { %v18185_v27 = vadd.f32 %v18163_v38, %v8690_v55  ;;  %13187 = vmatprep.subr.mxu0 %v9429_v24  ;;  %v8874_v63 = vmul.f32 0.1, %v18180_v57  ;;  %vm8842_vm13 = vcmp.ge.f32.partialorder %v18180_v57, 0.0 }
0x1b81   :  { %13188 = vmatpush3.msra.mxu0 %v9429_v24 }
0x1b82   :  { %vm8841_vm12 = vcmp.ge.f32.partialorder %v18185_v27, 0.0  ;;  %v8873_v46 = vmul.f32 0.1, %v18185_v27  ;;  %13189 = vmatprep.subr.mxu0 %v9428_v35  ;;  %v8906_v47 = vsel %vm8842_vm13, %v18180_v57, %v8874_v63 }
0x1b83   :  { %13190 = vmatpush3.msra.mxu0 %v9428_v35 }
0x1b84   :  { %v8905_v50 = vsel %vm8841_vm12, %v18185_v27, %v8873_v46 }
0x1b85   :  { %13140 = vmatprep.mubr.msk.f32.mxu0 %vm2793_vm0, %v8905_v50 }
0x1b86   :  { %v13089_v7 = vpop.f32.mrf.mxu1  ;;  %13141 = vmatmul.mubr.msk.f32.gmra.mxu0 %vm2793_vm0, %v8906_v47 }
0x1b87   :  { %v18195_v61 = vadd.f32 %v13089_v7, %v18163_v38 }
0x1b88   :  { %v8700_v33 = vpop.f32.mrf.mxu1 }
0x1b89   :  { %v18199_v18 = vadd.f32 %v18163_v38, %v8700_v33  ;;  %v8876_v12 = vmul.f32 0.1, %v18195_v61  ;;  %vm8844_vm2 = vcmp.ge.f32.partialorder %v18195_v61, 0.0 }
0x1b8b   :  { %vm8843_vm14 = vcmp.ge.f32.partialorder %v18199_v18, 0.0  ;;  %v8875_v32 = vmul.f32 0.1, %v18199_v18  ;;  %v8908_v45 = vsel %vm8844_vm2, %v18195_v61, %v8876_v12 }
0x1b8d   :  { %v8907_v60 = vsel %vm8843_vm14, %v18199_v18, %v8875_v32 }
0x1b8e   :  { %13143 = vmatprep.mubr.msk.f32.mxu0 %vm2793_vm0, %v8907_v60 }
0x1b8f   :  { %13144 = vmatmul.mubr.msk.f32.gmra.mxu0 %vm2793_vm0, %v8908_v45 }
0x1b90   :  { %v13092_v10 = vpop.f32.mrf.mxu1 }
0x1b91   :  { %v18209_v29 = vadd.f32 %v13092_v10, %v18163_v38 }
0x1b92   :  { %v8710_v16 = vpop.f32.mrf.mxu1 }
0x1b93   :  { %v18213_v54 = vadd.f32 %v18163_v38, %v8710_v16  ;;  %v8878_v43 = vmul.f32 0.1, %v18209_v29  ;;  %vm8846_vm10 = vcmp.ge.f32.partialorder %v18209_v29, 0.0 }
0x1b94   :  { %v13095_v44 = vpop.f32.mrf.mxu1 }
0x1b95   :  { %v18217_v48 = vadd.f32 %v13095_v44, %v18163_v38  ;;  %vm8845_vm3 = vcmp.ge.f32.partialorder %v18213_v54, 0.0  ;;  %v8877_v31 = vmul.f32 0.1, %v18213_v54  ;;  %v8910_v58 = vsel %vm8846_vm10, %v18209_v29, %v8878_v43 }
0x1b96   :  { %v8720_v15 = vpop.f32.mrf.mxu1 }
0x1b97   :  { %v18223_v0 = vadd.f32 %v18163_v38, %v8720_v15  ;;  %v8909_v1 = vsel %vm8845_vm3, %v18213_v54, %v8877_v31  ;;  %v8880_v62 = vmul.f32 0.1, %v18217_v48  ;;  %vm8848_vm4 = vcmp.ge.f32.partialorder %v18217_v48, 0.0 }
0x1b98   :  { %13146 = vmatprep.mubr.msk.f32.mxu0 %vm2793_vm0, %v8909_v1 }
0x1b99   :  { %13147 = vmatmul.mubr.msk.f32.gmra.mxu0 %vm2793_vm0, %v8910_v58  ;;  %vm8847_vm11 = vcmp.ge.f32.partialorder %v18223_v0, 0.0  ;;  %v8879_v53 = vmul.f32 0.1, %v18223_v0  ;;  %v8912_v6 = vsel %vm8848_vm4, %v18217_v48, %v8880_v62 }
0x1b9b   :  { %v8911_v28 = vsel %vm8847_vm11, %v18223_v0, %v8879_v53 }
0x1b9c   :  { %13149 = vmatprep.mubr.msk.f32.mxu0 %vm2793_vm0, %v8911_v28 }
0x1b9d   :  { %v13098_v11 = vpop.f32.mrf.mxu1  ;;  %13150 = vmatmul.mubr.msk.f32.gmra.mxu0 %vm2793_vm0, %v8912_v6 }
0x1b9e   :  { %v18238_v40 = vadd.f32 %v13098_v11, %v18163_v38 }
0x1b9f   :  { %v8730_v22 = vpop.f32.mrf.mxu1 }
0x1ba0   :  { %v18241_v9 = vadd.f32 %v18163_v38, %v8730_v22  ;;  %v8882_v21 = vmul.f32 0.1, %v18238_v40  ;;  %vm8850_vm9 = vcmp.ge.f32.partialorder %v18238_v40, 0.0 }
0x1ba1   :  { %v13101_v2 = vpop.f32.mrf.mxu1 }
0x1ba2   :  { %v18245_v56 = vadd.f32 %v13101_v2, %v18163_v38  ;;  %vm8849_vm5 = vcmp.ge.f32.partialorder %v18241_v9, 0.0  ;;  %v8881_v51 = vmul.f32 0.1, %v18241_v9  ;;  %v8914_v3 = vsel %vm8850_vm9, %v18238_v40, %v8882_v21 }
0x1ba3   :  { %v8740_v26 = vpop.f32.mrf.mxu1 }
0x1ba4   :  { %v18251_v39 = vadd.f32 %v18163_v38, %v8740_v26  ;;  %v8913_v4 = vsel %vm8849_vm5, %v18241_v9, %v8881_v51  ;;  %v8884_v52 = vmul.f32 0.1, %v18245_v56  ;;  %vm8852_vm7 = vcmp.ge.f32.partialorder %v18245_v56, 0.0 }
0x1ba5   :  { %v13104_v19 = vpop.f32.mrf.mxu1  ;;  %13152 = vmatprep.mubr.msk.f32.mxu0 %vm2793_vm0, %v8913_v4 }
0x1ba6   :  { %v18258_v23 = vadd.f32 %v13104_v19, %v18163_v38  ;;  %13153 = vmatmul.mubr.msk.f32.gmra.mxu0 %vm2793_vm0, %v8914_v3  ;;  %vm8851_vm15 = vcmp.ge.f32.partialorder %v18251_v39, 0.0  ;;  %v8883_v17 = vmul.f32 0.1, %v18251_v39  ;;  %v8916_v13 = vsel %vm8852_vm7, %v18245_v56, %v8884_v52 }
0x1ba7   :  { %v8750_v8 = vpop.f32.mrf.mxu1 }
0x1ba8   :  { %v18265_v37 = vadd.f32 %v18163_v38, %v8750_v8  ;;  %v8915_v49 = vsel %vm8851_vm15, %v18251_v39, %v8883_v17  ;;  %v8886_v14 = vmul.f32 0.1, %v18258_v23  ;;  %vm8854_vm8 = vcmp.ge.f32.partialorder %v18258_v23, 0.0 }
0x1ba9   :  { %v13107_v42 = vpop.f32.mrf.mxu1  ;;  %13155 = vmatprep.mubr.msk.f32.mxu0 %vm2793_vm0, %v8915_v49 }
0x1baa   :  { %v18272_v41 = vadd.f32 %v13107_v42, %v18163_v38  ;;  %13156 = vmatmul.mubr.msk.f32.gmra.mxu0 %vm2793_vm0, %v8916_v13  ;;  %vm8853_vm6 = vcmp.ge.f32.partialorder %v18265_v37, 0.0  ;;  %v8885_v5 = vmul.f32 0.1, %v18265_v37  ;;  %v8918_v35 = vsel %vm8854_vm8, %v18258_v23, %v8886_v14 }
0x1bab   :  { %v8760_v34 = vpop.f32.mrf.mxu1 }
0x1bac   :  { %v18279_v30 = vadd.f32 %v18163_v38, %v8760_v34  ;;  %v8917_v20 = vsel %vm8853_vm6, %v18265_v37, %v8885_v5  ;;  %v8888_v24 = vmul.f32 0.1, %v18272_v41  ;;  %vm8856_vm12 = vcmp.ge.f32.partialorder %v18272_v41, 0.0 }
0x1bad   :  { %v13110_v55 = vpop.f32.mrf.mxu1  ;;  %13158 = vmatprep.mubr.msk.f32.mxu0 %vm2793_vm0, %v8917_v20 }
0x1bae   :  { %v18286_v63 = vadd.f32 %v13110_v55, %v18163_v38  ;;  %13159 = vmatmul.mubr.msk.f32.gmra.mxu0 %vm2793_vm0, %v8918_v35  ;;  %vm8855_vm1 = vcmp.ge.f32.partialorder %v18279_v30, 0.0  ;;  %v8887_v46 = vmul.f32 0.1, %v18279_v30  ;;  %v8920_v32 = vsel %vm8856_vm12, %v18272_v41, %v8888_v24 }
0x1baf   :  { %v8770_v50 = vpop.f32.mrf.mxu1 }
0x1bb0   :  { %v18293_v7 = vadd.f32 %v18163_v38, %v8770_v50  ;;  %v8919_v47 = vsel %vm8855_vm1, %v18279_v30, %v8887_v46  ;;  %v8890_v33 = vmul.f32 0.1, %v18286_v63  ;;  %vm8858_vm14 = vcmp.ge.f32.partialorder %v18286_v63, 0.0 }
0x1bb1   :  { %v13113_v12 = vpop.f32.mrf.mxu1  ;;  %13161 = vmatprep.mubr.msk.f32.mxu0 %vm2793_vm0, %v8919_v47 }
0x1bb2   :  { %v18300_v60 = vadd.f32 %v13113_v12, %v18163_v38  ;;  %13162 = vmatmul.mubr.msk.f32.gmra.mxu0 %vm2793_vm0, %v8920_v32  ;;  %vm8857_vm13 = vcmp.ge.f32.partialorder %v18293_v7, 0.0  ;;  %v8889_v10 = vmul.f32 0.1, %v18293_v7  ;;  %v8922_v15 = vsel %vm8858_vm14, %v18286_v63, %v8890_v33 }
0x1bb3   :  { %v8780_v45 = vpop.f32.mrf.mxu1 }
0x1bb4   :  { %v18307_v16 = vadd.f32 %v18163_v38, %v8780_v45  ;;  %v8921_v43 = vsel %vm8857_vm13, %v18293_v7, %v8889_v10  ;;  %v8892_v44 = vmul.f32 0.1, %v18300_v60  ;;  %vm8860_vm3 = vcmp.ge.f32.partialorder %v18300_v60, 0.0 }
0x1bb5   :  { %v13116_v31 = vpop.f32.mrf.mxu1  ;;  %13164 = vmatprep.mubr.msk.f32.mxu0 %vm2793_vm0, %v8921_v43 }
0x1bb6   :  { %v18314_v1 = vadd.f32 %v13116_v31, %v18163_v38  ;;  %13165 = vmatmul.mubr.msk.f32.gmra.mxu0 %vm2793_vm0, %v8922_v15  ;;  %vm8859_vm2 = vcmp.ge.f32.partialorder %v18307_v16, 0.0  ;;  %v8891_v62 = vmul.f32 0.1, %v18307_v16  ;;  %v8924_v22 = vsel %vm8860_vm3, %v18300_v60, %v8892_v44 }
0x1bb7   :  { %v8790_v58 = vpop.f32.mrf.mxu1 }
0x1bb8   :  { %v18321_v53 = vadd.f32 %v18163_v38, %v8790_v58  ;;  %v8923_v28 = vsel %vm8859_vm2, %v18307_v16, %v8891_v62  ;;  %v8894_v6 = vmul.f32 0.1, %v18314_v1  ;;  %vm8862_vm11 = vcmp.ge.f32.partialorder %v18314_v1, 0.0  ;;  %v9427_v58 = vld [vmem:[%s19468_s20] sm:$0xff] }
0x1bb9   :  { %v13119_v11 = vpop.f32.mrf.mxu1  ;;  %13167 = vmatprep.mubr.msk.f32.mxu0 %vm2793_vm0, %v8923_v28  ;;  %13191 = vmatprep.subr.mxu0 %v9427_v58  ;;  %v9856_v28 = vld [vmem:[%s19469_s26 + $0x8] sm:$0xff] }
0x1bba   :  { %v18328_v21 = vadd.f32 %v13119_v11, %v18163_v38  ;;  %13168 = vmatmul.mubr.msk.f32.gmra.mxu0 %vm2793_vm0, %v8924_v22  ;;  %vm8861_vm10 = vcmp.ge.f32.partialorder %v18321_v53, 0.0  ;;  %v8893_v2 = vmul.f32 0.1, %v18321_v53  ;;  %v8926_v3 = vsel %vm8862_vm11, %v18314_v1, %v8894_v6  ;;  %v9855_v6 = vld [vmem:[%s19469_s26] sm:$0xff]  ;;  %13241 = vmatprep.subr.mxu1 %v9856_v28  ;;  %v18394_v22 = vld [vmem:[#allocation22] ss:$0 sm:$0xff] }
0x1bbb   :  { %v8800_v51 = vpop.f32.mrf.mxu1  ;;  %13192 = vmatpush3.msra.mxu0 %v9427_v58  ;;  %13242 = vmatpush3.msra.mxu1 %v9856_v28 }
0x1bbc   :  { %v18335_v26 = vadd.f32 %v18163_v38, %v8800_v51  ;;  %v8925_v4 = vsel %vm8861_vm10, %v18321_v53, %v8893_v2  ;;  %v8896_v52 = vmul.f32 0.1, %v18328_v21  ;;  %vm8864_vm5 = vcmp.ge.f32.partialorder %v18328_v21, 0.0  ;;  %13243 = vmatprep.subr.mxu1 %v9855_v6 }
0x1bbd   :  { %v13122_v19 = vpop.f32.mrf.mxu1  ;;  %13170 = vmatprep.mubr.msk.f32.mxu0 %vm2793_vm0, %v8925_v4  ;;  %13244 = vmatpush3.msra.mxu1 %v9855_v6 }
0x1bbe   :  { %v18342_v17 = vadd.f32 %v13122_v19, %v18163_v38  ;;  %13171 = vmatmul.mubr.msk.f32.gmra.mxu0 %vm2793_vm0, %v8926_v3  ;;  %vm8863_vm4 = vcmp.ge.f32.partialorder %v18335_v26, 0.0  ;;  %v8895_v8 = vmul.f32 0.1, %v18335_v26  ;;  %v8928_v34 = vsel %vm8864_vm5, %v18328_v21, %v8896_v52 }
0x1bbf   :  { %v8810_v49 = vpop.f32.mrf.mxu1 }
0x1bc0   :  { %v18349_v14 = vadd.f32 %v18163_v38, %v8810_v49  ;;  %v8927_v42 = vsel %vm8863_vm4, %v18335_v26, %v8895_v8  ;;  %v8898_v13 = vmul.f32 0.1, %v18342_v17  ;;  %vm8866_vm15 = vcmp.ge.f32.partialorder %v18342_v17, 0.0 }
0x1bc1   :  { %v13125_v5 = vpop.f32.mrf.mxu1  ;;  %13173 = vmatprep.mubr.msk.f32.mxu0 %vm2793_vm0, %v8927_v42 }
0x1bc2   :  { %v18356_v20 = vadd.f32 %v13125_v5, %v18163_v38  ;;  %13174 = vmatmul.mubr.msk.f32.gmra.mxu0 %vm2793_vm0, %v8928_v34  ;;  %vm8865_vm9 = vcmp.ge.f32.partialorder %v18349_v14, 0.0  ;;  %v8897_v24 = vmul.f32 0.1, %v18349_v14  ;;  %v8930_v33 = vsel %vm8866_vm15, %v18342_v17, %v8898_v13 }
0x1bc3   :  { %v8820_v55 = vpop.f32.mrf.mxu1 }
0x1bc4   :  { %v18363_v35 = vadd.f32 %v18163_v38, %v8820_v55  ;;  %v8929_v46 = vsel %vm8865_vm9, %v18349_v14, %v8897_v24  ;;  %v8900_v50 = vmul.f32 0.1, %v18356_v20  ;;  %vm8868_vm6 = vcmp.ge.f32.partialorder %v18356_v20, 0.0 }
0x1bc5   :  { %v13128_v47 = vpop.f32.mrf.mxu1  ;;  %13176 = vmatprep.mubr.msk.f32.mxu0 %vm2793_vm0, %v8929_v46 }
0x1bc6   :  { %v18370_v12 = vadd.f32 %v13128_v47, %v18163_v38  ;;  %13177 = vmatmul.mubr.msk.f32.gmra.mxu0 %vm2793_vm0, %v8930_v33  ;;  %vm8867_vm7 = vcmp.ge.f32.partialorder %v18363_v35, 0.0  ;;  %v8899_v32 = vmul.f32 0.1, %v18363_v35  ;;  %v8932_v31 = vsel %vm8868_vm6, %v18356_v20, %v8900_v50 }
0x1bc7   :  { %v8830_v10 = vpop.f32.mrf.mxu1 }
0x1bc8   :  { %v18377_v45 = vadd.f32 %v18163_v38, %v8830_v10  ;;  %v8931_v43 = vsel %vm8867_vm7, %v18363_v35, %v8899_v32  ;;  %v8902_v44 = vmul.f32 0.1, %v18370_v12  ;;  %vm8870_vm1 = vcmp.ge.f32.partialorder %v18370_v12, 0.0 }
0x1bc9   :  { %13179 = vmatprep.mubr.msk.f32.mxu0 %vm2793_vm0, %v8931_v43 }
0x1bca   :  { %13180 = vmatmul.mubr.msk.f32.gmra.mxu0 %vm2793_vm0, %v8932_v31  ;;  %vm8869_vm8 = vcmp.ge.f32.partialorder %v18377_v45, 0.0  ;;  %v8901_v15 = vmul.f32 0.1, %v18377_v45  ;;  %v8934_v62 = vsel %vm8870_vm1, %v18370_v12, %v8902_v44 }
0x1bcc   :  { %v8933_v38 = vsel %vm8869_vm8, %v18377_v45, %v8901_v15 }
0x1bcd   :  { %13182 = vmatprep.mubr.msk.f32.mxu0 %vm2793_vm0, %v8933_v38 }
0x1bce   :  { %13183 = vmatmul.mubr.msk.f32.gmra.mxu0 %vm2793_vm0, %v8934_v62 }
0x1c3e   :  { %v13139_v11 = vpop.f32.mrf.mxu0 }
0x1c3f   :  { %v9261_v2 = vadd.f32 %v13139_v11, %v18166_v59 }
0x1c40   :  { %v9101_v51 = vpop.f32.mrf.mxu0 }
0x1c41   :  { %v9300_v4 = vadd.f32 %v18394_v22, %v9261_v2  ;;  %v9260_v52 = vadd.f32 %v9101_v51, %v18169_v36 }
0x1c43   :  { %v9299_v19 = vadd.f32 %v18394_v22, %v9260_v52  ;;  %v9364_v3 = vmul.f32 0.1, %v9300_v4  ;;  %vm9332_vm12 = vcmp.ge.f32.partialorder %v9300_v4, 0.0 }
0x1c45   :  { %v9363_v8 = vmul.f32 0.1, %v9299_v19  ;;  %vm9331_vm13 = vcmp.ge.f32.partialorder %v9299_v19, 0.0  ;;  %v9396_v5 = vsel %vm9332_vm12, %v9300_v4, %v9364_v3 }
0x1c46   :  { %v13142_v49 = vpop.f32.mrf.mxu0 }
0x1c47   :  { %v9263_v42 = vadd.f32 %v13142_v49, %v18180_v57  ;;  %v9395_v13 = vsel %vm9331_vm13, %v9299_v19, %v9363_v8 }
0x1c48   :  { %v9111_v34 = vpop.f32.mrf.mxu0  ;;  %13193 = vmatprep.mubr.msk.f32.mxu0 %vm2793_vm0, %v9395_v13 }
0x1c49   :  { %v9302_v59 = vadd.f32 %v18394_v22, %v9263_v42  ;;  %v9262_v24 = vadd.f32 %v9111_v34, %v18185_v27  ;;  %13194 = vmatmul.mubr.msk.f32.vlgmr.msra.gmra.mxu0 %vm2793_vm0, %v9396_v5 }
0x1c4b   :  { %v9301_v36 = vadd.f32 %v18394_v22, %v9262_v24  ;;  %v9366_v55 = vmul.f32 0.1, %v9302_v59  ;;  %vm9334_vm14 = vcmp.ge.f32.partialorder %v9302_v59, 0.0 }
0x1c4d   :  { %v9365_v46 = vmul.f32 0.1, %v9301_v36  ;;  %vm9333_vm2 = vcmp.ge.f32.partialorder %v9301_v36, 0.0  ;;  %v9398_v32 = vsel %vm9334_vm14, %v9302_v59, %v9366_v55 }
0x1c4f   :  { %v13145_v50 = vpop.f32.mrf.mxu0  ;;  %v9397_v47 = vsel %vm9333_vm2, %v9301_v36, %v9365_v46 }
0x1c50   :  { %v9265_v57 = vadd.f32 %v13145_v50, %v18195_v61  ;;  %13196 = vmatprep.mubr.msk.f32.mxu0 %vm2793_vm0, %v9397_v47 }
0x1c51   :  { %v9121_v33 = vpop.f32.mrf.mxu0  ;;  %13197 = vmatmul.mubr.msk.f32.gmra.mxu0 %vm2793_vm0, %v9398_v32 }
0x1c52   :  { %v9304_v10 = vadd.f32 %v18394_v22, %v9265_v57  ;;  %v9264_v27 = vadd.f32 %v9121_v33, %v18199_v18 }
0x1c54   :  { %v9303_v43 = vadd.f32 %v18394_v22, %v9264_v27  ;;  %v9368_v44 = vmul.f32 0.1, %v9304_v10  ;;  %vm9336_vm3 = vcmp.ge.f32.partialorder %v9304_v10, 0.0 }
0x1c56   :  { %v9367_v31 = vmul.f32 0.1, %v9303_v43  ;;  %vm9335_vm10 = vcmp.ge.f32.partialorder %v9303_v43, 0.0  ;;  %v9400_v58 = vsel %vm9336_vm3, %v9304_v10, %v9368_v44 }
0x1c58   :  { %v9399_v38 = vsel %vm9335_vm10, %v9303_v43, %v9367_v31 }
0x1c59   :  { %v13148_v15 = vpop.f32.mrf.mxu0  ;;  %13199 = vmatprep.mubr.msk.f32.mxu0 %vm2793_vm0, %v9399_v38 }
0x1c5a   :  { %v9267_v61 = vadd.f32 %v13148_v15, %v18209_v29  ;;  %13200 = vmatmul.mubr.msk.f32.gmra.mxu0 %vm2793_vm0, %v9400_v58 }
0x1c5b   :  { %v9131_v62 = vpop.f32.mrf.mxu0 }
0x1c5c   :  { %v9306_v28 = vadd.f32 %v18394_v22, %v9267_v61  ;;  %v9266_v18 = vadd.f32 %v9131_v62, %v18213_v54 }
0x1c5d   :  { %v13151_v6 = vpop.f32.mrf.mxu0 }
0x1c5e   :  { %v9305_v11 = vadd.f32 %v18394_v22, %v9266_v18  ;;  %v9269_v2 = vadd.f32 %v13151_v6, %v18217_v48  ;;  %vm9338_vm11 = vcmp.ge.f32.partialorder %v9306_v28, 0.0  ;;  %v9370_v51 = vmul.f32 0.1, %v9306_v28 }
0x1c5f   :  { %v9141_v4 = vpop.f32.mrf.mxu0 }
0x1c60   :  { %v9369_v29 = vmul.f32 0.1, %v9305_v11  ;;  %v9308_v52 = vadd.f32 %v18394_v22, %v9269_v2  ;;  %v9268_v19 = vadd.f32 %v9141_v4, %v18223_v0  ;;  %vm9337_vm4 = vcmp.ge.f32.partialorder %v9305_v11, 0.0 }
0x1c61   :  { %v9402_v49 = vsel %vm9338_vm11, %v9306_v28, %v9370_v51 }
0x1c62   :  { %v9307_v3 = vadd.f32 %v18394_v22, %v9268_v19  ;;  %v9401_v8 = vsel %vm9337_vm4, %v9305_v11, %v9369_v29  ;;  %v9372_v54 = vmul.f32 0.1, %v9308_v52  ;;  %vm9340_vm5 = vcmp.ge.f32.partialorder %v9308_v52, 0.0 }
0x1c63   :  { %13202 = vmatprep.mubr.msk.f32.mxu0 %vm2793_vm0, %v9401_v8 }
0x1c64   :  { %v9371_v42 = vmul.f32 0.1, %v9307_v3  ;;  %13203 = vmatmul.mubr.msk.f32.gmra.mxu0 %vm2793_vm0, %v9402_v49  ;;  %vm9339_vm9 = vcmp.ge.f32.partialorder %v9307_v3, 0.0  ;;  %v9404_v0 = vsel %vm9340_vm5, %v9308_v52, %v9372_v54 }
0x1c66   :  { %v13154_v48 = vpop.f32.mrf.mxu0  ;;  %v9403_v13 = vsel %vm9339_vm9, %v9307_v3, %v9371_v42 }
0x1c67   :  { %v9271_v5 = vadd.f32 %v13154_v48, %v18238_v40  ;;  %13205 = vmatprep.mubr.msk.f32.mxu0 %vm2793_vm0, %v9403_v13 }
0x1c68   :  { %v9151_v34 = vpop.f32.mrf.mxu0  ;;  %13206 = vmatmul.mubr.msk.f32.gmra.mxu0 %vm2793_vm0, %v9404_v0 }
0x1c69   :  { %v9310_v59 = vadd.f32 %v18394_v22, %v9271_v5  ;;  %v9270_v24 = vadd.f32 %v9151_v34, %v18241_v9 }
0x1c6a   :  { %v13157_v36 = vpop.f32.mrf.mxu0 }
0x1c6b   :  { %v9309_v55 = vadd.f32 %v18394_v22, %v9270_v24  ;;  %v9273_v46 = vadd.f32 %v13157_v36, %v18245_v56  ;;  %vm9342_vm15 = vcmp.ge.f32.partialorder %v9310_v59, 0.0  ;;  %v9374_v50 = vmul.f32 0.1, %v9310_v59 }
0x1c6c   :  { %v9161_v57 = vpop.f32.mrf.mxu0 }
0x1c6d   :  { %v9373_v47 = vmul.f32 0.1, %v9309_v55  ;;  %v9312_v40 = vadd.f32 %v18394_v22, %v9273_v46  ;;  %v9272_v33 = vadd.f32 %v9161_v57, %v18251_v39  ;;  %vm9341_vm7 = vcmp.ge.f32.partialorder %v9309_v55, 0.0 }
0x1c6e   :  { %v13160_v32 = vpop.f32.mrf.mxu0  ;;  %v9406_v31 = vsel %vm9342_vm15, %v9310_v59, %v9374_v50 }
0x1c6f   :  { %v9311_v10 = vadd.f32 %v18394_v22, %v9272_v33  ;;  %v9275_v27 = vadd.f32 %v13160_v32, %v18258_v23  ;;  %vm9344_vm6 = vcmp.ge.f32.partialorder %v9312_v40, 0.0  ;;  %v9376_v9 = vmul.f32 0.1, %v9312_v40 }
0x1c70   :  { %v9171_v43 = vpop.f32.mrf.mxu0  ;;  %v9405_v44 = vsel %vm9341_vm7, %v9309_v55, %v9373_v47 }
0x1c71   :  { %v9375_v56 = vmul.f32 0.1, %v9311_v10  ;;  %v9314_v15 = vadd.f32 %v18394_v22, %v9275_v27  ;;  %v9274_v61 = vadd.f32 %v9171_v43, %v18265_v37  ;;  %13208 = vmatprep.mubr.msk.f32.mxu0 %vm2793_vm0, %v9405_v44  ;;  %vm9343_vm8 = vcmp.ge.f32.partialorder %v9311_v10, 0.0 }
0x1c72   :  { %13209 = vmatmul.mubr.msk.f32.gmra.mxu0 %vm2793_vm0, %v9406_v31  ;;  %v13163_v39 = vpop.f32.mrf.mxu0  ;;  %v9408_v18 = vsel %vm9344_vm6, %v9312_v40, %v9376_v9 }
0x1c73   :  { %v9313_v38 = vadd.f32 %v18394_v22, %v9274_v61  ;;  %v9277_v23 = vadd.f32 %v13163_v39, %v18272_v41  ;;  %vm9346_vm1 = vcmp.ge.f32.partialorder %v9314_v15, 0.0  ;;  %v9378_v62 = vmul.f32 0.1, %v9314_v15 }
0x1c74   :  { %v9181_v58 = vpop.f32.mrf.mxu0  ;;  %v9407_v28 = vsel %vm9343_vm8, %v9311_v10, %v9375_v56 }
0x1c75   :  { %v9377_v6 = vmul.f32 0.1, %v9313_v38  ;;  %v9316_v11 = vadd.f32 %v18394_v22, %v9277_v23  ;;  %v9276_v37 = vadd.f32 %v9181_v58, %v18279_v30  ;;  %13211 = vmatprep.mubr.msk.f32.mxu0 %vm2793_vm0, %v9407_v28  ;;  %vm9345_vm12 = vcmp.ge.f32.partialorder %v9313_v38, 0.0 }
0x1c76   :  { %13212 = vmatmul.mubr.msk.f32.gmra.mxu0 %vm2793_vm0, %v9408_v18  ;;  %v13166_v2 = vpop.f32.mrf.mxu0  ;;  %v9410_v19 = vsel %vm9346_vm1, %v9314_v15, %v9378_v62 }
0x1c77   :  { %v9315_v51 = vadd.f32 %v18394_v22, %v9276_v37  ;;  %v9279_v41 = vadd.f32 %v13166_v2, %v18286_v63  ;;  %vm9348_vm13 = vcmp.ge.f32.partialorder %v9316_v11, 0.0  ;;  %v9380_v4 = vmul.f32 0.1, %v9316_v11 }
0x1c78   :  { %v9191_v29 = vpop.f32.mrf.mxu0  ;;  %v9409_v52 = vsel %vm9345_vm12, %v9313_v38, %v9377_v6 }
0x1c79   :  { %v9379_v3 = vmul.f32 0.1, %v9315_v51  ;;  %v9318_v8 = vadd.f32 %v18394_v22, %v9279_v41  ;;  %v9278_v30 = vadd.f32 %v9191_v29, %v18293_v7  ;;  %13214 = vmatprep.mubr.msk.f32.mxu0 %vm2793_vm0, %v9409_v52  ;;  %vm9347_vm14 = vcmp.ge.f32.partialorder %v9315_v51, 0.0 }
0x1c7a   :  { %13215 = vmatmul.mubr.msk.f32.gmra.mxu0 %vm2793_vm0, %v9410_v19  ;;  %v13169_v54 = vpop.f32.mrf.mxu0  ;;  %v9412_v5 = vsel %vm9348_vm13, %v9316_v11, %v9380_v4 }
0x1c7b   :  { %v9317_v49 = vadd.f32 %v18394_v22, %v9278_v30  ;;  %v9281_v63 = vadd.f32 %v13169_v54, %v18300_v60  ;;  %vm9350_vm2 = vcmp.ge.f32.partialorder %v9318_v8, 0.0  ;;  %v9382_v42 = vmul.f32 0.1, %v9318_v8 }
0x1c7c   :  { %v9201_v48 = vpop.f32.mrf.mxu0  ;;  %v9411_v13 = vsel %vm9347_vm14, %v9315_v51, %v9379_v3 }
0x1c7d   :  { %v9381_v0 = vmul.f32 0.1, %v9317_v49  ;;  %v9320_v34 = vadd.f32 %v18394_v22, %v9281_v63  ;;  %v9280_v7 = vadd.f32 %v9201_v48, %v18307_v16  ;;  %13217 = vmatprep.mubr.msk.f32.mxu0 %vm2793_vm0, %v9411_v13  ;;  %vm9349_vm3 = vcmp.ge.f32.partialorder %v9317_v49, 0.0  ;;  %v18500_v13 = vld [vmem:[#allocation23] ss:$0 sm:$0xff] }
0x1c7e   :  { %13218 = vmatmul.mubr.msk.f32.gmra.mxu0 %vm2793_vm0, %v9412_v5  ;;  %v13172_v59 = vpop.f32.mrf.mxu0  ;;  %v9414_v50 = vsel %vm9350_vm2, %v9318_v8, %v9382_v42 }
0x1c7f   :  { %v9319_v24 = vadd.f32 %v18394_v22, %v9280_v7  ;;  %v9283_v60 = vadd.f32 %v13172_v59, %v18314_v1  ;;  %vm9352_vm10 = vcmp.ge.f32.partialorder %v9320_v34, 0.0  ;;  %v9384_v36 = vmul.f32 0.1, %v9320_v34 }
0x1c80   :  { %v9211_v55 = vpop.f32.mrf.mxu0  ;;  %v9413_v46 = vsel %vm9349_vm3, %v9317_v49, %v9381_v0  ;;  %vm9857_vm3 = vcmask 130048  }
0x1c81   :  { %v9383_v57 = vmul.f32 0.1, %v9319_v24  ;;  %v9322_v47 = vadd.f32 %v18394_v22, %v9283_v60  ;;  %v9282_v16 = vadd.f32 %v9211_v55, %v18321_v53  ;;  %13220 = vmatprep.mubr.msk.f32.mxu0 %vm2793_vm0, %v9413_v46  ;;  %vm9351_vm11 = vcmp.ge.f32.partialorder %v9319_v24, 0.0 }
0x1c82   :  { %13221 = vmatmul.mubr.msk.f32.gmra.mxu0 %vm2793_vm0, %v9414_v50  ;;  %v13175_v40 = vpop.f32.mrf.mxu0  ;;  %v9416_v9 = vsel %vm9352_vm10, %v9320_v34, %v9384_v36 }
0x1c83   :  { %v9321_v33 = vadd.f32 %v18394_v22, %v9282_v16  ;;  %v9285_v1 = vadd.f32 %v13175_v40, %v18328_v21  ;;  %vm9354_vm4 = vcmp.ge.f32.partialorder %v9322_v47, 0.0  ;;  %v9386_v32 = vmul.f32 0.1, %v9322_v47 }
0x1c84   :  { %v9221_v10 = vpop.f32.mrf.mxu0  ;;  %v9415_v27 = vsel %vm9351_vm11, %v9319_v24, %v9383_v57 }
0x1c85   :  { %v9385_v43 = vmul.f32 0.1, %v9321_v33  ;;  %v9324_v44 = vadd.f32 %v18394_v22, %v9285_v1  ;;  %v9284_v53 = vadd.f32 %v9221_v10, %v18335_v26  ;;  %13223 = vmatprep.mubr.msk.f32.mxu0 %vm2793_vm0, %v9415_v27  ;;  %vm9353_vm5 = vcmp.ge.f32.partialorder %v9321_v33, 0.0 }
0x1c86   :  { %13224 = vmatmul.mubr.msk.f32.gmra.mxu0 %vm2793_vm0, %v9416_v9  ;;  %v13178_v31 = vpop.f32.mrf.mxu0  ;;  %v9418_v38 = vsel %vm9354_vm4, %v9322_v47, %v9386_v32 }
0x1c87   :  { %v9323_v56 = vadd.f32 %v18394_v22, %v9284_v53  ;;  %v9287_v21 = vadd.f32 %v13178_v31, %v18342_v17  ;;  %vm9356_vm9 = vcmp.ge.f32.partialorder %v9324_v44, 0.0  ;;  %v9388_v15 = vmul.f32 0.1, %v9324_v44 }
0x1c88   :  { %v9231_v61 = vpop.f32.mrf.mxu0  ;;  %v9417_v39 = vsel %vm9353_vm5, %v9321_v33, %v9385_v43 }
0x1c89   :  { %v9387_v23 = vmul.f32 0.1, %v9323_v56  ;;  %v9326_v62 = vadd.f32 %v18394_v22, %v9287_v21  ;;  %v9286_v26 = vadd.f32 %v9231_v61, %v18349_v14  ;;  %13226 = vmatprep.mubr.msk.f32.mxu0 %vm2793_vm0, %v9417_v39  ;;  %vm9355_vm15 = vcmp.ge.f32.partialorder %v9323_v56, 0.0 }
0x1c8a   :  { %13227 = vmatmul.mubr.msk.f32.gmra.mxu0 %vm2793_vm0, %v9418_v38  ;;  %v13181_v58 = vpop.f32.mrf.mxu0  ;;  %v9420_v37 = vsel %vm9356_vm9, %v9324_v44, %v9388_v15 }
0x1c8b   :  { %v9325_v28 = vadd.f32 %v18394_v22, %v9286_v26  ;;  %v9289_v17 = vadd.f32 %v13181_v58, %v18356_v20  ;;  %vm9358_vm7 = vcmp.ge.f32.partialorder %v9326_v62, 0.0  ;;  %v9390_v18 = vmul.f32 0.1, %v9326_v62 }
0x1c8c   :  { %v9241_v6 = vpop.f32.mrf.mxu0  ;;  %v9419_v11 = vsel %vm9355_vm15, %v9323_v56, %v9387_v23 }
0x1c8d   :  { %v9389_v2 = vmul.f32 0.1, %v9325_v28  ;;  %v9328_v51 = vadd.f32 %v18394_v22, %v9289_v17  ;;  %v9288_v14 = vadd.f32 %v9241_v6, %v18363_v35  ;;  %13229 = vmatprep.mubr.msk.f32.mxu0 %vm2793_vm0, %v9419_v11  ;;  %vm9357_vm6 = vcmp.ge.f32.partialorder %v9325_v28, 0.0 }
0x1c8e   :  { %13230 = vmatmul.mubr.msk.f32.gmra.mxu0 %vm2793_vm0, %v9420_v37  ;;  %v13184_v41 = vpop.f32.mrf.mxu0  ;;  %v9422_v3 = vsel %vm9358_vm7, %v9326_v62, %v9390_v18 }
0x1c8f   :  { %v9327_v4 = vadd.f32 %v18394_v22, %v9288_v14  ;;  %v9291_v20 = vadd.f32 %v13184_v41, %v18370_v12  ;;  %v9392_v29 = vmul.f32 0.1, %v9328_v51  ;;  %v9421_v19 = vsel %vm9357_vm6, %v9325_v28, %v9389_v2 }
0x1c90   :  { %v9251_v52 = vpop.f32.mrf.mxu0  ;;  %13232 = vmatprep.mubr.msk.f32.mxu0 %vm2793_vm0, %v9421_v19  ;;  %vm9360_vm1 = vcmp.ge.f32.partialorder %v9328_v51, 0.0 }
0x1c91   :  { %v9391_v8 = vmul.f32 0.1, %v9327_v4  ;;  %v9330_v30 = vadd.f32 %v18394_v22, %v9291_v20  ;;  %v9290_v35 = vadd.f32 %v9251_v52, %v18377_v45  ;;  %vm9359_vm8 = vcmp.ge.f32.partialorder %v9327_v4, 0.0 }
0x1c92   :  { %13233 = vmatmul.mubr.msk.f32.gmra.mxu0 %vm2793_vm0, %v9422_v3  ;;  %v9424_v42 = vsel %vm9360_vm1, %v9328_v51, %v9392_v29 }
0x1c93   :  { %v9329_v54 = vadd.f32 %v18394_v22, %v9290_v35  ;;  %v9423_v49 = vsel %vm9359_vm8, %v9327_v4, %v9391_v8  ;;  %v9394_v12 = vmul.f32 0.1, %v9330_v30  ;;  %vm9362_vm13 = vcmp.ge.f32.partialorder %v9330_v30, 0.0 }
0x1c94   :  { %13235 = vmatprep.mubr.msk.f32.mxu0 %vm2793_vm0, %v9423_v49 }
0x1c95   :  { %v9393_v63 = vmul.f32 0.1, %v9329_v54  ;;  %vm9361_vm12 = vcmp.ge.f32.partialorder %v9329_v54, 0.0  ;;  %v9426_v45 = vsel %vm9362_vm13, %v9330_v30, %v9394_v12 }
0x1c96   :  { %13236 = vmatmul.mubr.msk.f32.gmra.mxu0 %vm2793_vm0, %v9424_v42 }
0x1c97   :  { %v9425_v48 = vsel %vm9361_vm12, %v9329_v54, %v9393_v63 }
0x1c98   :  { %13238 = vmatprep.mubr.msk.f32.mxu0 %vm2793_vm0, %v9425_v48 }
0x1c9a   :  { %13239 = vmatmul.mubr.msk.f32.gmra.mxu0 %vm2793_vm0, %v9426_v45 }
0x1d09   :  { %v13195_v5 = vpop.f32.mrf.mxu0 }
0x1d0a   :  { %v18503_v22 = vadd.f32 %v13195_v5, %v18500_v13 }
0x1d0b   :  { %v9600_v0 = vpop.f32.mrf.mxu0 }
0x1d0c   :  { %19470 = vst [vmem:[#allocation102_spill] sm:$0xff] %v18503_v22  ;;  %v18506_v34 = vadd.f32 %v18500_v13, %v9600_v0  ;;  %v9792_v7 = vmul.f32 0.1, %v18503_v22  ;;  %vm9760_vm14 = vcmp.ge.f32.partialorder %v18503_v22, 0.0 }
0x1d0e   :  { %19471 = vst [vmem:[#allocation121_spill] sm:$0xff] %v18506_v34  ;;  %vm9759_vm2 = vcmp.ge.f32.partialorder %v18506_v34, 0.0  ;;  %v9791_v59 = vmul.f32 0.1, %v18506_v34  ;;  %v9824_v60 = vsel %vm9760_vm14, %v18503_v22, %v9792_v7 }
0x1d10   :  { %v9823_v24 = vsel %vm9759_vm2, %v18506_v34, %v9791_v59 }
0x1d11   :  { %v13198_v36 = vpop.f32.mrf.mxu0  ;;  %13245 = vmatprep.mubr.msk.f32.mxu1 %vm9857_vm3, %v9823_v24 }
0x1d12   :  { %v18516_v55 = vadd.f32 %v13198_v36, %v18500_v13  ;;  %13246 = vmatmul.mubr.msk.f32.vlgmr.msra.gmra.mxu1 %vm9857_vm3, %v9824_v60 }
0x1d13   :  { %v9610_v46 = vpop.f32.mrf.mxu0 }
0x1d14   :  { %v18520_v50 = vadd.f32 %v18500_v13, %v9610_v46  ;;  %v9794_v57 = vmul.f32 0.1, %v18516_v55  ;;  %vm9762_vm10 = vcmp.ge.f32.partialorder %v18516_v55, 0.0 }
0x1d16   :  { %19472 = vst [vmem:[#allocation108_spill] sm:$0xff] %v18520_v50  ;;  %vm9761_vm0 = vcmp.ge.f32.partialorder %v18520_v50, 0.0  ;;  %v9793_v47 = vmul.f32 0.1, %v18520_v50  ;;  %v9826_v33 = vsel %vm9762_vm10, %v18516_v55, %v9794_v57 }
0x1d18   :  { %v9825_v16 = vsel %vm9761_vm0, %v18520_v50, %v9793_v47 }
0x1d19   :  { %13248 = vmatprep.mubr.msk.f32.mxu1 %vm9857_vm3, %v9825_v16 }
0x1d1a   :  { %v13201_v40 = vpop.f32.mrf.mxu0  ;;  %13249 = vmatmul.mubr.msk.f32.gmra.mxu1 %vm9857_vm3, %v9826_v33 }
0x1d1b   :  { %v18530_v1 = vadd.f32 %v13201_v40, %v18500_v13 }
0x1d1c   :  { %v9620_v32 = vpop.f32.mrf.mxu0 }
0x1d1d   :  { %v18534_v10 = vadd.f32 %v18500_v13, %v9620_v32  ;;  %v9796_v27 = vmul.f32 0.1, %v18530_v1  ;;  %vm9764_vm4 = vcmp.ge.f32.partialorder %v18530_v1, 0.0 }
0x1d1f   :  { %vm9763_vm11 = vcmp.ge.f32.partialorder %v18534_v10, 0.0  ;;  %v9795_v9 = vmul.f32 0.1, %v18534_v10  ;;  %v9828_v53 = vsel %vm9764_vm4, %v18530_v1, %v9796_v27 }
0x1d21   :  { %v9827_v43 = vsel %vm9763_vm11, %v18534_v10, %v9795_v9 }
0x1d22   :  { %13251 = vmatprep.mubr.msk.f32.mxu1 %vm9857_vm3, %v9827_v43 }
0x1d23   :  { %13252 = vmatmul.mubr.msk.f32.gmra.mxu1 %vm9857_vm3, %v9828_v53 }
0x1d24   :  { %v13204_v44 = vpop.f32.mrf.mxu0 }
0x1d25   :  { %v18544_v31 = vadd.f32 %v13204_v44, %v18500_v13 }
0x1d26   :  { %v9630_v56 = vpop.f32.mrf.mxu0 }
0x1d27   :  { %v18548_v21 = vadd.f32 %v18500_v13, %v9630_v56  ;;  %v9798_v15 = vmul.f32 0.1, %v18544_v31  ;;  %vm9766_vm9 = vcmp.ge.f32.partialorder %v18544_v31, 0.0 }
0x1d28   :  { %v13207_v61 = vpop.f32.mrf.mxu0 }
0x1d29   :  { %v18552_v39 = vadd.f32 %v13207_v61, %v18500_v13  ;;  %vm9765_vm5 = vcmp.ge.f32.partialorder %v18548_v21, 0.0  ;;  %v9797_v38 = vmul.f32 0.1, %v18548_v21  ;;  %v9830_v28 = vsel %vm9766_vm9, %v18544_v31, %v9798_v15 }
0x1d2a   :  { %v9640_v23 = vpop.f32.mrf.mxu0 }
0x1d2b   :  { %v18558_v62 = vadd.f32 %v18500_v13, %v9640_v23  ;;  %v9829_v26 = vsel %vm9765_vm5, %v18548_v21, %v9797_v38  ;;  %v9800_v58 = vmul.f32 0.1, %v18552_v39  ;;  %vm9768_vm7 = vcmp.ge.f32.partialorder %v18552_v39, 0.0 }
0x1d2c   :  { %13254 = vmatprep.mubr.msk.f32.mxu1 %vm9857_vm3, %v9829_v26 }
0x1d2d   :  { %13255 = vmatmul.mubr.msk.f32.gmra.mxu1 %vm9857_vm3, %v9830_v28  ;;  %vm9767_vm15 = vcmp.ge.f32.partialorder %v18558_v62, 0.0  ;;  %v9799_v17 = vmul.f32 0.1, %v18558_v62  ;;  %v9832_v6 = vsel %vm9768_vm7, %v18552_v39, %v9800_v58 }
0x1d2f   :  { %v9831_v18 = vsel %vm9767_vm15, %v18558_v62, %v9799_v17 }
0x1d30   :  { %13257 = vmatprep.mubr.msk.f32.mxu1 %vm9857_vm3, %v9831_v18 }
0x1d31   :  { %13258 = vmatmul.mubr.msk.f32.gmra.mxu1 %vm9857_vm3, %v9832_v6 }
0x1d32   :  { %v13210_v11 = vpop.f32.mrf.mxu0 }
0x1d33   :  { %v18573_v37 = vadd.f32 %v13210_v11, %v18500_v13 }
0x1d34   :  { %v9650_v2 = vpop.f32.mrf.mxu0 }
0x1d35   :  { %v18576_v51 = vadd.f32 %v18500_v13, %v9650_v2  ;;  %v9802_v14 = vmul.f32 0.1, %v18573_v37  ;;  %vm9770_vm8 = vcmp.ge.f32.partialorder %v18573_v37, 0.0 }
0x1d36   :  { %v13213_v41 = vpop.f32.mrf.mxu0 }
0x1d37   :  { %v18580_v4 = vadd.f32 %v13213_v41, %v18500_v13  ;;  %vm9769_vm6 = vcmp.ge.f32.partialorder %v18576_v51, 0.0  ;;  %v9801_v20 = vmul.f32 0.1, %v18576_v51  ;;  %v9834_v30 = vsel %vm9770_vm8, %v18573_v37, %v9802_v14 }
0x1d38   :  { %v9660_v29 = vpop.f32.mrf.mxu0 }
0x1d39   :  { %v18586_v52 = vadd.f32 %v18500_v13, %v9660_v29  ;;  %v9833_v19 = vsel %vm9769_vm6, %v18576_v51, %v9801_v20  ;;  %v9804_v3 = vmul.f32 0.1, %v18580_v4  ;;  %vm9772_vm12 = vcmp.ge.f32.partialorder %v18580_v4, 0.0 }
0x1d3a   :  { %v13216_v8 = vpop.f32.mrf.mxu0  ;;  %13260 = vmatprep.mubr.msk.f32.mxu1 %vm9857_vm3, %v9833_v19 }
0x1d3b   :  { %v18593_v35 = vadd.f32 %v13216_v8, %v18500_v13  ;;  %13261 = vmatmul.mubr.msk.f32.gmra.mxu1 %vm9857_vm3, %v9834_v30  ;;  %vm9771_vm1 = vcmp.ge.f32.partialorder %v18586_v52, 0.0  ;;  %v9803_v54 = vmul.f32 0.1, %v18586_v52  ;;  %v9836_v45 = vsel %vm9772_vm12, %v18580_v4, %v9804_v3 }
0x1d3c   :  { %v9670_v49 = vpop.f32.mrf.mxu0 }
0x1d3d   :  { %v18600_v12 = vadd.f32 %v18500_v13, %v9670_v49  ;;  %v9835_v63 = vsel %vm9771_vm1, %v18586_v52, %v9803_v54  ;;  %v9806_v42 = vmul.f32 0.1, %v18593_v35  ;;  %vm9774_vm14 = vcmp.ge.f32.partialorder %v18593_v35, 0.0 }
0x1d3e   :  { %v13219_v48 = vpop.f32.mrf.mxu0  ;;  %13263 = vmatprep.mubr.msk.f32.mxu1 %vm9857_vm3, %v9835_v63 }
0x1d3f   :  { %v18607_v5 = vadd.f32 %v13219_v48, %v18500_v13  ;;  %13264 = vmatmul.mubr.msk.f32.gmra.mxu1 %vm9857_vm3, %v9836_v45  ;;  %vm9773_vm13 = vcmp.ge.f32.partialorder %v18600_v12, 0.0  ;;  %v9805_v0 = vmul.f32 0.1, %v18600_v12  ;;  %v9838_v46 = vsel %vm9774_vm14, %v18593_v35, %v9806_v42 }
0x1d40   :  { %v9680_v7 = vpop.f32.mrf.mxu0 }
0x1d41   :  { %19473 = vst [vmem:[#allocation109_spill] sm:$0xff] %v18607_v5  ;;  %v18614_v59 = vadd.f32 %v18500_v13, %v9680_v7  ;;  %v9837_v24 = vsel %vm9773_vm13, %v18600_v12, %v9805_v0  ;;  %v9808_v60 = vmul.f32 0.1, %v18607_v5  ;;  %vm9776_vm0 = vcmp.ge.f32.partialorder %v18607_v5, 0.0 }
0x1d42   :  { %v13222_v36 = vpop.f32.mrf.mxu0  ;;  %13266 = vmatprep.mubr.msk.f32.mxu1 %vm9857_vm3, %v9837_v24 }
0x1d43   :  { %19474 = vst [vmem:[#allocation110_spill] sm:$0xff] %v18614_v59  ;;  %v18621_v57 = vadd.f32 %v13222_v36, %v18500_v13  ;;  %13267 = vmatmul.mubr.msk.f32.gmra.mxu1 %vm9857_vm3, %v9838_v46  ;;  %vm9775_vm2 = vcmp.ge.f32.partialorder %v18614_v59, 0.0  ;;  %v9807_v47 = vmul.f32 0.1, %v18614_v59  ;;  %v9840_v9 = vsel %vm9776_vm0, %v18607_v5, %v9808_v60 }
0x1d44   :  { %v9690_v16 = vpop.f32.mrf.mxu0 }
0x1d45   :  { %v18628_v40 = vadd.f32 %v18500_v13, %v9690_v16  ;;  %v9839_v33 = vsel %vm9775_vm2, %v18614_v59, %v9807_v47  ;;  %v9810_v32 = vmul.f32 0.1, %v18621_v57  ;;  %vm9778_vm11 = vcmp.ge.f32.partialorder %v18621_v57, 0.0 }
0x1d46   :  { %v13225_v27 = vpop.f32.mrf.mxu0  ;;  %13269 = vmatprep.mubr.msk.f32.mxu1 %vm9857_vm3, %v9839_v33 }
0x1d47   :  { %v18635_v43 = vadd.f32 %v13225_v27, %v18500_v13  ;;  %13270 = vmatmul.mubr.msk.f32.gmra.mxu1 %vm9857_vm3, %v9840_v9  ;;  %vm9777_vm10 = vcmp.ge.f32.partialorder %v18628_v40, 0.0  ;;  %v9809_v44 = vmul.f32 0.1, %v18628_v40  ;;  %v9842_v23 = vsel %vm9778_vm11, %v18621_v57, %v9810_v32 }
0x1d48   :  { %v9700_v53 = vpop.f32.mrf.mxu0 }
0x1d49   :  { %v18642_v56 = vadd.f32 %v18500_v13, %v9700_v53  ;;  %v9841_v15 = vsel %vm9777_vm10, %v18628_v40, %v9809_v44  ;;  %v9812_v61 = vmul.f32 0.1, %v18635_v43  ;;  %vm9780_vm5 = vcmp.ge.f32.partialorder %v18635_v43, 0.0 }
0x1d4a   :  { %v13228_v38 = vpop.f32.mrf.mxu0  ;;  %13272 = vmatprep.mubr.msk.f32.mxu1 %vm9857_vm3, %v9841_v15 }
0x1d4b   :  { %v18649_v26 = vadd.f32 %v13228_v38, %v18500_v13  ;;  %13273 = vmatmul.mubr.msk.f32.gmra.mxu1 %vm9857_vm3, %v9842_v23  ;;  %vm9779_vm4 = vcmp.ge.f32.partialorder %v18642_v56, 0.0  ;;  %v9811_v58 = vmul.f32 0.1, %v18642_v56  ;;  %v9844_v2 = vsel %vm9780_vm5, %v18635_v43, %v9812_v61 }
0x1d4c   :  { %v9710_v28 = vpop.f32.mrf.mxu0 }
0x1d4d   :  { %v18656_v17 = vadd.f32 %v18500_v13, %v9710_v28  ;;  %v9843_v18 = vsel %vm9779_vm4, %v18642_v56, %v9811_v58  ;;  %v9814_v6 = vmul.f32 0.1, %v18649_v26  ;;  %vm9782_vm15 = vcmp.ge.f32.partialorder %v18649_v26, 0.0 }
0x1d4e   :  { %v13231_v11 = vpop.f32.mrf.mxu0  ;;  %13275 = vmatprep.mubr.msk.f32.mxu1 %vm9857_vm3, %v9843_v18 }
0x1d4f   :  { %v18663_v14 = vadd.f32 %v13231_v11, %v18500_v13  ;;  %13276 = vmatmul.mubr.msk.f32.gmra.mxu1 %vm9857_vm3, %v9844_v2  ;;  %vm9781_vm9 = vcmp.ge.f32.partialorder %v18656_v17, 0.0  ;;  %v9813_v41 = vmul.f32 0.1, %v18656_v17  ;;  %v9846_v30 = vsel %vm9782_vm15, %v18649_v26, %v9814_v6 }
0x1d50   :  { %v9720_v20 = vpop.f32.mrf.mxu0 }
0x1d51   :  { %v18670_v29 = vadd.f32 %v18500_v13, %v9720_v20  ;;  %v9845_v19 = vsel %vm9781_vm9, %v18656_v17, %v9813_v41  ;;  %v9816_v3 = vmul.f32 0.1, %v18663_v14  ;;  %vm9784_vm6 = vcmp.ge.f32.partialorder %v18663_v14, 0.0  ;;  %v18726_v41 = vld [vmem:[#allocation26] sm:$0x1] }
0x1d52   :  { %v13234_v8 = vpop.f32.mrf.mxu0  ;;  %13278 = vmatprep.mubr.msk.f32.mxu1 %vm9857_vm3, %v9845_v19  ;;  %19478 = vst [vmem:[#allocation125_spill] sm:$0xff] %v18726_v41  ;;  %12279 = vmatprep.mubr.msk.f32.mxu0 %vm9857_vm3, %v18726_v41  ;;  %v18761_v41 = vld [vmem:[#allocation25] ss:$0 sm:$0xff] }
0x1d53   :  { %v18677_v54 = vadd.f32 %v13234_v8, %v18500_v13  ;;  %13279 = vmatmul.mubr.msk.f32.gmra.mxu1 %vm9857_vm3, %v9846_v30  ;;  %vm9783_vm7 = vcmp.ge.f32.partialorder %v18670_v29, 0.0  ;;  %v9815_v49 = vmul.f32 0.1, %v18670_v29  ;;  %v9848_v7 = vsel %vm9784_vm6, %v18663_v14, %v9816_v3 }
0x1d54   :  { %v9730_v63 = vpop.f32.mrf.mxu0 }
0x1d55   :  { %v18684_v42 = vadd.f32 %v18500_v13, %v9730_v63  ;;  %v9847_v48 = vsel %vm9783_vm7, %v18670_v29, %v9815_v49  ;;  %v9818_v45 = vmul.f32 0.1, %v18677_v54  ;;  %vm9786_vm1 = vcmp.ge.f32.partialorder %v18677_v54, 0.0 }
0x1d56   :  { %v13237_v0 = vpop.f32.mrf.mxu0  ;;  %13281 = vmatprep.mubr.msk.f32.mxu1 %vm9857_vm3, %v9847_v48 }
0x1d57   :  { %v18691_v24 = vadd.f32 %v13237_v0, %v18500_v13  ;;  %13282 = vmatmul.mubr.msk.f32.gmra.mxu1 %vm9857_vm3, %v9848_v7  ;;  %vm9785_vm8 = vcmp.ge.f32.partialorder %v18684_v42, 0.0  ;;  %v9817_v60 = vmul.f32 0.1, %v18684_v42  ;;  %v9850_v32 = vsel %vm9786_vm1, %v18677_v54, %v9818_v45 }
0x1d58   :  { %v9740_v36 = vpop.f32.mrf.mxu0 }
0x1d59   :  { %v18698_v46 = vadd.f32 %v18500_v13, %v9740_v36  ;;  %v9849_v47 = vsel %vm9785_vm8, %v18684_v42, %v9817_v60  ;;  %v9820_v16 = vmul.f32 0.1, %v18691_v24  ;;  %vm9788_vm13 = vcmp.ge.f32.partialorder %v18691_v24, 0.0 }
0x1d5a   :  { %v13240_v33 = vpop.f32.mrf.mxu0  ;;  %13284 = vmatprep.mubr.msk.f32.mxu1 %vm9857_vm3, %v9849_v47 }
0x1d5b   :  { %v9756_v27 = vadd.f32 %v13240_v33, %v18500_v13  ;;  %13285 = vmatmul.mubr.msk.f32.gmra.mxu1 %vm9857_vm3, %v9850_v32  ;;  %vm9787_vm12 = vcmp.ge.f32.partialorder %v18698_v46, 0.0  ;;  %v9819_v9 = vmul.f32 0.1, %v18698_v46  ;;  %v9852_v38 = vsel %vm9788_vm13, %v18691_v24, %v9820_v16 }
0x1d5c   :  { %v9750_v44 = vpop.f32.mrf.mxu0 }
0x1d5d   :  { %v9751_v53 = vadd.f32 %v18500_v13, %v9750_v44  ;;  %v9851_v15 = vsel %vm9787_vm12, %v18698_v46, %v9819_v9  ;;  %v9822_v61 = vmul.f32 0.1, %v9756_v27  ;;  %vm9790_vm2 = vcmp.ge.f32.partialorder %v9756_v27, 0.0 }
0x1d5e   :  { %13287 = vmatprep.mubr.msk.f32.mxu1 %vm9857_vm3, %v9851_v15 }
0x1d5f   :  { %13288 = vmatmul.mubr.msk.f32.gmra.mxu1 %vm9857_vm3, %v9852_v38  ;;  %vm9789_vm14 = vcmp.ge.f32.partialorder %v9751_v53, 0.0  ;;  %v9821_v23 = vmul.f32 0.1, %v9751_v53  ;;  %v9854_v28 = vsel %vm9790_vm2, %v9756_v27, %v9822_v61 }
0x1d61   :  { %v9853_v58 = vsel %vm9789_vm14, %v9751_v53, %v9821_v23 }
0x1d62   :  { %13290 = vmatprep.mubr.msk.f32.mxu1 %vm9857_vm3, %v9853_v58 }
0x1d63   :  { %13291 = vmatmul.mubr.msk.f32.gmra.mxu1 %vm9857_vm3, %v9854_v28 }
0x1dd2   :  { %v18716_v18 = vpop.f32.mrf.mxu1 }
0x1dd3   :  { %19475 = vst [vmem:[#allocation122_spill] sm:$0xff] %v18716_v18 }
0x1dd4   :  { %v18718_v13 = vpop.f32.mrf.mxu1 }
0x1dd5   :  { %19476 = vst [vmem:[#allocation123_spill] sm:$0xff] %v18718_v13 }
0x1dda   :  { %v18720_v6 = vpop.f32.mrf.mxu1 }
0x1ddc   :  { %v18722_v11 = vpop.f32.mrf.mxu1 }
0x1ddd   :  { %19477 = vst [vmem:[#allocation124_spill] sm:$0xff] %v18722_v11 }
0x1de3   :  { %v18724_v2 = vpop.f32.mrf.mxu1 }
0x1de5   :  { %v18730_v20 = vpop.f32.mrf.mxu1 }
0x1ded   :  { %v18732_v19 = vpop.f32.mrf.mxu1 }
0x1def   :  { %v18734_v3 = vpop.f32.mrf.mxu1 }
0x1df1   :  { %v18736_v8 = vpop.f32.mrf.mxu1 }
0x1df3   :  { %v18738_v30 = vpop.f32.mrf.mxu1 }
0x1dfb   :  { %v13262_v49 = vpop.f32.mrf.mxu1 }
0x1dfd   :  { %v18740_v63 = vpop.f32.mrf.mxu1 }
0x1dff   :  { %v13265_v48 = vpop.f32.mrf.mxu1 }
0x1e01   :  { %v10080_v45 = vpop.f32.mrf.mxu1 }
0x1e03   :  { %v13268_v0 = vpop.f32.mrf.mxu1 }
0x1e04   :  { %v10194_v58 = vadd.f32 %v13268_v0, %v18593_v35 }
0x1e05   :  { %v10090_v7 = vpop.f32.mrf.mxu1 }
0x1e06   :  { %v10233_v13 = vadd.f32 %v18761_v41, %v10194_v58  ;;  %v10193_v34 = vadd.f32 %v10090_v7, %v18600_v12 }
0x1e07   :  { %v18742_v60 = vpop.f32.mrf.mxu1 }
0x1e08   :  { %19479 = vst [vmem:[#allocation126_spill] sm:$0xff] %v18742_v60  ;;  %v10192_v60 = vadd.f32 %v13265_v48, %v18580_v4  ;;  %vm10265_vm0 = vcmp.ge.f32.partialorder %v10233_v13, 0.0  ;;  %v10297_v35 = vmul.f32 0.1, %v10233_v13  ;;  %v10232_v0 = vadd.f32 %v18761_v41, %v10193_v34 }
0x1e09   :  { %v18744_v36 = vpop.f32.mrf.mxu1  ;;  %v10191_v4 = vadd.f32 %v10080_v45, %v18586_v52 }
0x1e0a   :  { %19480 = vst [vmem:[#allocation111_spill] sm:$0xff] %v18744_v36  ;;  %vm10264_vm4 = vcmp.ge.f32.partialorder %v10232_v0, 0.0  ;;  %v10329_v34 = vsel %vm10265_vm0, %v10233_v13, %v10297_v35 }
0x1e0b   :  { %v18746_v47 = vpop.f32.mrf.mxu1 }
0x1e0d   :  { %v18748_v16 = vpop.f32.mrf.mxu1 }
0x1e0e   :  { %19481 = vst [vmem:[#allocation112_spill] sm:$0xff] %v18748_v16 }
0x1e0f   :  { %v18750_v33 = vpop.f32.mrf.mxu1 }
0x1e11   :  { %v18752_v32 = vpop.f32.mrf.mxu1 }
0x1e13   :  { %v18754_v9 = vpop.f32.mrf.mxu1 }
0x1e15   :  { %v18756_v44 = vpop.f32.mrf.mxu1 }
0x1e17   :  { %v13283_v15 = vpop.f32.mrf.mxu1 }
0x1e19   :  { %v18758_v61 = vpop.f32.mrf.mxu1 }
0x1e1b   :  { %v13286_v38 = vpop.f32.mrf.mxu1 }
0x1e1d   :  { %v10150_v23 = vpop.f32.mrf.mxu1 }
0x1e1f   :  { %v13289_v28 = vpop.f32.mrf.mxu1 }
0x1e20   :  { %v10208_v36 = vadd.f32 %v13289_v28, %v18691_v24 }
0x1e21   :  { %v10160_v25 = vpop.f32.mrf.mxu1 }
0x1e22   :  { %v10247_v50 = vadd.f32 %v18761_v41, %v10208_v36  ;;  %v10207_v58 = vadd.f32 %v10160_v25, %v18698_v46 }
0x1e23   :  { %v13292_v59 = vpop.f32.mrf.mxu1 }
0x1e24   :  { %v10210_v18 = vadd.f32 %v13292_v59, %v9756_v27  ;;  %v10231_v59 = vadd.f32 %v18761_v41, %v10192_v60  ;;  %v10311_v25 = vmul.f32 0.1, %v10247_v50  ;;  %v10246_v46 = vadd.f32 %v18761_v41, %v10207_v58 }
0x1e25   :  { %v10170_v22 = vpop.f32.mrf.mxu1  ;;  %vm10279_vm5 = vcmp.ge.f32.partialorder %v10247_v50, 0.0 }
0x1e26   :  { %v10249_v5 = vadd.f32 %v18761_v41, %v10210_v18  ;;  %v10209_v11 = vadd.f32 %v10170_v22, %v9751_v53  ;;  %v10296_v22 = vmul.f32 0.1, %v10232_v0  ;;  %v10206_v53 = vadd.f32 %v13286_v38, %v18677_v54 }
0x1e27   :  { %vm10263_vm9 = vcmp.ge.f32.partialorder %v10231_v59, 0.0  ;;  %v10295_v52 = vmul.f32 0.1, %v10231_v59  ;;  %v10205_v54 = vadd.f32 %v10150_v23, %v18684_v42  ;;  %v10310_v45 = vmul.f32 0.1, %v10246_v46 }
0x1e28   :  { %v10313_v16 = vmul.f32 0.1, %v10249_v5  ;;  %v10248_v12 = vadd.f32 %v18761_v41, %v10209_v11  ;;  %vm10281_vm10 = vcmp.ge.f32.partialorder %v10249_v5, 0.0  ;;  %v10230_v11 = vadd.f32 %v18761_v41, %v10191_v4 }
0x1e29   :  { %v10328_v48 = vsel %vm10264_vm4, %v10232_v0, %v10296_v22  ;;  %v10245_v13 = vadd.f32 %v18761_v41, %v10206_v53  ;;  %v10343_v7 = vsel %vm10279_vm5, %v10247_v50, %v10311_v25  ;;  %vm10278_vm15 = vcmp.ge.f32.partialorder %v10246_v46, 0.0 }
0x1e2a   :  { %v10312_v24 = vmul.f32 0.1, %v10248_v12  ;;  %v10345_v27 = vsel %vm10281_vm10, %v10249_v5, %v10313_v16  ;;  %vm10280_vm11 = vcmp.ge.f32.partialorder %v10248_v12, 0.0  ;;  %v10190_v5 = vadd.f32 %v13262_v49, %v18573_v37 }
0x1e2b   :  { %12247 = vmatprep.subr.msk.mxu0 %vm9857_vm3, %v10345_v27  ;;  %v10189_v37 = vadd.f32 %v18740_v63, %v18576_v51  ;;  %vm10262_vm7 = vcmp.ge.f32.partialorder %v10230_v11, 0.0  ;;  %v10294_v49 = vmul.f32 0.1, %v10230_v11  ;;  %v10327_v36 = vsel %vm10263_vm9, %v10231_v59, %v10295_v52 }
0x1e2c   :  { %12248 = vmatpush3.xpose.msk.msra.mxu0 %vm9857_vm3, %v10329_v34  ;;  %v10344_v18 = vsel %vm10280_vm11, %v10248_v12, %v10312_v24  ;;  %v10229_v60 = vadd.f32 %v18761_v41, %v10190_v5  ;;  %v10204_v16 = vadd.f32 %v13283_v15, %v18663_v14  ;;  %v10309_v38 = vmul.f32 0.1, %v10245_v13 }
0x1e2d   :  { %12249 = vmatprep.subr.msk.mxu0 %vm9857_vm3, %v10344_v18  ;;  %v10244_v42 = vadd.f32 %v18761_v41, %v10205_v54  ;;  %v10342_v23 = vsel %vm10278_vm15, %v10246_v46, %v10310_v45  ;;  %vm10277_vm6 = vcmp.ge.f32.partialorder %v10245_v13, 0.0  ;;  %v10188_v50 = vadd.f32 %v18736_v8, %v18552_v39 }
0x1e2e   :  { %vm10261_vm8 = vcmp.ge.f32.partialorder %v10229_v60, 0.0  ;;  %v10293_v28 = vmul.f32 0.1, %v10229_v60  ;;  %v10228_v51 = vadd.f32 %v18761_v41, %v10189_v37  ;;  %v10326_v63 = vsel %vm10262_vm7, %v10230_v11, %v10294_v49 }
0x1e2f   :  { %v10243_v35 = vadd.f32 %v18761_v41, %v10204_v16  ;;  %v10203_v14 = vadd.f32 %v18758_v61, %v18670_v29  ;;  %v10308_v15 = vmul.f32 0.1, %v10244_v42  ;;  %v10341_v0 = vsel %vm10277_vm6, %v10245_v13, %v10309_v38 }
0x1e30   :  { %12250 = vmatpush3.xpose.msk.msra.mxu0 %vm9857_vm3, %v10328_v48  ;;  %vm10276_vm1 = vcmp.ge.f32.partialorder %v10244_v42, 0.0  ;;  %v10227_v58 = vadd.f32 %v18761_v41, %v10188_v50  ;;  %v10187_v39 = vadd.f32 %v18738_v30, %v18558_v62  ;;  %vm10260_vm12 = vcmp.ge.f32.partialorder %v10228_v51, 0.0 }
0x1e31   :  { %12251 = vmatprep.subr.msk.mxu0 %vm9857_vm3, %v10343_v7  ;;  %v10292_v8 = vmul.f32 0.1, %v10228_v51  ;;  %v10325_v12 = vsel %vm10261_vm8, %v10229_v60, %v10293_v28  ;;  %v10202_v59 = vadd.f32 %v18754_v9, %v18649_v26  ;;  %v10307_v24 = vmul.f32 0.1, %v10243_v35  ;;  %v19485_v28 = vld [vmem:[#allocation109_spill] sm:$0xff] }
0x1e32   :  { %v10242_v29 = vadd.f32 %v18761_v41, %v10203_v14  ;;  %v10340_v61 = vsel %vm10276_vm1, %v10244_v42, %v10308_v15  ;;  %vm10275_vm13 = vcmp.ge.f32.partialorder %v10243_v35, 0.0  ;;  %v10186_v27 = vadd.f32 %v18732_v19, %v18544_v31  ;;  %v19487_v15 = vld [vmem:[#allocation102_spill] sm:$0xff] }
0x1e33   :  { %vm10259_vm14 = vcmp.ge.f32.partialorder %v10227_v58, 0.0  ;;  %v10291_v62 = vmul.f32 0.1, %v10227_v58  ;;  %v10226_v30 = vadd.f32 %v18761_v41, %v10187_v39  ;;  %v10324_v4 = vsel %vm10260_vm12, %v10228_v51, %v10292_v8  ;;  %v19486_v51 = vld [vmem:[#allocation126_spill] sm:$0xff] }
0x1e34   :  { %12252 = vmatpush3.xpose.msk.msra.mxu0 %vm9857_vm3, %v10327_v36  ;;  %v10241_v22 = vadd.f32 %v18761_v41, %v10202_v59  ;;  %v10201_v26 = vadd.f32 %v18756_v44, %v18656_v17  ;;  %v10306_v9 = vmul.f32 0.1, %v10242_v29  ;;  %v10339_v34 = vsel %vm10275_vm13, %v10243_v35, %v10307_v24  ;;  %v19489_v24 = vld [vmem:[#allocation110_spill] sm:$0xff] }
0x1e35   :  { %12253 = vmatprep.subr.msk.mxu0 %vm9857_vm3, %v10342_v23  ;;  %vm10274_vm2 = vcmp.ge.f32.partialorder %v10242_v29, 0.0  ;;  %v10225_v53 = vadd.f32 %v18761_v41, %v10186_v27  ;;  %v10185_v31 = vadd.f32 %v18734_v3, %v18548_v21  ;;  %vm10258_vm0 = vcmp.ge.f32.partialorder %v10226_v30, 0.0 }
0x1e36   :  { %v10290_v19 = vmul.f32 0.1, %v10226_v30  ;;  %v10323_v25 = vsel %vm10259_vm14, %v10227_v58, %v10291_v62  ;;  %v10200_v46 = vadd.f32 %v18750_v33, %v18635_v43  ;;  %v10305_v18 = vmul.f32 0.1, %v10241_v22 }
0x1e37   :  { %v10240_v17 = vadd.f32 %v18761_v41, %v10201_v26  ;;  %v10338_v44 = vsel %vm10274_vm2, %v10242_v29, %v10306_v9  ;;  %vm10273_vm10 = vcmp.ge.f32.partialorder %v10241_v22, 0.0  ;;  %v10184_v5 = vadd.f32 %v18724_v2, %v18530_v1  ;;  %v19490_v29 = vld [vmem:[#allocation111_spill] sm:$0xff] }
0x1e38   :  { %12254 = vmatpush3.xpose.msk.msra.mxu0 %vm9857_vm3, %v10326_v63  ;;  %vm10257_vm11 = vcmp.ge.f32.partialorder %v10225_v53, 0.0  ;;  %v10289_v21 = vmul.f32 0.1, %v10225_v53  ;;  %v10224_v3 = vadd.f32 %v18761_v41, %v10185_v31  ;;  %v10322_v52 = vsel %vm10258_vm0, %v10226_v30, %v10290_v19 }
0x1e39   :  { %12255 = vmatprep.subr.msk.mxu0 %vm9857_vm3, %v10341_v0  ;;  %v10239_v11 = vadd.f32 %v18761_v41, %v10200_v46  ;;  %v10199_v43 = vadd.f32 %v18752_v32, %v18642_v56  ;;  %v10304_v33 = vmul.f32 0.1, %v10240_v17  ;;  %v10337_v48 = vsel %vm10273_vm10, %v10241_v22, %v10305_v18  ;;  %v19488_v0 = vld [vmem:[#allocation122_spill] sm:$0xff]  ;;  %v19492_v22 = vld [vmem:[#allocation123_spill] sm:$0xff] }
0x1e3a   :  { %vm10272_vm4 = vcmp.ge.f32.partialorder %v10240_v17, 0.0  ;;  %v10223_v13 = vadd.f32 %v18761_v41, %v10184_v5  ;;  %v10183_v1 = vadd.f32 %v18730_v20, %v18534_v10  ;;  %vm10256_vm5 = vcmp.ge.f32.partialorder %v10224_v3, 0.0 }
0x1e3b   :  { %v10288_v2 = vmul.f32 0.1, %v10224_v3  ;;  %v10321_v54 = vsel %vm10257_vm11, %v10225_v53, %v10289_v21  ;;  %v10198_v45 = vadd.f32 %v18746_v47, %v18621_v57  ;;  %v10303_v7 = vmul.f32 0.1, %v10239_v11  ;;  %v19482_v57 = vld [vmem:[#allocation112_spill] sm:$0xff] }
0x1e3c   :  { %12256 = vmatpush3.xpose.msk.msra.mxu0 %vm9857_vm3, %v10325_v12  ;;  %v10238_v56 = vadd.f32 %v18761_v41, %v10199_v43  ;;  %v10336_v32 = vsel %vm10272_vm4, %v10240_v17, %v10304_v33  ;;  %vm10271_vm9 = vcmp.ge.f32.partialorder %v10239_v11, 0.0  ;;  %v10182_v60 = vadd.f32 %v18720_v6, %v18516_v55  ;;  %v19483_v55 = vld [vmem:[#allocation108_spill] sm:$0xff]  ;;  %v19494_v43 = vld [vmem:[#allocation94_spill] sm:$0xff] }
0x1e3d   :  { %12257 = vmatprep.subr.msk.mxu0 %vm9857_vm3, %v10340_v61  ;;  %vm10255_vm15 = vcmp.ge.f32.partialorder %v10223_v13, 0.0  ;;  %v10287_v10 = vmul.f32 0.1, %v10223_v13  ;;  %v10222_v20 = vadd.f32 %v18761_v41, %v10183_v1  ;;  %v10320_v37 = vsel %vm10256_vm5, %v10224_v3, %v10288_v2  ;;  %v19484_v6 = vld [vmem:[#allocation124_spill] sm:$0xff] }
0x1e3e   :  { %v10237_v49 = vadd.f32 %v18761_v41, %v10198_v45  ;;  %v10197_v47 = vadd.f32 %v19482_v57, %v18628_v40  ;;  %v10302_v36 = vmul.f32 0.1, %v10238_v56  ;;  %v10335_v16 = vsel %vm10271_vm9, %v10239_v11, %v10303_v7  ;;  %v10351_v11 = vpop.permute.xlu0 %10350 }
0x1e3f   :  { %vm10270_vm7 = vcmp.ge.f32.partialorder %v10238_v56, 0.0  ;;  %v10221_v38 = vadd.f32 %v18761_v41, %v10182_v60  ;;  %v10181_v42 = vadd.f32 %v19484_v6, %v19483_v55  ;;  %vm10254_vm6 = vcmp.ge.f32.partialorder %v10222_v20, 0.0 }
0x1e40   :  { %12258 = vmatpush3.xpose.msk.msra.mxu0 %vm9857_vm3, %v10324_v4  ;;  %v10286_v23 = vmul.f32 0.1, %v10222_v20  ;;  %v10319_v50 = vsel %vm10255_vm15, %v10223_v13, %v10287_v10  ;;  %v10196_v63 = vadd.f32 %v19486_v51, %v19485_v28  ;;  %v10301_v35 = vmul.f32 0.1, %v10237_v49  ;;  %v19491_v4 = vld [vmem:[#allocation121_spill] sm:$0xff] }
0x1e41   :  { %12259 = vmatprep.subr.msk.mxu0 %vm9857_vm3, %v10339_v34  ;;  %v10236_v40 = vadd.f32 %v18761_v41, %v10197_v47  ;;  %v10334_v14 = vsel %vm10270_vm7, %v10238_v56, %v10302_v36  ;;  %vm10269_vm8 = vcmp.ge.f32.partialorder %v10237_v49, 0.0  ;;  %v10180_v58 = vadd.f32 %v19488_v0, %v19487_v15  ;;  %v19495_v56 = vld [vmem:[#allocation90_spill] sm:$0xff] }
0x1e42   :  { %vm10253_vm1 = vcmp.ge.f32.partialorder %v10221_v38, 0.0  ;;  %v10285_v39 = vmul.f32 0.1, %v10221_v38  ;;  %v10220_v8 = vadd.f32 %v18761_v41, %v10181_v42  ;;  %v10318_v12 = vsel %vm10254_vm6, %v10222_v20, %v10286_v23 }
0x1e43   :  { %v10235_v59 = vadd.f32 %v18761_v41, %v10196_v63  ;;  %v10195_v61 = vadd.f32 %v19490_v29, %v19489_v24  ;;  %v10300_v27 = vmul.f32 0.1, %v10236_v40  ;;  %v10333_v62 = vsel %vm10269_vm8, %v10237_v49, %v10301_v35 }
0x1e44   :  { %12260 = vmatpush3.xpose.msk.msra.mxu0 %vm9857_vm3, %v10323_v25  ;;  %vm10268_vm12 = vcmp.ge.f32.partialorder %v10236_v40, 0.0  ;;  %v10219_v30 = vadd.f32 %v18761_v41, %v10180_v58  ;;  %v10179_v26 = vadd.f32 %v19492_v22, %v19491_v4  ;;  %v10284_v9 = vmul.f32 0.1, %v10220_v8 }
0x1e45   :  { %12261 = vmatprep.subr.msk.mxu0 %vm9857_vm3, %v10338_v44  ;;  %v10317_v34 = vsel %vm10253_vm1, %v10221_v38, %v10285_v39  ;;  %vm10252_vm13 = vcmp.ge.f32.partialorder %v10220_v8, 0.0  ;;  %v10299_v53 = vmul.f32 0.1, %v10235_v59  ;;  %v10234_v31 = vadd.f32 %v18761_v41, %v10195_v61 }
0x1e46   :  { %v10332_v19 = vsel %vm10268_vm12, %v10236_v40, %v10300_v27  ;;  %vm10267_vm14 = vcmp.ge.f32.partialorder %v10235_v59, 0.0  ;;  %v10283_v25 = vmul.f32 0.1, %v10219_v30  ;;  %v10218_v46 = vadd.f32 %v18761_v41, %v10179_v26  ;;  %v19493_v41 = vld [vmem:[#allocation125_spill] sm:$0xff] }
0x1e47   :  { %v10316_v18 = vsel %vm10252_vm13, %v10220_v8, %v10284_v9  ;;  %vm10251_vm2 = vcmp.ge.f32.partialorder %v10219_v30, 0.0  ;;  %v10298_v17 = vmul.f32 0.1, %v10234_v31  ;;  %v10331_v44 = vsel %vm10267_vm14, %v10235_v59, %v10299_v53 }
0x1e48   :  { %12262 = vmatpush3.xpose.msk.msra.mxu0 %vm9857_vm3, %v10322_v52  ;;  %vm10266_vm0 = vcmp.ge.f32.partialorder %v10234_v31, 0.0  ;;  %v10282_v5 = vmul.f32 0.1, %v10218_v46  ;;  %v10315_v21 = vsel %vm10251_vm2, %v10219_v30, %v10283_v25  ;;  %vm10250_vm10 = vcmp.ge.f32.partialorder %v10218_v46, 0.0 }
0x1e49   :  { %12263 = vmatprep.subr.msk.mxu0 %vm9857_vm3, %v10337_v48  ;;  %v10330_v3 = vsel %vm10266_vm0, %v10234_v31, %v10298_v17  ;;  %v10356_v33 = vrot.slane %v10351_v11, %v19494_v43  ;;  %v19496_v60 = vlaneseq }
0x1e4a   :  { %v10314_v52 = vsel %vm10250_vm10, %v10218_v46, %v10282_v5 }
0x1e4b   :  { %vm10549_vm11 = vcmp.lt.s32.totalorder %v19496_v60, 256 }
0x1e4c   :  { %12264 = vmatpush3.xpose.msk.msra.mxu0 %vm9857_vm3, %v10321_v54 }
0x1e4d   :  { %12265 = vmatprep.subr.msk.mxu0 %vm9857_vm3, %v10336_v32 }
0x1e50   :  { %12266 = vmatpush3.xpose.msk.msra.mxu0 %vm9857_vm3, %v10320_v37 }
0x1e51   :  { %12267 = vmatprep.subr.msk.mxu0 %vm9857_vm3, %v10335_v16 }
0x1e54   :  { %12268 = vmatpush3.xpose.msk.msra.mxu0 %vm9857_vm3, %v10319_v50 }
0x1e55   :  { %12269 = vmatprep.subr.msk.mxu0 %vm9857_vm3, %v10334_v14 }
0x1e58   :  { %12270 = vmatpush3.xpose.msk.msra.mxu0 %vm9857_vm3, %v10318_v12 }
0x1e59   :  { %12271 = vmatprep.subr.msk.mxu0 %vm9857_vm3, %v10333_v62 }
0x1e5c   :  { %12272 = vmatpush3.xpose.msk.msra.mxu0 %vm9857_vm3, %v10317_v34 }
0x1e5d   :  { %12273 = vmatprep.subr.msk.mxu0 %vm9857_vm3, %v10332_v19 }
0x1e60   :  { %12274 = vmatpush3.xpose.msk.msra.mxu0 %vm9857_vm3, %v10316_v18 }
0x1e61   :  { %12275 = vmatprep.subr.msk.mxu0 %vm9857_vm3, %v10331_v44 }
0x1e64   :  { %12276 = vmatpush3.xpose.msk.msra.mxu0 %vm9857_vm3, %v10315_v21 }
0x1e65   :  { %12277 = vmatprep.subr.msk.mxu0 %vm9857_vm3, %v10330_v3 }
0x1e68   :  { %12278 = vmatpush3.xpose.msk.msra.mxu0 %vm9857_vm3, %v10314_v52 }
0x1e6b   :  { %12280 = vmatmul.mubr.msk.f32.vlgmr.msra.gmra.mxu0 %vm9857_vm3, %v19493_v41 }
0x1f2b   :  { %v10522_v48 = vpop.f32.mrf.mxu0 }
0x1f2c   :  { %v10523_v13 = vadd.f32 %v10522_v48, %v10356_v33 }
0x1f2d   :  { %v10524_v1 = vpop.f32.mrf.mxu0 }
0x1f2e   :  { %v10525_v2 = vadd.f32 %v10524_v1, %v10356_v33  ;;  %13522 = vtanh.f32 %v10523_v13 }
0x1f30   :  { %13524 = vtanh.f32 %v10525_v2 }
0x1f3b   :  { %v13523_v54 = vpop.eup %13522 }
0x1f3d   :  { %v13525_v45 = vpop.eup %13524 }
0x1f3e   :  { %v10531_v7 = vcombine.low %v13523_v54, %v13525_v45 }
0x1f40   :  { %v10538_v32 = vrot.slane %v10531_v7, %v19495_v56 }
0x1f42   :  { %v10545_v10 = vrot.slane %v10538_v32, %v19495_v56 }
0x1f44   :  { %10551 = vst.msk [vmem:[%s14264_s30] sm:$0x3] %vm10549_vm11, %v10545_v10 }
0x1f45   :  { %10629 = vsyncpa [#allocation5], 1 }
0x1f46   :  { %10630 = vsyncpa [#allocation9], 1 }
0x1f47   :  { %10631 = vsyncpa [#allocation12], 1 }
0x1f48   :  { %10632 = vsyncpa [#allocation15], 1 }
0x1f49   :  { %10633 = vsyncpa [#allocation18], 1 }
0x1f4a   :  { %10634 = vsyncpa [#allocation21], 1 }
0x1f4b   :  { %10635 = vsyncpa [#allocation24], 1 }
0x1f4c   :  { %10636 = vsyncpa [#allocation27], 1 }
0x1f4d   :  { %10637 = vsyncpa [#allocation6], 1 }

</bundles_post_ra>
